<compile_context>
chip_gen: v5e
topology: v5e:2x2
jax: 0.10.0
libtpu: 0.0.40
codegen_flags: <defaults>
</compile_context>

<pallas_src>
import jax
import jax.numpy as jnp
from jax import lax
from jax.experimental import pallas as pl
from jax.experimental.pallas import tpu as pltpu

NUM_CLASSES = 10   # args.num_classes
LANES = 128        # TPU lane width; all channel dims are padded to this


# ----------------------------- fused Pallas kernel -----------------------------

def _lenet_kernel(xw_ref, w1_ref, b1_ref, w2_ref, b2_ref,
                  wf1_ref, bf1_ref, wf2_ref, bf2_ref, wf3_ref, bf3_ref,
                  out_ref, xw2_s):
    """Whole CNN_NET forward for one image; all intermediates stay in VMEM."""
    f32 = jnp.float32

    # ---- conv1 (5x5 valid) fused with the horizontal half of the 2x2 max-pool ----
    # xw_ref[0, par]: [448, 15], rows = h*14 + j (j = pooled column), lanes = kw*3 + ic
    xe = xw_ref[0, 0]                                      # even output columns
    xo = xw_ref[0, 1]                                      # odd output columns
    acc_e = None
    acc_o = None
    for kh in range(5):
        wk = w1_ref[kh]                                    # [15, 128]
        de = jnp.dot(xe[kh * 14:kh * 14 + 392, :], wk, preferred_element_type=f32)
        do = jnp.dot(xo[kh * 14:kh * 14 + 392, :], wk, preferred_element_type=f32)
        acc_e = de if acc_e is None else acc_e + de
        acc_o = do if acc_o is None else acc_o + do
    b1 = b1_ref[...]                                       # [1, 128]
    # relu(conv + b) then max over the column pair (relu/max commute, bias shared)
    wmax = jnp.maximum(jnp.maximum(acc_e, acc_o) + b1, 0.0)   # [392, 128], rows = oh*14 + pw

    # ---- vertical half of pool1 -> 14 chunks of [14, 128] (rows = pw, lanes = c) ----
    p1 = []
    for ph in range(14):
        top = wmax[(2 * ph) * 14:(2 * ph + 1) * 14, :]
        bot = wmax[(2 * ph + 1) * 14:(2 * ph + 2) * 14, :]
        p1.append(jnp.maximum(top, bot))

    # ---- on-chip width-im2col for conv2, stored in VMEM scratch: [140, 640] ----
    # row = h*10 + qw, lane = kw*128 + ic   (lane-tile aligned pieces only)
    for h in range(14):
        block = jnp.concatenate([p1[h][kw:kw + 10, :] for kw in range(5)], axis=1)  # [10, 640]
        xw2_s[h * 10:(h + 1) * 10, :] = block

    # ---- conv2 (5x5 valid) ----
    acc2 = None
    for kh in range(5):
        slab = xw2_s[kh * 10:kh * 10 + 100, :]             # [100, 640]
        d = jnp.dot(slab, w2_ref[kh], preferred_element_type=f32)
        acc2 = d if acc2 is None else acc2 + d
    y2 = jnp.maximum(acc2 + b2_ref[...], 0.0)              # [100, 128], rows = qh*10 + qw

    # ---- pool2 (2x2) + flatten (ordering folded into wf1; lane-aligned concat) ----
    pieces = []
    for ph in range(5):
        for pw in range(5):
            r = (2 * ph) * 10 + 2 * pw
            m = jnp.maximum(jnp.maximum(y2[r:r + 1, :], y2[r + 1:r + 2, :]),
                            jnp.maximum(y2[r + 10:r + 11, :], y2[r + 11:r + 12, :]))
            pieces.append(m)                               # [1, 128] (lanes >= 16 are zero)
    xfc = jnp.concatenate(pieces, axis=1)                  # [1, 3200], lane = p*128 + c

    # ---- fused MLP: fc1 -> relu -> fc2 -> relu -> fc3 ----
    h1 = jnp.maximum(jnp.dot(xfc, wf1_ref[...], preferred_element_type=f32) + bf1_ref[...], 0.0)
    h2 = jnp.maximum(jnp.dot(h1, wf2_ref[...], preferred_element_type=f32) + bf2_ref[...], 0.0)
    o = jnp.dot(h2, wf3_ref[...], preferred_element_type=f32) + bf3_ref[...]
    out_ref[0] = o                                         # lane-dense [1, 128] store


# ----------------------------- wrapper (layout plumbing in XLA) -----------------------------

def cnn_net_forward(x_nchw, params):
    (w1, b1, w2, b2, fw1, fb1, fw2, fb2, fw3, fb3) = params
    B = x_nchw.shape[0]
    num_classes = fw3.shape[0]
    assert num_classes <= LANES
    f32 = jnp.float32

    x = jnp.transpose(x_nchw, (0, 2, 3, 1)).astype(f32)    # NHWC [B, 32, 32, 3]

    # Width-partial im2col split by pooled-column parity: [B, 2, 448, 15]
    # xw[b, par, h*14 + j, kw*3 + ic] = x[b, h, 2*j + par + kw, ic]
    slabs = []
    for par in range(2):
        per_kw = [x[:, :, par + kw:par + kw + 28:2, :] for kw in range(5)]   # each [B, 32, 14, 3]
        slabs.append(jnp.concatenate(per_kw, axis=-1).reshape(B, 448, 15))
    xw = jnp.stack(slabs, axis=1)

    # conv1 weights -> [5, 15, 128]   (row = kw*3 + ic, col = oc zero-padded)
    w1p = jnp.pad(jnp.transpose(w1, (2, 3, 1, 0)).reshape(5, 15, 6),
                  ((0, 0), (0, 0), (0, LANES - 6)))
    b1p = jnp.pad(b1, (0, LANES - 6)).reshape(1, LANES)

    # conv2 weights -> [5, 640, 128]  (row = kw*128 + ic, col = oc zero-padded)
    w2p = jnp.pad(jnp.transpose(w2, (2, 3, 1, 0)),
                  ((0, 0), (0, 0), (0, LANES - 6), (0, LANES - 16))).reshape(5, 5 * LANES, LANES)
    b2p = jnp.pad(b2, (0, LANES - 16)).reshape(1, LANES)

    # fc1: fold torch's (c, h, w) flatten order into the weight; kernel feature = p*128 + c
    wf1 = jnp.pad(fw1.reshape(120, 16, 25).transpose(2, 1, 0),
                  ((0, 0), (0, LANES - 16), (0, LANES - 120))).reshape(25 * LANES, LANES)
    bf1p = jnp.pad(fb1, (0, LANES - 120)).reshape(1, LANES)

    wf2 = jnp.pad(fw2.T, ((0, LANES - 120), (0, LANES - 84)))
    bf2p = jnp.pad(fb2, (0, LANES - 84)).reshape(1, LANES)
    wf3 = jnp.pad(fw3.T, ((0, LANES - 84), (0, LANES - num_classes)))
    bf3p = jnp.pad(fb3, (0, LANES - num_classes)).reshape(1, LANES)

    out = pl.pallas_call(
        _lenet_kernel,
        out_shape=jax.ShapeDtypeStruct((B, 1, LANES), f32),
        grid=(B,),
        in_specs=[
            pl.BlockSpec((1, 2, 448, 15), lambda i: (i, 0, 0, 0)),      # per-image patches
            pl.BlockSpec((5, 15, LANES), lambda i: (0, 0, 0)),          # conv1 W
            pl.BlockSpec((1, LANES), lambda i: (0, 0)),                 # conv1 b
            pl.BlockSpec((5, 5 * LANES, LANES), lambda i: (0, 0, 0)),   # conv2 W
            pl.BlockSpec((1, LANES), lambda i: (0, 0)),                 # conv2 b
            pl.BlockSpec((25 * LANES, LANES), lambda i: (0, 0)),        # fc1 W
            pl.BlockSpec((1, LANES), lambda i: (0, 0)),                 # fc1 b
            pl.BlockSpec((LANES, LANES), lambda i: (0, 0)),             # fc2 W
            pl.BlockSpec((1, LANES), lambda i: (0, 0)),                 # fc2 b
            pl.BlockSpec((LANES, LANES), lambda i: (0, 0)),             # fc3 W
            pl.BlockSpec((1, LANES), lambda i: (0, 0)),                 # fc3 b
        ],
        out_specs=pl.BlockSpec((1, 1, LANES), lambda i: (i, 0, 0)),
        scratch_shapes=[pltpu.VMEM((140, 5 * LANES), f32)],             # conv2 patch slab
        compiler_params=pltpu.CompilerParams(
            dimension_semantics=("parallel",),
            vmem_limit_bytes=32 * 1024 * 1024,                          # ~8 MB used; safe on v5e/v6e/v7x
        ),
    )(xw, w1p, b1p, w2p, b2p, wf1, bf1p, wf2, bf2p, wf3, bf3p)

    # TODO(synk): for serving, pre-pack the padded weights once and process several
    # images per grid step so the FC matmuls are not M=1 latency-bound.
    return out.reshape(B, LANES)[:, :num_classes]


# ----------------------------- pure-JAX reference & init -----------------------------

def reference_forward(x_nchw, params):
    (w1, b1, w2, b2, fw1, fb1, fw2, fb2, fw3, fb3) = params
    dn = ('NCHW', 'OIHW', 'NCHW')
    hi = lax.Precision.HIGHEST

    def conv(x, w, b):
        y = lax.conv_general_dilated(x, w, (1, 1), 'VALID',
                                     dimension_numbers=dn, precision=hi)
        return jax.nn.relu(y + b.reshape(1, -1, 1, 1))

    def pool(x):
        return lax.reduce_window(x, -jnp.inf, lax.max,
                                 (1, 1, 2, 2), (1, 1, 2, 2), 'VALID')

    x = pool(conv(x_nchw, w1, b1))
    x = pool(conv(x, w2, b2))
    x = x.reshape(x.shape[0], -1)
    x = jax.nn.relu(jnp.dot(x, fw1.T, precision=hi) + fb1)
    x = jax.nn.relu(jnp.dot(x, fw2.T, precision=hi) + fb2)
    return jnp.dot(x, fw3.T, precision=hi) + fb3


def init_params(key, num_classes):
    keys = jax.random.split(key, 10)

    def u(k, shape, fan_in):
        bound = 1.0 / jnp.sqrt(jnp.float32(fan_in))
        return jax.random.uniform(k, shape, jnp.float32, -bound, bound)

    w1 = u(keys[0], (6, 3, 5, 5), 3 * 25)
    b1 = u(keys[1], (6,), 3 * 25)
    w2 = u(keys[2], (16, 6, 5, 5), 6 * 25)
    b2 = u(keys[3], (16,), 6 * 25)
    fw1 = u(keys[4], (120, 16 * 5 * 5), 16 * 5 * 5)
    fb1 = u(keys[5], (120,), 16 * 5 * 5)
    fw2 = u(keys[6], (84, 120), 120)
    fb2 = u(keys[7], (84,), 120)
    fw3 = u(keys[8], (num_classes, 84), 84)
    fb3 = u(keys[9], (num_classes,), 84)
    return (w1, b1, w2, b2, fw1, fb1, fw2, fb2, fw3, fb3)


if __name__ == "__main__":
    key = jax.random.PRNGKey(0)
    pkey, xkey = jax.random.split(key)
    params = init_params(pkey, NUM_CLASSES)
    # CNN_NET's fc1 = Linear(16*5*5, 120) implies 3x32x32 inputs (CIFAR-sized); batch = 2.
    x = jax.random.normal(xkey, (2, 3, 32, 32), jnp.float32)

    out = jax.jit(cnn_net_forward)(x, params)
    out = jax.block_until_ready(out)

    assert out.shape == (2, NUM_CLASSES), out.shape
    ref = reference_forward(x, params)
    max_err = float(jnp.max(jnp.abs(out - ref)))
    if max_err > 2e-3:
        raise AssertionError(f"Pallas/ref mismatch: max abs err {max_err}")

    print("KERNEL_OK")
</pallas_src>

<mosaic_0001>
module attributes {stable_mosaic.version = 11 : i64} {
  func.func @_lenet_kernel(%arg0: i32, %arg1: memref<1x2x448x15xf32, #tpu.memory_space<vmem>>, %arg2: memref<5x15x128xf32, #tpu.memory_space<vmem>>, %arg3: memref<1x128xf32, #tpu.memory_space<vmem>>, %arg4: memref<5x640x128xf32, #tpu.memory_space<vmem>>, %arg5: memref<1x128xf32, #tpu.memory_space<vmem>>, %arg6: memref<3200x128xf32, #tpu.memory_space<vmem>>, %arg7: memref<1x128xf32, #tpu.memory_space<vmem>>, %arg8: memref<128x128xf32, #tpu.memory_space<vmem>>, %arg9: memref<1x128xf32, #tpu.memory_space<vmem>>, %arg10: memref<128x128xf32, #tpu.memory_space<vmem>>, %arg11: memref<1x128xf32, #tpu.memory_space<vmem>>, %arg12: memref<1x1x128xf32, #tpu.memory_space<vmem>>, %arg13: memref<140x640xf32, #tpu.memory_space<vmem>>) attributes {dimension_semantics = [#tpu.dimension_semantics<parallel>], iteration_bounds = array<i64: 2>, scalar_prefetch = 0 : i64, scratch_operands = 1 : i64, tpu.core_type = #tpu.core_type<tc>, window_params = [{transform_indices = @transform_0, window_bounds = array<i64: 1, 2, 448, 15>}, {pipeline_mode = #tpu.pipeline_mode<synchronous>, transform_indices = @transform_1, window_bounds = array<i64: 5, 15, 128>}, {pipeline_mode = #tpu.pipeline_mode<synchronous>, transform_indices = @transform_2, window_bounds = array<i64: 1, 128>}, {pipeline_mode = #tpu.pipeline_mode<synchronous>, transform_indices = @transform_3, window_bounds = array<i64: 5, 640, 128>}, {pipeline_mode = #tpu.pipeline_mode<synchronous>, transform_indices = @transform_4, window_bounds = array<i64: 1, 128>}, {pipeline_mode = #tpu.pipeline_mode<synchronous>, transform_indices = @transform_5, window_bounds = array<i64: 3200, 128>}, {pipeline_mode = #tpu.pipeline_mode<synchronous>, transform_indices = @transform_6, window_bounds = array<i64: 1, 128>}, {pipeline_mode = #tpu.pipeline_mode<synchronous>, transform_indices = @transform_7, window_bounds = array<i64: 128, 128>}, {pipeline_mode = #tpu.pipeline_mode<synchronous>, transform_indices = @transform_8, window_bounds = array<i64: 1, 128>}, {pipeline_mode = #tpu.pipeline_mode<synchronous>, transform_indices = @transform_9, window_bounds = array<i64: 128, 128>}, {pipeline_mode = #tpu.pipeline_mode<synchronous>, transform_indices = @transform_10, window_bounds = array<i64: 1, 128>}, {transform_indices = @transform_11, window_bounds = array<i64: 1, 1, 128>}]} {
    %c0 = arith.constant 0 : index
    %c0_0 = arith.constant 0 : index
    %c0_1 = arith.constant 0 : index
    %c0_2 = arith.constant 0 : index
    %0 = vector.load %arg1[%c0, %c0_0, %c0_1, %c0_2] : memref<1x2x448x15xf32, #tpu.memory_space<vmem>>, vector<1x1x448x15xf32>
    %1 = vector.shape_cast %0 : vector<1x1x448x15xf32> to vector<448x15xf32>
    %c0_3 = arith.constant 0 : index
    %c1 = arith.constant 1 : index
    %c0_4 = arith.constant 0 : index
    %c0_5 = arith.constant 0 : index
    %2 = vector.load %arg1[%c0_3, %c1, %c0_4, %c0_5] : memref<1x2x448x15xf32, #tpu.memory_space<vmem>>, vector<1x1x448x15xf32>
    %3 = vector.shape_cast %2 : vector<1x1x448x15xf32> to vector<448x15xf32>
    %c0_6 = arith.constant 0 : index
    %c0_7 = arith.constant 0 : index
    %c0_8 = arith.constant 0 : index
    %4 = vector.load %arg2[%c0_6, %c0_7, %c0_8] : memref<5x15x128xf32, #tpu.memory_space<vmem>>, vector<1x15x128xf32>
    %5 = vector.shape_cast %4 : vector<1x15x128xf32> to vector<15x128xf32>
    %6 = vector.extract_strided_slice %1 {offsets = [0, 0], sizes = [392, 15], strides = [1, 1]} : vector<448x15xf32> to vector<392x15xf32>
    %cst = arith.constant dense<0.000000e+00> : vector<392x128xf32>
    %7 = tpu.matmul %6, %5, %cst {dimension_numbers = #tpu.dot_dimension_numbers<[1], [0], [0], [1], [0, 0, 1, 1], [], []>} : vector<392x15xf32>, vector<15x128xf32>, vector<392x128xf32> -> vector<392x128xf32>
    %8 = vector.extract_strided_slice %3 {offsets = [0, 0], sizes = [392, 15], strides = [1, 1]} : vector<448x15xf32> to vector<392x15xf32>
    %cst_9 = arith.constant dense<0.000000e+00> : vector<392x128xf32>
    %9 = tpu.matmul %8, %5, %cst_9 {dimension_numbers = #tpu.dot_dimension_numbers<[1], [0], [0], [1], [0, 0, 1, 1], [], []>} : vector<392x15xf32>, vector<15x128xf32>, vector<392x128xf32> -> vector<392x128xf32>
    %c1_10 = arith.constant 1 : index
    %c0_11 = arith.constant 0 : index
    %c0_12 = arith.constant 0 : index
    %10 = vector.load %arg2[%c1_10, %c0_11, %c0_12] : memref<5x15x128xf32, #tpu.memory_space<vmem>>, vector<1x15x128xf32>
    %11 = vector.shape_cast %10 : vector<1x15x128xf32> to vector<15x128xf32>
    %12 = vector.extract_strided_slice %1 {offsets = [14, 0], sizes = [392, 15], strides = [1, 1]} : vector<448x15xf32> to vector<392x15xf32>
    %cst_13 = arith.constant dense<0.000000e+00> : vector<392x128xf32>
    %13 = tpu.matmul %12, %11, %cst_13 {dimension_numbers = #tpu.dot_dimension_numbers<[1], [0], [0], [1], [0, 0, 1, 1], [], []>} : vector<392x15xf32>, vector<15x128xf32>, vector<392x128xf32> -> vector<392x128xf32>
    %14 = vector.extract_strided_slice %3 {offsets = [14, 0], sizes = [392, 15], strides = [1, 1]} : vector<448x15xf32> to vector<392x15xf32>
    %cst_14 = arith.constant dense<0.000000e+00> : vector<392x128xf32>
    %15 = tpu.matmul %14, %11, %cst_14 {dimension_numbers = #tpu.dot_dimension_numbers<[1], [0], [0], [1], [0, 0, 1, 1], [], []>} : vector<392x15xf32>, vector<15x128xf32>, vector<392x128xf32> -> vector<392x128xf32>
    %16 = arith.addf %7, %13 : vector<392x128xf32>
    %17 = arith.addf %9, %15 : vector<392x128xf32>
    %c2 = arith.constant 2 : index
    %c0_15 = arith.constant 0 : index
    %c0_16 = arith.constant 0 : index
    %18 = vector.load %arg2[%c2, %c0_15, %c0_16] : memref<5x15x128xf32, #tpu.memory_space<vmem>>, vector<1x15x128xf32>
    %19 = vector.shape_cast %18 : vector<1x15x128xf32> to vector<15x128xf32>
    %20 = vector.extract_strided_slice %1 {offsets = [28, 0], sizes = [392, 15], strides = [1, 1]} : vector<448x15xf32> to vector<392x15xf32>
    %cst_17 = arith.constant dense<0.000000e+00> : vector<392x128xf32>
    %21 = tpu.matmul %20, %19, %cst_17 {dimension_numbers = #tpu.dot_dimension_numbers<[1], [0], [0], [1], [0, 0, 1, 1], [], []>} : vector<392x15xf32>, vector<15x128xf32>, vector<392x128xf32> -> vector<392x128xf32>
    %22 = vector.extract_strided_slice %3 {offsets = [28, 0], sizes = [392, 15], strides = [1, 1]} : vector<448x15xf32> to vector<392x15xf32>
    %cst_18 = arith.constant dense<0.000000e+00> : vector<392x128xf32>
    %23 = tpu.matmul %22, %19, %cst_18 {dimension_numbers = #tpu.dot_dimension_numbers<[1], [0], [0], [1], [0, 0, 1, 1], [], []>} : vector<392x15xf32>, vector<15x128xf32>, vector<392x128xf32> -> vector<392x128xf32>
    %24 = arith.addf %16, %21 : vector<392x128xf32>
    %25 = arith.addf %17, %23 : vector<392x128xf32>
    %c3 = arith.constant 3 : index
    %c0_19 = arith.constant 0 : index
    %c0_20 = arith.constant 0 : index
    %26 = vector.load %arg2[%c3, %c0_19, %c0_20] : memref<5x15x128xf32, #tpu.memory_space<vmem>>, vector<1x15x128xf32>
    %27 = vector.shape_cast %26 : vector<1x15x128xf32> to vector<15x128xf32>
    %28 = vector.extract_strided_slice %1 {offsets = [42, 0], sizes = [392, 15], strides = [1, 1]} : vector<448x15xf32> to vector<392x15xf32>
    %cst_21 = arith.constant dense<0.000000e+00> : vector<392x128xf32>
    %29 = tpu.matmul %28, %27, %cst_21 {dimension_numbers = #tpu.dot_dimension_numbers<[1], [0], [0], [1], [0, 0, 1, 1], [], []>} : vector<392x15xf32>, vector<15x128xf32>, vector<392x128xf32> -> vector<392x128xf32>
    %30 = vector.extract_strided_slice %3 {offsets = [42, 0], sizes = [392, 15], strides = [1, 1]} : vector<448x15xf32> to vector<392x15xf32>
    %cst_22 = arith.constant dense<0.000000e+00> : vector<392x128xf32>
    %31 = tpu.matmul %30, %27, %cst_22 {dimension_numbers = #tpu.dot_dimension_numbers<[1], [0], [0], [1], [0, 0, 1, 1], [], []>} : vector<392x15xf32>, vector<15x128xf32>, vector<392x128xf32> -> vector<392x128xf32>
    %32 = arith.addf %24, %29 : vector<392x128xf32>
    %33 = arith.addf %25, %31 : vector<392x128xf32>
    %c4 = arith.constant 4 : index
    %c0_23 = arith.constant 0 : index
    %c0_24 = arith.constant 0 : index
    %34 = vector.load %arg2[%c4, %c0_23, %c0_24] : memref<5x15x128xf32, #tpu.memory_space<vmem>>, vector<1x15x128xf32>
    %35 = vector.shape_cast %34 : vector<1x15x128xf32> to vector<15x128xf32>
    %36 = vector.extract_strided_slice %1 {offsets = [56, 0], sizes = [392, 15], strides = [1, 1]} : vector<448x15xf32> to vector<392x15xf32>
    %cst_25 = arith.constant dense<0.000000e+00> : vector<392x128xf32>
    %37 = tpu.matmul %36, %35, %cst_25 {dimension_numbers = #tpu.dot_dimension_numbers<[1], [0], [0], [1], [0, 0, 1, 1], [], []>} : vector<392x15xf32>, vector<15x128xf32>, vector<392x128xf32> -> vector<392x128xf32>
    %38 = vector.extract_strided_slice %3 {offsets = [56, 0], sizes = [392, 15], strides = [1, 1]} : vector<448x15xf32> to vector<392x15xf32>
    %cst_26 = arith.constant dense<0.000000e+00> : vector<392x128xf32>
    %39 = tpu.matmul %38, %35, %cst_26 {dimension_numbers = #tpu.dot_dimension_numbers<[1], [0], [0], [1], [0, 0, 1, 1], [], []>} : vector<392x15xf32>, vector<15x128xf32>, vector<392x128xf32> -> vector<392x128xf32>
    %40 = arith.addf %32, %37 : vector<392x128xf32>
    %41 = arith.addf %33, %39 : vector<392x128xf32>
    %c0_27 = arith.constant 0 : index
    %c0_28 = arith.constant 0 : index
    %42 = vector.load %arg3[%c0_27, %c0_28] : memref<1x128xf32, #tpu.memory_space<vmem>>, vector<1x128xf32>
    %43 = arith.maximumf %40, %41 : vector<392x128xf32>
    %44 = vector.broadcast %42 : vector<1x128xf32> to vector<392x128xf32>
    %45 = arith.addf %43, %44 : vector<392x128xf32>
    %cst_29 = arith.constant 0.000000e+00 : f32
    %46 = vector.broadcast %cst_29 : f32 to vector<392x128xf32>
    %47 = arith.maximumf %45, %46 : vector<392x128xf32>
    %48 = vector.extract_strided_slice %47 {offsets = [0, 0], sizes = [14, 128], strides = [1, 1]} : vector<392x128xf32> to vector<14x128xf32>
    %49 = vector.extract_strided_slice %47 {offsets = [14, 0], sizes = [14, 128], strides = [1, 1]} : vector<392x128xf32> to vector<14x128xf32>
    %50 = arith.maximumf %48, %49 : vector<14x128xf32>
    %51 = vector.extract_strided_slice %47 {offsets = [28, 0], sizes = [14, 128], strides = [1, 1]} : vector<392x128xf32> to vector<14x128xf32>
    %52 = vector.extract_strided_slice %47 {offsets = [42, 0], sizes = [14, 128], strides = [1, 1]} : vector<392x128xf32> to vector<14x128xf32>
    %53 = arith.maximumf %51, %52 : vector<14x128xf32>
    %54 = vector.extract_strided_slice %47 {offsets = [56, 0], sizes = [14, 128], strides = [1, 1]} : vector<392x128xf32> to vector<14x128xf32>
    %55 = vector.extract_strided_slice %47 {offsets = [70, 0], sizes = [14, 128], strides = [1, 1]} : vector<392x128xf32> to vector<14x128xf32>
    %56 = arith.maximumf %54, %55 : vector<14x128xf32>
    %57 = vector.extract_strided_slice %47 {offsets = [84, 0], sizes = [14, 128], strides = [1, 1]} : vector<392x128xf32> to vector<14x128xf32>
    %58 = vector.extract_strided_slice %47 {offsets = [98, 0], sizes = [14, 128], strides = [1, 1]} : vector<392x128xf32> to vector<14x128xf32>
    %59 = arith.maximumf %57, %58 : vector<14x128xf32>
    %60 = vector.extract_strided_slice %47 {offsets = [112, 0], sizes = [14, 128], strides = [1, 1]} : vector<392x128xf32> to vector<14x128xf32>
    %61 = vector.extract_strided_slice %47 {offsets = [126, 0], sizes = [14, 128], strides = [1, 1]} : vector<392x128xf32> to vector<14x128xf32>
    %62 = arith.maximumf %60, %61 : vector<14x128xf32>
    %63 = vector.extract_strided_slice %47 {offsets = [140, 0], sizes = [14, 128], strides = [1, 1]} : vector<392x128xf32> to vector<14x128xf32>
    %64 = vector.extract_strided_slice %47 {offsets = [154, 0], sizes = [14, 128], strides = [1, 1]} : vector<392x128xf32> to vector<14x128xf32>
    %65 = arith.maximumf %63, %64 : vector<14x128xf32>
    %66 = vector.extract_strided_slice %47 {offsets = [168, 0], sizes = [14, 128], strides = [1, 1]} : vector<392x128xf32> to vector<14x128xf32>
    %67 = vector.extract_strided_slice %47 {offsets = [182, 0], sizes = [14, 128], strides = [1, 1]} : vector<392x128xf32> to vector<14x128xf32>
    %68 = arith.maximumf %66, %67 : vector<14x128xf32>
    %69 = vector.extract_strided_slice %47 {offsets = [196, 0], sizes = [14, 128], strides = [1, 1]} : vector<392x128xf32> to vector<14x128xf32>
    %70 = vector.extract_strided_slice %47 {offsets = [210, 0], sizes = [14, 128], strides = [1, 1]} : vector<392x128xf32> to vector<14x128xf32>
    %71 = arith.maximumf %69, %70 : vector<14x128xf32>
    %72 = vector.extract_strided_slice %47 {offsets = [224, 0], sizes = [14, 128], strides = [1, 1]} : vector<392x128xf32> to vector<14x128xf32>
    %73 = vector.extract_strided_slice %47 {offsets = [238, 0], sizes = [14, 128], strides = [1, 1]} : vector<392x128xf32> to vector<14x128xf32>
    %74 = arith.maximumf %72, %73 : vector<14x128xf32>
    %75 = vector.extract_strided_slice %47 {offsets = [252, 0], sizes = [14, 128], strides = [1, 1]} : vector<392x128xf32> to vector<14x128xf32>
    %76 = vector.extract_strided_slice %47 {offsets = [266, 0], sizes = [14, 128], strides = [1, 1]} : vector<392x128xf32> to vector<14x128xf32>
    %77 = arith.maximumf %75, %76 : vector<14x128xf32>
    %78 = vector.extract_strided_slice %47 {offsets = [280, 0], sizes = [14, 128], strides = [1, 1]} : vector<392x128xf32> to vector<14x128xf32>
    %79 = vector.extract_strided_slice %47 {offsets = [294, 0], sizes = [14, 128], strides = [1, 1]} : vector<392x128xf32> to vector<14x128xf32>
    %80 = arith.maximumf %78, %79 : vector<14x128xf32>
    %81 = vector.extract_strided_slice %47 {offsets = [308, 0], sizes = [14, 128], strides = [1, 1]} : vector<392x128xf32> to vector<14x128xf32>
    %82 = vector.extract_strided_slice %47 {offsets = [322, 0], sizes = [14, 128], strides = [1, 1]} : vector<392x128xf32> to vector<14x128xf32>
    %83 = arith.maximumf %81, %82 : vector<14x128xf32>
    %84 = vector.extract_strided_slice %47 {offsets = [336, 0], sizes = [14, 128], strides = [1, 1]} : vector<392x128xf32> to vector<14x128xf32>
    %85 = vector.extract_strided_slice %47 {offsets = [350, 0], sizes = [14, 128], strides = [1, 1]} : vector<392x128xf32> to vector<14x128xf32>
    %86 = arith.maximumf %84, %85 : vector<14x128xf32>
    %87 = vector.extract_strided_slice %47 {offsets = [364, 0], sizes = [14, 128], strides = [1, 1]} : vector<392x128xf32> to vector<14x128xf32>
    %88 = vector.extract_strided_slice %47 {offsets = [378, 0], sizes = [14, 128], strides = [1, 1]} : vector<392x128xf32> to vector<14x128xf32>
    %89 = arith.maximumf %87, %88 : vector<14x128xf32>
    %90 = vector.extract_strided_slice %50 {offsets = [0, 0], sizes = [10, 128], strides = [1, 1]} : vector<14x128xf32> to vector<10x128xf32>
    %91 = vector.extract_strided_slice %50 {offsets = [1, 0], sizes = [10, 128], strides = [1, 1]} : vector<14x128xf32> to vector<10x128xf32>
    %92 = vector.extract_strided_slice %50 {offsets = [2, 0], sizes = [10, 128], strides = [1, 1]} : vector<14x128xf32> to vector<10x128xf32>
    %93 = vector.extract_strided_slice %50 {offsets = [3, 0], sizes = [10, 128], strides = [1, 1]} : vector<14x128xf32> to vector<10x128xf32>
    %94 = vector.extract_strided_slice %50 {offsets = [4, 0], sizes = [10, 128], strides = [1, 1]} : vector<14x128xf32> to vector<10x128xf32>
    %95 = tpu.concatenate %90, %91, %92, %93, %94 in 1 : vector<10x128xf32>, vector<10x128xf32>, vector<10x128xf32>, vector<10x128xf32>, vector<10x128xf32> -> vector<10x640xf32>
    %c0_30 = arith.constant 0 : index
    %c0_31 = arith.constant 0 : index
    %96 = vector.load %arg13[%c0_30, %c0_31] : memref<140x640xf32, #tpu.memory_space<vmem>>, vector<10x640xf32>
    tpu.vector_store %arg13[%c0_30, %c0_31], %95 {strides = array<i32>} : memref<140x640xf32, #tpu.memory_space<vmem>>, vector<10x640xf32>,
    %97 = vector.extract_strided_slice %53 {offsets = [0, 0], sizes = [10, 128], strides = [1, 1]} : vector<14x128xf32> to vector<10x128xf32>
    %98 = vector.extract_strided_slice %53 {offsets = [1, 0], sizes = [10, 128], strides = [1, 1]} : vector<14x128xf32> to vector<10x128xf32>
    %99 = vector.extract_strided_slice %53 {offsets = [2, 0], sizes = [10, 128], strides = [1, 1]} : vector<14x128xf32> to vector<10x128xf32>
    %100 = vector.extract_strided_slice %53 {offsets = [3, 0], sizes = [10, 128], strides = [1, 1]} : vector<14x128xf32> to vector<10x128xf32>
    %101 = vector.extract_strided_slice %53 {offsets = [4, 0], sizes = [10, 128], strides = [1, 1]} : vector<14x128xf32> to vector<10x128xf32>
    %102 = tpu.concatenate %97, %98, %99, %100, %101 in 1 : vector<10x128xf32>, vector<10x128xf32>, vector<10x128xf32>, vector<10x128xf32>, vector<10x128xf32> -> vector<10x640xf32>
    %c10 = arith.constant 10 : index
    %c0_32 = arith.constant 0 : index
    %103 = vector.load %arg13[%c10, %c0_32] : memref<140x640xf32, #tpu.memory_space<vmem>>, vector<10x640xf32>
    tpu.vector_store %arg13[%c10, %c0_32], %102 {strides = array<i32>} : memref<140x640xf32, #tpu.memory_space<vmem>>, vector<10x640xf32>,
    %104 = vector.extract_strided_slice %56 {offsets = [0, 0], sizes = [10, 128], strides = [1, 1]} : vector<14x128xf32> to vector<10x128xf32>
    %105 = vector.extract_strided_slice %56 {offsets = [1, 0], sizes = [10, 128], strides = [1, 1]} : vector<14x128xf32> to vector<10x128xf32>
    %106 = vector.extract_strided_slice %56 {offsets = [2, 0], sizes = [10, 128], strides = [1, 1]} : vector<14x128xf32> to vector<10x128xf32>
    %107 = vector.extract_strided_slice %56 {offsets = [3, 0], sizes = [10, 128], strides = [1, 1]} : vector<14x128xf32> to vector<10x128xf32>
    %108 = vector.extract_strided_slice %56 {offsets = [4, 0], sizes = [10, 128], strides = [1, 1]} : vector<14x128xf32> to vector<10x128xf32>
    %109 = tpu.concatenate %104, %105, %106, %107, %108 in 1 : vector<10x128xf32>, vector<10x128xf32>, vector<10x128xf32>, vector<10x128xf32>, vector<10x128xf32> -> vector<10x640xf32>
    %c20 = arith.constant 20 : index
    %c0_33 = arith.constant 0 : index
    %110 = vector.load %arg13[%c20, %c0_33] : memref<140x640xf32, #tpu.memory_space<vmem>>, vector<10x640xf32>
    tpu.vector_store %arg13[%c20, %c0_33], %109 {strides = array<i32>} : memref<140x640xf32, #tpu.memory_space<vmem>>, vector<10x640xf32>,
    %111 = vector.extract_strided_slice %59 {offsets = [0, 0], sizes = [10, 128], strides = [1, 1]} : vector<14x128xf32> to vector<10x128xf32>
    %112 = vector.extract_strided_slice %59 {offsets = [1, 0], sizes = [10, 128], strides = [1, 1]} : vector<14x128xf32> to vector<10x128xf32>
    %113 = vector.extract_strided_slice %59 {offsets = [2, 0], sizes = [10, 128], strides = [1, 1]} : vector<14x128xf32> to vector<10x128xf32>
    %114 = vector.extract_strided_slice %59 {offsets = [3, 0], sizes = [10, 128], strides = [1, 1]} : vector<14x128xf32> to vector<10x128xf32>
    %115 = vector.extract_strided_slice %59 {offsets = [4, 0], sizes = [10, 128], strides = [1, 1]} : vector<14x128xf32> to vector<10x128xf32>
    %116 = tpu.concatenate %111, %112, %113, %114, %115 in 1 : vector<10x128xf32>, vector<10x128xf32>, vector<10x128xf32>, vector<10x128xf32>, vector<10x128xf32> -> vector<10x640xf32>
    %c30 = arith.constant 30 : index
    %c0_34 = arith.constant 0 : index
    %117 = vector.load %arg13[%c30, %c0_34] : memref<140x640xf32, #tpu.memory_space<vmem>>, vector<10x640xf32>
    tpu.vector_store %arg13[%c30, %c0_34], %116 {strides = array<i32>} : memref<140x640xf32, #tpu.memory_space<vmem>>, vector<10x640xf32>,
    %118 = vector.extract_strided_slice %62 {offsets = [0, 0], sizes = [10, 128], strides = [1, 1]} : vector<14x128xf32> to vector<10x128xf32>
    %119 = vector.extract_strided_slice %62 {offsets = [1, 0], sizes = [10, 128], strides = [1, 1]} : vector<14x128xf32> to vector<10x128xf32>
    %120 = vector.extract_strided_slice %62 {offsets = [2, 0], sizes = [10, 128], strides = [1, 1]} : vector<14x128xf32> to vector<10x128xf32>
    %121 = vector.extract_strided_slice %62 {offsets = [3, 0], sizes = [10, 128], strides = [1, 1]} : vector<14x128xf32> to vector<10x128xf32>
    %122 = vector.extract_strided_slice %62 {offsets = [4, 0], sizes = [10, 128], strides = [1, 1]} : vector<14x128xf32> to vector<10x128xf32>
    %123 = tpu.concatenate %118, %119, %120, %121, %122 in 1 : vector<10x128xf32>, vector<10x128xf32>, vector<10x128xf32>, vector<10x128xf32>, vector<10x128xf32> -> vector<10x640xf32>
    %c40 = arith.constant 40 : index
    %c0_35 = arith.constant 0 : index
    %124 = vector.load %arg13[%c40, %c0_35] : memref<140x640xf32, #tpu.memory_space<vmem>>, vector<10x640xf32>
    tpu.vector_store %arg13[%c40, %c0_35], %123 {strides = array<i32>} : memref<140x640xf32, #tpu.memory_space<vmem>>, vector<10x640xf32>,
    %125 = vector.extract_strided_slice %65 {offsets = [0, 0], sizes = [10, 128], strides = [1, 1]} : vector<14x128xf32> to vector<10x128xf32>
    %126 = vector.extract_strided_slice %65 {offsets = [1, 0], sizes = [10, 128], strides = [1, 1]} : vector<14x128xf32> to vector<10x128xf32>
    %127 = vector.extract_strided_slice %65 {offsets = [2, 0], sizes = [10, 128], strides = [1, 1]} : vector<14x128xf32> to vector<10x128xf32>
    %128 = vector.extract_strided_slice %65 {offsets = [3, 0], sizes = [10, 128], strides = [1, 1]} : vector<14x128xf32> to vector<10x128xf32>
    %129 = vector.extract_strided_slice %65 {offsets = [4, 0], sizes = [10, 128], strides = [1, 1]} : vector<14x128xf32> to vector<10x128xf32>
    %130 = tpu.concatenate %125, %126, %127, %128, %129 in 1 : vector<10x128xf32>, vector<10x128xf32>, vector<10x128xf32>, vector<10x128xf32>, vector<10x128xf32> -> vector<10x640xf32>
    %c50 = arith.constant 50 : index
    %c0_36 = arith.constant 0 : index
    %131 = vector.load %arg13[%c50, %c0_36] : memref<140x640xf32, #tpu.memory_space<vmem>>, vector<10x640xf32>
    tpu.vector_store %arg13[%c50, %c0_36], %130 {strides = array<i32>} : memref<140x640xf32, #tpu.memory_space<vmem>>, vector<10x640xf32>,
    %132 = vector.extract_strided_slice %68 {offsets = [0, 0], sizes = [10, 128], strides = [1, 1]} : vector<14x128xf32> to vector<10x128xf32>
    %133 = vector.extract_strided_slice %68 {offsets = [1, 0], sizes = [10, 128], strides = [1, 1]} : vector<14x128xf32> to vector<10x128xf32>
    %134 = vector.extract_strided_slice %68 {offsets = [2, 0], sizes = [10, 128], strides = [1, 1]} : vector<14x128xf32> to vector<10x128xf32>
    %135 = vector.extract_strided_slice %68 {offsets = [3, 0], sizes = [10, 128], strides = [1, 1]} : vector<14x128xf32> to vector<10x128xf32>
    %136 = vector.extract_strided_slice %68 {offsets = [4, 0], sizes = [10, 128], strides = [1, 1]} : vector<14x128xf32> to vector<10x128xf32>
    %137 = tpu.concatenate %132, %133, %134, %135, %136 in 1 : vector<10x128xf32>, vector<10x128xf32>, vector<10x128xf32>, vector<10x128xf32>, vector<10x128xf32> -> vector<10x640xf32>
    %c60 = arith.constant 60 : index
    %c0_37 = arith.constant 0 : index
    %138 = vector.load %arg13[%c60, %c0_37] : memref<140x640xf32, #tpu.memory_space<vmem>>, vector<10x640xf32>
    tpu.vector_store %arg13[%c60, %c0_37], %137 {strides = array<i32>} : memref<140x640xf32, #tpu.memory_space<vmem>>, vector<10x640xf32>,
    %139 = vector.extract_strided_slice %71 {offsets = [0, 0], sizes = [10, 128], strides = [1, 1]} : vector<14x128xf32> to vector<10x128xf32>
    %140 = vector.extract_strided_slice %71 {offsets = [1, 0], sizes = [10, 128], strides = [1, 1]} : vector<14x128xf32> to vector<10x128xf32>
    %141 = vector.extract_strided_slice %71 {offsets = [2, 0], sizes = [10, 128], strides = [1, 1]} : vector<14x128xf32> to vector<10x128xf32>
    %142 = vector.extract_strided_slice %71 {offsets = [3, 0], sizes = [10, 128], strides = [1, 1]} : vector<14x128xf32> to vector<10x128xf32>
    %143 = vector.extract_strided_slice %71 {offsets = [4, 0], sizes = [10, 128], strides = [1, 1]} : vector<14x128xf32> to vector<10x128xf32>
    %144 = tpu.concatenate %139, %140, %141, %142, %143 in 1 : vector<10x128xf32>, vector<10x128xf32>, vector<10x128xf32>, vector<10x128xf32>, vector<10x128xf32> -> vector<10x640xf32>
    %c70 = arith.constant 70 : index
    %c0_38 = arith.constant 0 : index
    %145 = vector.load %arg13[%c70, %c0_38] : memref<140x640xf32, #tpu.memory_space<vmem>>, vector<10x640xf32>
    tpu.vector_store %arg13[%c70, %c0_38], %144 {strides = array<i32>} : memref<140x640xf32, #tpu.memory_space<vmem>>, vector<10x640xf32>,
    %146 = vector.extract_strided_slice %74 {offsets = [0, 0], sizes = [10, 128], strides = [1, 1]} : vector<14x128xf32> to vector<10x128xf32>
    %147 = vector.extract_strided_slice %74 {offsets = [1, 0], sizes = [10, 128], strides = [1, 1]} : vector<14x128xf32> to vector<10x128xf32>
    %148 = vector.extract_strided_slice %74 {offsets = [2, 0], sizes = [10, 128], strides = [1, 1]} : vector<14x128xf32> to vector<10x128xf32>
    %149 = vector.extract_strided_slice %74 {offsets = [3, 0], sizes = [10, 128], strides = [1, 1]} : vector<14x128xf32> to vector<10x128xf32>
    %150 = vector.extract_strided_slice %74 {offsets = [4, 0], sizes = [10, 128], strides = [1, 1]} : vector<14x128xf32> to vector<10x128xf32>
    %151 = tpu.concatenate %146, %147, %148, %149, %150 in 1 : vector<10x128xf32>, vector<10x128xf32>, vector<10x128xf32>, vector<10x128xf32>, vector<10x128xf32> -> vector<10x640xf32>
    %c80 = arith.constant 80 : index
    %c0_39 = arith.constant 0 : index
    %152 = vector.load %arg13[%c80, %c0_39] : memref<140x640xf32, #tpu.memory_space<vmem>>, vector<10x640xf32>
    tpu.vector_store %arg13[%c80, %c0_39], %151 {strides = array<i32>} : memref<140x640xf32, #tpu.memory_space<vmem>>, vector<10x640xf32>,
    %153 = vector.extract_strided_slice %77 {offsets = [0, 0], sizes = [10, 128], strides = [1, 1]} : vector<14x128xf32> to vector<10x128xf32>
    %154 = vector.extract_strided_slice %77 {offsets = [1, 0], sizes = [10, 128], strides = [1, 1]} : vector<14x128xf32> to vector<10x128xf32>
    %155 = vector.extract_strided_slice %77 {offsets = [2, 0], sizes = [10, 128], strides = [1, 1]} : vector<14x128xf32> to vector<10x128xf32>
    %156 = vector.extract_strided_slice %77 {offsets = [3, 0], sizes = [10, 128], strides = [1, 1]} : vector<14x128xf32> to vector<10x128xf32>
    %157 = vector.extract_strided_slice %77 {offsets = [4, 0], sizes = [10, 128], strides = [1, 1]} : vector<14x128xf32> to vector<10x128xf32>
    %158 = tpu.concatenate %153, %154, %155, %156, %157 in 1 : vector<10x128xf32>, vector<10x128xf32>, vector<10x128xf32>, vector<10x128xf32>, vector<10x128xf32> -> vector<10x640xf32>
    %c90 = arith.constant 90 : index
    %c0_40 = arith.constant 0 : index
    %159 = vector.load %arg13[%c90, %c0_40] : memref<140x640xf32, #tpu.memory_space<vmem>>, vector<10x640xf32>
    tpu.vector_store %arg13[%c90, %c0_40], %158 {strides = array<i32>} : memref<140x640xf32, #tpu.memory_space<vmem>>, vector<10x640xf32>,
    %160 = vector.extract_strided_slice %80 {offsets = [0, 0], sizes = [10, 128], strides = [1, 1]} : vector<14x128xf32> to vector<10x128xf32>
    %161 = vector.extract_strided_slice %80 {offsets = [1, 0], sizes = [10, 128], strides = [1, 1]} : vector<14x128xf32> to vector<10x128xf32>
    %162 = vector.extract_strided_slice %80 {offsets = [2, 0], sizes = [10, 128], strides = [1, 1]} : vector<14x128xf32> to vector<10x128xf32>
    %163 = vector.extract_strided_slice %80 {offsets = [3, 0], sizes = [10, 128], strides = [1, 1]} : vector<14x128xf32> to vector<10x128xf32>
    %164 = vector.extract_strided_slice %80 {offsets = [4, 0], sizes = [10, 128], strides = [1, 1]} : vector<14x128xf32> to vector<10x128xf32>
    %165 = tpu.concatenate %160, %161, %162, %163, %164 in 1 : vector<10x128xf32>, vector<10x128xf32>, vector<10x128xf32>, vector<10x128xf32>, vector<10x128xf32> -> vector<10x640xf32>
    %c100 = arith.constant 100 : index
    %c0_41 = arith.constant 0 : index
    %166 = vector.load %arg13[%c100, %c0_41] : memref<140x640xf32, #tpu.memory_space<vmem>>, vector<10x640xf32>
    tpu.vector_store %arg13[%c100, %c0_41], %165 {strides = array<i32>} : memref<140x640xf32, #tpu.memory_space<vmem>>, vector<10x640xf32>,
    %167 = vector.extract_strided_slice %83 {offsets = [0, 0], sizes = [10, 128], strides = [1, 1]} : vector<14x128xf32> to vector<10x128xf32>
    %168 = vector.extract_strided_slice %83 {offsets = [1, 0], sizes = [10, 128], strides = [1, 1]} : vector<14x128xf32> to vector<10x128xf32>
    %169 = vector.extract_strided_slice %83 {offsets = [2, 0], sizes = [10, 128], strides = [1, 1]} : vector<14x128xf32> to vector<10x128xf32>
    %170 = vector.extract_strided_slice %83 {offsets = [3, 0], sizes = [10, 128], strides = [1, 1]} : vector<14x128xf32> to vector<10x128xf32>
    %171 = vector.extract_strided_slice %83 {offsets = [4, 0], sizes = [10, 128], strides = [1, 1]} : vector<14x128xf32> to vector<10x128xf32>
    %172 = tpu.concatenate %167, %168, %169, %170, %171 in 1 : vector<10x128xf32>, vector<10x128xf32>, vector<10x128xf32>, vector<10x128xf32>, vector<10x128xf32> -> vector<10x640xf32>
    %c110 = arith.constant 110 : index
    %c0_42 = arith.constant 0 : index
    %173 = vector.load %arg13[%c110, %c0_42] : memref<140x640xf32, #tpu.memory_space<vmem>>, vector<10x640xf32>
    tpu.vector_store %arg13[%c110, %c0_42], %172 {strides = array<i32>} : memref<140x640xf32, #tpu.memory_space<vmem>>, vector<10x640xf32>,
    %174 = vector.extract_strided_slice %86 {offsets = [0, 0], sizes = [10, 128], strides = [1, 1]} : vector<14x128xf32> to vector<10x128xf32>
    %175 = vector.extract_strided_slice %86 {offsets = [1, 0], sizes = [10, 128], strides = [1, 1]} : vector<14x128xf32> to vector<10x128xf32>
    %176 = vector.extract_strided_slice %86 {offsets = [2, 0], sizes = [10, 128], strides = [1, 1]} : vector<14x128xf32> to vector<10x128xf32>
    %177 = vector.extract_strided_slice %86 {offsets = [3, 0], sizes = [10, 128], strides = [1, 1]} : vector<14x128xf32> to vector<10x128xf32>
    %178 = vector.extract_strided_slice %86 {offsets = [4, 0], sizes = [10, 128], strides = [1, 1]} : vector<14x128xf32> to vector<10x128xf32>
    %179 = tpu.concatenate %174, %175, %176, %177, %178 in 1 : vector<10x128xf32>, vector<10x128xf32>, vector<10x128xf32>, vector<10x128xf32>, vector<10x128xf32> -> vector<10x640xf32>
    %c120 = arith.constant 120 : index
    %c0_43 = arith.constant 0 : index
    %180 = vector.load %arg13[%c120, %c0_43] : memref<140x640xf32, #tpu.memory_space<vmem>>, vector<10x640xf32>
    tpu.vector_store %arg13[%c120, %c0_43], %179 {strides = array<i32>} : memref<140x640xf32, #tpu.memory_space<vmem>>, vector<10x640xf32>,
    %181 = vector.extract_strided_slice %89 {offsets = [0, 0], sizes = [10, 128], strides = [1, 1]} : vector<14x128xf32> to vector<10x128xf32>
    %182 = vector.extract_strided_slice %89 {offsets = [1, 0], sizes = [10, 128], strides = [1, 1]} : vector<14x128xf32> to vector<10x128xf32>
    %183 = vector.extract_strided_slice %89 {offsets = [2, 0], sizes = [10, 128], strides = [1, 1]} : vector<14x128xf32> to vector<10x128xf32>
    %184 = vector.extract_strided_slice %89 {offsets = [3, 0], sizes = [10, 128], strides = [1, 1]} : vector<14x128xf32> to vector<10x128xf32>
    %185 = vector.extract_strided_slice %89 {offsets = [4, 0], sizes = [10, 128], strides = [1, 1]} : vector<14x128xf32> to vector<10x128xf32>
    %186 = tpu.concatenate %181, %182, %183, %184, %185 in 1 : vector<10x128xf32>, vector<10x128xf32>, vector<10x128xf32>, vector<10x128xf32>, vector<10x128xf32> -> vector<10x640xf32>
    %c130 = arith.constant 130 : index
    %c0_44 = arith.constant 0 : index
    %187 = vector.load %arg13[%c130, %c0_44] : memref<140x640xf32, #tpu.memory_space<vmem>>, vector<10x640xf32>
    tpu.vector_store %arg13[%c130, %c0_44], %186 {strides = array<i32>} : memref<140x640xf32, #tpu.memory_space<vmem>>, vector<10x640xf32>,
    %c0_45 = arith.constant 0 : index
    %c0_46 = arith.constant 0 : index
    %188 = vector.load %arg13[%c0_45, %c0_46] : memref<140x640xf32, #tpu.memory_space<vmem>>, vector<100x640xf32>
    %c0_47 = arith.constant 0 : index
    %c0_48 = arith.constant 0 : index
    %c0_49 = arith.constant 0 : index
    %189 = vector.load %arg4[%c0_47, %c0_48, %c0_49] : memref<5x640x128xf32, #tpu.memory_space<vmem>>, vector<1x640x128xf32>
    %190 = vector.shape_cast %189 : vector<1x640x128xf32> to vector<640x128xf32>
    %cst_50 = arith.constant dense<0.000000e+00> : vector<100x128xf32>
    %191 = tpu.matmul %188, %190, %cst_50 {dimension_numbers = #tpu.dot_dimension_numbers<[1], [0], [0], [1], [0, 0, 1, 1], [], []>} : vector<100x640xf32>, vector<640x128xf32>, vector<100x128xf32> -> vector<100x128xf32>
    %c10_51 = arith.constant 10 : index
    %c0_52 = arith.constant 0 : index
    %192 = vector.load %arg13[%c10_51, %c0_52] : memref<140x640xf32, #tpu.memory_space<vmem>>, vector<100x640xf32>
    %c1_53 = arith.constant 1 : index
    %c0_54 = arith.constant 0 : index
    %c0_55 = arith.constant 0 : index
    %193 = vector.load %arg4[%c1_53, %c0_54, %c0_55] : memref<5x640x128xf32, #tpu.memory_space<vmem>>, vector<1x640x128xf32>
    %194 = vector.shape_cast %193 : vector<1x640x128xf32> to vector<640x128xf32>
    %cst_56 = arith.constant dense<0.000000e+00> : vector<100x128xf32>
    %195 = tpu.matmul %192, %194, %cst_56 {dimension_numbers = #tpu.dot_dimension_numbers<[1], [0], [0], [1], [0, 0, 1, 1], [], []>} : vector<100x640xf32>, vector<640x128xf32>, vector<100x128xf32> -> vector<100x128xf32>
    %196 = arith.addf %191, %195 : vector<100x128xf32>
    %c20_57 = arith.constant 20 : index
    %c0_58 = arith.constant 0 : index
    %197 = vector.load %arg13[%c20_57, %c0_58] : memref<140x640xf32, #tpu.memory_space<vmem>>, vector<100x640xf32>
    %c2_59 = arith.constant 2 : index
    %c0_60 = arith.constant 0 : index
    %c0_61 = arith.constant 0 : index
    %198 = vector.load %arg4[%c2_59, %c0_60, %c0_61] : memref<5x640x128xf32, #tpu.memory_space<vmem>>, vector<1x640x128xf32>
    %199 = vector.shape_cast %198 : vector<1x640x128xf32> to vector<640x128xf32>
    %cst_62 = arith.constant dense<0.000000e+00> : vector<100x128xf32>
    %200 = tpu.matmul %197, %199, %cst_62 {dimension_numbers = #tpu.dot_dimension_numbers<[1], [0], [0], [1], [0, 0, 1, 1], [], []>} : vector<100x640xf32>, vector<640x128xf32>, vector<100x128xf32> -> vector<100x128xf32>
    %201 = arith.addf %196, %200 : vector<100x128xf32>
    %c30_63 = arith.constant 30 : index
    %c0_64 = arith.constant 0 : index
    %202 = vector.load %arg13[%c30_63, %c0_64] : memref<140x640xf32, #tpu.memory_space<vmem>>, vector<100x640xf32>
    %c3_65 = arith.constant 3 : index
    %c0_66 = arith.constant 0 : index
    %c0_67 = arith.constant 0 : index
    %203 = vector.load %arg4[%c3_65, %c0_66, %c0_67] : memref<5x640x128xf32, #tpu.memory_space<vmem>>, vector<1x640x128xf32>
    %204 = vector.shape_cast %203 : vector<1x640x128xf32> to vector<640x128xf32>
    %cst_68 = arith.constant dense<0.000000e+00> : vector<100x128xf32>
    %205 = tpu.matmul %202, %204, %cst_68 {dimension_numbers = #tpu.dot_dimension_numbers<[1], [0], [0], [1], [0, 0, 1, 1], [], []>} : vector<100x640xf32>, vector<640x128xf32>, vector<100x128xf32> -> vector<100x128xf32>
    %206 = arith.addf %201, %205 : vector<100x128xf32>
    %c40_69 = arith.constant 40 : index
    %c0_70 = arith.constant 0 : index
    %207 = vector.load %arg13[%c40_69, %c0_70] : memref<140x640xf32, #tpu.memory_space<vmem>>, vector<100x640xf32>
    %c4_71 = arith.constant 4 : index
    %c0_72 = arith.constant 0 : index
    %c0_73 = arith.constant 0 : index
    %208 = vector.load %arg4[%c4_71, %c0_72, %c0_73] : memref<5x640x128xf32, #tpu.memory_space<vmem>>, vector<1x640x128xf32>
    %209 = vector.shape_cast %208 : vector<1x640x128xf32> to vector<640x128xf32>
    %cst_74 = arith.constant dense<0.000000e+00> : vector<100x128xf32>
    %210 = tpu.matmul %207, %209, %cst_74 {dimension_numbers = #tpu.dot_dimension_numbers<[1], [0], [0], [1], [0, 0, 1, 1], [], []>} : vector<100x640xf32>, vector<640x128xf32>, vector<100x128xf32> -> vector<100x128xf32>
    %211 = arith.addf %206, %210 : vector<100x128xf32>
    %c0_75 = arith.constant 0 : index
    %c0_76 = arith.constant 0 : index
    %212 = vector.load %arg5[%c0_75, %c0_76] : memref<1x128xf32, #tpu.memory_space<vmem>>, vector<1x128xf32>
    %213 = vector.broadcast %212 : vector<1x128xf32> to vector<100x128xf32>
    %214 = arith.addf %211, %213 : vector<100x128xf32>
    %cst_77 = arith.constant 0.000000e+00 : f32
    %215 = vector.broadcast %cst_77 : f32 to vector<100x128xf32>
    %216 = arith.maximumf %214, %215 : vector<100x128xf32>
    %217 = vector.extract_strided_slice %216 {offsets = [0, 0], sizes = [1, 128], strides = [1, 1]} : vector<100x128xf32> to vector<1x128xf32>
    %218 = vector.extract_strided_slice %216 {offsets = [1, 0], sizes = [1, 128], strides = [1, 1]} : vector<100x128xf32> to vector<1x128xf32>
    %219 = arith.maximumf %217, %218 : vector<1x128xf32>
    %220 = vector.extract_strided_slice %216 {offsets = [10, 0], sizes = [1, 128], strides = [1, 1]} : vector<100x128xf32> to vector<1x128xf32>
    %221 = vector.extract_strided_slice %216 {offsets = [11, 0], sizes = [1, 128], strides = [1, 1]} : vector<100x128xf32> to vector<1x128xf32>
    %222 = arith.maximumf %220, %221 : vector<1x128xf32>
    %223 = arith.maximumf %219, %222 : vector<1x128xf32>
    %224 = vector.extract_strided_slice %216 {offsets = [2, 0], sizes = [1, 128], strides = [1, 1]} : vector<100x128xf32> to vector<1x128xf32>
    %225 = vector.extract_strided_slice %216 {offsets = [3, 0], sizes = [1, 128], strides = [1, 1]} : vector<100x128xf32> to vector<1x128xf32>
    %226 = arith.maximumf %224, %225 : vector<1x128xf32>
    %227 = vector.extract_strided_slice %216 {offsets = [12, 0], sizes = [1, 128], strides = [1, 1]} : vector<100x128xf32> to vector<1x128xf32>
    %228 = vector.extract_strided_slice %216 {offsets = [13, 0], sizes = [1, 128], strides = [1, 1]} : vector<100x128xf32> to vector<1x128xf32>
    %229 = arith.maximumf %227, %228 : vector<1x128xf32>
    %230 = arith.maximumf %226, %229 : vector<1x128xf32>
    %231 = vector.extract_strided_slice %216 {offsets = [4, 0], sizes = [1, 128], strides = [1, 1]} : vector<100x128xf32> to vector<1x128xf32>
    %232 = vector.extract_strided_slice %216 {offsets = [5, 0], sizes = [1, 128], strides = [1, 1]} : vector<100x128xf32> to vector<1x128xf32>
    %233 = arith.maximumf %231, %232 : vector<1x128xf32>
    %234 = vector.extract_strided_slice %216 {offsets = [14, 0], sizes = [1, 128], strides = [1, 1]} : vector<100x128xf32> to vector<1x128xf32>
    %235 = vector.extract_strided_slice %216 {offsets = [15, 0], sizes = [1, 128], strides = [1, 1]} : vector<100x128xf32> to vector<1x128xf32>
    %236 = arith.maximumf %234, %235 : vector<1x128xf32>
    %237 = arith.maximumf %233, %236 : vector<1x128xf32>
    %238 = vector.extract_strided_slice %216 {offsets = [6, 0], sizes = [1, 128], strides = [1, 1]} : vector<100x128xf32> to vector<1x128xf32>
    %239 = vector.extract_strided_slice %216 {offsets = [7, 0], sizes = [1, 128], strides = [1, 1]} : vector<100x128xf32> to vector<1x128xf32>
    %240 = arith.maximumf %238, %239 : vector<1x128xf32>
    %241 = vector.extract_strided_slice %216 {offsets = [16, 0], sizes = [1, 128], strides = [1, 1]} : vector<100x128xf32> to vector<1x128xf32>
    %242 = vector.extract_strided_slice %216 {offsets = [17, 0], sizes = [1, 128], strides = [1, 1]} : vector<100x128xf32> to vector<1x128xf32>
    %243 = arith.maximumf %241, %242 : vector<1x128xf32>
    %244 = arith.maximumf %240, %243 : vector<1x128xf32>
    %245 = vector.extract_strided_slice %216 {offsets = [8, 0], sizes = [1, 128], strides = [1, 1]} : vector<100x128xf32> to vector<1x128xf32>
    %246 = vector.extract_strided_slice %216 {offsets = [9, 0], sizes = [1, 128], strides = [1, 1]} : vector<100x128xf32> to vector<1x128xf32>
    %247 = arith.maximumf %245, %246 : vector<1x128xf32>
    %248 = vector.extract_strided_slice %216 {offsets = [18, 0], sizes = [1, 128], strides = [1, 1]} : vector<100x128xf32> to vector<1x128xf32>
    %249 = vector.extract_strided_slice %216 {offsets = [19, 0], sizes = [1, 128], strides = [1, 1]} : vector<100x128xf32> to vector<1x128xf32>
    %250 = arith.maximumf %248, %249 : vector<1x128xf32>
    %251 = arith.maximumf %247, %250 : vector<1x128xf32>
    %252 = vector.extract_strided_slice %216 {offsets = [20, 0], sizes = [1, 128], strides = [1, 1]} : vector<100x128xf32> to vector<1x128xf32>
    %253 = vector.extract_strided_slice %216 {offsets = [21, 0], sizes = [1, 128], strides = [1, 1]} : vector<100x128xf32> to vector<1x128xf32>
    %254 = arith.maximumf %252, %253 : vector<1x128xf32>
    %255 = vector.extract_strided_slice %216 {offsets = [30, 0], sizes = [1, 128], strides = [1, 1]} : vector<100x128xf32> to vector<1x128xf32>
    %256 = vector.extract_strided_slice %216 {offsets = [31, 0], sizes = [1, 128], strides = [1, 1]} : vector<100x128xf32> to vector<1x128xf32>
    %257 = arith.maximumf %255, %256 : vector<1x128xf32>
    %258 = arith.maximumf %254, %257 : vector<1x128xf32>
    %259 = vector.extract_strided_slice %216 {offsets = [22, 0], sizes = [1, 128], strides = [1, 1]} : vector<100x128xf32> to vector<1x128xf32>
    %260 = vector.extract_strided_slice %216 {offsets = [23, 0], sizes = [1, 128], strides = [1, 1]} : vector<100x128xf32> to vector<1x128xf32>
    %261 = arith.maximumf %259, %260 : vector<1x128xf32>
    %262 = vector.extract_strided_slice %216 {offsets = [32, 0], sizes = [1, 128], strides = [1, 1]} : vector<100x128xf32> to vector<1x128xf32>
    %263 = vector.extract_strided_slice %216 {offsets = [33, 0], sizes = [1, 128], strides = [1, 1]} : vector<100x128xf32> to vector<1x128xf32>
    %264 = arith.maximumf %262, %263 : vector<1x128xf32>
    %265 = arith.maximumf %261, %264 : vector<1x128xf32>
    %266 = vector.extract_strided_slice %216 {offsets = [24, 0], sizes = [1, 128], strides = [1, 1]} : vector<100x128xf32> to vector<1x128xf32>
    %267 = vector.extract_strided_slice %216 {offsets = [25, 0], sizes = [1, 128], strides = [1, 1]} : vector<100x128xf32> to vector<1x128xf32>
    %268 = arith.maximumf %266, %267 : vector<1x128xf32>
    %269 = vector.extract_strided_slice %216 {offsets = [34, 0], sizes = [1, 128], strides = [1, 1]} : vector<100x128xf32> to vector<1x128xf32>
    %270 = vector.extract_strided_slice %216 {offsets = [35, 0], sizes = [1, 128], strides = [1, 1]} : vector<100x128xf32> to vector<1x128xf32>
    %271 = arith.maximumf %269, %270 : vector<1x128xf32>
    %272 = arith.maximumf %268, %271 : vector<1x128xf32>
    %273 = vector.extract_strided_slice %216 {offsets = [26, 0], sizes = [1, 128], strides = [1, 1]} : vector<100x128xf32> to vector<1x128xf32>
    %274 = vector.extract_strided_slice %216 {offsets = [27, 0], sizes = [1, 128], strides = [1, 1]} : vector<100x128xf32> to vector<1x128xf32>
    %275 = arith.maximumf %273, %274 : vector<1x128xf32>
    %276 = vector.extract_strided_slice %216 {offsets = [36, 0], sizes = [1, 128], strides = [1, 1]} : vector<100x128xf32> to vector<1x128xf32>
    %277 = vector.extract_strided_slice %216 {offsets = [37, 0], sizes = [1, 128], strides = [1, 1]} : vector<100x128xf32> to vector<1x128xf32>
    %278 = arith.maximumf %276, %277 : vector<1x128xf32>
    %279 = arith.maximumf %275, %278 : vector<1x128xf32>
    %280 = vector.extract_strided_slice %216 {offsets = [28, 0], sizes = [1, 128], strides = [1, 1]} : vector<100x128xf32> to vector<1x128xf32>
    %281 = vector.extract_strided_slice %216 {offsets = [29, 0], sizes = [1, 128], strides = [1, 1]} : vector<100x128xf32> to vector<1x128xf32>
    %282 = arith.maximumf %280, %281 : vector<1x128xf32>
    %283 = vector.extract_strided_slice %216 {offsets = [38, 0], sizes = [1, 128], strides = [1, 1]} : vector<100x128xf32> to vector<1x128xf32>
    %284 = vector.extract_strided_slice %216 {offsets = [39, 0], sizes = [1, 128], strides = [1, 1]} : vector<100x128xf32> to vector<1x128xf32>
    %285 = arith.maximumf %283, %284 : vector<1x128xf32>
    %286 = arith.maximumf %282, %285 : vector<1x128xf32>
    %287 = vector.extract_strided_slice %216 {offsets = [40, 0], sizes = [1, 128], strides = [1, 1]} : vector<100x128xf32> to vector<1x128xf32>
    %288 = vector.extract_strided_slice %216 {offsets = [41, 0], sizes = [1, 128], strides = [1, 1]} : vector<100x128xf32> to vector<1x128xf32>
    %289 = arith.maximumf %287, %288 : vector<1x128xf32>
    %290 = vector.extract_strided_slice %216 {offsets = [50, 0], sizes = [1, 128], strides = [1, 1]} : vector<100x128xf32> to vector<1x128xf32>
    %291 = vector.extract_strided_slice %216 {offsets = [51, 0], sizes = [1, 128], strides = [1, 1]} : vector<100x128xf32> to vector<1x128xf32>
    %292 = arith.maximumf %290, %291 : vector<1x128xf32>
    %293 = arith.maximumf %289, %292 : vector<1x128xf32>
    %294 = vector.extract_strided_slice %216 {offsets = [42, 0], sizes = [1, 128], strides = [1, 1]} : vector<100x128xf32> to vector<1x128xf32>
    %295 = vector.extract_strided_slice %216 {offsets = [43, 0], sizes = [1, 128], strides = [1, 1]} : vector<100x128xf32> to vector<1x128xf32>
    %296 = arith.maximumf %294, %295 : vector<1x128xf32>
    %297 = vector.extract_strided_slice %216 {offsets = [52, 0], sizes = [1, 128], strides = [1, 1]} : vector<100x128xf32> to vector<1x128xf32>
    %298 = vector.extract_strided_slice %216 {offsets = [53, 0], sizes = [1, 128], strides = [1, 1]} : vector<100x128xf32> to vector<1x128xf32>
    %299 = arith.maximumf %297, %298 : vector<1x128xf32>
    %300 = arith.maximumf %296, %299 : vector<1x128xf32>
    %301 = vector.extract_strided_slice %216 {offsets = [44, 0], sizes = [1, 128], strides = [1, 1]} : vector<100x128xf32> to vector<1x128xf32>
    %302 = vector.extract_strided_slice %216 {offsets = [45, 0], sizes = [1, 128], strides = [1, 1]} : vector<100x128xf32> to vector<1x128xf32>
    %303 = arith.maximumf %301, %302 : vector<1x128xf32>
    %304 = vector.extract_strided_slice %216 {offsets = [54, 0], sizes = [1, 128], strides = [1, 1]} : vector<100x128xf32> to vector<1x128xf32>
    %305 = vector.extract_strided_slice %216 {offsets = [55, 0], sizes = [1, 128], strides = [1, 1]} : vector<100x128xf32> to vector<1x128xf32>
    %306 = arith.maximumf %304, %305 : vector<1x128xf32>
    %307 = arith.maximumf %303, %306 : vector<1x128xf32>
    %308 = vector.extract_strided_slice %216 {offsets = [46, 0], sizes = [1, 128], strides = [1, 1]} : vector<100x128xf32> to vector<1x128xf32>
    %309 = vector.extract_strided_slice %216 {offsets = [47, 0], sizes = [1, 128], strides = [1, 1]} : vector<100x128xf32> to vector<1x128xf32>
    %310 = arith.maximumf %308, %309 : vector<1x128xf32>
    %311 = vector.extract_strided_slice %216 {offsets = [56, 0], sizes = [1, 128], strides = [1, 1]} : vector<100x128xf32> to vector<1x128xf32>
    %312 = vector.extract_strided_slice %216 {offsets = [57, 0], sizes = [1, 128], strides = [1, 1]} : vector<100x128xf32> to vector<1x128xf32>
    %313 = arith.maximumf %311, %312 : vector<1x128xf32>
    %314 = arith.maximumf %310, %313 : vector<1x128xf32>
    %315 = vector.extract_strided_slice %216 {offsets = [48, 0], sizes = [1, 128], strides = [1, 1]} : vector<100x128xf32> to vector<1x128xf32>
    %316 = vector.extract_strided_slice %216 {offsets = [49, 0], sizes = [1, 128], strides = [1, 1]} : vector<100x128xf32> to vector<1x128xf32>
    %317 = arith.maximumf %315, %316 : vector<1x128xf32>
    %318 = vector.extract_strided_slice %216 {offsets = [58, 0], sizes = [1, 128], strides = [1, 1]} : vector<100x128xf32> to vector<1x128xf32>
    %319 = vector.extract_strided_slice %216 {offsets = [59, 0], sizes = [1, 128], strides = [1, 1]} : vector<100x128xf32> to vector<1x128xf32>
    %320 = arith.maximumf %318, %319 : vector<1x128xf32>
    %321 = arith.maximumf %317, %320 : vector<1x128xf32>
    %322 = vector.extract_strided_slice %216 {offsets = [60, 0], sizes = [1, 128], strides = [1, 1]} : vector<100x128xf32> to vector<1x128xf32>
    %323 = vector.extract_strided_slice %216 {offsets = [61, 0], sizes = [1, 128], strides = [1, 1]} : vector<100x128xf32> to vector<1x128xf32>
    %324 = arith.maximumf %322, %323 : vector<1x128xf32>
    %325 = vector.extract_strided_slice %216 {offsets = [70, 0], sizes = [1, 128], strides = [1, 1]} : vector<100x128xf32> to vector<1x128xf32>
    %326 = vector.extract_strided_slice %216 {offsets = [71, 0], sizes = [1, 128], strides = [1, 1]} : vector<100x128xf32> to vector<1x128xf32>
    %327 = arith.maximumf %325, %326 : vector<1x128xf32>
    %328 = arith.maximumf %324, %327 : vector<1x128xf32>
    %329 = vector.extract_strided_slice %216 {offsets = [62, 0], sizes = [1, 128], strides = [1, 1]} : vector<100x128xf32> to vector<1x128xf32>
    %330 = vector.extract_strided_slice %216 {offsets = [63, 0], sizes = [1, 128], strides = [1, 1]} : vector<100x128xf32> to vector<1x128xf32>
    %331 = arith.maximumf %329, %330 : vector<1x128xf32>
    %332 = vector.extract_strided_slice %216 {offsets = [72, 0], sizes = [1, 128], strides = [1, 1]} : vector<100x128xf32> to vector<1x128xf32>
    %333 = vector.extract_strided_slice %216 {offsets = [73, 0], sizes = [1, 128], strides = [1, 1]} : vector<100x128xf32> to vector<1x128xf32>
    %334 = arith.maximumf %332, %333 : vector<1x128xf32>
    %335 = arith.maximumf %331, %334 : vector<1x128xf32>
    %336 = vector.extract_strided_slice %216 {offsets = [64, 0], sizes = [1, 128], strides = [1, 1]} : vector<100x128xf32> to vector<1x128xf32>
    %337 = vector.extract_strided_slice %216 {offsets = [65, 0], sizes = [1, 128], strides = [1, 1]} : vector<100x128xf32> to vector<1x128xf32>
    %338 = arith.maximumf %336, %337 : vector<1x128xf32>
    %339 = vector.extract_strided_slice %216 {offsets = [74, 0], sizes = [1, 128], strides = [1, 1]} : vector<100x128xf32> to vector<1x128xf32>
    %340 = vector.extract_strided_slice %216 {offsets = [75, 0], sizes = [1, 128], strides = [1, 1]} : vector<100x128xf32> to vector<1x128xf32>
    %341 = arith.maximumf %339, %340 : vector<1x128xf32>
    %342 = arith.maximumf %338, %341 : vector<1x128xf32>
    %343 = vector.extract_strided_slice %216 {offsets = [66, 0], sizes = [1, 128], strides = [1, 1]} : vector<100x128xf32> to vector<1x128xf32>
    %344 = vector.extract_strided_slice %216 {offsets = [67, 0], sizes = [1, 128], strides = [1, 1]} : vector<100x128xf32> to vector<1x128xf32>
    %345 = arith.maximumf %343, %344 : vector<1x128xf32>
    %346 = vector.extract_strided_slice %216 {offsets = [76, 0], sizes = [1, 128], strides = [1, 1]} : vector<100x128xf32> to vector<1x128xf32>
    %347 = vector.extract_strided_slice %216 {offsets = [77, 0], sizes = [1, 128], strides = [1, 1]} : vector<100x128xf32> to vector<1x128xf32>
    %348 = arith.maximumf %346, %347 : vector<1x128xf32>
    %349 = arith.maximumf %345, %348 : vector<1x128xf32>
    %350 = vector.extract_strided_slice %216 {offsets = [68, 0], sizes = [1, 128], strides = [1, 1]} : vector<100x128xf32> to vector<1x128xf32>
    %351 = vector.extract_strided_slice %216 {offsets = [69, 0], sizes = [1, 128], strides = [1, 1]} : vector<100x128xf32> to vector<1x128xf32>
    %352 = arith.maximumf %350, %351 : vector<1x128xf32>
    %353 = vector.extract_strided_slice %216 {offsets = [78, 0], sizes = [1, 128], strides = [1, 1]} : vector<100x128xf32> to vector<1x128xf32>
    %354 = vector.extract_strided_slice %216 {offsets = [79, 0], sizes = [1, 128], strides = [1, 1]} : vector<100x128xf32> to vector<1x128xf32>
    %355 = arith.maximumf %353, %354 : vector<1x128xf32>
    %356 = arith.maximumf %352, %355 : vector<1x128xf32>
    %357 = vector.extract_strided_slice %216 {offsets = [80, 0], sizes = [1, 128], strides = [1, 1]} : vector<100x128xf32> to vector<1x128xf32>
    %358 = vector.extract_strided_slice %216 {offsets = [81, 0], sizes = [1, 128], strides = [1, 1]} : vector<100x128xf32> to vector<1x128xf32>
    %359 = arith.maximumf %357, %358 : vector<1x128xf32>
    %360 = vector.extract_strided_slice %216 {offsets = [90, 0], sizes = [1, 128], strides = [1, 1]} : vector<100x128xf32> to vector<1x128xf32>
    %361 = vector.extract_strided_slice %216 {offsets = [91, 0], sizes = [1, 128], strides = [1, 1]} : vector<100x128xf32> to vector<1x128xf32>
    %362 = arith.maximumf %360, %361 : vector<1x128xf32>
    %363 = arith.maximumf %359, %362 : vector<1x128xf32>
    %364 = vector.extract_strided_slice %216 {offsets = [82, 0], sizes = [1, 128], strides = [1, 1]} : vector<100x128xf32> to vector<1x128xf32>
    %365 = vector.extract_strided_slice %216 {offsets = [83, 0], sizes = [1, 128], strides = [1, 1]} : vector<100x128xf32> to vector<1x128xf32>
    %366 = arith.maximumf %364, %365 : vector<1x128xf32>
    %367 = vector.extract_strided_slice %216 {offsets = [92, 0], sizes = [1, 128], strides = [1, 1]} : vector<100x128xf32> to vector<1x128xf32>
    %368 = vector.extract_strided_slice %216 {offsets = [93, 0], sizes = [1, 128], strides = [1, 1]} : vector<100x128xf32> to vector<1x128xf32>
    %369 = arith.maximumf %367, %368 : vector<1x128xf32>
    %370 = arith.maximumf %366, %369 : vector<1x128xf32>
    %371 = vector.extract_strided_slice %216 {offsets = [84, 0], sizes = [1, 128], strides = [1, 1]} : vector<100x128xf32> to vector<1x128xf32>
    %372 = vector.extract_strided_slice %216 {offsets = [85, 0], sizes = [1, 128], strides = [1, 1]} : vector<100x128xf32> to vector<1x128xf32>
    %373 = arith.maximumf %371, %372 : vector<1x128xf32>
    %374 = vector.extract_strided_slice %216 {offsets = [94, 0], sizes = [1, 128], strides = [1, 1]} : vector<100x128xf32> to vector<1x128xf32>
    %375 = vector.extract_strided_slice %216 {offsets = [95, 0], sizes = [1, 128], strides = [1, 1]} : vector<100x128xf32> to vector<1x128xf32>
    %376 = arith.maximumf %374, %375 : vector<1x128xf32>
    %377 = arith.maximumf %373, %376 : vector<1x128xf32>
    %378 = vector.extract_strided_slice %216 {offsets = [86, 0], sizes = [1, 128], strides = [1, 1]} : vector<100x128xf32> to vector<1x128xf32>
    %379 = vector.extract_strided_slice %216 {offsets = [87, 0], sizes = [1, 128], strides = [1, 1]} : vector<100x128xf32> to vector<1x128xf32>
    %380 = arith.maximumf %378, %379 : vector<1x128xf32>
    %381 = vector.extract_strided_slice %216 {offsets = [96, 0], sizes = [1, 128], strides = [1, 1]} : vector<100x128xf32> to vector<1x128xf32>
    %382 = vector.extract_strided_slice %216 {offsets = [97, 0], sizes = [1, 128], strides = [1, 1]} : vector<100x128xf32> to vector<1x128xf32>
    %383 = arith.maximumf %381, %382 : vector<1x128xf32>
    %384 = arith.maximumf %380, %383 : vector<1x128xf32>
    %385 = vector.extract_strided_slice %216 {offsets = [88, 0], sizes = [1, 128], strides = [1, 1]} : vector<100x128xf32> to vector<1x128xf32>
    %386 = vector.extract_strided_slice %216 {offsets = [89, 0], sizes = [1, 128], strides = [1, 1]} : vector<100x128xf32> to vector<1x128xf32>
    %387 = arith.maximumf %385, %386 : vector<1x128xf32>
    %388 = vector.extract_strided_slice %216 {offsets = [98, 0], sizes = [1, 128], strides = [1, 1]} : vector<100x128xf32> to vector<1x128xf32>
    %389 = vector.extract_strided_slice %216 {offsets = [99, 0], sizes = [1, 128], strides = [1, 1]} : vector<100x128xf32> to vector<1x128xf32>
    %390 = arith.maximumf %388, %389 : vector<1x128xf32>
    %391 = arith.maximumf %387, %390 : vector<1x128xf32>
    %392 = tpu.concatenate %223, %230, %237, %244, %251, %258, %265, %272, %279, %286, %293, %300, %307, %314, %321, %328 in 1 : vector<1x128xf32>, vector<1x128xf32>, vector<1x128xf32>, vector<1x128xf32>, vector<1x128xf32>, vector<1x128xf32>, vector<1x128xf32>, vector<1x128xf32>, vector<1x128xf32>, vector<1x128xf32>, vector<1x128xf32>, vector<1x128xf32>, vector<1x128xf32>, vector<1x128xf32>, vector<1x128xf32>, vector<1x128xf32> -> vector<1x2048xf32>
    %393 = tpu.concatenate %335, %342, %349, %356, %363, %370, %377, %384, %391 in 1 : vector<1x128xf32>, vector<1x128xf32>, vector<1x128xf32>, vector<1x128xf32>, vector<1x128xf32>, vector<1x128xf32>, vector<1x128xf32>, vector<1x128xf32>, vector<1x128xf32> -> vector<1x1152xf32>
    %394 = tpu.concatenate %392, %393 in 1 : vector<1x2048xf32>, vector<1x1152xf32> -> vector<1x3200xf32>
    %c0_78 = arith.constant 0 : index
    %c0_79 = arith.constant 0 : index
    %395 = vector.load %arg6[%c0_78, %c0_79] : memref<3200x128xf32, #tpu.memory_space<vmem>>, vector<3200x128xf32>
    %cst_80 = arith.constant dense<0.000000e+00> : vector<1x128xf32>
    %396 = tpu.matmul %394, %395, %cst_80 {dimension_numbers = #tpu.dot_dimension_numbers<[1], [0], [0], [1], [0, 0, 1, 1], [], []>} : vector<1x3200xf32>, vector<3200x128xf32>, vector<1x128xf32> -> vector<1x128xf32>
    %c0_81 = arith.constant 0 : index
    %c0_82 = arith.constant 0 : index
    %397 = vector.load %arg7[%c0_81, %c0_82] : memref<1x128xf32, #tpu.memory_space<vmem>>, vector<1x128xf32>
    %398 = arith.addf %396, %397 : vector<1x128xf32>
    %cst_83 = arith.constant 0.000000e+00 : f32
    %399 = vector.broadcast %cst_83 : f32 to vector<1x128xf32>
    %400 = arith.maximumf %398, %399 : vector<1x128xf32>
    %c0_84 = arith.constant 0 : index
    %c0_85 = arith.constant 0 : index
    %401 = vector.load %arg8[%c0_84, %c0_85] : memref<128x128xf32, #tpu.memory_space<vmem>>, vector<128x128xf32>
    %cst_86 = arith.constant dense<0.000000e+00> : vector<1x128xf32>
    %402 = tpu.matmul %400, %401, %cst_86 {dimension_numbers = #tpu.dot_dimension_numbers<[1], [0], [0], [1], [0, 0, 1, 1], [], []>} : vector<1x128xf32>, vector<128x128xf32>, vector<1x128xf32> -> vector<1x128xf32>
    %c0_87 = arith.constant 0 : index
    %c0_88 = arith.constant 0 : index
    %403 = vector.load %arg9[%c0_87, %c0_88] : memref<1x128xf32, #tpu.memory_space<vmem>>, vector<1x128xf32>
    %404 = arith.addf %402, %403 : vector<1x128xf32>
    %cst_89 = arith.constant 0.000000e+00 : f32
    %405 = vector.broadcast %cst_89 : f32 to vector<1x128xf32>
    %406 = arith.maximumf %404, %405 : vector<1x128xf32>
    %c0_90 = arith.constant 0 : index
    %c0_91 = arith.constant 0 : index
    %407 = vector.load %arg10[%c0_90, %c0_91] : memref<128x128xf32, #tpu.memory_space<vmem>>, vector<128x128xf32>
    %cst_92 = arith.constant dense<0.000000e+00> : vector<1x128xf32>
    %408 = tpu.matmul %406, %407, %cst_92 {dimension_numbers = #tpu.dot_dimension_numbers<[1], [0], [0], [1], [0, 0, 1, 1], [], []>} : vector<1x128xf32>, vector<128x128xf32>, vector<1x128xf32> -> vector<1x128xf32>
    %c0_93 = arith.constant 0 : index
    %c0_94 = arith.constant 0 : index
    %409 = vector.load %arg11[%c0_93, %c0_94] : memref<1x128xf32, #tpu.memory_space<vmem>>, vector<1x128xf32>
    %410 = arith.addf %408, %409 : vector<1x128xf32>
    %c0_95 = arith.constant 0 : index
    %c0_96 = arith.constant 0 : index
    %c0_97 = arith.constant 0 : index
    %411 = vector.load %arg12[%c0_95, %c0_96, %c0_97] : memref<1x1x128xf32, #tpu.memory_space<vmem>>, vector<1x1x128xf32>
    %412 = vector.shape_cast %411 : vector<1x1x128xf32> to vector<1x128xf32>
    %413 = vector.shape_cast %410 : vector<1x128xf32> to vector<1x1x128xf32>
    tpu.vector_store %arg12[%c0_95, %c0_96, %c0_97], %413 {strides = array<i32>} : memref<1x1x128xf32, #tpu.memory_space<vmem>>, vector<1x1x128xf32>,
    return
  }
  func.func @transform_0(%arg0: i32) -> (i32, i32, i32, i32) {
    %c0_i32 = arith.constant 0 : i32
    %c0_i32_0 = arith.constant 0 : i32
    %c0_i32_1 = arith.constant 0 : i32
    %c0_i32_2 = arith.constant 0 : i32
    return %arg0, %c0_i32, %c0_i32_0, %c0_i32_1 : i32, i32, i32, i32
  }
  func.func @transform_1(%arg0: i32) -> (i32, i32, i32) {
    %c0_i32 = arith.constant 0 : i32
    %c0_i32_0 = arith.constant 0 : i32
    %c0_i32_1 = arith.constant 0 : i32
    %c0_i32_2 = arith.constant 0 : i32
    return %c0_i32, %c0_i32_0, %c0_i32_1 : i32, i32, i32
  }
  func.func @transform_2(%arg0: i32) -> (i32, i32) {
    %c0_i32 = arith.constant 0 : i32
    %c0_i32_0 = arith.constant 0 : i32
    %c0_i32_1 = arith.constant 0 : i32
    return %c0_i32, %c0_i32_0 : i32, i32
  }
  func.func @transform_3(%arg0: i32) -> (i32, i32, i32) {
    %c0_i32 = arith.constant 0 : i32
    %c0_i32_0 = arith.constant 0 : i32
    %c0_i32_1 = arith.constant 0 : i32
    %c0_i32_2 = arith.constant 0 : i32
    return %c0_i32, %c0_i32_0, %c0_i32_1 : i32, i32, i32
  }
  func.func @transform_4(%arg0: i32) -> (i32, i32) {
    %c0_i32 = arith.constant 0 : i32
    %c0_i32_0 = arith.constant 0 : i32
    %c0_i32_1 = arith.constant 0 : i32
    return %c0_i32, %c0_i32_0 : i32, i32
  }
  func.func @transform_5(%arg0: i32) -> (i32, i32) {
    %c0_i32 = arith.constant 0 : i32
    %c0_i32_0 = arith.constant 0 : i32
    %c0_i32_1 = arith.constant 0 : i32
    return %c0_i32, %c0_i32_0 : i32, i32
  }
  func.func @transform_6(%arg0: i32) -> (i32, i32) {
    %c0_i32 = arith.constant 0 : i32
    %c0_i32_0 = arith.constant 0 : i32
    %c0_i32_1 = arith.constant 0 : i32
    return %c0_i32, %c0_i32_0 : i32, i32
  }
  func.func @transform_7(%arg0: i32) -> (i32, i32) {
    %c0_i32 = arith.constant 0 : i32
    %c0_i32_0 = arith.constant 0 : i32
    %c0_i32_1 = arith.constant 0 : i32
    return %c0_i32, %c0_i32_0 : i32, i32
  }
  func.func @transform_8(%arg0: i32) -> (i32, i32) {
    %c0_i32 = arith.constant 0 : i32
    %c0_i32_0 = arith.constant 0 : i32
    %c0_i32_1 = arith.constant 0 : i32
    return %c0_i32, %c0_i32_0 : i32, i32
  }
  func.func @transform_9(%arg0: i32) -> (i32, i32) {
    %c0_i32 = arith.constant 0 : i32
    %c0_i32_0 = arith.constant 0 : i32
    %c0_i32_1 = arith.constant 0 : i32
    return %c0_i32, %c0_i32_0 : i32, i32
  }
  func.func @transform_10(%arg0: i32) -> (i32, i32) {
    %c0_i32 = arith.constant 0 : i32
    %c0_i32_0 = arith.constant 0 : i32
    %c0_i32_1 = arith.constant 0 : i32
    return %c0_i32, %c0_i32_0 : i32, i32
  }
  func.func @transform_11(%arg0: i32) -> (i32, i32, i32) {
    %c0_i32 = arith.constant 0 : i32
    %c0_i32_0 = arith.constant 0 : i32
    %c0_i32_1 = arith.constant 0 : i32
    return %arg0, %c0_i32, %c0_i32_0 : i32, i32, i32
  }
}

</mosaic_0001>

<bundles_post_ra>
// kernel: cnn_net_forward.1
= control target key start
LH: loop header
LB: loop body
LE: loop exit
PB: predicated region body
PF: predicated region fallthrough
CT: control target
= control target key end

     0   :  { %s17223_s0 = inlined_call_operand.vmem [shape: f32[2,2,448,15], index: 0, kind: input, shape index: {}]   ;;  %s17224_s1 = inlined_call_operand.vmem [shape: f32[5,15,128], index: 1, kind: input, shape index: {}]   ;;  %s17225_s2 = inlined_call_operand.vmem [shape: f32[1,128], index: 2, kind: input, shape index: {}]   ;;  %s17226_s3 = inlined_call_operand.vmem [shape: f32[5,640,128], index: 3, kind: input, shape index: {}]   ;;  %s17227_s4 = inlined_call_operand.vmem [shape: f32[1,128], index: 4, kind: input, shape index: {}]   ;;  %s17228_s5 = inlined_call_operand.vmem [shape: f32[3200,128], index: 5, kind: input, shape index: {}]   ;;  %s17229_s6 = inlined_call_operand.vmem [shape: f32[1,128], index: 6, kind: input, shape index: {}]   ;;  %s17230_s7 = inlined_call_operand.vmem [shape: f32[128,128], index: 7, kind: input, shape index: {}]   ;;  %s17231_s8 = inlined_call_operand.vmem [shape: f32[1,128], index: 8, kind: input, shape index: {}]   ;;  %s17232_s9 = inlined_call_operand.vmem [shape: f32[128,128], index: 9, kind: input, shape index: {}]   ;;  %s17233_s10 = inlined_call_operand.vmem [shape: f32[1,128], index: 10, kind: input, shape index: {}]   ;;  %s17234_s11 = inlined_call_operand.hbm [shape: f32[2,1,128], index: 11, kind: output, shape index: {}]  }
   0x1   :  { %17242 = sst [smem:[#allocation126_spill]] %s17223_s0 }
   0x2   :  { %17243 = sst [smem:[#allocation127_spill]] %s17224_s1 }
   0x3   :  { %16 = vsyncpa [#allocation4], 0 }
   0x4   :  { %18 = vsyncpa [#allocation4 + $0x1], 0  ;;  %s10352_s17 = smov 0   ;;  %s10354_s18 = smov 0  }
   0x5   :  { %s10356_s19 = smov 0   ;;  %s10358_s20 = smov 0  }
   0x6 LB: > { %s10373_s21 = sadd.s32 4294967295, %s10290_s20   ;;  %s9050_s22 = sadd.s32 4294967294, %s10290_s20   ;;  %s10290_s20 = sphi %s10358_s20, %s17667_s20   ;;  %s10286_s19 = sphi %s10356_s19, %s17666_s19   ;;  %s10282_s18 = sphi %s10354_s18, %s17665_s18   ;;  %s10278_s17 = sphi %s10352_s17, %s17664_s17  }
   0x7   : > { %s10377_s23 = sadd.s32 1, %s10290_s20   ;;  %s267_s24 = sadd.s32 1, %s10286_s19 }
   0x8   : > { %s264_s25 = ssub.s32 %s10290_s20, %s10377_s23  ;;  %p277_p0 = scmp.ne.s32.totalorder %s10286_s19, %s10282_s18 }
   0x9   : > { %p265_p1 = scmp.eq.s32.totalorder %s264_s25, 0  ;;  %p278_p2 = scmp.eq.s32.totalorder %s10373_s21, 1 }
   0xa   : > { %p283_p3 = scmp.ne.s32.totalorder %s10282_s18, %s10278_s17  ;;  %p284_p4 = scmp.eq.s32.totalorder %s9050_s22, 1 }
   0xb   : > { %s10388_s26 = scalar_select %p265_p1, %s10286_s19, %s267_s24  }
   0xc   : > { %p10390_p5 = por %p278_p2, %p277_p0  ;;  %p10394_p6 = por %p284_p4, %p283_p3 }
   0xd   : > { %p9053_p7 = scmp.ge.s32.totalorder %s10290_s20, 1  ;;  %p340_p8 = scmp.lt.s32.totalorder %s10290_s20, 3 }
   0xf   : > { %p341_p9 = pnand %p9053_p7, %p340_p8 }
  0x11   : > { %344 = sbr.rel (%p341_p9) target bundleno = 2652 (0xa5c), region = 64 }
  0x16   : > { %s17246_s1 = sld [smem:[#allocation127_spill]]  ;;  %vm751_vm0 = vcmask 1046528   ;;  %p379_p10 = scmp.lt.s32.totalorder %s10373_s21, 1  ;;  %vm652_vm1 = vcmask 121856   ;;  %vm552_vm2 = vcmask 1041408   ;;  %vm1864_vm3 = vcmask 1043456  }
  0x17   : > { %s17247_s0 = sld [smem:[#allocation126_spill]]  ;;  %vm2695_vm4 = vcmask 1045504   ;;  %vm4307_vm5 = vcmask 1044480   ;;  %s377_s16 = sand.u32 1, %s10282_s18  }
  0x18   : > { %s380_s24 = scalar_select %p379_p10, %s10373_s21, 1 }
  0x19   : > { %s8983_s14 = scalar_lea.sflag [#allocation4], %s377_s16 }
  0x1a   : > { %s9950_s25 = smul.u32 896, %s380_s24  ;;  %s10248_s24 = scalar_lea.hbm %s17234_s11, 2 }
  0x1c   : > { %v498_v0 = vld [vmem:[%s17246_s1 + $0x8] sm:$0x7f]  ;;  %v497_v1 = vld [vmem:[%s17246_s1] sm:$0xff]  ;;  %v9112_v2 = vld [vmem:[%s17246_s1 + $0x18] sm:$0x7f] }
  0x1d   : > { %9263 = vmatpush.msk.msra.mxu3 %vm751_vm0, %v498_v0  ;;  %9113 = vmatpush.msk.msra.mxu0 %vm751_vm0, %v9112_v2  ;;  %v9111_v3 = vld [vmem:[%s17246_s1 + $0x10] sm:$0xff]  ;;  %s10422_s12 = scalar_lea.vmem %s17247_s0, %s9950_s25  ;;  %v9314_v42 = vld [vmem:[%s17246_s1 + $0x28] sm:$0x7f]  ;;  %s8991_s25 = scalar_lea.hbm %s17234_s11, %s10373_s21 }
  0x1e   : > { %9948 = vmatpush.msk.msra.mxu2 %vm751_vm0, %v9112_v2  ;;  %9163 = vmatpush.msk.msra.mxu1 %vm751_vm0, %v9112_v2  ;;  %v9055_v4 = vld [vmem:[%s10422_s12 + $0x1c0] sm:$0xff]  ;;  %v385_v5 = vld [vmem:[%s10422_s12 + $0x8] sm:$0xff]  ;;  %v386_v6 = vld [vmem:[%s10422_s12 + $0x10] sm:$0xff]  ;;  %s8995_s0 = sshll.u32 %s8991_s25, 4  ;;  %s8996_s0 = int_to_ptr.hbm [resolvable:$true] %s8995_s0 }
  0x1f   : > { %1710 = vmatpush.msra.mxu3 %v497_v1  ;;  %770 = vmatpush.msra.mxu0 %v9111_v3  ;;  %v553_v7 = vrot.slane %v385_v5, 6  ;;  %v554_v8 = vrot.slane %v386_v6, 6  ;;  %v10429_v9 = vld [vmem:[%s10422_s12 + $0x188] sm:$0xff]  ;;  %v434_v10 = vld [vmem:[%s10422_s12 + $0x190] sm:$0xff]  ;;  %v387_v16 = vld [vmem:[%s10422_s12 + $0x18] sm:$0xff]  ;;  %s10242_s15 = sshra.s32 %s8996_s0, 4  ;;  %s10243_s15 = int_to_ptr.hbm [resolvable:$true] %s10242_s15 }
  0x20   : > { %9949 = vmatpush.msra.mxu2 %v9111_v3  ;;  %1181 = vmatpush.msra.mxu1 %v9111_v3  ;;  %v9056_v11 = vld [vmem:[%s10422_s12 + $0x1c8] sm:$0xff]  ;;  %v17235_v12 = vrot.slane %v10429_v9, 6  ;;  %v650_v13 = vrot.slane %v434_v10, 6  ;;  %v9057_v14 = vld [vmem:[%s10422_s12 + $0x1d0] sm:$0xff]  ;;  %v9058_v20 = vld [vmem:[%s10422_s12 + $0x1d8] sm:$0xff]  ;;  %v556_v22 = vrot.slane %v387_v16, 6  ;;  %p10249_p0 = scmp.lt.s32.totalorder %s10243_s15, %s17234_s11 }
  0x21   : > { %9264 = vmatmul.msk.f32.vlgmr.msra.gmra.mxu3 %vm652_vm1, %v9055_v4  ;;  %v969_v15 = vrot.slane %v9056_v11, 6  ;;  %v555_v17 = vsel %vm552_vm2, %v553_v7, %v554_v8  ;;  %v970_v18 = vrot.slane %v9057_v14, 6  ;;  %v972_v23 = vrot.slane %v9058_v20, 6  ;;  %v384_v25 = vld [vmem:[%s10422_s12] sm:$0xff]  ;;  %v389_v32 = vld [vmem:[%s10422_s12 + $0x28] sm:$0xff]  ;;  %v390_v38 = vld [vmem:[%s10422_s12 + $0x30] sm:$0xff]  ;;  %9315 = vmatpush.msk.msrb.mxu0 %vm751_vm0, %v9314_v42 }
  0x22   : > { %9213 = vmatpush.msk.msrb.mxu2 %vm751_vm0, %v498_v0  ;;  %9114 = vmatmul.msk.f32.vlgmr.msra.gmra.mxu0 %vm652_vm1, %v555_v17  ;;  %v651_v19 = vsel %vm552_vm2, %v17235_v12, %v650_v13  ;;  %v557_v24 = vsel %vm552_vm2, %v554_v8, %v556_v22  ;;  %v388_v26 = vld [vmem:[%s10422_s12 + $0x20] sm:$0xff]  ;;  %v9060_v34 = vld [vmem:[%s10422_s12 + $0x1e8] sm:$0xff]  ;;  %v560_v35 = vrot.slane %v389_v32, 6  ;;  %v9061_v40 = vld [vmem:[%s10422_s12 + $0x1f0] sm:$0xff]  ;;  %v562_v41 = vrot.slane %v390_v38, 6 }
  0x23   : > { %9162 = vmatmul.msk.f32.vlgmr.msra.gmra.mxu2 %vm652_vm1, %v651_v19  ;;  %v971_v21 = vsel %vm552_vm2, %v969_v15, %v970_v18  ;;  %v973_v27 = vsel %vm552_vm2, %v970_v18, %v972_v23  ;;  %v9059_v28 = vld [vmem:[%s10422_s12 + $0x1e0] sm:$0xff]  ;;  %v558_v29 = vrot.slane %v388_v26, 6  ;;  %v976_v36 = vrot.slane %v9060_v34, 6  ;;  %9365 = vmatpush.msk.msrb.mxu1 %vm751_vm0, %v9314_v42  ;;  %v391_v45 = vld [vmem:[%s10422_s12 + $0x38] sm:$0xff]  ;;  %v393_v57 = vld [vmem:[%s10422_s12 + $0x48] sm:$0xff] }
  0x24   : > { %1447 = vmatpush.msrb.mxu2 %v497_v1  ;;  %9164 = vmatmul.msk.f32.vlgmr.msra.gmra.mxu1 %vm652_vm1, %v971_v21  ;;  %v974_v30 = vrot.slane %v9059_v28, 6  ;;  %v978_v43 = vrot.slane %v9061_v40, 6  ;;  %v563_v44 = vsel %vm552_vm2, %v560_v35, %v562_v41  ;;  %v9062_v47 = vld [vmem:[%s10422_s12 + $0x1f8] sm:$0xff]  ;;  %v564_v48 = vrot.slane %v391_v45, 6  ;;  %v392_v51 = vld [vmem:[%s10422_s12 + $0x40] sm:$0xff]  ;;  %v9064_v59 = vld [vmem:[%s10422_s12 + $0x208] sm:$0xff] }
  0x25   : > { %v559_v31 = vsel %vm552_vm2, %v556_v22, %v558_v29  ;;  %v561_v37 = vsel %vm552_vm2, %v558_v29, %v560_v35  ;;  %v980_v49 = vrot.slane %v9062_v47, 6  ;;  %v9063_v53 = vld [vmem:[%s10422_s12 + $0x200] sm:$0xff]  ;;  %v566_v54 = vrot.slane %v392_v51, 6  ;;  %v394_v63 = vld [vmem:[%s10422_s12 + $0x50] sm:$0xff]  ;;  %v9066_v7 = vld [vmem:[%s10422_s12 + $0x218] sm:$0xff] }
  0x26   : > { %v975_v33 = vsel %vm552_vm2, %v972_v23, %v974_v30  ;;  %v977_v39 = vsel %vm552_vm2, %v974_v30, %v976_v36  ;;  %v979_v46 = vsel %vm552_vm2, %v976_v36, %v978_v43  ;;  %v565_v50 = vsel %vm552_vm2, %v562_v41, %v564_v48  ;;  %v9065_v1 = vld [vmem:[%s10422_s12 + $0x210] sm:$0xff]  ;;  %v396_v13 = vld [vmem:[%s10422_s12 + $0x60] sm:$0xff]  ;;  %v397_v19 = vld [vmem:[%s10422_s12 + $0x68] sm:$0xff] }
  0x27   : > { %v981_v52 = vsel %vm552_vm2, %v978_v43, %v980_v49  ;;  %v982_v55 = vrot.slane %v9063_v53, 6  ;;  %v567_v56 = vsel %vm552_vm2, %v564_v48, %v566_v54  ;;  %v568_v60 = vrot.slane %v393_v57, 6  ;;  %v9067_v15 = vld [vmem:[%s10422_s12 + $0x220] sm:$0xff]  ;;  %v9068_v21 = vld [vmem:[%s10422_s12 + $0x228] sm:$0xff] }
  0x28   : > { %v984_v61 = vrot.slane %v9064_v59, 6  ;;  %v570_v2 = vrot.slane %v394_v63, 6  ;;  %v986_v3 = vrot.slane %v9065_v1, 6  ;;  %v988_v10 = vrot.slane %v9066_v7, 6  ;;  %v401_v43 = vld [vmem:[%s10422_s12 + $0x88] sm:$0xff] }
  0x29   : > { %9265 = vmatmul.msk.f32.gmra.mxu3 %vm652_vm1, %v9056_v11  ;;  %v983_v58 = vsel %vm552_vm2, %v980_v49, %v982_v55  ;;  %v569_v62 = vsel %vm552_vm2, %v566_v54, %v568_v60  ;;  %v990_v17 = vrot.slane %v9067_v15, 6  ;;  %v576_v22 = vrot.slane %v397_v19, 6  ;;  %v402_v49 = vld [vmem:[%s10422_s12 + $0x90] sm:$0xff] }
  0x2a   : > { %9115 = vmatmul.msk.f32.gmra.mxu0 %vm652_vm1, %v557_v24  ;;  %v985_v0 = vsel %vm552_vm2, %v982_v55, %v984_v61  ;;  %v571_v4 = vsel %vm552_vm2, %v568_v60, %v570_v2  ;;  %v992_v23 = vrot.slane %v9068_v21, 6  ;;  %v9074_v60 = vld [vmem:[%s10422_s12 + $0x258] sm:$0xff] }
  0x2b   : > { %9214 = vmatmul.msk.f32.vlgmr.msrb.gmra.mxu2 %vm652_vm1, %v384_v25  ;;  %v398_v25 = vld [vmem:[%s10422_s12 + $0x70] sm:$0xff] }
  0x2c   : > { %9165 = vmatmul.msk.f32.gmra.mxu1 %vm652_vm1, %v973_v27  ;;  %v9069_v27 = vld [vmem:[%s10422_s12 + $0x230] sm:$0xff] }
  0x2d   : > { %v994_v29 = vrot.slane %v9069_v27, 6 }
  0x31   : > { %9266 = vmatmul.msk.f32.gmra.mxu3 %vm652_vm1, %v9057_v14  ;;  %v989_v14 = vsel %vm552_vm2, %v986_v3, %v988_v10 }
  0x32   : > { %9116 = vmatmul.msk.f32.gmra.mxu0 %vm652_vm1, %v559_v31  ;;  %v399_v31 = vld [vmem:[%s10422_s12 + $0x78] sm:$0xff] }
  0x33   : > { %9215 = vmatmul.msk.f32.gmra.mxu2 %vm652_vm1, %v385_v5  ;;  %v395_v5 = vld [vmem:[%s10422_s12 + $0x58] sm:$0xff] }
  0x34   : > { %9166 = vmatmul.msk.f32.gmra.mxu1 %vm652_vm1, %v975_v33  ;;  %v572_v8 = vrot.slane %v395_v5, 6  ;;  %v9070_v33 = vld [vmem:[%s10422_s12 + $0x238] sm:$0xff] }
  0x35   : > { %v996_v35 = vrot.slane %v9070_v33, 6 }
  0x36   : > { %v573_v11 = vsel %vm552_vm2, %v570_v2, %v572_v8  ;;  %v10591_v2 = vld [vmem:[%s10422_s12 + $0xa0] sm:$0xff] }
  0x39   : > { %9267 = vmatmul.msk.f32.gmra.mxu3 %vm652_vm1, %v9058_v20  ;;  %v991_v20 = vsel %vm552_vm2, %v988_v10, %v990_v17 }
  0x3a   : > { %9117 = vmatmul.msk.f32.gmra.mxu0 %vm652_vm1, %v561_v37  ;;  %v400_v37 = vld [vmem:[%s10422_s12 + $0x80] sm:$0xff] }
  0x3b   : > { %9216 = vmatmul.msk.f32.gmra.mxu2 %vm652_vm1, %v386_v6  ;;  %v987_v6 = vsel %vm552_vm2, %v984_v61, %v986_v3 }
  0x3c   : > { %9167 = vmatmul.msk.f32.gmra.mxu1 %vm652_vm1, %v977_v39  ;;  %v9071_v39 = vld [vmem:[%s10422_s12 + $0x240] sm:$0xff] }
  0x3d   : > { %v998_v41 = vrot.slane %v9071_v39, 6 }
  0x41   : > { %9268 = vmatmul.msk.f32.gmra.mxu3 %vm652_vm1, %v9059_v28  ;;  %v578_v28 = vrot.slane %v398_v25, 6 }
  0x42   : > { %9118 = vmatmul.msk.f32.gmra.mxu0 %vm652_vm1, %v563_v44  ;;  %v999_v44 = vsel %vm552_vm2, %v996_v35, %v998_v41 }
  0x43   : > { %9217 = vmatmul.msk.f32.gmra.mxu2 %vm652_vm1, %v387_v16  ;;  %v574_v16 = vrot.slane %v396_v13, 6  ;;  %v579_v30 = vsel %vm552_vm2, %v576_v22, %v578_v28 }
  0x44   : > { %9168 = vmatmul.msk.f32.gmra.mxu1 %vm652_vm1, %v979_v46  ;;  %v584_v46 = vrot.slane %v401_v43, 6 }
  0x45   : > { %v575_v18 = vsel %vm552_vm2, %v572_v8, %v574_v16  ;;  %v577_v24 = vsel %vm552_vm2, %v574_v16, %v576_v22 }
  0x49   : > { %9269 = vmatmul.msk.f32.gmra.mxu3 %vm652_vm1, %v9060_v34  ;;  %v580_v34 = vrot.slane %v399_v31, 6 }
  0x4a   : > { %9119 = vmatmul.msk.f32.gmra.mxu0 %vm652_vm1, %v565_v50 }
  0x4b   : > { %9218 = vmatmul.msk.f32.gmra.mxu2 %vm652_vm1, %v388_v26  ;;  %v993_v26 = vsel %vm552_vm2, %v990_v17, %v992_v23  ;;  %v581_v36 = vsel %vm552_vm2, %v578_v28, %v580_v34 }
  0x4c   : > { %9169 = vmatmul.msk.f32.gmra.mxu1 %vm652_vm1, %v981_v52  ;;  %v586_v52 = vrot.slane %v402_v49, 6 }
  0x4e   : > { %v587_v55 = vsel %vm552_vm2, %v584_v46, %v586_v52 }
  0x51   : > { %9270 = vmatmul.msk.f32.gmra.mxu3 %vm652_vm1, %v9061_v40  ;;  %v582_v40 = vrot.slane %v400_v37, 6 }
  0x52   : > { %9120 = vmatmul.msk.f32.gmra.mxu0 %vm652_vm1, %v567_v56  ;;  %v10574_v56 = vld [vmem:[%s10422_s12 + $0x98] sm:$0xff] }
  0x53   : > { %9219 = vmatmul.msk.f32.gmra.mxu2 %vm652_vm1, %v389_v32  ;;  %v995_v32 = vsel %vm552_vm2, %v992_v23, %v994_v29  ;;  %v583_v42 = vsel %vm552_vm2, %v580_v34, %v582_v40  ;;  %v585_v48 = vsel %vm552_vm2, %v582_v40, %v584_v46  ;;  %v588_v61 = vrot.slane %v10574_v56, 6 }
  0x54   : > { %9170 = vmatmul.msk.f32.gmra.mxu1 %vm652_vm1, %v983_v58 }
  0x59   : > { %9271 = vmatmul.msk.f32.gmra.mxu3 %vm652_vm1, %v9062_v47 }
  0x5a   : > { %9121 = vmatmul.msk.f32.gmra.mxu0 %vm652_vm1, %v569_v62  ;;  %v1004_v62 = vrot.slane %v9074_v60, 6 }
  0x5b   : > { %9220 = vmatmul.msk.f32.gmra.mxu2 %vm652_vm1, %v390_v38  ;;  %v997_v38 = vsel %vm552_vm2, %v994_v29, %v996_v35 }
  0x5c   : > { %9171 = vmatmul.msk.f32.gmra.mxu1 %vm652_vm1, %v985_v0 }
  0x61   : > { %9272 = vmatmul.msk.f32.gmra.mxu3 %vm652_vm1, %v9063_v53 }
  0x62   : > { %9122 = vmatmul.msk.f32.gmra.mxu0 %vm652_vm1, %v571_v4 }
  0x63   : > { %9221 = vmatmul.msk.f32.gmra.mxu2 %vm652_vm1, %v391_v45  ;;  %v9072_v45 = vld [vmem:[%s10422_s12 + $0x248] sm:$0xff] }
  0x64   : > { %9172 = vmatmul.msk.f32.gmra.mxu1 %vm652_vm1, %v987_v6  ;;  %v1000_v47 = vrot.slane %v9072_v45, 6  ;;  %v9075_v6 = vld [vmem:[%s10422_s12 + $0x260] sm:$0xff] }
  0x65   : > { %v1006_v8 = vrot.slane %v9075_v6, 6 }
  0x66   : > { %v1001_v50 = vsel %vm552_vm2, %v998_v41, %v1000_v47  ;;  %v9078_v41 = vld [vmem:[%s10422_s12 + $0x278] sm:$0xff] }
  0x67   : > { %v1007_v17 = vsel %vm552_vm2, %v1004_v62, %v1006_v8 }
  0x69   : > { %9273 = vmatmul.msk.f32.gmra.mxu3 %vm652_vm1, %v9064_v59 }
  0x6a   : > { %9123 = vmatmul.msk.f32.gmra.mxu0 %vm652_vm1, %v573_v11 }
  0x6b   : > { %9222 = vmatmul.msk.f32.gmra.mxu2 %vm652_vm1, %v392_v51  ;;  %v9073_v51 = vld [vmem:[%s10422_s12 + $0x250] sm:$0xff] }
  0x6c   : > { %9173 = vmatmul.msk.f32.gmra.mxu1 %vm652_vm1, %v989_v14  ;;  %v1002_v53 = vrot.slane %v9073_v51, 6 }
  0x6e   : > { %v1003_v58 = vsel %vm552_vm2, %v1000_v47, %v1002_v53  ;;  %v1005_v4 = vsel %vm552_vm2, %v1002_v53, %v1004_v62 }
  0x71   : > { %9274 = vmatmul.msk.f32.gmra.mxu3 %vm652_vm1, %v9065_v1  ;;  %v589_v1 = vsel %vm552_vm2, %v586_v52, %v588_v61  ;;  %v9079_v52 = vld [vmem:[%s10422_s12 + $0x280] sm:$0xff] }
  0x72   : > { %9124 = vmatmul.msk.f32.gmra.mxu0 %vm652_vm1, %v575_v18 }
  0x73   : > { %9223 = vmatmul.msk.f32.gmra.mxu2 %vm652_vm1, %v393_v57 }
  0x74   : > { %9174 = vmatmul.msk.f32.gmra.mxu1 %vm652_vm1, %v991_v20 }
  0x79   : > { %9275 = vmatmul.msk.f32.gmra.mxu3 %vm652_vm1, %v9066_v7  ;;  %v590_v7 = vrot.slane %v10591_v2, 6 }
  0x7a   : > { %9125 = vmatmul.msk.f32.gmra.mxu0 %vm652_vm1, %v577_v24 }
  0x7b   : > { %9224 = vmatmul.msk.f32.gmra.mxu2 %vm652_vm1, %v394_v63  ;;  %v591_v14 = vsel %vm552_vm2, %v588_v61, %v590_v7  ;;  %v10678_v61 = vld [vmem:[%s10422_s12 + $0xc8] sm:$0xff] }
  0x7c   : > { %9175 = vmatmul.msk.f32.gmra.mxu1 %vm652_vm1, %v993_v26  ;;  %v10625_v26 = vld [vmem:[%s10422_s12 + $0xb0] sm:$0xff] }
  0x81   : > { %9276 = vmatmul.msk.f32.gmra.mxu3 %vm652_vm1, %v9067_v15  ;;  %v10608_v15 = vld [vmem:[%s10422_s12 + $0xa8] sm:$0xff] }
  0x82   : > { %9126 = vmatmul.msk.f32.gmra.mxu0 %vm652_vm1, %v579_v30  ;;  %v592_v20 = vrot.slane %v10608_v15, 6  ;;  %v9077_v30 = vld [vmem:[%s10422_s12 + $0x270] sm:$0xff] }
  0x83   : > { %9225 = vmatmul.msk.f32.gmra.mxu2 %vm652_vm1, %v395_v5 }
  0x84   : > { %9176 = vmatmul.msk.f32.gmra.mxu1 %vm652_vm1, %v995_v32  ;;  %v1010_v32 = vrot.slane %v9077_v30, 6 }
  0x89   : > { %9277 = vmatmul.msk.f32.gmra.mxu3 %vm652_vm1, %v9068_v21 }
  0x8a   : > { %9127 = vmatmul.msk.f32.gmra.mxu0 %vm652_vm1, %v581_v36 }
  0x8b   : > { %9226 = vmatmul.msk.f32.gmra.mxu2 %vm652_vm1, %v396_v13 }
  0x8c   : > { %9177 = vmatmul.msk.f32.gmra.mxu1 %vm652_vm1, %v997_v38 }
  0x91   : > { %9278 = vmatmul.msk.f32.gmra.mxu3 %vm652_vm1, %v9069_v27 }
  0x92   : > { %9128 = vmatmul.msk.f32.gmra.mxu0 %vm652_vm1, %v583_v42 }
  0x93   : > { %9227 = vmatmul.msk.f32.gmra.mxu2 %vm652_vm1, %v397_v19  ;;  %v9076_v19 = vld [vmem:[%s10422_s12 + $0x268] sm:$0xff] }
  0x94   : > { %9178 = vmatmul.msk.f32.gmra.mxu1 %vm652_vm1, %v999_v44  ;;  %v1008_v21 = vrot.slane %v9076_v19, 6 }
  0x96   : > { %v1009_v28 = vsel %vm552_vm2, %v1006_v8, %v1008_v21 }
  0x99   : > { %9279 = vmatmul.msk.f32.gmra.mxu3 %vm652_vm1, %v9070_v33 }
  0x9a   : > { %9129 = vmatmul.msk.f32.gmra.mxu0 %vm652_vm1, %v585_v48  ;;  %v10660_v48 = vld [vmem:[%s10422_s12 + $0xc0] sm:$0xff] }
  0x9b   : > { %9228 = vmatmul.msk.f32.gmra.mxu2 %vm652_vm1, %v398_v25  ;;  %v593_v25 = vsel %vm552_vm2, %v590_v7, %v592_v20  ;;  %v598_v53 = vrot.slane %v10660_v48, 6 }
  0x9c   : > { %9179 = vmatmul.msk.f32.gmra.mxu1 %vm652_vm1, %v1001_v50 }
  0x9f   : > { %v772_v54 = vpop.f32.mrf.mxu0 }
  0xa1   : > { %9280 = vmatmul.msk.f32.gmra.mxu3 %vm652_vm1, %v9071_v39  ;;  %v10576_v57 = vpop.f32.mrf.mxu1  ;;  %v1011_v39 = vsel %vm552_vm2, %v1008_v21, %v1010_v32 }
  0xa2   : > { %9130 = vmatmul.msk.f32.gmra.mxu0 %vm652_vm1, %v587_v55 }
  0xa3   : > { %9229 = vmatmul.msk.f32.gmra.mxu2 %vm652_vm1, %v399_v31  ;;  %v594_v31 = vrot.slane %v10625_v26, 6 }
  0xa4   : > { %v10580_v59 = vpop.f32.mrf.mxu3  ;;  %9180 = vmatmul.msk.f32.gmra.mxu1 %vm652_vm1, %v1003_v58 }
  0xa5   : > { %v595_v36 = vsel %vm552_vm2, %v592_v20, %v594_v31  ;;  %v9081_v20 = vld [vmem:[%s10422_s12 + $0x290] sm:$0xff] }
  0xa6   : > { %v10586_v63 = vpop.f32.mrf.mxu2 }
  0xa7   : > { %17248 = vst [vmem:[#allocation6_spill] sm:$0xff] %v10586_v63  ;;  %v775_v0 = vpop.f32.mrf.mxu0 }
  0xa9   : > { %9281 = vmatmul.msk.f32.gmra.mxu3 %vm652_vm1, %v9072_v45  ;;  %v10593_v3 = vpop.f32.mrf.mxu1 }
  0xaa   : > { %9131 = vmatmul.msk.f32.gmra.mxu0 %vm652_vm1, %v589_v1 }
  0xab   : > { %9230 = vmatmul.msk.f32.gmra.mxu2 %vm652_vm1, %v400_v37  ;;  %v10642_v37 = vld [vmem:[%s10422_s12 + $0xb8] sm:$0xff] }
  0xac   : > { %v10597_v5 = vpop.f32.mrf.mxu3  ;;  %9181 = vmatmul.msk.f32.gmra.mxu1 %vm652_vm1, %v1005_v4  ;;  %v596_v42 = vrot.slane %v10642_v37, 6  ;;  %v600_v4 = vrot.slane %v10678_v61, 6 }
  0xae   : > { %v1449_v10 = vpop.f32.mrf.mxu2  ;;  %v597_v47 = vsel %vm552_vm2, %v594_v31, %v596_v42  ;;  %v10714_v31 = vld [vmem:[%s10422_s12 + $0xd8] sm:$0xff] }
  0xaf   : > { %v10603_v11 = vadd.f32 %v1449_v10, %v772_v54  ;;  %v778_v13 = vpop.f32.mrf.mxu0  ;;  %v1014_v54 = vrot.slane %v9079_v52, 6 }
  0xb1   : > { %9282 = vmatmul.msk.f32.gmra.mxu3 %vm652_vm1, %v9073_v51  ;;  %v10610_v16 = vpop.f32.mrf.mxu1 }
  0xb2   : > { %9132 = vmatmul.msk.f32.gmra.mxu0 %vm652_vm1, %v591_v14  ;;  %v10696_v14 = vld [vmem:[%s10422_s12 + $0xd0] sm:$0xff] }
  0xb3   : > { %9231 = vmatmul.msk.f32.gmra.mxu2 %vm652_vm1, %v401_v43  ;;  %v1012_v43 = vrot.slane %v9078_v41, 6  ;;  %v602_v21 = vrot.slane %v10696_v14, 6 }
  0xb4   : > { %v10614_v18 = vpop.f32.mrf.mxu3  ;;  %9182 = vmatmul.msk.f32.gmra.mxu1 %vm652_vm1, %v1007_v17 }
  0xb5   : > { %v1013_v50 = vsel %vm552_vm2, %v1010_v32, %v1012_v43 }
  0xb6   : > { %v1452_v22 = vpop.f32.mrf.mxu2 }
  0xb7   : > { %v10620_v23 = vadd.f32 %v1452_v22, %v775_v0  ;;  %v781_v24 = vpop.f32.mrf.mxu0  ;;  %v1015_v0 = vsel %vm552_vm2, %v1012_v43, %v1014_v54  ;;  %v1018_v22 = vrot.slane %v9081_v20, 6 }
  0xb9   : > { %9283 = vmatmul.msk.f32.gmra.mxu3 %vm652_vm1, %v9074_v60  ;;  %v10627_v27 = vpop.f32.mrf.mxu1  ;;  %v599_v60 = vsel %vm552_vm2, %v596_v42, %v598_v53 }
  0xba   : > { %9133 = vmatmul.msk.f32.gmra.mxu0 %vm652_vm1, %v593_v25 }
  0xbb   : > { %9232 = vmatmul.msk.f32.gmra.mxu2 %vm652_vm1, %v402_v49 }
  0xbc   : > { %v10631_v29 = vpop.f32.mrf.mxu3  ;;  %9183 = vmatmul.msk.f32.gmra.mxu1 %vm652_vm1, %v1009_v28 }
  0xbe   : > { %v1455_v33 = vpop.f32.mrf.mxu2 }
  0xbf   : > { %v10637_v34 = vadd.f32 %v1455_v33, %v778_v13  ;;  %v784_v35 = vpop.f32.mrf.mxu0  ;;  %v601_v13 = vsel %vm552_vm2, %v598_v53, %v600_v4 }
  0xc1   : > { %9284 = vmatmul.msk.f32.gmra.mxu3 %vm652_vm1, %v9075_v6  ;;  %v10644_v38 = vpop.f32.mrf.mxu1 }
  0xc2   : > { %9134 = vmatmul.msk.f32.gmra.mxu0 %vm652_vm1, %v595_v36  ;;  %v604_v36 = vrot.slane %v10714_v31, 6 }
  0xc3   : > { %9233 = vmatmul.msk.f32.gmra.mxu2 %vm652_vm1, %v10574_v56 }
  0xc4   : > { %v10648_v40 = vpop.f32.mrf.mxu3  ;;  %9184 = vmatmul.msk.f32.gmra.mxu1 %vm652_vm1, %v1011_v39 }
  0xc6   : > { %v1458_v44 = vpop.f32.mrf.mxu2 }
  0xc7   : > { %v10655_v45 = vadd.f32 %v1458_v44, %v781_v24  ;;  %v787_v46 = vpop.f32.mrf.mxu0  ;;  %v605_v44 = vsel %vm552_vm2, %v602_v21, %v604_v36 }
  0xc9   : > { %9285 = vmatmul.msk.f32.gmra.mxu3 %vm652_vm1, %v9076_v19  ;;  %v10662_v49 = vpop.f32.mrf.mxu1 }
  0xca   : > { %9135 = vmatmul.msk.f32.gmra.mxu0 %vm652_vm1, %v597_v47 }
  0xcb   : > { %9234 = vmatmul.msk.f32.gmra.mxu2 %vm652_vm1, %v10591_v2  ;;  %v9080_v2 = vld [vmem:[%s10422_s12 + $0x288] sm:$0xff] }
  0xcc   : > { %v10666_v51 = vpop.f32.mrf.mxu3  ;;  %9185 = vmatmul.msk.f32.gmra.mxu1 %vm652_vm1, %v1013_v50  ;;  %v1016_v6 = vrot.slane %v9080_v2, 6 }
  0xce   : > { %v1461_v55 = vpop.f32.mrf.mxu2 }
  0xcf   : > { %v10673_v56 = vadd.f32 %v1461_v55, %v784_v35  ;;  %v790_v58 = vpop.f32.mrf.mxu0  ;;  %v9082_v35 = vld [vmem:[%s10422_s12 + $0x298] sm:$0xff] }
  0xd0   : > { %v1020_v39 = vrot.slane %v9082_v35, 6 }
  0xd1   : > { %9286 = vmatmul.msk.f32.gmra.mxu3 %vm652_vm1, %v9077_v30  ;;  %v10680_v62 = vpop.f32.mrf.mxu1  ;;  %v603_v30 = vsel %vm552_vm2, %v600_v4, %v602_v21 }
  0xd2   : > { %9136 = vmatmul.msk.f32.gmra.mxu0 %vm652_vm1, %v599_v60 }
  0xd3   : > { %9235 = vmatmul.msk.f32.gmra.mxu2 %vm652_vm1, %v10608_v15  ;;  %v1017_v15 = vsel %vm552_vm2, %v1014_v54, %v1016_v6 }
  0xd4   : > { %v10684_v1 = vpop.f32.mrf.mxu3  ;;  %9186 = vmatmul.msk.f32.gmra.mxu1 %vm652_vm1, %v1015_v0 }
  0xd6   : > { %v1464_v7 = vpop.f32.mrf.mxu2 }
  0xd7   : > { %v10691_v8 = vadd.f32 %v1464_v7, %v787_v46  ;;  %v793_v10 = vpop.f32.mrf.mxu0  ;;  %v10732_v46 = vld [vmem:[%s10422_s12 + $0xe0] sm:$0xff]  ;;  %v9084_v7 = vld [vmem:[%s10422_s12 + $0x2a8] sm:$0xff] }
  0xd8   : > { %v606_v53 = vrot.slane %v10732_v46, 6 }
  0xd9   : > { %9287 = vmatmul.msk.f32.gmra.mxu3 %vm652_vm1, %v9078_v41  ;;  %v10698_v17 = vpop.f32.mrf.mxu1 }
  0xda   : > { %9137 = vmatmul.msk.f32.gmra.mxu0 %vm652_vm1, %v601_v13  ;;  %v607_v0 = vsel %vm552_vm2, %v604_v36, %v606_v53  ;;  %v1024_v13 = vrot.slane %v9084_v7, 6 }
  0xdb   : > { %9236 = vmatmul.msk.f32.gmra.mxu2 %vm652_vm1, %v10625_v26  ;;  %v1019_v26 = vsel %vm552_vm2, %v1016_v6, %v1018_v22 }
  0xdc   : > { %v10702_v19 = vpop.f32.mrf.mxu3  ;;  %9187 = vmatmul.msk.f32.gmra.mxu1 %vm652_vm1, %v1017_v15 }
  0xde   : > { %v1467_v24 = vpop.f32.mrf.mxu2 }
  0xdf   : > { %v10709_v25 = vadd.f32 %v1467_v24, %v790_v58  ;;  %v796_v28 = vpop.f32.mrf.mxu0  ;;  %v10768_v24 = vld [vmem:[%s10422_s12 + $0xf0] sm:$0xff] }
  0xe1   : > { %9288 = vmatmul.msk.f32.gmra.mxu3 %vm652_vm1, %v9079_v52  ;;  %v10716_v32 = vpop.f32.mrf.mxu1  ;;  %v9083_v52 = vld [vmem:[%s10422_s12 + $0x2a0] sm:$0xff] }
  0xe2   : > { %9138 = vmatmul.msk.f32.gmra.mxu0 %vm652_vm1, %v603_v30  ;;  %v1022_v54 = vrot.slane %v9083_v52, 6 }
  0xe3   : > { %9237 = vmatmul.msk.f32.gmra.mxu2 %vm652_vm1, %v10642_v37  ;;  %v1021_v37 = vsel %vm552_vm2, %v1018_v22, %v1020_v39 }
  0xe4   : > { %v10720_v33 = vpop.f32.mrf.mxu3  ;;  %9188 = vmatmul.msk.f32.gmra.mxu1 %vm652_vm1, %v1019_v26  ;;  %v9085_v26 = vld [vmem:[%s10422_s12 + $0x2b0] sm:$0xff] }
  0xe5   : > { %v1026_v36 = vrot.slane %v9085_v26, 6 }
  0xe6   : > { %v1470_v41 = vpop.f32.mrf.mxu2 }
  0xe7   : > { %v10727_v42 = vadd.f32 %v1470_v41, %v793_v10  ;;  %v799_v43 = vpop.f32.mrf.mxu0 }
  0xe9   : > { %9289 = vmatmul.msk.f32.gmra.mxu3 %vm652_vm1, %v9080_v2  ;;  %v10734_v47 = vpop.f32.mrf.mxu1  ;;  %v10750_v2 = vld [vmem:[%s10422_s12 + $0xe8] sm:$0xff] }
  0xea   : > { %9139 = vmatmul.msk.f32.gmra.mxu0 %vm652_vm1, %v605_v44  ;;  %v608_v10 = vrot.slane %v10750_v2, 6 }
  0xeb   : > { %9238 = vmatmul.msk.f32.gmra.mxu2 %vm652_vm1, %v10660_v48  ;;  %v1023_v48 = vsel %vm552_vm2, %v1020_v39, %v1022_v54 }
  0xec   : > { %v10738_v50 = vpop.f32.mrf.mxu3  ;;  %9189 = vmatmul.msk.f32.gmra.mxu1 %vm652_vm1, %v1021_v37  ;;  %v609_v22 = vsel %vm552_vm2, %v606_v53, %v608_v10  ;;  %v10786_v37 = vld [vmem:[%s10422_s12 + $0xf8] sm:$0xff] }
  0xee   : > { %v1473_v55 = vpop.f32.mrf.mxu2 }
  0xef   : > { %v10745_v58 = vadd.f32 %v1473_v55, %v796_v28  ;;  %v802_v60 = vpop.f32.mrf.mxu0  ;;  %v9086_v55 = vld [vmem:[%s10422_s12 + $0x2b8] sm:$0xff] }
  0xf1   : > { %9290 = vmatmul.msk.f32.gmra.mxu3 %vm652_vm1, %v9081_v20  ;;  %v10752_v4 = vpop.f32.mrf.mxu1 }
  0xf2   : > { %9140 = vmatmul.msk.f32.gmra.mxu0 %vm652_vm1, %v607_v0  ;;  %v1028_v0 = vrot.slane %v9086_v55, 6 }
  0xf3   : > { %9239 = vmatmul.msk.f32.gmra.mxu2 %vm652_vm1, %v10678_v61  ;;  %v1025_v61 = vsel %vm552_vm2, %v1022_v54, %v1024_v13  ;;  %v1027_v54 = vsel %vm552_vm2, %v1024_v13, %v1026_v36 }
  0xf4   : > { %v10756_v6 = vpop.f32.mrf.mxu3  ;;  %9190 = vmatmul.msk.f32.gmra.mxu1 %vm652_vm1, %v1023_v48 }
  0xf6   : > { %v1476_v15 = vpop.f32.mrf.mxu2 }
  0xf7   : > { %v10763_v20 = vadd.f32 %v1476_v15, %v799_v43  ;;  %v805_v21 = vpop.f32.mrf.mxu0  ;;  %v10807_v15 = vld [vmem:[%s10422_s12 + $0x100] sm:$0xff] }
  0xf9   : > { %9291 = vmatmul.msk.f32.gmra.mxu3 %vm652_vm1, %v9082_v35  ;;  %v10770_v28 = vpop.f32.mrf.mxu1  ;;  %v610_v35 = vrot.slane %v10768_v24, 6 }
  0xfa   : > { %9141 = vmatmul.msk.f32.gmra.mxu0 %vm652_vm1, %v609_v22 }
  0xfb   : > { %9240 = vmatmul.msk.f32.gmra.mxu2 %vm652_vm1, %v10696_v14  ;;  %v611_v44 = vsel %vm552_vm2, %v608_v10, %v610_v35 }
  0xfc   : > { %v10774_v30 = vpop.f32.mrf.mxu3  ;;  %9191 = vmatmul.msk.f32.gmra.mxu1 %vm652_vm1, %v1025_v61  ;;  %v1029_v61 = vsel %vm552_vm2, %v1026_v36, %v1028_v0 }
  0xfe   : > { %v1479_v39 = vpop.f32.mrf.mxu2 }
  0xff   : > { %v10781_v41 = vadd.f32 %v1479_v39, %v802_v60  ;;  %v808_v43 = vpop.f32.mrf.mxu0  ;;  %v612_v60 = vrot.slane %v10786_v37, 6 }
 0x101   : > { %9292 = vmatmul.msk.f32.gmra.mxu3 %vm652_vm1, %v9083_v52  ;;  %v10788_v53 = vpop.f32.mrf.mxu1  ;;  %v9313_v52 = vld [vmem:[%s17246_s1 + $0x20] sm:$0xff] }
 0x102   : > { %9142 = vmatmul.msk.f32.gmra.mxu0 %vm652_vm1, %v611_v44  ;;  %2443 = vmatpush.msrb.mxu1 %v9313_v52  ;;  %v9087_v44 = vld [vmem:[%s10422_s12 + $0x2c0] sm:$0xff] }
 0x103   : > { %9241 = vmatmul.msk.f32.gmra.mxu2 %vm652_vm1, %v10714_v31  ;;  %2080 = vmatpush.msrb.mxu0 %v9313_v52  ;;  %v613_v31 = vsel %vm552_vm2, %v610_v35, %v612_v60 }
 0x104   : > { %v10792_v14 = vpop.f32.mrf.mxu3  ;;  %9192 = vmatmul.msk.f32.gmra.mxu1 %vm652_vm1, %v1027_v54 }
 0x106   : > { %v1482_v48 = vpop.f32.mrf.mxu2 }
 0x107   : > { %v10802_v10 = vadd.f32 %v1482_v48, %v805_v21  ;;  %v811_v13 = vpop.f32.mrf.mxu0  ;;  %v1030_v21 = vrot.slane %v9087_v44, 6  ;;  %v10825_v48 = vld [vmem:[%s10422_s12 + $0x108] sm:$0xff] }
 0x109   : > { %9293 = vmatmul.msk.f32.gmra.mxu3 %vm652_vm1, %v9084_v7  ;;  %v10809_v22 = vpop.f32.mrf.mxu1  ;;  %v614_v7 = vrot.slane %v10807_v15, 6 }
 0x10a   : > { %9143 = vmatmul.msk.f32.gmra.mxu0 %vm652_vm1, %v613_v31 }
 0x10b   : > { %9242 = vmatmul.msk.f32.gmra.mxu2 %vm652_vm1, %v10732_v46  ;;  %v615_v36 = vsel %vm552_vm2, %v612_v60, %v614_v7  ;;  %v1031_v46 = vsel %vm552_vm2, %v1028_v0, %v1030_v21 }
 0x10c   : > { %v10813_v39 = vpop.f32.mrf.mxu3  ;;  %9193 = vmatmul.msk.f32.gmra.mxu1 %vm652_vm1, %v1029_v61  ;;  %v9088_v61 = vld [vmem:[%s10422_s12 + $0x2c8] sm:$0xff] }
 0x10e   : > { %v1485_v35 = vpop.f32.mrf.mxu2 }
 0x10f   : > { %v10820_v54 = vadd.f32 %v1485_v35, %v808_v43  ;;  %v814_v52 = vpop.f32.mrf.mxu0  ;;  %v1032_v43 = vrot.slane %v9088_v61, 6 }
 0x111   : > { %9294 = vmatmul.msk.f32.gmra.mxu3 %vm652_vm1, %v9085_v26  ;;  %v10827_v31 = vpop.f32.mrf.mxu1  ;;  %v616_v26 = vrot.slane %v10825_v48, 6 }
 0x112   : > { %17249 = vst [vmem:[#allocation7_spill] sm:$0xff] %v10827_v31  ;;  %9144 = vmatmul.msk.f32.gmra.mxu0 %vm652_vm1, %v615_v36  ;;  %v10843_v36 = vld [vmem:[%s10422_s12 + $0x110] sm:$0xff] }
 0x113   : > { %9243 = vmatmul.msk.f32.gmra.mxu2 %vm652_vm1, %v10750_v2  ;;  %v617_v0 = vsel %vm552_vm2, %v614_v7, %v616_v26  ;;  %v1033_v2 = vsel %vm552_vm2, %v1030_v21, %v1032_v43 }
 0x114   : > { %v10831_v12 = vpop.f32.mrf.mxu3  ;;  %9194 = vmatmul.msk.f32.gmra.mxu1 %vm652_vm1, %v1031_v46  ;;  %v9089_v46 = vld [vmem:[%s10422_s12 + $0x2d0] sm:$0xff] }
 0x115   : > { %17250 = vst [vmem:[#allocation8_spill] sm:$0xff] %v10831_v12 }
 0x116   : > { %v1488_v60 = vpop.f32.mrf.mxu2 }
 0x117   : > { %v10838_v35 = vadd.f32 %v1488_v60, %v811_v13  ;;  %v817_v63 = vpop.f32.mrf.mxu0  ;;  %v1034_v13 = vrot.slane %v9089_v46, 6 }
 0x119   : > { %17251 = vst [vmem:[#allocation9_spill] sm:$0xff] %v10838_v35  ;;  %9295 = vmatmul.msk.f32.gmra.mxu3 %vm652_vm1, %v9086_v55  ;;  %v10845_v12 = vpop.f32.mrf.mxu1  ;;  %v618_v55 = vrot.slane %v10843_v36, 6 }
 0x11a   : > { %17252 = vst [vmem:[#allocation10_spill] sm:$0xff] %v10845_v12  ;;  %9145 = vmatmul.msk.f32.gmra.mxu0 %vm652_vm1, %v617_v0  ;;  %v10861_v0 = vld [vmem:[%s10422_s12 + $0x118] sm:$0xff] }
 0x11b   : > { %9244 = vmatmul.msk.f32.gmra.mxu2 %vm652_vm1, %v10768_v24  ;;  %v619_v21 = vsel %vm552_vm2, %v616_v26, %v618_v55  ;;  %v1035_v24 = vsel %vm552_vm2, %v1032_v43, %v1034_v13 }
 0x11c   : > { %v10849_v31 = vpop.f32.mrf.mxu3  ;;  %9195 = vmatmul.msk.f32.gmra.mxu1 %vm652_vm1, %v1033_v2  ;;  %v9090_v2 = vld [vmem:[%s10422_s12 + $0x2d8] sm:$0xff] }
 0x11d   : > { %17253 = vst [vmem:[#allocation11_spill] sm:$0xff] %v10849_v31 }
 0x11e   : > { %v1491_v7 = vpop.f32.mrf.mxu2 }
 0x11f   : > { %v10856_v60 = vadd.f32 %v1491_v7, %v814_v52  ;;  %v820_v12 = vpop.f32.mrf.mxu0  ;;  %v1036_v52 = vrot.slane %v9090_v2, 6 }
 0x121   : > { %17254 = vst [vmem:[#allocation12_spill] sm:$0xff] %v10856_v60  ;;  %9296 = vmatmul.msk.f32.gmra.mxu3 %vm652_vm1, %v9087_v44  ;;  %v10863_v31 = vpop.f32.mrf.mxu1  ;;  %v620_v44 = vrot.slane %v10861_v0, 6 }
 0x122   : > { %17255 = vst [vmem:[#allocation13_spill] sm:$0xff] %v10863_v31  ;;  %9146 = vmatmul.msk.f32.gmra.mxu0 %vm652_vm1, %v619_v21  ;;  %v10879_v21 = vld [vmem:[%s10422_s12 + $0x120] sm:$0xff] }
 0x123   : > { %9245 = vmatmul.msk.f32.gmra.mxu2 %vm652_vm1, %v10786_v37  ;;  %v621_v43 = vsel %vm552_vm2, %v618_v55, %v620_v44  ;;  %v1037_v37 = vsel %vm552_vm2, %v1034_v13, %v1036_v52 }
 0x124   : > { %v10867_v35 = vpop.f32.mrf.mxu3  ;;  %9196 = vmatmul.msk.f32.gmra.mxu1 %vm652_vm1, %v1035_v24  ;;  %v9091_v24 = vld [vmem:[%s10422_s12 + $0x2e0] sm:$0xff] }
 0x125   : > { %17256 = vst [vmem:[#allocation14_spill] sm:$0xff] %v10867_v35 }
 0x126   : > { %v1494_v26 = vpop.f32.mrf.mxu2 }
 0x127   : > { %v10874_v7 = vadd.f32 %v1494_v26, %v817_v63  ;;  %v823_v31 = vpop.f32.mrf.mxu0  ;;  %v622_v63 = vrot.slane %v10879_v21, 6 }
 0x129   : > { %17257 = vst [vmem:[#allocation15_spill] sm:$0xff] %v10874_v7  ;;  %9297 = vmatmul.msk.f32.gmra.mxu3 %vm652_vm1, %v9088_v61  ;;  %v10881_v35 = vpop.f32.mrf.mxu1  ;;  %v1038_v61 = vrot.slane %v9091_v24, 6  ;;  %v623_v13 = vsel %vm552_vm2, %v620_v44, %v622_v63 }
 0x12a   : > { %17258 = vst [vmem:[#allocation16_spill] sm:$0xff] %v10881_v35  ;;  %9147 = vmatmul.msk.f32.gmra.mxu0 %vm652_vm1, %v621_v43  ;;  %v10897_v43 = vld [vmem:[%s10422_s12 + $0x128] sm:$0xff] }
 0x12b   : > { %9246 = vmatmul.msk.f32.gmra.mxu2 %vm652_vm1, %v10807_v15  ;;  %v1039_v15 = vsel %vm552_vm2, %v1036_v52, %v1038_v61 }
 0x12c   : > { %v10885_v60 = vpop.f32.mrf.mxu3  ;;  %9197 = vmatmul.msk.f32.gmra.mxu1 %vm652_vm1, %v1037_v37  ;;  %v9092_v37 = vld [vmem:[%s10422_s12 + $0x2e8] sm:$0xff] }
 0x12d   : > { %17259 = vst [vmem:[#allocation17_spill] sm:$0xff] %v10885_v60 }
 0x12e   : > { %v1497_v55 = vpop.f32.mrf.mxu2 }
 0x12f   : > { %v10892_v26 = vadd.f32 %v1497_v55, %v820_v12  ;;  %v826_v35 = vpop.f32.mrf.mxu0  ;;  %v624_v12 = vrot.slane %v10897_v43, 6 }
 0x131   : > { %17260 = vst [vmem:[#allocation18_spill] sm:$0xff] %v10892_v26  ;;  %9298 = vmatmul.msk.f32.gmra.mxu3 %vm652_vm1, %v9089_v46  ;;  %v10899_v60 = vpop.f32.mrf.mxu1  ;;  %v1040_v46 = vrot.slane %v9092_v37, 6  ;;  %v625_v52 = vsel %vm552_vm2, %v622_v63, %v624_v12 }
 0x132   : > { %17261 = vst [vmem:[#allocation19_spill] sm:$0xff] %v10899_v60  ;;  %9148 = vmatmul.msk.f32.gmra.mxu0 %vm652_vm1, %v623_v13  ;;  %v10915_v13 = vld [vmem:[%s10422_s12 + $0x130] sm:$0xff] }
 0x133   : > { %9247 = vmatmul.msk.f32.gmra.mxu2 %vm652_vm1, %v10825_v48  ;;  %v1041_v48 = vsel %vm552_vm2, %v1038_v61, %v1040_v46 }
 0x134   : > { %v10903_v7 = vpop.f32.mrf.mxu3  ;;  %9198 = vmatmul.msk.f32.gmra.mxu1 %vm652_vm1, %v1039_v15  ;;  %v9093_v15 = vld [vmem:[%s10422_s12 + $0x2f0] sm:$0xff] }
 0x135   : > { %17262 = vst [vmem:[#allocation20_spill] sm:$0xff] %v10903_v7 }
 0x136   : > { %v1500_v44 = vpop.f32.mrf.mxu2 }
 0x137   : > { %v10910_v55 = vadd.f32 %v1500_v44, %v823_v31  ;;  %v829_v60 = vpop.f32.mrf.mxu0  ;;  %v626_v31 = vrot.slane %v10915_v13, 6 }
 0x139   : > { %17263 = vst [vmem:[#allocation21_spill] sm:$0xff] %v10910_v55  ;;  %9299 = vmatmul.msk.f32.gmra.mxu3 %vm652_vm1, %v9090_v2  ;;  %v10917_v7 = vpop.f32.mrf.mxu1  ;;  %v1042_v2 = vrot.slane %v9093_v15, 6  ;;  %v627_v61 = vsel %vm552_vm2, %v624_v12, %v626_v31 }
 0x13a   : > { %17264 = vst [vmem:[#allocation22_spill] sm:$0xff] %v10917_v7  ;;  %9149 = vmatmul.msk.f32.gmra.mxu0 %vm652_vm1, %v625_v52  ;;  %v10933_v52 = vld [vmem:[%s10422_s12 + $0x138] sm:$0xff] }
 0x13b   : > { %9248 = vmatmul.msk.f32.gmra.mxu2 %vm652_vm1, %v10843_v36  ;;  %v1043_v36 = vsel %vm552_vm2, %v1040_v46, %v1042_v2 }
 0x13c   : > { %v10921_v26 = vpop.f32.mrf.mxu3  ;;  %9199 = vmatmul.msk.f32.gmra.mxu1 %vm652_vm1, %v1041_v48  ;;  %v9094_v48 = vld [vmem:[%s10422_s12 + $0x2f8] sm:$0xff] }
 0x13d   : > { %17265 = vst [vmem:[#allocation23_spill] sm:$0xff] %v10921_v26 }
 0x13e   : > { %v1503_v63 = vpop.f32.mrf.mxu2 }
 0x13f   : > { %v10928_v44 = vadd.f32 %v1503_v63, %v826_v35  ;;  %v832_v7 = vpop.f32.mrf.mxu0  ;;  %v628_v35 = vrot.slane %v10933_v52, 6 }
 0x141   : > { %17266 = vst [vmem:[#allocation24_spill] sm:$0xff] %v10928_v44  ;;  %9300 = vmatmul.msk.f32.gmra.mxu3 %vm652_vm1, %v9091_v24  ;;  %v10935_v26 = vpop.f32.mrf.mxu1  ;;  %v1044_v24 = vrot.slane %v9094_v48, 6  ;;  %v629_v46 = vsel %vm552_vm2, %v626_v31, %v628_v35 }
 0x142   : > { %17267 = vst [vmem:[#allocation25_spill] sm:$0xff] %v10935_v26  ;;  %9150 = vmatmul.msk.f32.gmra.mxu0 %vm652_vm1, %v627_v61  ;;  %v10951_v61 = vld [vmem:[%s10422_s12 + $0x140] sm:$0xff] }
 0x143   : > { %9249 = vmatmul.msk.f32.gmra.mxu2 %vm652_vm1, %v10861_v0  ;;  %v1045_v0 = vsel %vm552_vm2, %v1042_v2, %v1044_v24 }
 0x144   : > { %v10939_v55 = vpop.f32.mrf.mxu3  ;;  %9200 = vmatmul.msk.f32.gmra.mxu1 %vm652_vm1, %v1043_v36  ;;  %v9095_v36 = vld [vmem:[%s10422_s12 + $0x300] sm:$0xff] }
 0x145   : > { %17268 = vst [vmem:[#allocation26_spill] sm:$0xff] %v10939_v55 }
 0x146   : > { %v1506_v12 = vpop.f32.mrf.mxu2 }
 0x147   : > { %v10946_v63 = vadd.f32 %v1506_v12, %v829_v60  ;;  %v835_v26 = vpop.f32.mrf.mxu0  ;;  %v630_v60 = vrot.slane %v10951_v61, 6 }
 0x149   : > { %17269 = vst [vmem:[#allocation27_spill] sm:$0xff] %v10946_v63  ;;  %9301 = vmatmul.msk.f32.gmra.mxu3 %vm652_vm1, %v9092_v37  ;;  %v10953_v55 = vpop.f32.mrf.mxu1  ;;  %v1046_v37 = vrot.slane %v9095_v36, 6  ;;  %v631_v2 = vsel %vm552_vm2, %v628_v35, %v630_v60 }
 0x14a   : > { %17270 = vst [vmem:[#allocation28_spill] sm:$0xff] %v10953_v55  ;;  %9151 = vmatmul.msk.f32.gmra.mxu0 %vm652_vm1, %v629_v46  ;;  %v10969_v46 = vld [vmem:[%s10422_s12 + $0x148] sm:$0xff] }
 0x14b   : > { %9250 = vmatmul.msk.f32.gmra.mxu2 %vm652_vm1, %v10879_v21  ;;  %v1047_v21 = vsel %vm552_vm2, %v1044_v24, %v1046_v37 }
 0x14c   : > { %v10957_v44 = vpop.f32.mrf.mxu3  ;;  %9201 = vmatmul.msk.f32.gmra.mxu1 %vm652_vm1, %v1045_v0  ;;  %v9096_v0 = vld [vmem:[%s10422_s12 + $0x308] sm:$0xff] }
 0x14d   : > { %17271 = vst [vmem:[#allocation29_spill] sm:$0xff] %v10957_v44 }
 0x14e   : > { %v1509_v31 = vpop.f32.mrf.mxu2 }
 0x14f   : > { %v10964_v12 = vadd.f32 %v1509_v31, %v832_v7  ;;  %v838_v55 = vpop.f32.mrf.mxu0  ;;  %v632_v7 = vrot.slane %v10969_v46, 6 }
 0x151   : > { %17272 = vst [vmem:[#allocation30_spill] sm:$0xff] %v10964_v12  ;;  %9302 = vmatmul.msk.f32.gmra.mxu3 %vm652_vm1, %v9093_v15  ;;  %v10971_v44 = vpop.f32.mrf.mxu1  ;;  %v1048_v15 = vrot.slane %v9096_v0, 6  ;;  %v633_v24 = vsel %vm552_vm2, %v630_v60, %v632_v7 }
 0x152   : > { %17273 = vst [vmem:[#allocation31_spill] sm:$0xff] %v10971_v44  ;;  %9152 = vmatmul.msk.f32.gmra.mxu0 %vm652_vm1, %v631_v2  ;;  %v10987_v2 = vld [vmem:[%s10422_s12 + $0x150] sm:$0xff] }
 0x153   : > { %9251 = vmatmul.msk.f32.gmra.mxu2 %vm652_vm1, %v10897_v43  ;;  %v1049_v43 = vsel %vm552_vm2, %v1046_v37, %v1048_v15 }
 0x154   : > { %v10975_v63 = vpop.f32.mrf.mxu3  ;;  %9202 = vmatmul.msk.f32.gmra.mxu1 %vm652_vm1, %v1047_v21  ;;  %v9097_v21 = vld [vmem:[%s10422_s12 + $0x310] sm:$0xff] }
 0x155   : > { %17274 = vst [vmem:[#allocation32_spill] sm:$0xff] %v10975_v63 }
 0x156   : > { %v1512_v35 = vpop.f32.mrf.mxu2 }
 0x157   : > { %v10982_v31 = vadd.f32 %v1512_v35, %v835_v26  ;;  %v841_v44 = vpop.f32.mrf.mxu0  ;;  %v634_v26 = vrot.slane %v10987_v2, 6 }
 0x159   : > { %17275 = vst [vmem:[#allocation33_spill] sm:$0xff] %v10982_v31  ;;  %9303 = vmatmul.msk.f32.gmra.mxu3 %vm652_vm1, %v9094_v48  ;;  %v10989_v63 = vpop.f32.mrf.mxu1  ;;  %v1050_v48 = vrot.slane %v9097_v21, 6  ;;  %v635_v37 = vsel %vm552_vm2, %v632_v7, %v634_v26 }
 0x15a   : > { %17276 = vst [vmem:[#allocation34_spill] sm:$0xff] %v10989_v63  ;;  %9153 = vmatmul.msk.f32.gmra.mxu0 %vm652_vm1, %v633_v24  ;;  %v11005_v24 = vld [vmem:[%s10422_s12 + $0x158] sm:$0xff] }
 0x15b   : > { %9252 = vmatmul.msk.f32.gmra.mxu2 %vm652_vm1, %v10915_v13  ;;  %v1051_v13 = vsel %vm552_vm2, %v1048_v15, %v1050_v48 }
 0x15c   : > { %v10993_v12 = vpop.f32.mrf.mxu3  ;;  %9203 = vmatmul.msk.f32.gmra.mxu1 %vm652_vm1, %v1049_v43  ;;  %v9098_v43 = vld [vmem:[%s10422_s12 + $0x318] sm:$0xff] }
 0x15d   : > { %17277 = vst [vmem:[#allocation35_spill] sm:$0xff] %v10993_v12 }
 0x15e   : > { %v1515_v60 = vpop.f32.mrf.mxu2 }
 0x15f   : > { %v11000_v35 = vadd.f32 %v1515_v60, %v838_v55  ;;  %v844_v63 = vpop.f32.mrf.mxu0  ;;  %v636_v55 = vrot.slane %v11005_v24, 6 }
 0x161   : > { %17278 = vst [vmem:[#allocation36_spill] sm:$0xff] %v11000_v35  ;;  %9304 = vmatmul.msk.f32.gmra.mxu3 %vm652_vm1, %v9095_v36  ;;  %v11007_v12 = vpop.f32.mrf.mxu1  ;;  %v1052_v36 = vrot.slane %v9098_v43, 6  ;;  %v637_v15 = vsel %vm552_vm2, %v634_v26, %v636_v55 }
 0x162   : > { %17279 = vst [vmem:[#allocation37_spill] sm:$0xff] %v11007_v12  ;;  %9154 = vmatmul.msk.f32.gmra.mxu0 %vm652_vm1, %v635_v37  ;;  %v11023_v37 = vld [vmem:[%s10422_s12 + $0x160] sm:$0xff] }
 0x163   : > { %9253 = vmatmul.msk.f32.gmra.mxu2 %vm652_vm1, %v10933_v52  ;;  %v1053_v52 = vsel %vm552_vm2, %v1050_v48, %v1052_v36 }
 0x164   : > { %v11011_v31 = vpop.f32.mrf.mxu3  ;;  %9204 = vmatmul.msk.f32.gmra.mxu1 %vm652_vm1, %v1051_v13  ;;  %v9099_v13 = vld [vmem:[%s10422_s12 + $0x320] sm:$0xff] }
 0x165   : > { %17280 = vst [vmem:[#allocation38_spill] sm:$0xff] %v11011_v31 }
 0x166   : > { %v1518_v7 = vpop.f32.mrf.mxu2 }
 0x167   : > { %v11018_v60 = vadd.f32 %v1518_v7, %v841_v44  ;;  %v847_v12 = vpop.f32.mrf.mxu0  ;;  %v638_v44 = vrot.slane %v11023_v37, 6 }
 0x169   : > { %17281 = vst [vmem:[#allocation39_spill] sm:$0xff] %v11018_v60  ;;  %9305 = vmatmul.msk.f32.gmra.mxu3 %vm652_vm1, %v9096_v0  ;;  %v11025_v31 = vpop.f32.mrf.mxu1  ;;  %v1054_v0 = vrot.slane %v9099_v13, 6  ;;  %v639_v48 = vsel %vm552_vm2, %v636_v55, %v638_v44 }
 0x16a   : > { %17282 = vst [vmem:[#allocation40_spill] sm:$0xff] %v11025_v31  ;;  %9155 = vmatmul.msk.f32.gmra.mxu0 %vm652_vm1, %v637_v15  ;;  %v11041_v15 = vld [vmem:[%s10422_s12 + $0x168] sm:$0xff] }
 0x16b   : > { %9254 = vmatmul.msk.f32.gmra.mxu2 %vm652_vm1, %v10951_v61  ;;  %v1055_v61 = vsel %vm552_vm2, %v1052_v36, %v1054_v0 }
 0x16c   : > { %v11029_v35 = vpop.f32.mrf.mxu3  ;;  %9205 = vmatmul.msk.f32.gmra.mxu1 %vm652_vm1, %v1053_v52  ;;  %v9100_v52 = vld [vmem:[%s10422_s12 + $0x328] sm:$0xff] }
 0x16d   : > { %17283 = vst [vmem:[#allocation41_spill] sm:$0xff] %v11029_v35 }
 0x16e   : > { %v1521_v26 = vpop.f32.mrf.mxu2 }
 0x16f   : > { %v11036_v7 = vadd.f32 %v1521_v26, %v844_v63  ;;  %v850_v31 = vpop.f32.mrf.mxu0  ;;  %v640_v63 = vrot.slane %v11041_v15, 6 }
 0x171   : > { %17284 = vst [vmem:[#allocation42_spill] sm:$0xff] %v11036_v7  ;;  %9306 = vmatmul.msk.f32.gmra.mxu3 %vm652_vm1, %v9097_v21  ;;  %v11043_v35 = vpop.f32.mrf.mxu1  ;;  %v1056_v21 = vrot.slane %v9100_v52, 6  ;;  %v641_v36 = vsel %vm552_vm2, %v638_v44, %v640_v63 }
 0x172   : > { %17285 = vst [vmem:[#allocation43_spill] sm:$0xff] %v11043_v35  ;;  %9156 = vmatmul.msk.f32.gmra.mxu0 %vm652_vm1, %v639_v48  ;;  %v11059_v48 = vld [vmem:[%s10422_s12 + $0x170] sm:$0xff] }
 0x173   : > { %9255 = vmatmul.msk.f32.gmra.mxu2 %vm652_vm1, %v10969_v46  ;;  %v1057_v46 = vsel %vm552_vm2, %v1054_v0, %v1056_v21 }
 0x174   : > { %v11047_v60 = vpop.f32.mrf.mxu3  ;;  %9206 = vmatmul.msk.f32.gmra.mxu1 %vm652_vm1, %v1055_v61  ;;  %v9101_v61 = vld [vmem:[%s10422_s12 + $0x330] sm:$0xff] }
 0x175   : > { %17286 = vst [vmem:[#allocation44_spill] sm:$0xff] %v11047_v60 }
 0x176   : > { %v1524_v55 = vpop.f32.mrf.mxu2 }
 0x177   : > { %v11054_v26 = vadd.f32 %v1524_v55, %v847_v12  ;;  %v853_v35 = vpop.f32.mrf.mxu0  ;;  %v642_v12 = vrot.slane %v11059_v48, 6 }
 0x179   : > { %17287 = vst [vmem:[#allocation45_spill] sm:$0xff] %v11054_v26  ;;  %9307 = vmatmul.msk.f32.gmra.mxu3 %vm652_vm1, %v9098_v43  ;;  %v11061_v60 = vpop.f32.mrf.mxu1  ;;  %v1058_v43 = vrot.slane %v9101_v61, 6  ;;  %v643_v0 = vsel %vm552_vm2, %v640_v63, %v642_v12 }
 0x17a   : > { %17288 = vst [vmem:[#allocation46_spill] sm:$0xff] %v11061_v60  ;;  %9157 = vmatmul.msk.f32.gmra.mxu0 %vm652_vm1, %v641_v36  ;;  %v11077_v36 = vld [vmem:[%s10422_s12 + $0x178] sm:$0xff] }
 0x17b   : > { %9256 = vmatmul.msk.f32.gmra.mxu2 %vm652_vm1, %v10987_v2  ;;  %v1059_v26 = vsel %vm552_vm2, %v1056_v21, %v1058_v43 }
 0x17c   : > { %v11065_v7 = vpop.f32.mrf.mxu3  ;;  %9207 = vmatmul.msk.f32.gmra.mxu1 %vm652_vm1, %v1057_v46  ;;  %v9102_v46 = vld [vmem:[%s10422_s12 + $0x338] sm:$0xff] }
 0x17d   : > { %17289 = vst [vmem:[#allocation47_spill] sm:$0xff] %v11065_v7  ;;  %v1060_v63 = vrot.slane %v9102_v46, 6 }
 0x17e   : > { %v1527_v44 = vpop.f32.mrf.mxu2 }
 0x17f   : > { %v11072_v55 = vadd.f32 %v1527_v44, %v850_v31  ;;  %v856_v60 = vpop.f32.mrf.mxu0  ;;  %v644_v31 = vrot.slane %v11077_v36, 6 }
 0x181   : > { %17290 = vst [vmem:[#allocation48_spill] sm:$0xff] %v11072_v55  ;;  %9308 = vmatmul.msk.f32.gmra.mxu3 %vm652_vm1, %v9099_v13  ;;  %v11079_v7 = vpop.f32.mrf.mxu1  ;;  %v9416_v13 = vld [vmem:[%s17246_s1 + $0x38] sm:$0x7f] }
 0x182   : > { %17291 = vst [vmem:[#allocation49_spill] sm:$0xff] %v11079_v7  ;;  %9158 = vmatmul.msk.f32.gmra.mxu0 %vm652_vm1, %v643_v0  ;;  %9467 = vmatpush.msk.msrb.mxu3 %vm751_vm0, %v9416_v13 }
 0x183   : > { %9257 = vmatmul.msk.f32.gmra.mxu2 %vm652_vm1, %v11005_v24  ;;  %v645_v24 = vsel %vm552_vm2, %v642_v12, %v644_v31 }
 0x184   : > { %v11083_v2 = vpop.f32.mrf.mxu3  ;;  %9208 = vmatmul.msk.f32.gmra.mxu1 %vm652_vm1, %v1059_v26  ;;  %9417 = vmatpush.msk.msra.mxu2 %vm751_vm0, %v9416_v13  ;;  %v9415_v26 = vld [vmem:[%s17246_s1 + $0x30] sm:$0xff]  ;;  %v1061_v13 = vsel %vm552_vm2, %v1058_v43, %v1060_v63 }
 0x185   : > { %17292 = vst [vmem:[#allocation50_spill] sm:$0xff] %v11083_v2  ;;  %v11103_v2 = vld [vmem:[%s10422_s12 + $0x180] sm:$0xff]  ;;  %3274 = vmatpush.msrb.mxu3 %v9415_v26 }
 0x186   : > { %v1530_v21 = vpop.f32.mrf.mxu2  ;;  %2911 = vmatpush.msra.mxu2 %v9415_v26  ;;  %v646_v12 = vrot.slane %v11103_v2, 6 }
 0x187   : > { %v11095_v44 = vadd.f32 %v1530_v21, %v853_v35  ;;  %v859_v0 = vpop.f32.mrf.mxu0 }
 0x188   : > { %v647_v43 = vsel %vm552_vm2, %v644_v31, %v646_v12 }
 0x189   : > { %17293 = vst [vmem:[#allocation51_spill] sm:$0xff] %v11095_v44  ;;  %9309 = vmatmul.msk.f32.gmra.mxu3 %vm652_vm1, %v9100_v52  ;;  %v11105_v7 = vpop.f32.mrf.mxu1  ;;  %v9103_v52 = vld [vmem:[%s10422_s12 + $0x340] sm:$0xff] }
 0x18a   : > { %17294 = vst [vmem:[#allocation52_spill] sm:$0xff] %v11105_v7  ;;  %9159 = vmatmul.msk.f32.gmra.mxu0 %vm652_vm1, %v645_v24  ;;  %v1062_v21 = vrot.slane %v9103_v52, 6 }
 0x18b   : > { %9258 = vmatmul.msk.f32.gmra.mxu2 %vm652_vm1, %v11023_v37 }
 0x18c   : > { %v11109_v35 = vpop.f32.mrf.mxu3  ;;  %9209 = vmatmul.msk.f32.gmra.mxu1 %vm652_vm1, %v1061_v13  ;;  %v9104_v13 = vld [vmem:[%s10422_s12 + $0x348] sm:$0xff] }
 0x18d   : > { %17295 = vst [vmem:[#allocation53_spill] sm:$0xff] %v11109_v35  ;;  %v1063_v35 = vsel %vm552_vm2, %v1060_v63, %v1062_v21  ;;  %v17300_v63 = vrot.slane %v10429_v9, 6 }
 0x18e   : > { %v1533_v44 = vpop.f32.mrf.mxu2 }
 0x18f   : > { %v11116_v26 = vadd.f32 %v1533_v44, %v856_v60  ;;  %v862_v7 = vpop.f32.mrf.mxu0  ;;  %v1064_v60 = vrot.slane %v9104_v13, 6  ;;  %v9993_v13 = vld [vmem:[%s10422_s12 + $0x20] sm:$0xff] }
 0x190   : > { %v1866_v9 = vrot.slane %v9993_v13, 4 }
 0x191   : > { %17296 = vst [vmem:[#allocation54_spill] sm:$0xff] %v11116_v26  ;;  %9310 = vmatmul.msk.f32.gmra.mxu3 %vm652_vm1, %v9101_v61  ;;  %v11120_v24 = vpop.f32.mrf.mxu1 }
 0x192   : > { %17297 = vst [vmem:[#allocation55_spill] sm:$0xff] %v11120_v24  ;;  %9160 = vmatmul.msk.f32.gmra.mxu0 %vm652_vm1, %v647_v43  ;;  %v649_v43 = vsel %vm552_vm2, %v646_v12, %v17300_v63  ;;  %v1065_v24 = vsel %vm552_vm2, %v1062_v21, %v1064_v60 }
 0x193   : > { %9259 = vmatmul.msk.f32.gmra.mxu2 %vm652_vm1, %v11041_v15 }
 0x194   : > { %v11124_v37 = vpop.f32.mrf.mxu3  ;;  %9210 = vmatmul.msk.f32.gmra.mxu1 %vm652_vm1, %v1063_v35  ;;  %v9105_v35 = vld [vmem:[%s10422_s12 + $0x350] sm:$0xff] }
 0x195   : > { %17298 = vst [vmem:[#allocation56_spill] sm:$0xff] %v11124_v37  ;;  %v1066_v12 = vrot.slane %v9105_v35, 6 }
 0x196   : > { %v1536_v61 = vpop.f32.mrf.mxu2 }
 0x197   : > { %v11130_v31 = vadd.f32 %v1536_v61, %v859_v0  ;;  %v865_v44 = vpop.f32.mrf.mxu0  ;;  %v9992_v0 = vld [vmem:[%s10422_s12 + $0x18] sm:$0xff] }
 0x199   : > { %17299 = vst [vmem:[#allocation57_spill] sm:$0xff] %v11130_v31  ;;  %9311 = vmatmul.msk.f32.gmra.mxu3 %vm652_vm1, %v9102_v46  ;;  %v11136_v37 = vpop.f32.mrf.mxu1  ;;  %v1865_v46 = vrot.slane %v9992_v0, 4  ;;  %v11157_v0 = vld [vmem:[%s10422_s12 + $0x1f0] sm:$0xff] }
 0x19a   : > { %17301 = vst [vmem:[#allocation58_spill] sm:$0xff] %v11136_v37  ;;  %9161 = vmatmul.msk.f32.gmra.mxu0 %vm652_vm1, %v649_v43  ;;  %v9997_v37 = vld [vmem:[%s10422_s12 + $0x1d8] sm:$0xff] }
 0x19b   : > { %9260 = vmatmul.msk.f32.gmra.mxu2 %vm652_vm1, %v11059_v48  ;;  %v1867_v43 = vsel %vm1864_vm3, %v1865_v46, %v1866_v9 }
 0x19c   : > { %v11140_v15 = vpop.f32.mrf.mxu3  ;;  %9211 = vmatmul.msk.f32.gmra.mxu1 %vm652_vm1, %v1065_v24  ;;  %v3063_v24 = vrot.slane %v11157_v0, 2 }
 0x19d   : > { %17302 = vst [vmem:[#allocation59_spill] sm:$0xff] %v11140_v15  ;;  %v11153_v15 = vld [vmem:[%s10422_s12 + $0x1e8] sm:$0xff] }
 0x19e   : > { %v1539_v21 = vpop.f32.mrf.mxu2  ;;  %v3062_v48 = vrot.slane %v11153_v15, 2 }
 0x19f   : > { %v11148_v61 = vadd.f32 %v1539_v21, %v862_v7  ;;  %v868_v63 = vpop.f32.mrf.mxu0  ;;  %v1067_v7 = vsel %vm552_vm2, %v1064_v60, %v1066_v12 }
 0x1a0   : > { %v3064_v21 = vsel %vm2695_vm4, %v3062_v48, %v3063_v24 }
 0x1a1   : > { %17303 = vst [vmem:[#allocation60_spill] sm:$0xff] %v11148_v61  ;;  %9312 = vmatmul.msk.f32.gmra.mxu3 %vm652_vm1, %v9103_v52  ;;  %v11160_v35 = vpop.f32.mrf.mxu1  ;;  %v9996_v52 = vld [vmem:[%s10422_s12 + $0x28] sm:$0xff]  ;;  %v9998_v61 = vld [vmem:[%s10422_s12 + $0x1e0] sm:$0xff] }
 0x1a2   : > { %17304 = vst [vmem:[#allocation61_spill] sm:$0xff] %v11160_v35  ;;  %9316 = vmatmul.msk.f32.vlgmr.msrb.gmra.mxu0 %vm652_vm1, %v1867_v43  ;;  %v1868_v46 = vrot.slane %v9996_v52, 4  ;;  %v2231_v35 = vrot.slane %v9997_v37, 4  ;;  %v2232_v60 = vrot.slane %v9998_v61, 4  ;;  %v10000_v37 = vld [vmem:[%s10422_s12 + $0x30] sm:$0xff]  ;;  %v2696_v61 = vrot.slane %v9996_v52, 2 }
 0x1a3   : > { %9261 = vmatmul.msk.f32.gmra.mxu2 %vm652_vm1, %v11077_v36  ;;  %v11178_v36 = vld [vmem:[%s10422_s12 + $0x1f8] sm:$0xff] }
 0x1a4   : > { %v11163_v13 = vpop.f32.mrf.mxu3  ;;  %9212 = vmatmul.msk.f32.gmra.mxu1 %vm652_vm1, %v1067_v7  ;;  %v1869_v43 = vsel %vm1864_vm3, %v1866_v9, %v1868_v46  ;;  %v3065_v26 = vrot.slane %v11178_v36, 2  ;;  %v2233_v48 = vsel %vm1864_vm3, %v2231_v35, %v2232_v60 }
 0x1a5   : > { %17305 = vst [vmem:[#allocation62_spill] sm:$0xff] %v11163_v13 }
 0x1a6   : > { %v1542_v12 = vpop.f32.mrf.mxu2  ;;  %v3066_v9 = vsel %vm2695_vm4, %v3063_v24, %v3065_v26 }
 0x1a7   : > { %v11173_v31 = vadd.f32 %v1542_v12, %v865_v44  ;;  %v871_v13 = vpop.f32.mrf.mxu0  ;;  %v1870_v44 = vrot.slane %v10000_v37, 4  ;;  %v2234_v12 = vrot.slane %v11153_v15, 4 }
 0x1a9   : > { %17306 = vst [vmem:[#allocation63_spill] sm:$0xff] %v11173_v31  ;;  %9468 = vmatmul.msk.f32.vlgmr.msrb.gmra.mxu3 %vm652_vm1, %v3064_v21  ;;  %v11181_v7 = vpop.f32.mrf.mxu1  ;;  %v2697_v21 = vrot.slane %v10000_v37, 2  ;;  %v11199_v31 = vld [vmem:[%s10422_s12 + $0x200] sm:$0xff]  ;;  %v2235_v52 = vsel %vm1864_vm3, %v2232_v60, %v2234_v12 }
 0x1aa   : > { %17307 = vst [vmem:[#allocation64_spill] sm:$0xff] %v11181_v7  ;;  %9317 = vmatmul.msk.f32.gmra.mxu0 %vm652_vm1, %v1869_v43  ;;  %v1871_v43 = vsel %vm1864_vm3, %v1868_v46, %v1870_v44 }
 0x1ab   : > { %9262 = vmatmul.msk.f32.gmra.mxu2 %vm652_vm1, %v11103_v2  ;;  %v2698_v2 = vsel %vm2695_vm4, %v2696_v61, %v2697_v21  ;;  %v2236_v61 = vrot.slane %v11157_v0, 4 }
 0x1ac   : > { %v11184_v55 = vpop.f32.mrf.mxu3  ;;  %9366 = vmatmul.msk.f32.vlgmr.msrb.gmra.mxu1 %vm652_vm1, %v2233_v48  ;;  %v3067_v48 = vrot.slane %v11199_v31, 2 }
 0x1ad   : > { %17308 = vst [vmem:[#allocation65_spill] sm:$0xff] %v11184_v55 }
 0x1ae   : > { %v1545_v35 = vpop.f32.mrf.mxu2  ;;  %v3068_v46 = vsel %vm2695_vm4, %v3065_v26, %v3067_v48  ;;  %v2237_v26 = vsel %vm1864_vm3, %v2234_v12, %v2236_v61 }
 0x1af   : > { %v11193_v7 = vadd.f32 %v1545_v35, %v868_v63  ;;  %v874_v55 = vpop.f32.mrf.mxu0  ;;  %v10002_v63 = vld [vmem:[%s10422_s12 + $0x38] sm:$0xff] }
 0x1b0   : > { %v1872_v37 = vrot.slane %v10002_v63, 4 }
 0x1b1   : > { %17309 = vst [vmem:[#allocation66_spill] sm:$0xff] %v11193_v7  ;;  %9469 = vmatmul.msk.f32.gmra.mxu3 %vm652_vm1, %v3066_v9  ;;  %v11202_v24 = vpop.f32.mrf.mxu1  ;;  %v2699_v9 = vrot.slane %v10002_v63, 2 }
 0x1b2   : > { %17310 = vst [vmem:[#allocation67_spill] sm:$0xff] %v11202_v24  ;;  %9318 = vmatmul.msk.f32.gmra.mxu0 %vm652_vm1, %v1871_v43  ;;  %v1873_v43 = vsel %vm1864_vm3, %v1870_v44, %v1872_v37 }
 0x1b3   : > { %9418 = vmatmul.msk.f32.vlgmr.msra.gmra.mxu2 %vm652_vm1, %v2698_v2  ;;  %v2700_v2 = vsel %vm2695_vm4, %v2697_v21, %v2699_v9 }
 0x1b4   : > { %v11205_v15 = vpop.f32.mrf.mxu3  ;;  %9367 = vmatmul.msk.f32.gmra.mxu1 %vm652_vm1, %v2235_v52 }
 0x1b5   : > { %17311 = vst [vmem:[#allocation68_spill] sm:$0xff] %v11205_v15  ;;  %v11219_v15 = vld [vmem:[%s10422_s12 + $0x208] sm:$0xff] }
 0x1b6   : > { %v1548_v35 = vpop.f32.mrf.mxu2  ;;  %v3069_v52 = vrot.slane %v11219_v15, 2 }
 0x1b7   : > { %v11213_v24 = vadd.f32 %v1548_v35, %v871_v13  ;;  %v877_v60 = vpop.f32.mrf.mxu0  ;;  %v10004_v13 = vld [vmem:[%s10422_s12 + $0x40] sm:$0xff] }
 0x1b8   : > { %v1874_v63 = vrot.slane %v10004_v13, 4  ;;  %v3070_v44 = vsel %vm2695_vm4, %v3067_v48, %v3069_v52  ;;  %v2701_v21 = vrot.slane %v10004_v13, 2 }
 0x1b9   : > { %17312 = vst [vmem:[#allocation69_spill] sm:$0xff] %v11213_v24  ;;  %9470 = vmatmul.msk.f32.gmra.mxu3 %vm652_vm1, %v3068_v46  ;;  %v11222_v7 = vpop.f32.mrf.mxu1  ;;  %v2238_v46 = vrot.slane %v11178_v36, 4 }
 0x1ba   : > { %17313 = vst [vmem:[#allocation70_spill] sm:$0xff] %v11222_v7  ;;  %9319 = vmatmul.msk.f32.gmra.mxu0 %vm652_vm1, %v1873_v43  ;;  %v1875_v43 = vsel %vm1864_vm3, %v1872_v37, %v1874_v63 }
 0x1bb   : > { %9419 = vmatmul.msk.f32.gmra.mxu2 %vm652_vm1, %v2700_v2  ;;  %v2702_v2 = vsel %vm2695_vm4, %v2699_v9, %v2701_v21  ;;  %v2239_v48 = vsel %vm1864_vm3, %v2236_v61, %v2238_v46 }
 0x1bc   : > { %v11225_v0 = vpop.f32.mrf.mxu3  ;;  %9368 = vmatmul.msk.f32.gmra.mxu1 %vm652_vm1, %v2237_v26 }
 0x1bd   : > { %17314 = vst [vmem:[#allocation71_spill] sm:$0xff] %v11225_v0  ;;  %v11239_v0 = vld [vmem:[%s10422_s12 + $0x210] sm:$0xff] }
 0x1be   : > { %v1551_v35 = vpop.f32.mrf.mxu2  ;;  %v3071_v26 = vrot.slane %v11239_v0, 2 }
 0x1bf   : > { %v11233_v7 = vadd.f32 %v1551_v35, %v874_v55  ;;  %v880_v12 = vpop.f32.mrf.mxu0  ;;  %v10006_v55 = vld [vmem:[%s10422_s12 + $0x48] sm:$0xff] }
 0x1c0   : > { %v1876_v36 = vrot.slane %v10006_v55, 4  ;;  %v3072_v37 = vsel %vm2695_vm4, %v3069_v52, %v3071_v26  ;;  %v2703_v9 = vrot.slane %v10006_v55, 2 }
 0x1c1   : > { %17315 = vst [vmem:[#allocation72_spill] sm:$0xff] %v11233_v7  ;;  %9471 = vmatmul.msk.f32.gmra.mxu3 %vm652_vm1, %v3070_v44  ;;  %v11242_v24 = vpop.f32.mrf.mxu1  ;;  %v2240_v44 = vrot.slane %v11199_v31, 4 }
 0x1c2   : > { %17316 = vst [vmem:[#allocation73_spill] sm:$0xff] %v11242_v24  ;;  %9320 = vmatmul.msk.f32.gmra.mxu0 %vm652_vm1, %v1875_v43  ;;  %v1877_v43 = vsel %vm1864_vm3, %v1874_v63, %v1876_v36 }
 0x1c3   : > { %9420 = vmatmul.msk.f32.gmra.mxu2 %vm652_vm1, %v2702_v2  ;;  %v9518_v2 = vld [vmem:[%s17246_s1 + $0x48] sm:$0x7f] }
 0x1c4   : > { %v11245_v13 = vpop.f32.mrf.mxu3  ;;  %9369 = vmatmul.msk.f32.gmra.mxu1 %vm652_vm1, %v2239_v48  ;;  %v2704_v48 = vsel %vm2695_vm4, %v2701_v21, %v2703_v9  ;;  %9519 = vmatpush.msk.msra.mxu0 %vm751_vm0, %v9518_v2  ;;  %v10008_v21 = vld [vmem:[%s10422_s12 + $0x50] sm:$0xff] }
 0x1c5   : > { %17317 = vst [vmem:[#allocation74_spill] sm:$0xff] %v11245_v13  ;;  %v11262_v13 = vld [vmem:[%s10422_s12 + $0x218] sm:$0xff]  ;;  %9569 = vmatpush.msk.msra.mxu1 %vm751_vm0, %v9518_v2  ;;  %v1878_v55 = vrot.slane %v10008_v21, 4  ;;  %v2242_v2 = vrot.slane %v11219_v15, 4 }
 0x1c6   : > { %v1554_v35 = vpop.f32.mrf.mxu2  ;;  %v3073_v52 = vrot.slane %v11262_v13, 2 }
 0x1c7   : > { %v11253_v24 = vadd.f32 %v1554_v35, %v877_v60  ;;  %v883_v61 = vpop.f32.mrf.mxu0  ;;  %v2241_v60 = vsel %vm1864_vm3, %v2238_v46, %v2240_v44  ;;  %v2705_v35 = vrot.slane %v10008_v21, 2  ;;  %v2244_v21 = vrot.slane %v11239_v0, 4 }
 0x1c9   : > { %17318 = vst [vmem:[#allocation75_spill] sm:$0xff] %v11253_v24  ;;  %9472 = vmatmul.msk.f32.gmra.mxu3 %vm652_vm1, %v3072_v37  ;;  %v11267_v31 = vpop.f32.mrf.mxu1  ;;  %v3074_v37 = vsel %vm2695_vm4, %v3071_v26, %v3073_v52  ;;  %v2243_v26 = vsel %vm1864_vm3, %v2240_v44, %v2242_v2 }
 0x1ca   : > { %17319 = vst [vmem:[#allocation76_spill] sm:$0xff] %v11267_v31  ;;  %9321 = vmatmul.msk.f32.gmra.mxu0 %vm652_vm1, %v1877_v43  ;;  %v1879_v43 = vsel %vm1864_vm3, %v1876_v36, %v1878_v55 }
 0x1cb   : > { %9421 = vmatmul.msk.f32.gmra.mxu2 %vm652_vm1, %v2704_v48  ;;  %v2706_v48 = vsel %vm2695_vm4, %v2703_v9, %v2705_v35 }
 0x1cc   : > { %v11270_v63 = vpop.f32.mrf.mxu3  ;;  %9370 = vmatmul.msk.f32.gmra.mxu1 %vm652_vm1, %v2241_v60 }
 0x1cd   : > { %17320 = vst [vmem:[#allocation77_spill] sm:$0xff] %v11270_v63  ;;  %v11284_v63 = vld [vmem:[%s10422_s12 + $0x220] sm:$0xff] }
 0x1ce   : > { %v1557_v31 = vpop.f32.mrf.mxu2  ;;  %v3075_v60 = vrot.slane %v11284_v63, 2 }
 0x1cf   : > { %v11278_v24 = vadd.f32 %v1557_v31, %v880_v12  ;;  %v886_v46 = vpop.f32.mrf.mxu0  ;;  %v10010_v12 = vld [vmem:[%s10422_s12 + $0x58] sm:$0xff] }
 0x1d0   : > { %v1880_v31 = vrot.slane %v10010_v12, 4  ;;  %v3076_v36 = vsel %vm2695_vm4, %v3073_v52, %v3075_v60  ;;  %v2707_v9 = vrot.slane %v10010_v12, 2  ;;  %v2245_v52 = vsel %vm1864_vm3, %v2242_v2, %v2244_v21 }
 0x1d1   : > { %17321 = vst [vmem:[#allocation78_spill] sm:$0xff] %v11278_v24  ;;  %9473 = vmatmul.msk.f32.gmra.mxu3 %vm652_vm1, %v3074_v37  ;;  %v11287_v7 = vpop.f32.mrf.mxu1 }
 0x1d2   : > { %17322 = vst [vmem:[#allocation79_spill] sm:$0xff] %v11287_v7  ;;  %9322 = vmatmul.msk.f32.gmra.mxu0 %vm652_vm1, %v1879_v43  ;;  %v1881_v43 = vsel %vm1864_vm3, %v1878_v55, %v1880_v31 }
 0x1d3   : > { %9422 = vmatmul.msk.f32.gmra.mxu2 %vm652_vm1, %v2706_v48  ;;  %v2708_v48 = vsel %vm2695_vm4, %v2705_v35, %v2707_v9 }
 0x1d4   : > { %v11290_v15 = vpop.f32.mrf.mxu3  ;;  %9371 = vmatmul.msk.f32.gmra.mxu1 %vm652_vm1, %v2243_v26 }
 0x1d5   : > { %17323 = vst [vmem:[#allocation80_spill] sm:$0xff] %v11290_v15  ;;  %v11304_v15 = vld [vmem:[%s10422_s12 + $0x228] sm:$0xff] }
 0x1d6   : > { %v1560_v37 = vpop.f32.mrf.mxu2  ;;  %v3077_v26 = vrot.slane %v11304_v15, 2 }
 0x1d7   : > { %v11298_v7 = vadd.f32 %v1560_v37, %v883_v61  ;;  %v889_v44 = vpop.f32.mrf.mxu0  ;;  %v10012_v61 = vld [vmem:[%s10422_s12 + $0x60] sm:$0xff] }
 0x1d8   : > { %v1882_v12 = vrot.slane %v10012_v61, 4  ;;  %v3078_v55 = vsel %vm2695_vm4, %v3075_v60, %v3077_v26  ;;  %v2709_v35 = vrot.slane %v10012_v61, 2 }
 0x1d9   : > { %17324 = vst [vmem:[#allocation81_spill] sm:$0xff] %v11298_v7  ;;  %9474 = vmatmul.msk.f32.gmra.mxu3 %vm652_vm1, %v3076_v36  ;;  %v11307_v24 = vpop.f32.mrf.mxu1  ;;  %v2246_v36 = vrot.slane %v11262_v13, 4 }
 0x1da   : > { %17325 = vst [vmem:[#allocation82_spill] sm:$0xff] %v11307_v24  ;;  %9323 = vmatmul.msk.f32.gmra.mxu0 %vm652_vm1, %v1881_v43  ;;  %v1883_v43 = vsel %vm1864_vm3, %v1880_v31, %v1882_v12 }
 0x1db   : > { %9423 = vmatmul.msk.f32.gmra.mxu2 %vm652_vm1, %v2708_v48  ;;  %v2710_v48 = vsel %vm2695_vm4, %v2707_v9, %v2709_v35  ;;  %v2247_v60 = vsel %vm1864_vm3, %v2244_v21, %v2246_v36 }
 0x1dc   : > { %v11310_v0 = vpop.f32.mrf.mxu3  ;;  %9372 = vmatmul.msk.f32.gmra.mxu1 %vm652_vm1, %v2245_v52 }
 0x1dd   : > { %17326 = vst [vmem:[#allocation83_spill] sm:$0xff] %v11310_v0  ;;  %v11324_v0 = vld [vmem:[%s10422_s12 + $0x230] sm:$0xff] }
 0x1de   : > { %v1563_v37 = vpop.f32.mrf.mxu2  ;;  %v3079_v52 = vrot.slane %v11324_v0, 2 }
 0x1df   : > { %v11318_v24 = vadd.f32 %v1563_v37, %v886_v46  ;;  %v892_v2 = vpop.f32.mrf.mxu0  ;;  %v10014_v46 = vld [vmem:[%s10422_s12 + $0x68] sm:$0xff] }
 0x1e0   : > { %v1884_v61 = vrot.slane %v10014_v46, 4  ;;  %v3080_v31 = vsel %vm2695_vm4, %v3077_v26, %v3079_v52  ;;  %v2711_v9 = vrot.slane %v10014_v46, 2 }
 0x1e1   : > { %17327 = vst [vmem:[#allocation84_spill] sm:$0xff] %v11318_v24  ;;  %9475 = vmatmul.msk.f32.gmra.mxu3 %vm652_vm1, %v3078_v55  ;;  %v11327_v7 = vpop.f32.mrf.mxu1  ;;  %v2248_v55 = vrot.slane %v11284_v63, 4 }
 0x1e2   : > { %17328 = vst [vmem:[#allocation85_spill] sm:$0xff] %v11327_v7  ;;  %9324 = vmatmul.msk.f32.gmra.mxu0 %vm652_vm1, %v1883_v43  ;;  %v1885_v43 = vsel %vm1864_vm3, %v1882_v12, %v1884_v61 }
 0x1e3   : > { %9424 = vmatmul.msk.f32.gmra.mxu2 %vm652_vm1, %v2710_v48  ;;  %v2712_v48 = vsel %vm2695_vm4, %v2709_v35, %v2711_v9  ;;  %v2249_v26 = vsel %vm1864_vm3, %v2246_v36, %v2248_v55 }
 0x1e4   : > { %v11330_v13 = vpop.f32.mrf.mxu3  ;;  %9373 = vmatmul.msk.f32.gmra.mxu1 %vm652_vm1, %v2247_v60 }
 0x1e5   : > { %17329 = vst [vmem:[#allocation86_spill] sm:$0xff] %v11330_v13  ;;  %v11344_v13 = vld [vmem:[%s10422_s12 + $0x238] sm:$0xff] }
 0x1e6   : > { %v1566_v37 = vpop.f32.mrf.mxu2  ;;  %v3081_v60 = vrot.slane %v11344_v13, 2 }
 0x1e7   : > { %v11338_v7 = vadd.f32 %v1566_v37, %v889_v44  ;;  %v895_v21 = vpop.f32.mrf.mxu0  ;;  %v10016_v44 = vld [vmem:[%s10422_s12 + $0x70] sm:$0xff] }
 0x1e8   : > { %v1886_v46 = vrot.slane %v10016_v44, 4  ;;  %v3082_v12 = vsel %vm2695_vm4, %v3079_v52, %v3081_v60  ;;  %v2713_v35 = vrot.slane %v10016_v44, 2 }
 0x1e9   : > { %17330 = vst [vmem:[#allocation87_spill] sm:$0xff] %v11338_v7  ;;  %9476 = vmatmul.msk.f32.gmra.mxu3 %vm652_vm1, %v3080_v31  ;;  %v11347_v24 = vpop.f32.mrf.mxu1  ;;  %v2250_v31 = vrot.slane %v11304_v15, 4 }
 0x1ea   : > { %17331 = vst [vmem:[#allocation88_spill] sm:$0xff] %v11347_v24  ;;  %9325 = vmatmul.msk.f32.gmra.mxu0 %vm652_vm1, %v1885_v43  ;;  %v1887_v43 = vsel %vm1864_vm3, %v1884_v61, %v1886_v46 }
 0x1eb   : > { %9425 = vmatmul.msk.f32.gmra.mxu2 %vm652_vm1, %v2712_v48  ;;  %v2714_v48 = vsel %vm2695_vm4, %v2711_v9, %v2713_v35  ;;  %v2251_v52 = vsel %vm1864_vm3, %v2248_v55, %v2250_v31 }
 0x1ec   : > { %v11350_v63 = vpop.f32.mrf.mxu3  ;;  %9374 = vmatmul.msk.f32.gmra.mxu1 %vm652_vm1, %v2249_v26 }
 0x1ed   : > { %17332 = vst [vmem:[#allocation89_spill] sm:$0xff] %v11350_v63  ;;  %v11364_v63 = vld [vmem:[%s10422_s12 + $0x240] sm:$0xff] }
 0x1ee   : > { %v1569_v37 = vpop.f32.mrf.mxu2  ;;  %v3083_v26 = vrot.slane %v11364_v63, 2 }
 0x1ef   : > { %v11358_v24 = vadd.f32 %v1569_v37, %v892_v2  ;;  %v898_v36 = vpop.f32.mrf.mxu0  ;;  %v10018_v2 = vld [vmem:[%s10422_s12 + $0x78] sm:$0xff] }
 0x1f0   : > { %v1888_v44 = vrot.slane %v10018_v2, 4  ;;  %v3084_v61 = vsel %vm2695_vm4, %v3081_v60, %v3083_v26  ;;  %v2715_v9 = vrot.slane %v10018_v2, 2 }
 0x1f1   : > { %17333 = vst [vmem:[#allocation90_spill] sm:$0xff] %v11358_v24  ;;  %9477 = vmatmul.msk.f32.gmra.mxu3 %vm652_vm1, %v3082_v12  ;;  %v11367_v7 = vpop.f32.mrf.mxu1  ;;  %v2252_v12 = vrot.slane %v11324_v0, 4 }
 0x1f2   : > { %17334 = vst [vmem:[#allocation91_spill] sm:$0xff] %v11367_v7  ;;  %9326 = vmatmul.msk.f32.gmra.mxu0 %vm652_vm1, %v1887_v43  ;;  %v1889_v43 = vsel %vm1864_vm3, %v1886_v46, %v1888_v44 }
 0x1f3   : > { %9426 = vmatmul.msk.f32.gmra.mxu2 %vm652_vm1, %v2714_v48  ;;  %v2716_v48 = vsel %vm2695_vm4, %v2713_v35, %v2715_v9  ;;  %v2253_v60 = vsel %vm1864_vm3, %v2250_v31, %v2252_v12 }
 0x1f4   : > { %v11370_v15 = vpop.f32.mrf.mxu3  ;;  %9375 = vmatmul.msk.f32.gmra.mxu1 %vm652_vm1, %v2251_v52 }
 0x1f5   : > { %17335 = vst [vmem:[#allocation92_spill] sm:$0xff] %v11370_v15  ;;  %v11384_v15 = vld [vmem:[%s10422_s12 + $0x248] sm:$0xff] }
 0x1f6   : > { %v1572_v37 = vpop.f32.mrf.mxu2  ;;  %v3085_v52 = vrot.slane %v11384_v15, 2 }
 0x1f7   : > { %v11378_v7 = vadd.f32 %v1572_v37, %v895_v21  ;;  %v901_v55 = vpop.f32.mrf.mxu0  ;;  %v10020_v21 = vld [vmem:[%s10422_s12 + $0x80] sm:$0xff] }
 0x1f8   : > { %v1890_v2 = vrot.slane %v10020_v21, 4  ;;  %v3086_v46 = vsel %vm2695_vm4, %v3083_v26, %v3085_v52  ;;  %v2717_v35 = vrot.slane %v10020_v21, 2 }
 0x1f9   : > { %17336 = vst [vmem:[#allocation93_spill] sm:$0xff] %v11378_v7  ;;  %9478 = vmatmul.msk.f32.gmra.mxu3 %vm652_vm1, %v3084_v61  ;;  %v11387_v24 = vpop.f32.mrf.mxu1  ;;  %v2254_v61 = vrot.slane %v11344_v13, 4 }
 0x1fa   : > { %17337 = vst [vmem:[#allocation94_spill] sm:$0xff] %v11387_v24  ;;  %9327 = vmatmul.msk.f32.gmra.mxu0 %vm652_vm1, %v1889_v43  ;;  %v1891_v43 = vsel %vm1864_vm3, %v1888_v44, %v1890_v2 }
 0x1fb   : > { %9427 = vmatmul.msk.f32.gmra.mxu2 %vm652_vm1, %v2716_v48  ;;  %v2718_v48 = vsel %vm2695_vm4, %v2715_v9, %v2717_v35  ;;  %v2255_v26 = vsel %vm1864_vm3, %v2252_v12, %v2254_v61 }
 0x1fc   : > { %v11390_v0 = vpop.f32.mrf.mxu3  ;;  %9376 = vmatmul.msk.f32.gmra.mxu1 %vm652_vm1, %v2253_v60 }
 0x1fd   : > { %17338 = vst [vmem:[#allocation95_spill] sm:$0xff] %v11390_v0  ;;  %v11404_v0 = vld [vmem:[%s10422_s12 + $0x250] sm:$0xff] }
 0x1fe   : > { %v1575_v37 = vpop.f32.mrf.mxu2  ;;  %v3087_v60 = vrot.slane %v11404_v0, 2 }
 0x1ff   : > { %v11398_v24 = vadd.f32 %v1575_v37, %v898_v36  ;;  %v904_v31 = vpop.f32.mrf.mxu0  ;;  %v10022_v36 = vld [vmem:[%s10422_s12 + $0x88] sm:$0xff] }
 0x200   : > { %v1892_v21 = vrot.slane %v10022_v36, 4  ;;  %v3088_v44 = vsel %vm2695_vm4, %v3085_v52, %v3087_v60  ;;  %v2719_v9 = vrot.slane %v10022_v36, 2 }
 0x201   : > { %17339 = vst [vmem:[#allocation96_spill] sm:$0xff] %v11398_v24  ;;  %9479 = vmatmul.msk.f32.gmra.mxu3 %vm652_vm1, %v3086_v46  ;;  %v11407_v7 = vpop.f32.mrf.mxu1  ;;  %v2256_v46 = vrot.slane %v11364_v63, 4 }
 0x202   : > { %17340 = vst [vmem:[#allocation97_spill] sm:$0xff] %v11407_v7  ;;  %9328 = vmatmul.msk.f32.gmra.mxu0 %vm652_vm1, %v1891_v43  ;;  %v1893_v43 = vsel %vm1864_vm3, %v1890_v2, %v1892_v21 }
 0x203   : > { %9428 = vmatmul.msk.f32.gmra.mxu2 %vm652_vm1, %v2718_v48  ;;  %v2720_v48 = vsel %vm2695_vm4, %v2717_v35, %v2719_v9  ;;  %v2257_v52 = vsel %vm1864_vm3, %v2254_v61, %v2256_v46 }
 0x204   : > { %v11410_v13 = vpop.f32.mrf.mxu3  ;;  %9377 = vmatmul.msk.f32.gmra.mxu1 %vm652_vm1, %v2255_v26 }
 0x205   : > { %17341 = vst [vmem:[#allocation98_spill] sm:$0xff] %v11410_v13  ;;  %v11424_v13 = vld [vmem:[%s10422_s12 + $0x258] sm:$0xff] }
 0x206   : > { %v1578_v37 = vpop.f32.mrf.mxu2  ;;  %v3089_v26 = vrot.slane %v11424_v13, 2 }
 0x207   : > { %v11418_v7 = vadd.f32 %v1578_v37, %v901_v55  ;;  %v907_v12 = vpop.f32.mrf.mxu0  ;;  %v10024_v55 = vld [vmem:[%s10422_s12 + $0x90] sm:$0xff] }
 0x208   : > { %v1894_v36 = vrot.slane %v10024_v55, 4  ;;  %v3090_v2 = vsel %vm2695_vm4, %v3087_v60, %v3089_v26  ;;  %v2721_v35 = vrot.slane %v10024_v55, 2 }
 0x209   : > { %17342 = vst [vmem:[#allocation99_spill] sm:$0xff] %v11418_v7  ;;  %9480 = vmatmul.msk.f32.gmra.mxu3 %vm652_vm1, %v3088_v44  ;;  %v11427_v24 = vpop.f32.mrf.mxu1  ;;  %v2258_v44 = vrot.slane %v11384_v15, 4 }
 0x20a   : > { %17343 = vst [vmem:[#allocation100_spill] sm:$0xff] %v11427_v24  ;;  %9329 = vmatmul.msk.f32.gmra.mxu0 %vm652_vm1, %v1893_v43  ;;  %v1895_v43 = vsel %vm1864_vm3, %v1892_v21, %v1894_v36 }
 0x20b   : > { %9429 = vmatmul.msk.f32.gmra.mxu2 %vm652_vm1, %v2720_v48  ;;  %v2722_v48 = vsel %vm2695_vm4, %v2719_v9, %v2721_v35  ;;  %v2259_v60 = vsel %vm1864_vm3, %v2256_v46, %v2258_v44 }
 0x20c   : > { %v11430_v63 = vpop.f32.mrf.mxu3  ;;  %9378 = vmatmul.msk.f32.gmra.mxu1 %vm652_vm1, %v2257_v52 }
 0x20d   : > { %17344 = vst [vmem:[#allocation101_spill] sm:$0xff] %v11430_v63  ;;  %v11444_v63 = vld [vmem:[%s10422_s12 + $0x260] sm:$0xff] }
 0x20e   : > { %v1581_v37 = vpop.f32.mrf.mxu2  ;;  %v3091_v52 = vrot.slane %v11444_v63, 2 }
 0x20f   : > { %v11438_v24 = vadd.f32 %v1581_v37, %v904_v31  ;;  %v910_v61 = vpop.f32.mrf.mxu0  ;;  %v10026_v31 = vld [vmem:[%s10422_s12 + $0x98] sm:$0xff] }
 0x210   : > { %v1896_v55 = vrot.slane %v10026_v31, 4  ;;  %v3092_v21 = vsel %vm2695_vm4, %v3089_v26, %v3091_v52  ;;  %v2723_v9 = vrot.slane %v10026_v31, 2 }
 0x211   : > { %17345 = vst [vmem:[#allocation102_spill] sm:$0xff] %v11438_v24  ;;  %9481 = vmatmul.msk.f32.gmra.mxu3 %vm652_vm1, %v3090_v2  ;;  %v11447_v7 = vpop.f32.mrf.mxu1  ;;  %v2260_v2 = vrot.slane %v11404_v0, 4 }
 0x212   : > { %17346 = vst [vmem:[#allocation103_spill] sm:$0xff] %v11447_v7  ;;  %9330 = vmatmul.msk.f32.gmra.mxu0 %vm652_vm1, %v1895_v43  ;;  %v1897_v43 = vsel %vm1864_vm3, %v1894_v36, %v1896_v55 }
 0x213   : > { %9430 = vmatmul.msk.f32.gmra.mxu2 %vm652_vm1, %v2722_v48  ;;  %v2724_v48 = vsel %vm2695_vm4, %v2721_v35, %v2723_v9  ;;  %v2261_v26 = vsel %vm1864_vm3, %v2258_v44, %v2260_v2 }
 0x214   : > { %v11450_v15 = vpop.f32.mrf.mxu3  ;;  %9379 = vmatmul.msk.f32.gmra.mxu1 %vm652_vm1, %v2259_v60 }
 0x215   : > { %17347 = vst [vmem:[#allocation104_spill] sm:$0xff] %v11450_v15  ;;  %v11464_v15 = vld [vmem:[%s10422_s12 + $0x268] sm:$0xff] }
 0x216   : > { %v1584_v37 = vpop.f32.mrf.mxu2  ;;  %v3093_v60 = vrot.slane %v11464_v15, 2 }
 0x217   : > { %v11458_v7 = vadd.f32 %v1584_v37, %v907_v12  ;;  %v913_v46 = vpop.f32.mrf.mxu0  ;;  %v10028_v12 = vld [vmem:[%s10422_s12 + $0xa0] sm:$0xff] }
 0x218   : > { %v1898_v31 = vrot.slane %v10028_v12, 4  ;;  %v3094_v36 = vsel %vm2695_vm4, %v3091_v52, %v3093_v60  ;;  %v2725_v35 = vrot.slane %v10028_v12, 2 }
 0x219   : > { %17348 = vst [vmem:[#allocation105_spill] sm:$0xff] %v11458_v7  ;;  %9482 = vmatmul.msk.f32.gmra.mxu3 %vm652_vm1, %v3092_v21  ;;  %v11467_v24 = vpop.f32.mrf.mxu1  ;;  %v2262_v21 = vrot.slane %v11424_v13, 4  ;;  %v10030_v13 = vld [vmem:[%s10422_s12 + $0xa8] sm:$0xff] }
 0x21a   : > { %17349 = vst [vmem:[#allocation106_spill] sm:$0xff] %v11467_v24  ;;  %9331 = vmatmul.msk.f32.gmra.mxu0 %vm652_vm1, %v1897_v43  ;;  %v1899_v43 = vsel %vm1864_vm3, %v1896_v55, %v1898_v31 }
 0x21b   : > { %9431 = vmatmul.msk.f32.gmra.mxu2 %vm652_vm1, %v2724_v48  ;;  %v2726_v48 = vsel %vm2695_vm4, %v2723_v9, %v2725_v35  ;;  %v2263_v52 = vsel %vm1864_vm3, %v2260_v2, %v2262_v21  ;;  %v2727_v9 = vrot.slane %v10030_v13, 2 }
 0x21c   : > { %v11470_v0 = vpop.f32.mrf.mxu3  ;;  %9380 = vmatmul.msk.f32.gmra.mxu1 %vm652_vm1, %v2261_v26 }
 0x21d   : > { %17350 = vst [vmem:[#allocation107_spill] sm:$0xff] %v11470_v0  ;;  %v11484_v0 = vld [vmem:[%s10422_s12 + $0x270] sm:$0xff] }
 0x21e   : > { %v1587_v37 = vpop.f32.mrf.mxu2  ;;  %v3095_v26 = vrot.slane %v11484_v0, 2 }
 0x21f   : > { %v11478_v24 = vadd.f32 %v1587_v37, %v910_v61  ;;  %v2082_v44 = vpop.f32.mrf.mxu0  ;;  %v1900_v61 = vrot.slane %v10030_v13, 4 }
 0x220   : > { %v3096_v55 = vsel %vm2695_vm4, %v3093_v60, %v3095_v26 }
 0x221   : > { %17351 = vst [vmem:[#allocation108_spill] sm:$0xff] %v11478_v24  ;;  %9483 = vmatmul.msk.f32.gmra.mxu3 %vm652_vm1, %v3094_v36  ;;  %v11487_v7 = vpop.f32.mrf.mxu1  ;;  %v2264_v36 = vrot.slane %v11444_v63, 4  ;;  %v17378_v24 = vld [vmem:[#allocation27_spill] sm:$0xff] }
 0x222   : > { %17352 = vst [vmem:[#allocation109_spill] sm:$0xff] %v11487_v7  ;;  %9332 = vmatmul.msk.f32.gmra.mxu0 %vm652_vm1, %v1899_v43  ;;  %v1901_v43 = vsel %vm1864_vm3, %v1898_v31, %v1900_v61  ;;  %v10032_v31 = vld [vmem:[%s10422_s12 + $0xb0] sm:$0xff] }
 0x223   : > { %9432 = vmatmul.msk.f32.gmra.mxu2 %vm652_vm1, %v2726_v48  ;;  %v1713_v48 = vadd.f32 %v10580_v59, %v10576_v57  ;;  %v2265_v13 = vsel %vm1864_vm3, %v2262_v21, %v2264_v36 }
 0x224   : > { %v11490_v12 = vpop.f32.mrf.mxu3  ;;  %9381 = vmatmul.msk.f32.gmra.mxu1 %vm652_vm1, %v2263_v52  ;;  %v2728_v52 = vsel %vm2695_vm4, %v2725_v35, %v2727_v9  ;;  %v2729_v35 = vrot.slane %v10032_v31, 2 }
 0x225   : > { %17353 = vst [vmem:[#allocation110_spill] sm:$0xff] %v11490_v12  ;;  %v11508_v12 = vld [vmem:[%s10422_s12 + $0x278] sm:$0xff] }
 0x226   : > { %v1590_v37 = vpop.f32.mrf.mxu2  ;;  %v3097_v60 = vrot.slane %v11508_v12, 2 }
 0x227   : > { %v11498_v7 = vadd.f32 %v1590_v37, %v913_v46  ;;  %v11500_v2 = vpop.f32.mrf.mxu0 }
 0x228   : > { %v3098_v59 = vsel %vm2695_vm4, %v3095_v26, %v3097_v60 }
 0x229   : > { %17354 = vst [vmem:[#allocation111_spill] sm:$0xff] %v11498_v7  ;;  %9484 = vmatmul.msk.f32.gmra.mxu3 %vm652_vm1, %v3096_v55  ;;  %v2445_v63 = vpop.f32.mrf.mxu1  ;;  %v1902_v55 = vrot.slane %v10032_v31, 4  ;;  %v2266_v7 = vrot.slane %v11464_v15, 4 }
 0x22a   : > { %v2641_v46 = vadd.f32 %v2445_v63, %v1713_v48  ;;  %9333 = vmatmul.msk.f32.gmra.mxu0 %vm652_vm1, %v1901_v43  ;;  %v2730_v63 = vsel %vm2695_vm4, %v2727_v9, %v2729_v35 }
 0x22b   : > { %9433 = vmatmul.msk.f32.gmra.mxu2 %vm652_vm1, %v2728_v52  ;;  %v1903_v43 = vsel %vm1864_vm3, %v1900_v61, %v1902_v55  ;;  %v1716_v52 = vadd.f32 %v10597_v5, %v10593_v3  ;;  %v2267_v15 = vsel %vm1864_vm3, %v2264_v36, %v2266_v7  ;;  %v10034_v61 = vld [vmem:[%s10422_s12 + $0xb8] sm:$0xff]  ;;  %v2268_v36 = vrot.slane %v11484_v0, 4 }
 0x22c   : > { %v3276_v37 = vpop.f32.mrf.mxu3  ;;  %9382 = vmatmul.msk.f32.gmra.mxu1 %vm652_vm1, %v2265_v13  ;;  %v11530_v13 = vld [vmem:[%s10422_s12 + $0x280] sm:$0xff]  ;;  %v2731_v9 = vrot.slane %v10034_v61, 2 }
 0x22d   : > { %v11516_v57 = vadd.f32 %v3276_v37, %v2641_v46  ;;  %v3099_v26 = vrot.slane %v11530_v13, 2 }
 0x22e   : > { %v11520_v21 = vpop.f32.mrf.mxu2 }
 0x22f   : > { %17355 = vst [vmem:[#allocation112_spill] sm:$0xff] %v11520_v21  ;;  %v11522_v48 = vpop.f32.mrf.mxu0  ;;  %v3100_v5 = vsel %vm2695_vm4, %v3097_v60, %v3099_v26  ;;  %v2592_v21 = vadd.f32 %v2082_v44, %v10603_v11  ;;  %v2732_v60 = vsel %vm2695_vm4, %v2729_v35, %v2731_v9  ;;  %v2269_v44 = vsel %vm1864_vm3, %v2266_v7, %v2268_v36 }
 0x230   : > { %v2270_v7 = vrot.slane %v11508_v12, 4 }
 0x231   : > { %9485 = vmatmul.msk.f32.gmra.mxu3 %vm652_vm1, %v3098_v59  ;;  %v2448_v46 = vpop.f32.mrf.mxu1  ;;  %v1904_v59 = vrot.slane %v10034_v61, 4 }
 0x232   : > { %v2642_v37 = vadd.f32 %v2448_v46, %v1716_v52  ;;  %9334 = vmatmul.msk.f32.gmra.mxu0 %vm652_vm1, %v1903_v43 }
 0x233   : > { %9434 = vmatmul.msk.f32.gmra.mxu2 %vm652_vm1, %v2730_v63  ;;  %v1905_v63 = vsel %vm1864_vm3, %v1902_v55, %v1904_v59  ;;  %v10036_v55 = vld [vmem:[%s10422_s12 + $0xc0] sm:$0xff] }
 0x234   : > { %v3279_v31 = vpop.f32.mrf.mxu3  ;;  %9383 = vmatmul.msk.f32.gmra.mxu1 %vm652_vm1, %v2267_v15  ;;  %v1719_v15 = vadd.f32 %v10614_v18, %v10610_v16  ;;  %v1906_v61 = vrot.slane %v10036_v55, 4  ;;  %v2733_v35 = vrot.slane %v10036_v55, 2 }
 0x235   : > { %v11538_v3 = vadd.f32 %v3279_v31, %v2642_v37  ;;  %v11553_v37 = vld [vmem:[%s10422_s12 + $0x288] sm:$0xff] }
 0x236   : > { %v2913_v52 = vpop.f32.mrf.mxu2  ;;  %v3101_v11 = vrot.slane %v11553_v37, 2 }
 0x237   : > { %v11543_v43 = vadd.f32 %v2913_v52, %v2592_v21  ;;  %v11545_v46 = vpop.f32.mrf.mxu0 }
 0x238   : > { %v3102_v18 = vsel %vm2695_vm4, %v3099_v26, %v3101_v11  ;;  %v2734_v26 = vsel %vm2695_vm4, %v2731_v9, %v2733_v35 }
 0x239   : > { %9486 = vmatmul.msk.f32.gmra.mxu3 %vm652_vm1, %v3100_v5  ;;  %v2451_v0 = vpop.f32.mrf.mxu1  ;;  %v2593_v5 = vadd.f32 %v11500_v2, %v10620_v23  ;;  %v2271_v2 = vsel %vm1864_vm3, %v2268_v36, %v2270_v7  ;;  %v2272_v36 = vrot.slane %v11530_v13, 4 }
 0x23a   : > { %v2643_v21 = vadd.f32 %v2451_v0, %v1719_v15  ;;  %9335 = vmatmul.msk.f32.gmra.mxu0 %vm652_vm1, %v1905_v63  ;;  %v1722_v0 = vadd.f32 %v10631_v29, %v10627_v27 }
 0x23b   : > { %9435 = vmatmul.msk.f32.gmra.mxu2 %vm652_vm1, %v2732_v60  ;;  %v1907_v60 = vsel %vm1864_vm3, %v1904_v59, %v1906_v61  ;;  %v10038_v59 = vld [vmem:[%s10422_s12 + $0xc8] sm:$0xff]  ;;  %v2273_v13 = vsel %vm1864_vm3, %v2270_v7, %v2272_v36  ;;  %v2274_v7 = vrot.slane %v11553_v37, 4 }
 0x23c   : > { %v3282_v31 = vpop.f32.mrf.mxu3  ;;  %9384 = vmatmul.msk.f32.gmra.mxu1 %vm652_vm1, %v2269_v44  ;;  %v11577_v44 = vld [vmem:[%s10422_s12 + $0x290] sm:$0xff]  ;;  %v1908_v55 = vrot.slane %v10038_v59, 4  ;;  %v2735_v9 = vrot.slane %v10038_v59, 2  ;;  %v2595_v59 = vadd.f32 %v11545_v46, %v10655_v45 }
 0x23d   : > { %v11561_v16 = vadd.f32 %v3282_v31, %v2643_v21  ;;  %v3103_v23 = vrot.slane %v11577_v44, 2  ;;  %v2275_v37 = vsel %vm1864_vm3, %v2272_v36, %v2274_v7  ;;  %v2276_v36 = vrot.slane %v11577_v44, 4 }
 0x23e   : > { %v2916_v52 = vpop.f32.mrf.mxu2 }
 0x23f   : > { %v11567_v63 = vadd.f32 %v2916_v52, %v2593_v5  ;;  %v11569_v15 = vpop.f32.mrf.mxu0  ;;  %v3104_v29 = vsel %vm2695_vm4, %v3101_v11, %v3103_v23  ;;  %v2736_v11 = vsel %vm2695_vm4, %v2733_v35, %v2735_v9  ;;  %v2277_v44 = vsel %vm1864_vm3, %v2274_v7, %v2276_v36 }
 0x241   : > { %9487 = vmatmul.msk.f32.gmra.mxu3 %vm652_vm1, %v3102_v18  ;;  %v2454_v12 = vpop.f32.mrf.mxu1  ;;  %v2594_v18 = vadd.f32 %v11522_v48, %v10637_v34 }
 0x242   : > { %v2644_v21 = vadd.f32 %v2454_v12, %v1722_v0  ;;  %9336 = vmatmul.msk.f32.gmra.mxu0 %vm652_vm1, %v1907_v60  ;;  %v1909_v0 = vsel %vm1864_vm3, %v1906_v61, %v1908_v55  ;;  %v11601_v12 = vld [vmem:[%s10422_s12 + $0x298] sm:$0xff]  ;;  %v10040_v61 = vld [vmem:[%s10422_s12 + $0xd0] sm:$0xff] }
 0x243   : > { %9436 = vmatmul.msk.f32.gmra.mxu2 %vm652_vm1, %v2734_v26  ;;  %v1725_v26 = vadd.f32 %v10648_v40, %v10644_v38  ;;  %v3105_v34 = vrot.slane %v11601_v12, 2  ;;  %v2737_v35 = vrot.slane %v10040_v61, 2  ;;  %v2278_v7 = vrot.slane %v11601_v12, 4 }
 0x244   : > { %v3285_v31 = vpop.f32.mrf.mxu3  ;;  %9385 = vmatmul.msk.f32.gmra.mxu1 %vm652_vm1, %v2271_v2 }
 0x245   : > { %v11585_v27 = vadd.f32 %v3285_v31, %v2644_v21  ;;  %v1910_v31 = vrot.slane %v10040_v61, 4  ;;  %v3106_v40 = vsel %vm2695_vm4, %v3103_v23, %v3105_v34  ;;  %v2738_v23 = vsel %vm2695_vm4, %v2735_v9, %v2737_v35 }
 0x246   : > { %v2919_v5 = vpop.f32.mrf.mxu2  ;;  %v2279_v12 = vsel %vm1864_vm3, %v2276_v36, %v2278_v7 }
 0x247   : > { %v11591_v52 = vadd.f32 %v2919_v5, %v2594_v18  ;;  %v11593_v60 = vpop.f32.mrf.mxu0 }
 0x249   : > { %9488 = vmatmul.msk.f32.gmra.mxu3 %vm652_vm1, %v3104_v29  ;;  %v2457_v48 = vpop.f32.mrf.mxu1 }
 0x24a   : > { %v2645_v2 = vadd.f32 %v2457_v48, %v1725_v26  ;;  %9337 = vmatmul.msk.f32.gmra.mxu0 %vm652_vm1, %v1909_v0  ;;  %v1911_v0 = vsel %vm1864_vm3, %v1908_v55, %v1910_v31  ;;  %v1728_v26 = vadd.f32 %v10666_v51, %v10662_v49  ;;  %v10042_v55 = vld [vmem:[%s10422_s12 + $0xd8] sm:$0xff] }
 0x24b   : > { %9437 = vmatmul.msk.f32.gmra.mxu2 %vm652_vm1, %v2736_v11  ;;  %v11625_v11 = vld [vmem:[%s10422_s12 + $0x2a0] sm:$0xff]  ;;  %v2739_v9 = vrot.slane %v10042_v55, 2 }
 0x24c   : > { %v3288_v21 = vpop.f32.mrf.mxu3  ;;  %9386 = vmatmul.msk.f32.gmra.mxu1 %vm652_vm1, %v2273_v13  ;;  %v3107_v45 = vrot.slane %v11625_v11, 2  ;;  %v2280_v36 = vrot.slane %v11625_v11, 4 }
 0x24d   : > { %v11609_v38 = vadd.f32 %v3288_v21, %v2645_v2  ;;  %v1912_v2 = vrot.slane %v10042_v55, 4  ;;  %v2596_v21 = vadd.f32 %v11569_v15, %v10673_v56 }
 0x24e   : > { %v2922_v29 = vpop.f32.mrf.mxu2  ;;  %v3108_v51 = vsel %vm2695_vm4, %v3105_v34, %v3107_v45  ;;  %v2740_v34 = vsel %vm2695_vm4, %v2737_v35, %v2739_v9  ;;  %v2281_v11 = vsel %vm1864_vm3, %v2278_v7, %v2280_v36 }
 0x24f   : > { %v11615_v18 = vadd.f32 %v2922_v29, %v2595_v59  ;;  %v11617_v5 = vpop.f32.mrf.mxu0  ;;  %v1913_v29 = vsel %vm1864_vm3, %v1910_v31, %v1912_v2  ;;  %v10044_v31 = vld [vmem:[%s10422_s12 + $0xe0] sm:$0xff] }
 0x250   : > { %v2741_v35 = vrot.slane %v10044_v31, 2 }
 0x251   : > { %9489 = vmatmul.msk.f32.gmra.mxu3 %vm652_vm1, %v3106_v40  ;;  %v2460_v46 = vpop.f32.mrf.mxu1 }
 0x252   : > { %v2646_v48 = vadd.f32 %v2460_v46, %v1728_v26  ;;  %9338 = vmatmul.msk.f32.gmra.mxu0 %vm652_vm1, %v1911_v0  ;;  %v1731_v0 = vadd.f32 %v10684_v1, %v10680_v62  ;;  %v11649_v26 = vld [vmem:[%s10422_s12 + $0x2a8] sm:$0xff] }
 0x253   : > { %9438 = vmatmul.msk.f32.gmra.mxu2 %vm652_vm1, %v2738_v23  ;;  %v3109_v56 = vrot.slane %v11649_v26, 2  ;;  %v2282_v7 = vrot.slane %v11649_v26, 4 }
 0x254   : > { %v3291_v13 = vpop.f32.mrf.mxu3  ;;  %9387 = vmatmul.msk.f32.gmra.mxu1 %vm652_vm1, %v2275_v37  ;;  %v1914_v37 = vrot.slane %v10044_v31, 4 }
 0x255   : > { %v11633_v49 = vadd.f32 %v3291_v13, %v2646_v48  ;;  %v3110_v1 = vsel %vm2695_vm4, %v3107_v45, %v3109_v56  ;;  %v2597_v48 = vadd.f32 %v11593_v60, %v10691_v8  ;;  %v2742_v45 = vsel %vm2695_vm4, %v2739_v9, %v2741_v35 }
 0x256   : > { %v2925_v61 = vpop.f32.mrf.mxu2  ;;  %v2283_v26 = vsel %vm1864_vm3, %v2280_v36, %v2282_v7 }
 0x257   : > { %v11639_v40 = vadd.f32 %v2925_v61, %v2596_v21  ;;  %v11641_v59 = vpop.f32.mrf.mxu0  ;;  %v1915_v21 = vsel %vm1864_vm3, %v1912_v2, %v1914_v37  ;;  %v1734_v61 = vadd.f32 %v10702_v19, %v10698_v17  ;;  %v10046_v2 = vld [vmem:[%s10422_s12 + $0xe8] sm:$0xff] }
 0x258   : > { %v2743_v9 = vrot.slane %v10046_v2, 2 }
 0x259   : > { %9490 = vmatmul.msk.f32.gmra.mxu3 %vm652_vm1, %v3108_v51  ;;  %v2463_v15 = vpop.f32.mrf.mxu1 }
 0x25a   : > { %v2647_v23 = vadd.f32 %v2463_v15, %v1731_v0  ;;  %9339 = vmatmul.msk.f32.gmra.mxu0 %vm652_vm1, %v1913_v29  ;;  %v11673_v29 = vld [vmem:[%s10422_s12 + $0x2b0] sm:$0xff]  ;;  %v1916_v15 = vrot.slane %v10046_v2, 4 }
 0x25b   : > { %9439 = vmatmul.msk.f32.gmra.mxu2 %vm652_vm1, %v2740_v34  ;;  %v3111_v8 = vrot.slane %v11673_v29, 2  ;;  %v2284_v36 = vrot.slane %v11673_v29, 4 }
 0x25c   : > { %v3294_v46 = vpop.f32.mrf.mxu3  ;;  %9388 = vmatmul.msk.f32.gmra.mxu1 %vm652_vm1, %v2277_v44  ;;  %v2598_v44 = vadd.f32 %v11617_v5, %v10709_v25 }
 0x25d   : > { %v11657_v62 = vadd.f32 %v3294_v46, %v2647_v23  ;;  %v3112_v19 = vsel %vm2695_vm4, %v3109_v56, %v3111_v8  ;;  %v2744_v56 = vsel %vm2695_vm4, %v2741_v35, %v2743_v9  ;;  %v2285_v29 = vsel %vm1864_vm3, %v2282_v7, %v2284_v36 }
 0x25e   : > { %v2928_v13 = vpop.f32.mrf.mxu2 }
 0x25f   : > { %v11663_v55 = vadd.f32 %v2928_v13, %v2597_v48  ;;  %v11665_v51 = vpop.f32.mrf.mxu0  ;;  %v1737_v48 = vadd.f32 %v10720_v33, %v10716_v32  ;;  %v11697_v13 = vld [vmem:[%s10422_s12 + $0x2b8] sm:$0xff] }
 0x260   : > { %v3113_v25 = vrot.slane %v11697_v13, 2  ;;  %v2286_v7 = vrot.slane %v11697_v13, 4 }
 0x261   : > { %9491 = vmatmul.msk.f32.gmra.mxu3 %vm652_vm1, %v3110_v1  ;;  %v2466_v60 = vpop.f32.mrf.mxu1  ;;  %v1917_v1 = vsel %vm1864_vm3, %v1914_v37, %v1916_v15  ;;  %v10048_v37 = vld [vmem:[%s10422_s12 + $0xf0] sm:$0xff] }
 0x262   : > { %v2648_v0 = vadd.f32 %v2466_v60, %v1734_v61  ;;  %9340 = vmatmul.msk.f32.gmra.mxu0 %vm652_vm1, %v1915_v21  ;;  %v3114_v33 = vsel %vm2695_vm4, %v3111_v8, %v3113_v25  ;;  %v2745_v35 = vrot.slane %v10048_v37, 2  ;;  %v2599_v60 = vadd.f32 %v11641_v59, %v10727_v42 }
 0x263   : > { %9440 = vmatmul.msk.f32.gmra.mxu2 %vm652_vm1, %v2742_v45  ;;  %v1918_v45 = vrot.slane %v10048_v37, 4  ;;  %v1743_v37 = vadd.f32 %v10756_v6, %v10752_v4  ;;  %v2287_v13 = vsel %vm1864_vm3, %v2284_v36, %v2286_v7 }
 0x264   : > { %v3297_v34 = vpop.f32.mrf.mxu3  ;;  %9389 = vmatmul.msk.f32.gmra.mxu1 %vm652_vm1, %v2279_v12  ;;  %v2746_v8 = vsel %vm2695_vm4, %v2743_v9, %v2745_v35 }
 0x265   : > { %v11681_v17 = vadd.f32 %v3297_v34, %v2648_v0  ;;  %v1919_v2 = vsel %vm1864_vm3, %v1916_v15, %v1918_v45  ;;  %v10050_v15 = vld [vmem:[%s10422_s12 + $0xf8] sm:$0xff] }
 0x266   : > { %v2931_v23 = vpop.f32.mrf.mxu2  ;;  %v2747_v9 = vrot.slane %v10050_v15, 2 }
 0x267   : > { %v11687_v46 = vadd.f32 %v2931_v23, %v2598_v44  ;;  %v11689_v31 = vpop.f32.mrf.mxu0  ;;  %v11721_v44 = vld [vmem:[%s10422_s12 + $0x2c0] sm:$0xff] }
 0x268   : > { %v3115_v42 = vrot.slane %v11721_v44, 2  ;;  %v2288_v36 = vrot.slane %v11721_v44, 4 }
 0x269   : > { %9492 = vmatmul.msk.f32.gmra.mxu3 %vm652_vm1, %v3112_v19  ;;  %v2469_v5 = vpop.f32.mrf.mxu1  ;;  %v1740_v19 = vadd.f32 %v10738_v50, %v10734_v47 }
 0x26a   : > { %v2649_v21 = vadd.f32 %v2469_v5, %v1737_v48  ;;  %9341 = vmatmul.msk.f32.gmra.mxu0 %vm652_vm1, %v1917_v1  ;;  %v1920_v48 = vrot.slane %v10050_v15, 4  ;;  %v3116_v50 = vsel %vm2695_vm4, %v3113_v25, %v3115_v42  ;;  %v2748_v25 = vsel %vm2695_vm4, %v2745_v35, %v2747_v9  ;;  %v11769_v15 = vld [vmem:[%s10422_s12 + $0x2d0] sm:$0xff] }
 0x26b   : > { %9441 = vmatmul.msk.f32.gmra.mxu2 %vm652_vm1, %v2744_v56  ;;  %v2600_v56 = vadd.f32 %v11665_v51, %v10745_v58  ;;  %v2289_v44 = vsel %vm1864_vm3, %v2286_v7, %v2288_v36  ;;  %v9517_v7 = vld [vmem:[%s17246_s1 + $0x40] sm:$0xff]  ;;  %s10244_s1 = scalar_lea.hbm %s10243_s15, 1 }
 0x26c   : > { %v3300_v61 = vpop.f32.mrf.mxu3  ;;  %9390 = vmatmul.msk.f32.gmra.mxu1 %vm652_vm1, %v2281_v11  ;;  %3557 = vmatpush.msra.mxu0 %v9517_v7  ;;  %p10245_p11 = scmp.ne.s32.totalorder %s10243_s15, %s10244_s1  ;;  %p10250_p1 = scmp.lt.s32.totalorder %s10248_s24, %s10244_s1 }
 0x26d   : > { %v11705_v32 = vadd.f32 %v3300_v61, %v2649_v21  ;;  %v1921_v61 = vsel %vm1864_vm3, %v1918_v45, %v1920_v48  ;;  %v10052_v45 = vld [vmem:[%s10422_s12 + $0x100] sm:$0xff]  ;;  %3736 = vmatpush.msra.mxu1 %v9517_v7 }
 0x26e   : > { %v2934_v12 = vpop.f32.mrf.mxu2  ;;  %v2749_v35 = vrot.slane %v10052_v45, 2  ;;  %p10246_p12 = pnand %p10245_p11, %p10390_p5  ;;  %p10251_p2 = por %p10250_p1, %p10249_p0 }
 0x26f   : > { %v11711_v0 = vadd.f32 %v2934_v12, %v2599_v60  ;;  %v11713_v34 = vpop.f32.mrf.mxu0 }
 0x270   : > { %p10247_p13 = pneg %p10246_p12 }
 0x271   : > { %9493 = vmatmul.msk.f32.gmra.mxu3 %vm652_vm1, %v3114_v33  ;;  %v2472_v59 = vpop.f32.mrf.mxu1  ;;  %v11745_v33 = vld [vmem:[%s10422_s12 + $0x2c8] sm:$0xff] }
 0x272   : > { %v2650_v23 = vadd.f32 %v2472_v59, %v1740_v19  ;;  %9342 = vmatmul.msk.f32.gmra.mxu0 %vm652_vm1, %v1919_v2  ;;  %v3117_v58 = vrot.slane %v11745_v33, 2  ;;  %v1922_v2 = vrot.slane %v10052_v45, 4  ;;  %v2601_v19 = vadd.f32 %v11689_v31, %v10763_v20  ;;  %p10252_p3 = pnand %p10251_p2, %p10247_p13 }
 0x273   : > { %9442 = vmatmul.msk.f32.gmra.mxu2 %vm652_vm1, %v2746_v8  ;;  %v3119_v20 = vrot.slane %v11769_v15, 2 }
 0x274   : > { %v3303_v1 = vpop.f32.mrf.mxu3  ;;  %9391 = vmatmul.msk.f32.gmra.mxu1 %vm652_vm1, %v2283_v26  ;;  %v3118_v6 = vsel %vm2695_vm4, %v3115_v42, %v3117_v58  ;;  %v2750_v42 = vsel %vm2695_vm4, %v2747_v9, %v2749_v35 }
 0x275   : > { %v11729_v47 = vadd.f32 %v3303_v1, %v2650_v23  ;;  %v1923_v23 = vsel %vm1864_vm3, %v1920_v48, %v1922_v2  ;;  %v1746_v1 = vadd.f32 %v10774_v30, %v10770_v28  ;;  %v10054_v48 = vld [vmem:[%s10422_s12 + $0x108] sm:$0xff]  ;;  %v3120_v30 = vsel %vm2695_vm4, %v3117_v58, %v3119_v20 }
 0x276   : > { %v2937_v5 = vpop.f32.mrf.mxu2  ;;  %v2751_v9 = vrot.slane %v10054_v48, 2 }
 0x277   : > { %v11735_v11 = vadd.f32 %v2937_v5, %v2600_v56  ;;  %v11737_v21 = vpop.f32.mrf.mxu0  ;;  %v1924_v5 = vrot.slane %v10054_v48, 4 }
 0x278   : > { %v2752_v58 = vsel %vm2695_vm4, %v2749_v35, %v2751_v9 }
 0x279   : > { %9494 = vmatmul.msk.f32.gmra.mxu3 %vm652_vm1, %v3116_v50  ;;  %v2475_v51 = vpop.f32.mrf.mxu1 }
 0x27a   : > { %v2651_v60 = vadd.f32 %v2475_v51, %v1743_v37  ;;  %9343 = vmatmul.msk.f32.gmra.mxu0 %vm652_vm1, %v1921_v61  ;;  %v2602_v61 = vadd.f32 %v11713_v34, %v10781_v41 }
 0x27b   : > { %9443 = vmatmul.msk.f32.gmra.mxu2 %vm652_vm1, %v2748_v25 }
 0x27c   : > { %v3306_v12 = vpop.f32.mrf.mxu3  ;;  %9392 = vmatmul.msk.f32.gmra.mxu1 %vm652_vm1, %v2285_v29  ;;  %v1925_v29 = vsel %vm1864_vm3, %v1922_v2, %v1924_v5 }
 0x27d   : > { %v11753_v4 = vadd.f32 %v3306_v12, %v2651_v60  ;;  %v1749_v60 = vadd.f32 %v10792_v14, %v10788_v53  ;;  %v11793_v12 = vld [vmem:[%s10422_s12 + $0x2d8] sm:$0xff] }
 0x27e   : > { %v2940_v8 = vpop.f32.mrf.mxu2  ;;  %v3121_v41 = vrot.slane %v11793_v12, 2 }
 0x27f   : > { %v11759_v59 = vadd.f32 %v2940_v8, %v2601_v19  ;;  %v11761_v26 = vpop.f32.mrf.mxu0  ;;  %v10056_v19 = vld [vmem:[%s10422_s12 + $0x110] sm:$0xff]  ;;  %v2603_v8 = vadd.f32 %v11737_v21, %v10802_v10  ;;  %v11820_v10 = vld [vmem:[%s10422_s12 + $0x2e0] sm:$0xff] }
 0x280   : > { %v1926_v2 = vrot.slane %v10056_v19, 4  ;;  %v3122_v14 = vsel %vm2695_vm4, %v3119_v20, %v3121_v41  ;;  %v2753_v35 = vrot.slane %v10056_v19, 2  ;;  %v3123_v21 = vrot.slane %v11820_v10, 2  ;;  %v11844_v19 = vld [vmem:[%s10422_s12 + $0x2e8] sm:$0xff] }
 0x281   : > { %9495 = vmatmul.msk.f32.gmra.mxu3 %vm652_vm1, %v3118_v6  ;;  %v2478_v31 = vpop.f32.mrf.mxu1 }
 0x282   : > { %v2652_v50 = vadd.f32 %v2478_v31, %v1746_v1  ;;  %9344 = vmatmul.msk.f32.gmra.mxu0 %vm652_vm1, %v1923_v23  ;;  %v2290_v23 = vrot.slane %v11745_v33, 4  ;;  %v1927_v20 = vsel %vm1864_vm3, %v1924_v5, %v1926_v2  ;;  %v10058_v5 = vld [vmem:[%s10422_s12 + $0x118] sm:$0xff] }
 0x283   : > { %9444 = vmatmul.msk.f32.gmra.mxu2 %vm652_vm1, %v2750_v42 }
 0x284   : > { %v3309_v56 = vpop.f32.mrf.mxu3  ;;  %9393 = vmatmul.msk.f32.gmra.mxu1 %vm652_vm1, %v2287_v13  ;;  %v1752_v13 = vadd.f32 %v10813_v39, %v10809_v22  ;;  %v3124_v39 = vsel %vm2695_vm4, %v3121_v41, %v3123_v21 }
 0x285   : > { %v11777_v28 = vadd.f32 %v3309_v56, %v2652_v50  ;;  %v2754_v50 = vsel %vm2695_vm4, %v2751_v9, %v2753_v35  ;;  %v2291_v56 = vsel %vm1864_vm3, %v2288_v36, %v2290_v23  ;;  %v2755_v9 = vrot.slane %v10058_v5, 2 }
 0x286   : > { %v2943_v37 = vpop.f32.mrf.mxu2  ;;  %v2292_v36 = vrot.slane %v11769_v15, 4 }
 0x287   : > { %v11783_v25 = vadd.f32 %v2943_v37, %v2602_v61  ;;  %v11785_v51 = vpop.f32.mrf.mxu0  ;;  %v1928_v61 = vrot.slane %v10058_v5, 4  ;;  %v2604_v37 = vadd.f32 %v11761_v26, %v10820_v54  ;;  %v2756_v41 = vsel %vm2695_vm4, %v2753_v35, %v2755_v9  ;;  %v17359_v5 = vld [vmem:[#allocation10_spill] sm:$0xff] }
 0x288   : > { %v3125_v54 = vrot.slane %v11844_v19, 2  ;;  %v2293_v15 = vsel %vm1864_vm3, %v2290_v23, %v2292_v36  ;;  %v2294_v23 = vrot.slane %v11793_v12, 4 }
 0x289   : > { %9496 = vmatmul.msk.f32.gmra.mxu3 %vm652_vm1, %v3120_v30  ;;  %v2481_v34 = vpop.f32.mrf.mxu1 }
 0x28a   : > { %v2653_v45 = vadd.f32 %v2481_v34, %v1749_v60  ;;  %9345 = vmatmul.msk.f32.gmra.mxu0 %vm652_vm1, %v1925_v29  ;;  %v1929_v34 = vsel %vm1864_vm3, %v1926_v2, %v1928_v61  ;;  %v10060_v2 = vld [vmem:[%s10422_s12 + $0x120] sm:$0xff]  ;;  %v3126_v35 = vsel %vm2695_vm4, %v3123_v21, %v3125_v54 }
 0x28b   : > { %9445 = vmatmul.msk.f32.gmra.mxu2 %vm652_vm1, %v2752_v58 }
 0x28c   : > { %v3312_v6 = vpop.f32.mrf.mxu3  ;;  %9394 = vmatmul.msk.f32.gmra.mxu1 %vm652_vm1, %v2289_v44  ;;  %v17356_v44 = vld [vmem:[#allocation7_spill] sm:$0xff] }
 0x28d   : > { %v11801_v53 = vadd.f32 %v3312_v6, %v2653_v45  ;;  %v17357_v45 = vld [vmem:[#allocation8_spill] sm:$0xff] }
 0x28e   : > { %v2946_v1 = vpop.f32.mrf.mxu2  ;;  %v1755_v6 = vadd.f32 %v17357_v45, %v17356_v44 }
 0x28f   : > { %v11810_v42 = vadd.f32 %v2946_v1, %v2603_v8  ;;  %v11812_v31 = vpop.f32.mrf.mxu0  ;;  %v1930_v8 = vrot.slane %v10060_v2, 4 }
 0x291   : > { %9497 = vmatmul.msk.f32.gmra.mxu3 %vm652_vm1, %v3122_v14  ;;  %v2484_v33 = vpop.f32.mrf.mxu1 }
 0x292   : > { %v2654_v48 = vadd.f32 %v2484_v33, %v1752_v13  ;;  %9346 = vmatmul.msk.f32.gmra.mxu0 %vm652_vm1, %v1927_v20  ;;  %v2757_v20 = vrot.slane %v10060_v2, 2  ;;  %v17358_v13 = vld [vmem:[#allocation9_spill] sm:$0xff] }
 0x293   : > { %9446 = vmatmul.msk.f32.gmra.mxu2 %vm652_vm1, %v2754_v50  ;;  %v2605_v50 = vadd.f32 %v11785_v51, %v17358_v13 }
 0x294   : > { %v3315_v30 = vpop.f32.mrf.mxu3  ;;  %9395 = vmatmul.msk.f32.gmra.mxu1 %vm652_vm1, %v2291_v56  ;;  %v2758_v21 = vsel %vm2695_vm4, %v2755_v9, %v2757_v20 }
 0x295   : > { %v11828_v22 = vadd.f32 %v3315_v30, %v2654_v48  ;;  %v1931_v30 = vsel %vm1864_vm3, %v1928_v61, %v1930_v8  ;;  %v10062_v61 = vld [vmem:[%s10422_s12 + $0x128] sm:$0xff] }
 0x296   : > { %v2949_v29 = vpop.f32.mrf.mxu2 }
 0x297   : > { %v11834_v60 = vadd.f32 %v2949_v29, %v2604_v37  ;;  %v11836_v58 = vpop.f32.mrf.mxu0  ;;  %v11868_v29 = vld [vmem:[%s10422_s12 + $0x2f0] sm:$0xff] }
 0x298   : > { %v3127_v51 = vrot.slane %v11868_v29, 2 }
 0x299   : > { %9498 = vmatmul.msk.f32.gmra.mxu3 %vm652_vm1, %v3124_v39  ;;  %v2487_v26 = vpop.f32.mrf.mxu1  ;;  %v17360_v39 = vld [vmem:[#allocation11_spill] sm:$0xff] }
 0x29a   : > { %v2655_v14 = vadd.f32 %v2487_v26, %v1755_v6  ;;  %9347 = vmatmul.msk.f32.gmra.mxu0 %vm652_vm1, %v1929_v34  ;;  %v1758_v37 = vadd.f32 %v17360_v39, %v17359_v5  ;;  %v2295_v34 = vsel %vm1864_vm3, %v2292_v36, %v2294_v23  ;;  %v1932_v6 = vrot.slane %v10062_v61, 4  ;;  %v11892_v5 = vld [vmem:[%s10422_s12 + $0x2f8] sm:$0xff] }
 0x29b   : > { %9447 = vmatmul.msk.f32.gmra.mxu2 %vm652_vm1, %v2756_v41  ;;  %v3128_v9 = vsel %vm2695_vm4, %v3125_v54, %v3127_v51  ;;  %v2759_v26 = vrot.slane %v10062_v61, 2  ;;  %v2296_v36 = vrot.slane %v11820_v10, 4 }
 0x29c   : > { %v3318_v7 = vpop.f32.mrf.mxu3  ;;  %9396 = vmatmul.msk.f32.gmra.mxu1 %vm652_vm1, %v2293_v15  ;;  %v17361_v15 = vld [vmem:[#allocation12_spill] sm:$0xff]  ;;  %v1933_v13 = vsel %vm1864_vm3, %v1930_v8, %v1932_v6  ;;  %v10064_v8 = vld [vmem:[%s10422_s12 + $0x130] sm:$0xff] }
 0x29d   : > { %v11852_v1 = vadd.f32 %v3318_v7, %v2655_v14  ;;  %v2606_v14 = vadd.f32 %v11812_v31, %v17361_v15  ;;  %v2760_v54 = vsel %vm2695_vm4, %v2757_v20, %v2759_v26  ;;  %v3129_v31 = vrot.slane %v11892_v5, 2 }
 0x29e   : > { %v2952_v33 = vpop.f32.mrf.mxu2  ;;  %v2297_v39 = vsel %vm1864_vm3, %v2294_v23, %v2296_v36  ;;  %v2298_v23 = vrot.slane %v11844_v19, 4 }
 0x29f   : > { %v11858_v56 = vadd.f32 %v2952_v33, %v2605_v50  ;;  %v11860_v48 = vpop.f32.mrf.mxu0  ;;  %v17362_v50 = vld [vmem:[#allocation13_spill] sm:$0xff]  ;;  %v17363_v33 = vld [vmem:[#allocation14_spill] sm:$0xff]  ;;  %v3130_v20 = vsel %vm2695_vm4, %v3127_v51, %v3129_v31 }
 0x2a1   : > { %9499 = vmatmul.msk.f32.gmra.mxu3 %vm652_vm1, %v3126_v35  ;;  %v2490_v12 = vpop.f32.mrf.mxu1 }
 0x2a2   : > { %v2656_v44 = vadd.f32 %v2490_v12, %v1758_v37  ;;  %9348 = vmatmul.msk.f32.gmra.mxu0 %vm652_vm1, %v1931_v30  ;;  %v1761_v30 = vadd.f32 %v17363_v33, %v17362_v50  ;;  %v1934_v12 = vrot.slane %v10064_v8, 4  ;;  %v17366_v50 = vld [vmem:[#allocation17_spill] sm:$0xff] }
 0x2a3   : > { %9448 = vmatmul.msk.f32.gmra.mxu2 %vm652_vm1, %v2758_v21 }
 0x2a4   : > { %v3321_v45 = vpop.f32.mrf.mxu3  ;;  %9397 = vmatmul.msk.f32.gmra.mxu1 %vm652_vm1, %v2295_v34 }
 0x2a5   : > { %v11876_v41 = vadd.f32 %v3321_v45, %v2656_v44  ;;  %v2761_v44 = vrot.slane %v10064_v8, 2  ;;  %v17364_v45 = vld [vmem:[#allocation15_spill] sm:$0xff] }
 0x2a6   : > { %v2955_v7 = vpop.f32.mrf.mxu2  ;;  %v2607_v61 = vadd.f32 %v11836_v58, %v17364_v45 }
 0x2a7   : > { %v11882_v2 = vadd.f32 %v2955_v7, %v2606_v14  ;;  %v11884_v35 = vpop.f32.mrf.mxu0  ;;  %v1935_v7 = vsel %vm1864_vm3, %v1932_v6, %v1934_v12  ;;  %v2762_v51 = vsel %vm2695_vm4, %v2759_v26, %v2761_v44  ;;  %v10066_v6 = vld [vmem:[%s10422_s12 + $0x138] sm:$0xff] }
 0x2a8   : > { %v2763_v8 = vrot.slane %v10066_v6, 2 }
 0x2a9   : > { %9500 = vmatmul.msk.f32.gmra.mxu3 %vm652_vm1, %v3128_v9  ;;  %v2493_v10 = vpop.f32.mrf.mxu1 }
 0x2aa   : > { %v2657_v37 = vadd.f32 %v2493_v10, %v1761_v30  ;;  %9349 = vmatmul.msk.f32.gmra.mxu0 %vm652_vm1, %v1933_v13  ;;  %v17365_v13 = vld [vmem:[#allocation16_spill] sm:$0xff] }
 0x2ab   : > { %9449 = vmatmul.msk.f32.gmra.mxu2 %vm652_vm1, %v2760_v54  ;;  %v1764_v33 = vadd.f32 %v17366_v50, %v17365_v13  ;;  %v11916_v30 = vld [vmem:[%s10422_s12 + $0x300] sm:$0xff]  ;;  %v2299_v54 = vsel %vm1864_vm3, %v2296_v36, %v2298_v23  ;;  %v2300_v36 = vrot.slane %v11868_v29, 4 }
 0x2ac   : > { %v3324_v21 = vpop.f32.mrf.mxu3  ;;  %9398 = vmatmul.msk.f32.gmra.mxu1 %vm652_vm1, %v2297_v39  ;;  %v3131_v58 = vrot.slane %v11916_v30, 2  ;;  %v17368_v50 = vld [vmem:[#allocation19_spill] sm:$0xff] }
 0x2ad   : > { %v11900_v34 = vadd.f32 %v3324_v21, %v2657_v37  ;;  %v1936_v37 = vrot.slane %v10066_v6, 4 }
 0x2ae   : > { %v2958_v9 = vpop.f32.mrf.mxu2  ;;  %v3132_v26 = vsel %vm2695_vm4, %v3129_v31, %v3131_v58  ;;  %v2764_v31 = vsel %vm2695_vm4, %v2761_v44, %v2763_v8 }
 0x2af   : > { %v11906_v15 = vadd.f32 %v2958_v9, %v2607_v61  ;;  %v11908_v14 = vpop.f32.mrf.mxu0  ;;  %v1937_v13 = vsel %vm1864_vm3, %v1934_v12, %v1936_v37  ;;  %v10068_v12 = vld [vmem:[%s10422_s12 + $0x140] sm:$0xff] }
 0x2b0   : > { %v1938_v6 = vrot.slane %v10068_v12, 4 }
 0x2b1   : > { %9501 = vmatmul.msk.f32.gmra.mxu3 %vm652_vm1, %v3130_v20  ;;  %v2496_v19 = vpop.f32.mrf.mxu1  ;;  %v17367_v20 = vld [vmem:[#allocation18_spill] sm:$0xff] }
 0x2b2   : > { %v2658_v10 = vadd.f32 %v2496_v19, %v1764_v33  ;;  %9350 = vmatmul.msk.f32.gmra.mxu0 %vm652_vm1, %v1935_v7  ;;  %v2608_v45 = vadd.f32 %v11860_v48, %v17367_v20  ;;  %v17369_v33 = vld [vmem:[#allocation20_spill] sm:$0xff]  ;;  %v2765_v20 = vrot.slane %v10068_v12, 2 }
 0x2b3   : > { %9450 = vmatmul.msk.f32.gmra.mxu2 %vm652_vm1, %v2762_v51  ;;  %v1767_v51 = vadd.f32 %v17369_v33, %v17368_v50  ;;  %v11940_v19 = vld [vmem:[%s10422_s12 + $0x308] sm:$0xff] }
 0x2b4   : > { %v3327_v39 = vpop.f32.mrf.mxu3  ;;  %9399 = vmatmul.msk.f32.gmra.mxu1 %vm652_vm1, %v2299_v54  ;;  %v3133_v48 = vrot.slane %v11940_v19, 2  ;;  %v2301_v54 = vsel %vm1864_vm3, %v2298_v23, %v2300_v36  ;;  %v2302_v23 = vrot.slane %v11892_v5, 4 }
 0x2b5   : > { %v11924_v21 = vadd.f32 %v3327_v39, %v2658_v10 }
 0x2b6   : > { %v2961_v61 = vpop.f32.mrf.mxu2  ;;  %v3134_v44 = vsel %vm2695_vm4, %v3131_v58, %v3133_v48  ;;  %v2766_v58 = vsel %vm2695_vm4, %v2763_v8, %v2765_v20 }
 0x2b7   : > { %v11930_v9 = vadd.f32 %v2961_v61, %v2608_v45  ;;  %v11932_v7 = vpop.f32.mrf.mxu0  ;;  %v17370_v45 = vld [vmem:[#allocation21_spill] sm:$0xff] }
 0x2b8   : > { %v2609_v61 = vadd.f32 %v11884_v35, %v17370_v45 }
 0x2b9   : > { %9502 = vmatmul.msk.f32.gmra.mxu3 %vm652_vm1, %v3132_v26  ;;  %v2499_v29 = vpop.f32.mrf.mxu1 }
 0x2ba   : > { %v2659_v10 = vadd.f32 %v2499_v29, %v1767_v51  ;;  %9351 = vmatmul.msk.f32.gmra.mxu0 %vm652_vm1, %v1937_v13  ;;  %v1939_v51 = vsel %vm1864_vm3, %v1936_v37, %v1938_v6  ;;  %v17372_v29 = vld [vmem:[#allocation23_spill] sm:$0xff]  ;;  %v10070_v37 = vld [vmem:[%s10422_s12 + $0x148] sm:$0xff] }
 0x2bb   : > { %9451 = vmatmul.msk.f32.gmra.mxu2 %vm652_vm1, %v2764_v31  ;;  %v17371_v31 = vld [vmem:[#allocation22_spill] sm:$0xff] }
 0x2bc   : > { %v3330_v39 = vpop.f32.mrf.mxu3  ;;  %9400 = vmatmul.msk.f32.gmra.mxu1 %vm652_vm1, %v2301_v54  ;;  %v1770_v54 = vadd.f32 %v17372_v29, %v17371_v31  ;;  %v17374_v31 = vld [vmem:[#allocation24_spill] sm:$0xff] }
 0x2bd   : > { %v11948_v26 = vadd.f32 %v3330_v39, %v2659_v10  ;;  %v11964_v10 = vld [vmem:[%s10422_s12 + $0x310] sm:$0xff]  ;;  %v2303_v39 = vsel %vm1864_vm3, %v2300_v36, %v2302_v23  ;;  %v2610_v29 = vadd.f32 %v11908_v14, %v17374_v31  ;;  %v2304_v36 = vrot.slane %v11916_v30, 4 }
 0x2be   : > { %v2964_v13 = vpop.f32.mrf.mxu2  ;;  %v3135_v35 = vrot.slane %v11964_v10, 2 }
 0x2bf   : > { %v11954_v50 = vadd.f32 %v2964_v13, %v2609_v61  ;;  %v11956_v33 = vpop.f32.mrf.mxu0  ;;  %v2767_v13 = vrot.slane %v10070_v37, 2  ;;  %v2305_v31 = vsel %vm1864_vm3, %v2302_v23, %v2304_v36  ;;  %v2306_v23 = vrot.slane %v11940_v19, 4 }
 0x2c0   : > { %v3136_v8 = vsel %vm2695_vm4, %v3133_v48, %v3135_v35 }
 0x2c1   : > { %9503 = vmatmul.msk.f32.gmra.mxu3 %vm652_vm1, %v3134_v44  ;;  %v2502_v5 = vpop.f32.mrf.mxu1  ;;  %v1940_v44 = vrot.slane %v10070_v37, 4  ;;  %v2768_v48 = vsel %vm2695_vm4, %v2765_v20, %v2767_v13  ;;  %v11988_v37 = vld [vmem:[%s10422_s12 + $0x318] sm:$0xff]  ;;  %v2307_v19 = vsel %vm1864_vm3, %v2304_v36, %v2306_v23  ;;  %v2308_v36 = vrot.slane %v11964_v10, 4 }
 0x2c2   : > { %v2660_v12 = vadd.f32 %v2502_v5, %v1770_v54  ;;  %9352 = vmatmul.msk.f32.gmra.mxu0 %vm652_vm1, %v1939_v51  ;;  %v3137_v14 = vrot.slane %v11988_v37, 2 }
 0x2c3   : > { %9452 = vmatmul.msk.f32.gmra.mxu2 %vm652_vm1, %v2766_v58  ;;  %v1941_v5 = vsel %vm1864_vm3, %v1938_v6, %v1940_v44  ;;  %v10072_v6 = vld [vmem:[%s10422_s12 + $0x150] sm:$0xff] }
 0x2c4   : > { %v3333_v45 = vpop.f32.mrf.mxu3  ;;  %9401 = vmatmul.msk.f32.gmra.mxu1 %vm652_vm1, %v2303_v39  ;;  %v17375_v39 = vld [vmem:[#allocation25_spill] sm:$0xff]  ;;  %v3138_v20 = vsel %vm2695_vm4, %v3135_v35, %v3137_v14 }
 0x2c5   : > { %v11972_v61 = vadd.f32 %v3333_v45, %v2660_v12  ;;  %v17376_v12 = vld [vmem:[#allocation26_spill] sm:$0xff] }
 0x2c6   : > { %v2967_v51 = vpop.f32.mrf.mxu2  ;;  %v1773_v45 = vadd.f32 %v17376_v12, %v17375_v39  ;;  %v2769_v12 = vrot.slane %v10072_v6, 2 }
 0x2c7   : > { %17373 = vst [vmem:[#allocation7_spill] sm:$0xff] %v11972_v61  ;;  %v11978_v54 = vadd.f32 %v2967_v51, %v2610_v29  ;;  %v11980_v58 = vpop.f32.mrf.mxu0  ;;  %v2611_v61 = vadd.f32 %v11932_v7, %v17378_v24 }
 0x2c8   : > { %v2770_v35 = vsel %vm2695_vm4, %v2767_v13, %v2769_v12 }
 0x2c9   : > { %9504 = vmatmul.msk.f32.gmra.mxu3 %vm652_vm1, %v3136_v8  ;;  %v2505_v30 = vpop.f32.mrf.mxu1  ;;  %v1942_v8 = vrot.slane %v10072_v6, 4  ;;  %v12012_v6 = vld [vmem:[%s10422_s12 + $0x320] sm:$0xff] }
 0x2ca   : > { %v2661_v29 = vadd.f32 %v2505_v30, %v1773_v45  ;;  %9353 = vmatmul.msk.f32.gmra.mxu0 %vm652_vm1, %v1941_v5  ;;  %v3139_v24 = vrot.slane %v12012_v6, 2 }
 0x2cb   : > { %9453 = vmatmul.msk.f32.gmra.mxu2 %vm652_vm1, %v2768_v48  ;;  %v1943_v30 = vsel %vm1864_vm3, %v1940_v44, %v1942_v8  ;;  %v10074_v44 = vld [vmem:[%s10422_s12 + $0x158] sm:$0xff] }
 0x2cc   : > { %v3336_v51 = vpop.f32.mrf.mxu3  ;;  %9402 = vmatmul.msk.f32.gmra.mxu1 %vm652_vm1, %v2305_v31  ;;  %v17380_v31 = vld [vmem:[#allocation28_spill] sm:$0xff]  ;;  %v3140_v13 = vsel %vm2695_vm4, %v3137_v14, %v3139_v24 }
 0x2cd   : > { %v11996_v39 = vadd.f32 %v3336_v51, %v2661_v29  ;;  %v17381_v29 = vld [vmem:[#allocation29_spill] sm:$0xff] }
 0x2ce   : > { %v2970_v5 = vpop.f32.mrf.mxu2  ;;  %v1776_v51 = vadd.f32 %v17381_v29, %v17380_v31  ;;  %v2771_v29 = vrot.slane %v10074_v44, 2 }
 0x2cf   : > { %17377 = vst [vmem:[#allocation8_spill] sm:$0xff] %v11996_v39  ;;  %v12002_v45 = vadd.f32 %v2970_v5, %v2611_v61  ;;  %v12004_v48 = vpop.f32.mrf.mxu0  ;;  %v17383_v39 = vld [vmem:[#allocation30_spill] sm:$0xff] }
 0x2d0   : > { %v2772_v14 = vsel %vm2695_vm4, %v2769_v12, %v2771_v29 }
 0x2d1   : > { %17379 = vst [vmem:[#allocation9_spill] sm:$0xff] %v12002_v45  ;;  %9505 = vmatmul.msk.f32.gmra.mxu3 %vm652_vm1, %v3138_v20  ;;  %v2508_v7 = vpop.f32.mrf.mxu1  ;;  %v1944_v20 = vrot.slane %v10074_v44, 4  ;;  %v2612_v45 = vadd.f32 %v11956_v33, %v17383_v39  ;;  %v12036_v44 = vld [vmem:[%s10422_s12 + $0x328] sm:$0xff]  ;;  %v2309_v39 = vsel %vm1864_vm3, %v2306_v23, %v2308_v36  ;;  %v2310_v23 = vrot.slane %v11988_v37, 4 }
 0x2d2   : > { %v2662_v61 = vadd.f32 %v2508_v7, %v1776_v51  ;;  %9354 = vmatmul.msk.f32.gmra.mxu0 %vm652_vm1, %v1943_v30  ;;  %v3141_v33 = vrot.slane %v12036_v44, 2 }
 0x2d3   : > { %9454 = vmatmul.msk.f32.gmra.mxu2 %vm652_vm1, %v2770_v35  ;;  %v1945_v7 = vsel %vm1864_vm3, %v1942_v8, %v1944_v20  ;;  %v10076_v8 = vld [vmem:[%s10422_s12 + $0x160] sm:$0xff]  ;;  %v2311_v37 = vsel %vm1864_vm3, %v2308_v36, %v2310_v23  ;;  %v2312_v36 = vrot.slane %v12012_v6, 4 }
 0x2d4   : > { %v3339_v5 = vpop.f32.mrf.mxu3  ;;  %9403 = vmatmul.msk.f32.gmra.mxu1 %vm652_vm1, %v2307_v19  ;;  %v17385_v19 = vld [vmem:[#allocation31_spill] sm:$0xff]  ;;  %v3142_v12 = vsel %vm2695_vm4, %v3139_v24, %v3141_v33 }
 0x2d5   : > { %v12020_v31 = vadd.f32 %v3339_v5, %v2662_v61  ;;  %v17386_v61 = vld [vmem:[#allocation32_spill] sm:$0xff] }
 0x2d6   : > { %v2973_v30 = vpop.f32.mrf.mxu2  ;;  %v1779_v5 = vadd.f32 %v17386_v61, %v17385_v19  ;;  %v2773_v61 = vrot.slane %v10076_v8, 2 }
 0x2d7   : > { %17382 = vst [vmem:[#allocation10_spill] sm:$0xff] %v12020_v31  ;;  %v12026_v51 = vadd.f32 %v2973_v30, %v2612_v45  ;;  %v12028_v35 = vpop.f32.mrf.mxu0  ;;  %v17388_v31 = vld [vmem:[#allocation33_spill] sm:$0xff] }
 0x2d8   : > { %v2774_v24 = vsel %vm2695_vm4, %v2771_v29, %v2773_v61 }
 0x2d9   : > { %17384 = vst [vmem:[#allocation11_spill] sm:$0xff] %v12026_v51  ;;  %9506 = vmatmul.msk.f32.gmra.mxu3 %vm652_vm1, %v3140_v13  ;;  %v2511_v10 = vpop.f32.mrf.mxu1  ;;  %v1946_v13 = vrot.slane %v10076_v8, 4  ;;  %v2613_v51 = vadd.f32 %v11980_v58, %v17388_v31  ;;  %v12058_v8 = vld [vmem:[%s10422_s12 + $0x330] sm:$0xff] }
 0x2da   : > { %v2663_v45 = vadd.f32 %v2511_v10, %v1779_v5  ;;  %9355 = vmatmul.msk.f32.gmra.mxu0 %vm652_vm1, %v1945_v7  ;;  %v3143_v58 = vrot.slane %v12058_v8, 2 }
 0x2db   : > { %9455 = vmatmul.msk.f32.gmra.mxu2 %vm652_vm1, %v2772_v14  ;;  %v1947_v10 = vsel %vm1864_vm3, %v1944_v20, %v1946_v13  ;;  %v10078_v20 = vld [vmem:[%s10422_s12 + $0x168] sm:$0xff] }
 0x2dc   : > { %v3342_v30 = vpop.f32.mrf.mxu3  ;;  %9404 = vmatmul.msk.f32.gmra.mxu1 %vm652_vm1, %v2309_v39  ;;  %v17390_v39 = vld [vmem:[#allocation34_spill] sm:$0xff]  ;;  %v3144_v29 = vsel %vm2695_vm4, %v3141_v33, %v3143_v58 }
 0x2dd   : > { %v12044_v19 = vadd.f32 %v3342_v30, %v2663_v45  ;;  %v17391_v45 = vld [vmem:[#allocation35_spill] sm:$0xff] }
 0x2de   : > { %v2976_v7 = vpop.f32.mrf.mxu2  ;;  %v1782_v30 = vadd.f32 %v17391_v45, %v17390_v39  ;;  %v2775_v39 = vrot.slane %v10078_v20, 2  ;;  %v17393_v45 = vld [vmem:[#allocation36_spill] sm:$0xff] }
 0x2df   : > { %17387 = vst [vmem:[#allocation12_spill] sm:$0xff] %v12044_v19  ;;  %v12050_v5 = vadd.f32 %v2976_v7, %v2613_v51  ;;  %v2154_v14 = vpop.f32.mrf.mxu0 }
 0x2e0   : > { %v2776_v33 = vsel %vm2695_vm4, %v2773_v61, %v2775_v39 }
 0x2e1   : > { %17389 = vst [vmem:[#allocation13_spill] sm:$0xff] %v12050_v5  ;;  %9507 = vmatmul.msk.f32.gmra.mxu3 %vm652_vm1, %v3142_v12  ;;  %v2514_v31 = vpop.f32.mrf.mxu1  ;;  %v1948_v12 = vrot.slane %v10078_v20, 4  ;;  %v2614_v5 = vadd.f32 %v12004_v48, %v17393_v45  ;;  %v12082_v20 = vld [vmem:[%s10422_s12 + $0x338] sm:$0xff]  ;;  %v2313_v45 = vsel %vm1864_vm3, %v2310_v23, %v2312_v36 }
 0x2e2   : > { %v2664_v19 = vadd.f32 %v2514_v31, %v1782_v30  ;;  %9356 = vmatmul.msk.f32.gmra.mxu0 %vm652_vm1, %v1947_v10  ;;  %v3145_v48 = vrot.slane %v12082_v20, 2 }
 0x2e3   : > { %9456 = vmatmul.msk.f32.gmra.mxu2 %vm652_vm1, %v2774_v24  ;;  %v1949_v31 = vsel %vm1864_vm3, %v1946_v13, %v1948_v12  ;;  %v10080_v13 = vld [vmem:[%s10422_s12 + $0x170] sm:$0xff] }
 0x2e4   : > { %v3345_v51 = vpop.f32.mrf.mxu3  ;;  %9405 = vmatmul.msk.f32.gmra.mxu1 %vm652_vm1, %v2311_v37  ;;  %v17396_v37 = vld [vmem:[#allocation38_spill] sm:$0xff]  ;;  %v3146_v61 = vsel %vm2695_vm4, %v3143_v58, %v3145_v48 }
 0x2e5   : > { %v12066_v7 = vadd.f32 %v3345_v51, %v2664_v19  ;;  %v17395_v19 = vld [vmem:[#allocation37_spill] sm:$0xff] }
 0x2e6   : > { %v2979_v10 = vpop.f32.mrf.mxu2  ;;  %v1785_v51 = vadd.f32 %v17396_v37, %v17395_v19  ;;  %v2777_v37 = vrot.slane %v10080_v13, 2 }
 0x2e7   : > { %17392 = vst [vmem:[#allocation14_spill] sm:$0xff] %v12066_v7  ;;  %v12072_v30 = vadd.f32 %v2979_v10, %v2614_v5  ;;  %v12074_v24 = vpop.f32.mrf.mxu0 }
 0x2e8   : > { %17394 = vst [vmem:[#allocation15_spill] sm:$0xff] %v12074_v24  ;;  %v17397_v24 = vld [vmem:[#allocation39_spill] sm:$0xff] }
 0x2e9   : > { %9508 = vmatmul.msk.f32.gmra.mxu3 %vm652_vm1, %v3144_v29  ;;  %v2517_v6 = vpop.f32.mrf.mxu1  ;;  %v1950_v29 = vrot.slane %v10080_v13, 4  ;;  %v2615_v23 = vadd.f32 %v12028_v35, %v17397_v24  ;;  %v17399_v13 = vld [vmem:[#allocation42_spill] sm:$0xff] }
 0x2ea   : > { %v2665_v5 = vadd.f32 %v2517_v6, %v1785_v51  ;;  %9357 = vmatmul.msk.f32.gmra.mxu0 %vm652_vm1, %v1949_v31  ;;  %v2314_v51 = vrot.slane %v12036_v44, 4  ;;  %v10082_v44 = vld [vmem:[%s10422_s12 + $0x178] sm:$0xff] }
 0x2eb   : > { %9457 = vmatmul.msk.f32.gmra.mxu2 %vm652_vm1, %v2776_v33  ;;  %v1951_v33 = vsel %vm1864_vm3, %v1948_v12, %v1950_v29  ;;  %v1952_v24 = vrot.slane %v10082_v44, 4 }
 0x2ec   : > { %v3348_v10 = vpop.f32.mrf.mxu3  ;;  %9406 = vmatmul.msk.f32.gmra.mxu1 %vm652_vm1, %v2313_v45  ;;  %v2778_v45 = vsel %vm2695_vm4, %v2775_v39, %v2777_v37  ;;  %v2315_v35 = vsel %vm1864_vm3, %v2312_v36, %v2314_v51  ;;  %v2779_v39 = vrot.slane %v10082_v44, 2 }
 0x2ed   : > { %v12090_v19 = vadd.f32 %v3348_v10, %v2665_v5  ;;  %v12104_v5 = vld [vmem:[%s10422_s12 + $0x340] sm:$0xff] }
 0x2ee   : > { %v2982_v31 = vpop.f32.mrf.mxu2  ;;  %v3147_v58 = vrot.slane %v12104_v5, 2 }
 0x2ef   : > { %v12096_v6 = vadd.f32 %v2982_v31, %v2615_v23  ;;  %v12098_v7 = vpop.f32.mrf.mxu0  ;;  %v2316_v23 = vrot.slane %v12058_v8, 4  ;;  %v10084_v8 = vld [vmem:[%s10422_s12 + $0x180] sm:$0xff] }
 0x2f0   : > { %17398 = vst [vmem:[#allocation16_spill] sm:$0xff] %v12098_v7  ;;  %v3148_v12 = vsel %vm2695_vm4, %v3145_v48, %v3147_v58 }
 0x2f1   : > { %9509 = vmatmul.msk.f32.gmra.mxu3 %vm652_vm1, %v3146_v61  ;;  %v12107_v10 = vpop.f32.mrf.mxu1  ;;  %v2616_v61 = vadd.f32 %v2154_v14, %v17399_v13  ;;  %v2317_v14 = vsel %vm1864_vm3, %v2314_v51, %v2316_v23  ;;  %v2318_v13 = vrot.slane %v12082_v20, 4  ;;  %v10086_v20 = vld [vmem:[%s10422_s12 + $0x188] sm:$0xff] }
 0x2f2   : > { %9358 = vmatmul.msk.f32.gmra.mxu0 %vm652_vm1, %v1951_v33  ;;  %v1953_v33 = vsel %vm1864_vm3, %v1950_v29, %v1952_v24 }
 0x2f3   : > { %9458 = vmatmul.msk.f32.gmra.mxu2 %vm652_vm1, %v2778_v45  ;;  %v2780_v45 = vsel %vm2695_vm4, %v2777_v37, %v2779_v39  ;;  %v2781_v37 = vrot.slane %v10084_v8, 2 }
 0x2f4   : > { %9407 = vmatmul.msk.f32.gmra.mxu1 %vm652_vm1, %v2315_v35  ;;  %v12125_v35 = vld [vmem:[%s10422_s12 + $0x348] sm:$0xff] }
 0x2f5   : > { %v3149_v48 = vrot.slane %v12125_v35, 2 }
 0x2f6   : > { %v2985_v31 = vpop.f32.mrf.mxu2 }
 0x2f7   : > { %v12117_v7 = vadd.f32 %v2985_v31, %v2616_v61  ;;  %v12119_v36 = vpop.f32.mrf.mxu0  ;;  %v3150_v29 = vsel %vm2695_vm4, %v3147_v58, %v3149_v48  ;;  %v2782_v31 = vsel %vm2695_vm4, %v2779_v39, %v2781_v37  ;;  %v2319_v58 = vsel %vm1864_vm3, %v2316_v23, %v2318_v13 }
 0x2f8   : > { %17400 = vst [vmem:[#allocation17_spill] sm:$0xff] %v12119_v36  ;;  %v2783_v39 = vrot.slane %v10086_v20, 2 }
 0x2f9   : > { %9510 = vmatmul.msk.f32.gmra.mxu3 %vm652_vm1, %v3148_v12  ;;  %v12128_v44 = vpop.f32.mrf.mxu1  ;;  %v1954_v12 = vrot.slane %v10084_v8, 4  ;;  %v2320_v8 = vrot.slane %v12104_v5, 4  ;;  %v10087_v5 = vld [vmem:[%s10422_s12 + $0x190] sm:$0xff] }
 0x2fa   : > { %17401 = vst [vmem:[#allocation18_spill] sm:$0xff] %v12128_v44  ;;  %9359 = vmatmul.msk.f32.gmra.mxu0 %vm652_vm1, %v1953_v33  ;;  %v12143_v33 = vld [vmem:[%s10422_s12 + $0x350] sm:$0xff] }
 0x2fb   : > { %9459 = vmatmul.msk.f32.gmra.mxu2 %vm652_vm1, %v2780_v45  ;;  %v1955_v51 = vsel %vm1864_vm3, %v1952_v24, %v1954_v12  ;;  %v3151_v45 = vrot.slane %v12143_v33, 2 }
 0x2fc   : > { %9408 = vmatmul.msk.f32.gmra.mxu1 %vm652_vm1, %v2317_v14  ;;  %v1956_v14 = vrot.slane %v10086_v20, 4 }
 0x2fd   : > { %v3152_v24 = vsel %vm2695_vm4, %v3149_v48, %v3151_v45  ;;  %v2321_v48 = vsel %vm1864_vm3, %v2318_v13, %v2320_v8 }
 0x2fe   : > { %v1957_v23 = vsel %vm1864_vm3, %v1954_v12, %v1956_v14  ;;  %v2785_v12 = vrot.slane %v10087_v5, 2 }
 0x2ff   : > { %v12137_v61 = vpop.f32.mrf.mxu0 }
 0x300   : > { %17402 = vst [vmem:[#allocation19_spill] sm:$0xff] %v12137_v61 }
 0x301   : > { %9511 = vmatmul.msk.f32.gmra.mxu3 %vm652_vm1, %v3150_v29  ;;  %v12146_v36 = vpop.f32.mrf.mxu1  ;;  %v12156_v29 = vld [vmem:[%s10422_s12 + $0x358] sm:$0xff] }
 0x302   : > { %17403 = vst [vmem:[#allocation20_spill] sm:$0xff] %v12146_v36  ;;  %9360 = vmatmul.msk.f32.gmra.mxu0 %vm652_vm1, %v1955_v51  ;;  %v2784_v51 = vsel %vm2695_vm4, %v2781_v37, %v2783_v39  ;;  %v2322_v37 = vrot.slane %v12125_v35, 4 }
 0x303   : > { %9460 = vmatmul.msk.f32.gmra.mxu2 %vm652_vm1, %v2782_v31  ;;  %v3153_v31 = vrot.slane %v12156_v29, 2 }
 0x304   : > { %9409 = vmatmul.msk.f32.gmra.mxu1 %vm652_vm1, %v2319_v58  ;;  %v1958_v58 = vrot.slane %v10087_v5, 4 }
 0x305   : > { %v3154_v20 = vsel %vm2695_vm4, %v3151_v45, %v3153_v31  ;;  %v2323_v45 = vsel %vm1864_vm3, %v2320_v8, %v2322_v37 }
 0x306   : > { %v1959_v13 = vsel %vm1864_vm3, %v1956_v14, %v1958_v58  ;;  %v2324_v14 = vrot.slane %v12143_v33, 4 }
 0x307   : > { %v12158_v61 = vpop.f32.mrf.mxu0 }
 0x308   : > { %17404 = vst [vmem:[#allocation21_spill] sm:$0xff] %v12158_v61 }
 0x309   : > { %9512 = vmatmul.msk.f32.gmra.mxu3 %vm652_vm1, %v3152_v24  ;;  %v12164_v36 = vpop.f32.mrf.mxu1  ;;  %v9107_v24 = vld [vmem:[%s10422_s12 + $0x360] sm:$0xff] }
 0x30a   : > { %17405 = vst [vmem:[#allocation22_spill] sm:$0xff] %v12164_v36  ;;  %9361 = vmatmul.msk.f32.gmra.mxu0 %vm652_vm1, %v1957_v23  ;;  %v2786_v23 = vsel %vm2695_vm4, %v2783_v39, %v2785_v12  ;;  %v435_v36 = vld [vmem:[%s10422_s12 + $0x198] sm:$0xff]  ;;  %v9108_v39 = vld [vmem:[%s10422_s12 + $0x368] sm:$0xff] }
 0x30b   : > { %9461 = vmatmul.msk.f32.gmra.mxu2 %vm652_vm1, %v2784_v51  ;;  %v3155_v51 = vrot.slane %v9107_v24, 2  ;;  %v1960_v35 = vrot.slane %v435_v36, 4  ;;  %v2787_v5 = vrot.slane %v435_v36, 2 }
 0x30c   : > { %9410 = vmatmul.msk.f32.gmra.mxu1 %vm652_vm1, %v2321_v48 }
 0x30d   : > { %v3156_v48 = vsel %vm2695_vm4, %v3153_v31, %v3155_v51  ;;  %v1961_v8 = vsel %vm1864_vm3, %v1958_v58, %v1960_v35  ;;  %v2326_v58 = vrot.slane %v12156_v29, 4 }
 0x30f   : > { %v12174_v61 = vpop.f32.mrf.mxu0 }
 0x310   : > { %17406 = vst [vmem:[#allocation23_spill] sm:$0xff] %v12174_v61  ;;  %v3157_v61 = vrot.slane %v9108_v39, 2 }
 0x311   : > { %9513 = vmatmul.msk.f32.gmra.mxu3 %vm652_vm1, %v3154_v20  ;;  %v12180_v44 = vpop.f32.mrf.mxu1 }
 0x312   : > { %17407 = vst [vmem:[#allocation24_spill] sm:$0xff] %v12180_v44  ;;  %9362 = vmatmul.msk.f32.gmra.mxu0 %vm652_vm1, %v1959_v13  ;;  %v2788_v13 = vsel %vm2695_vm4, %v2785_v12, %v2787_v5  ;;  %v3158_v33 = vsel %vm2695_vm4, %v3155_v51, %v3157_v61  ;;  %v9109_v12 = vld [vmem:[%s10422_s12 + $0x370] sm:$0xff]  ;;  %v437_v51 = vld [vmem:[%s10422_s12 + $0x1a8] sm:$0xff] }
 0x313   : > { %9462 = vmatmul.msk.f32.gmra.mxu2 %vm652_vm1, %v2786_v23  ;;  %v436_v23 = vld [vmem:[%s10422_s12 + $0x1a0] sm:$0xff] }
 0x314   : > { %9411 = vmatmul.msk.f32.gmra.mxu1 %vm652_vm1, %v2323_v45  ;;  %v2325_v45 = vsel %vm1864_vm3, %v2322_v37, %v2324_v14  ;;  %v1962_v36 = vrot.slane %v436_v23, 4  ;;  %v2789_v31 = vrot.slane %v436_v23, 2  ;;  %v2791_v23 = vrot.slane %v437_v51, 2 }
 0x316   : > { %v1963_v37 = vsel %vm1864_vm3, %v1960_v35, %v1962_v36  ;;  %v2790_v39 = vsel %vm2695_vm4, %v2787_v5, %v2789_v31  ;;  %v2328_v35 = vrot.slane %v9107_v24, 4  ;;  %v2792_v36 = vsel %vm2695_vm4, %v2789_v31, %v2791_v23 }
 0x317   : > { %v12189_v20 = vpop.f32.mrf.mxu0 }
 0x319   : > { %9514 = vmatmul.msk.f32.gmra.mxu3 %vm652_vm1, %v3156_v48  ;;  %v12195_v44 = vpop.f32.mrf.mxu1 }
 0x31a   : > { %9363 = vmatmul.msk.f32.gmra.mxu0 %vm652_vm1, %v1961_v8  ;;  %v3159_v8 = vrot.slane %v9109_v12, 2  ;;  %v438_v12 = vld [vmem:[%s10422_s12 + $0x1b0] sm:$0xff] }
 0x31b   : > { %9463 = vmatmul.msk.f32.gmra.mxu2 %vm652_vm1, %v2788_v13 }
 0x31c   : > { %9412 = vmatmul.msk.f32.gmra.mxu1 %vm652_vm1, %v2325_v45  ;;  %v2327_v45 = vsel %vm1864_vm3, %v2324_v14, %v2326_v58  ;;  %v3160_v29 = vsel %vm2695_vm4, %v3157_v61, %v3159_v8  ;;  %v2793_v61 = vrot.slane %v438_v12, 2  ;;  %v10089_v8 = vld [vmem:[%s10422_s12 + $0x40] sm:$0xff]  ;;  %v9634_v12 = vld [vmem:[%s17226_s3 + $0x2f8] sm:$0xff] }
 0x31d   : > { %5410 = vmatpush.msrb.mxu2 %v9634_v12  ;;  %v10097_v12 = vld [vmem:[%s10422_s12 + $0x60] sm:$0xff] }
 0x31e   : > { %v2794_v31 = vsel %vm2695_vm4, %v2791_v23, %v2793_v61  ;;  %v10092_v23 = vld [vmem:[%s10422_s12 + $0x200] sm:$0xff]  ;;  %v10094_v61 = vld [vmem:[%s10422_s12 + $0x208] sm:$0xff] }
 0x31f   : > { %v12204_v48 = vpop.f32.mrf.mxu0 }
 0x321   : > { %9515 = vmatmul.msk.f32.gmra.mxu3 %vm652_vm1, %v3158_v33  ;;  %v12209_v13 = vpop.f32.mrf.mxu1  ;;  %v2329_v33 = vsel %vm1864_vm3, %v2326_v58, %v2328_v35  ;;  %v10090_v58 = vld [vmem:[%s10422_s12 + $0x1f8] sm:$0xff] }
 0x322   : > { %9364 = vmatmul.msk.f32.gmra.mxu0 %vm652_vm1, %v1963_v37  ;;  %v10088_v37 = vld [vmem:[%s10422_s12 + $0x38] sm:$0xff] }
 0x323   : > { %9464 = vmatmul.msk.f32.gmra.mxu2 %vm652_vm1, %v2790_v39 }
 0x324   : > { %9413 = vmatmul.msk.f32.gmra.mxu1 %vm652_vm1, %v2327_v45 }
 0x327   : > { %v12217_v5 = vpop.f32.mrf.mxu0 }
 0x329   : > { %9516 = vmatmul.msk.f32.gmra.mxu3 %vm652_vm1, %v3160_v29  ;;  %v12221_v14 = vpop.f32.mrf.mxu1  ;;  %v10091_v29 = vld [vmem:[%s10422_s12 + $0x48] sm:$0xff] }
 0x32a   : > { %9520 = vmatmul.msk.f32.vlgmr.msra.gmra.mxu0 %vm652_vm1, %v10088_v37  ;;  %v9650_v37 = vld [vmem:[%s17226_s3 + $0x378] sm:$0xff] }
 0x32b   : > { %9465 = vmatmul.msk.f32.gmra.mxu2 %vm652_vm1, %v2792_v36  ;;  %5466 = vmatpush.msra.mxu3 %v9650_v37  ;;  %v10098_v37 = vld [vmem:[%s10422_s12 + $0x218] sm:$0xff] }
 0x32c   : > { %9414 = vmatmul.msk.f32.gmra.mxu1 %vm652_vm1, %v2329_v33  ;;  %v10093_v33 = vld [vmem:[%s10422_s12 + $0x50] sm:$0xff] }
 0x32f   : > { %v12229_v24 = vpop.f32.mrf.mxu0 }
 0x330   : > { %17408 = vst [vmem:[#allocation25_spill] sm:$0xff] %v12229_v24 }
 0x331   : > { %v12232_v39 = vpop.f32.mrf.mxu1 }
 0x332   : > { %9521 = vmatmul.msk.f32.gmra.mxu0 %vm652_vm1, %v10089_v8 }
 0x333   : > { %9466 = vmatmul.msk.f32.gmra.mxu2 %vm652_vm1, %v2794_v31 }
 0x334   : > { %9570 = vmatmul.msk.f32.vlgmr.msra.gmra.mxu1 %vm652_vm1, %v10090_v58  ;;  %v10095_v58 = vld [vmem:[%s10422_s12 + $0x58] sm:$0xff] }
 0x337   : > { %v12239_v45 = vpop.f32.mrf.mxu0 }
 0x338   : > { %17409 = vst [vmem:[#allocation26_spill] sm:$0xff] %v12239_v45 }
 0x339   : > { %v12241_v51 = vpop.f32.mrf.mxu1 }
 0x33a   : > { %9522 = vmatmul.msk.f32.gmra.mxu0 %vm652_vm1, %v10091_v29  ;;  %v10096_v29 = vld [vmem:[%s10422_s12 + $0x210] sm:$0xff] }
 0x33c   : > { %9571 = vmatmul.msk.f32.gmra.mxu1 %vm652_vm1, %v10092_v23 }
 0x33f   : > { %v12247_v35 = vpop.f32.mrf.mxu0 }
 0x340   : > { %17410 = vst [vmem:[#allocation27_spill] sm:$0xff] %v12247_v35  ;;  %v10118_v35 = vld [vmem:[%s10422_s12 + $0x268] sm:$0xff] }
 0x341   : > { %v12249_v36 = vpop.f32.mrf.mxu1 }
 0x342   : > { %17411 = vst [vmem:[#allocation28_spill] sm:$0xff] %v12249_v36  ;;  %9523 = vmatmul.msk.f32.gmra.mxu0 %vm652_vm1, %v10093_v33 }
 0x344   : > { %9572 = vmatmul.msk.f32.gmra.mxu1 %vm652_vm1, %v10094_v61 }
 0x347   : > { %v12261_v31 = vpop.f32.mrf.mxu0 }
 0x348   : > { %17412 = vst [vmem:[#allocation29_spill] sm:$0xff] %v12261_v31 }
 0x349   : > { %v12263_v8 = vpop.f32.mrf.mxu1 }
 0x34a   : > { %17413 = vst [vmem:[#allocation30_spill] sm:$0xff] %v12263_v8  ;;  %9524 = vmatmul.msk.f32.gmra.mxu0 %vm652_vm1, %v10095_v58  ;;  %v10099_v58 = vld [vmem:[%s10422_s12 + $0x68] sm:$0xff]  ;;  %v10122_v8 = vld [vmem:[%s10422_s12 + $0x278] sm:$0xff] }
 0x34c   : > { %9573 = vmatmul.msk.f32.gmra.mxu1 %vm652_vm1, %v10096_v29  ;;  %v9633_v29 = vld [vmem:[%s17226_s3 + $0x2f0] sm:$0xff] }
 0x34d   : > { %5411 = vmatpush.msrb.mxu2 %v9633_v29 }
 0x34f   : > { %v12269_v23 = vpop.f32.mrf.mxu0 }
 0x350   : > { %17414 = vst [vmem:[#allocation31_spill] sm:$0xff] %v12269_v23  ;;  %v10100_v23 = vld [vmem:[%s10422_s12 + $0x220] sm:$0xff] }
 0x351   : > { %v12271_v33 = vpop.f32.mrf.mxu1 }
 0x352   : > { %17415 = vst [vmem:[#allocation32_spill] sm:$0xff] %v12271_v33  ;;  %9525 = vmatmul.msk.f32.gmra.mxu0 %vm652_vm1, %v10097_v12  ;;  %v9649_v12 = vld [vmem:[%s17226_s3 + $0x370] sm:$0xff]  ;;  %v10103_v33 = vld [vmem:[%s10422_s12 + $0x78] sm:$0xff] }
 0x353   : > { %5467 = vmatpush.msra.mxu3 %v9649_v12  ;;  %v10104_v12 = vld [vmem:[%s10422_s12 + $0x230] sm:$0xff] }
 0x354   : > { %9574 = vmatmul.msk.f32.gmra.mxu1 %vm652_vm1, %v10098_v37 }
 0x357   : > { %v12277_v61 = vpop.f32.mrf.mxu0 }
 0x358   : > { %17416 = vst [vmem:[#allocation33_spill] sm:$0xff] %v12277_v61 }
 0x359   : > { %v12279_v31 = vpop.f32.mrf.mxu1 }
 0x35a   : > { %17417 = vst [vmem:[#allocation34_spill] sm:$0xff] %v12279_v31  ;;  %9526 = vmatmul.msk.f32.gmra.mxu0 %vm652_vm1, %v10099_v58  ;;  %v10101_v58 = vld [vmem:[%s10422_s12 + $0x70] sm:$0xff]  ;;  %v10102_v31 = vld [vmem:[%s10422_s12 + $0x228] sm:$0xff] }
 0x35c   : > { %9575 = vmatmul.msk.f32.gmra.mxu1 %vm652_vm1, %v10100_v23 }
 0x35f   : > { %v12291_v37 = vpop.f32.mrf.mxu0 }
 0x360   : > { %17418 = vst [vmem:[#allocation35_spill] sm:$0xff] %v12291_v37 }
 0x361   : > { %v12293_v61 = vpop.f32.mrf.mxu1 }
 0x362   : > { %17419 = vst [vmem:[#allocation36_spill] sm:$0xff] %v12293_v61  ;;  %9527 = vmatmul.msk.f32.gmra.mxu0 %vm652_vm1, %v10101_v58  ;;  %v10105_v58 = vld [vmem:[%s10422_s12 + $0x80] sm:$0xff] }
 0x364   : > { %9576 = vmatmul.msk.f32.gmra.mxu1 %vm652_vm1, %v10102_v31  ;;  %v9632_v31 = vld [vmem:[%s17226_s3 + $0x2e8] sm:$0xff] }
 0x365   : > { %5412 = vmatpush.msrb.mxu2 %v9632_v31 }
 0x367   : > { %v12299_v29 = vpop.f32.mrf.mxu0 }
 0x368   : > { %17420 = vst [vmem:[#allocation37_spill] sm:$0xff] %v12299_v29  ;;  %v10106_v29 = vld [vmem:[%s10422_s12 + $0x238] sm:$0xff] }
 0x369   : > { %v12301_v23 = vpop.f32.mrf.mxu1 }
 0x36a   : > { %17421 = vst [vmem:[#allocation38_spill] sm:$0xff] %v12301_v23  ;;  %9528 = vmatmul.msk.f32.gmra.mxu0 %vm652_vm1, %v10103_v33  ;;  %v9648_v33 = vld [vmem:[%s17226_s3 + $0x368] sm:$0xff]  ;;  %v10109_v23 = vld [vmem:[%s10422_s12 + $0x90] sm:$0xff] }
 0x36b   : > { %5468 = vmatpush.msra.mxu3 %v9648_v33  ;;  %v10110_v33 = vld [vmem:[%s10422_s12 + $0x248] sm:$0xff] }
 0x36c   : > { %9577 = vmatmul.msk.f32.gmra.mxu1 %vm652_vm1, %v10104_v12 }
 0x36f   : > { %v12307_v37 = vpop.f32.mrf.mxu0 }
 0x370   : > { %17422 = vst [vmem:[#allocation39_spill] sm:$0xff] %v12307_v37 }
 0x371   : > { %v12309_v61 = vpop.f32.mrf.mxu1 }
 0x372   : > { %17423 = vst [vmem:[#allocation42_spill] sm:$0xff] %v12309_v61  ;;  %9529 = vmatmul.msk.f32.gmra.mxu0 %vm652_vm1, %v10105_v58  ;;  %v10107_v58 = vld [vmem:[%s10422_s12 + $0x88] sm:$0xff]  ;;  %v10108_v61 = vld [vmem:[%s10422_s12 + $0x240] sm:$0xff] }
 0x374   : > { %9578 = vmatmul.msk.f32.gmra.mxu1 %vm652_vm1, %v10106_v29 }
 0x377   : > { %v12321_v12 = vpop.f32.mrf.mxu0 }
 0x378   : > { %17424 = vst [vmem:[#allocation113_spill] sm:$0xff] %v12321_v12 }
 0x379   : > { %v12323_v37 = vpop.f32.mrf.mxu1 }
 0x37a   : > { %17425 = vst [vmem:[#allocation114_spill] sm:$0xff] %v12323_v37  ;;  %9530 = vmatmul.msk.f32.gmra.mxu0 %vm652_vm1, %v10107_v58  ;;  %v10111_v58 = vld [vmem:[%s10422_s12 + $0x98] sm:$0xff] }
 0x37c   : > { %9579 = vmatmul.msk.f32.gmra.mxu1 %vm652_vm1, %v10108_v61  ;;  %v9631_v61 = vld [vmem:[%s17226_s3 + $0x2e0] sm:$0xff] }
 0x37d   : > { %5413 = vmatpush.msrb.mxu2 %v9631_v61 }
 0x37f   : > { %v12329_v31 = vpop.f32.mrf.mxu0 }
 0x380   : > { %17426 = vst [vmem:[#allocation115_spill] sm:$0xff] %v12329_v31  ;;  %v10112_v31 = vld [vmem:[%s10422_s12 + $0x250] sm:$0xff] }
 0x381   : > { %v12331_v29 = vpop.f32.mrf.mxu1 }
 0x382   : > { %17427 = vst [vmem:[#allocation116_spill] sm:$0xff] %v12331_v29  ;;  %9531 = vmatmul.msk.f32.gmra.mxu0 %vm652_vm1, %v10109_v23  ;;  %v9647_v23 = vld [vmem:[%s17226_s3 + $0x360] sm:$0xff]  ;;  %v10115_v29 = vld [vmem:[%s10422_s12 + $0xa8] sm:$0xff] }
 0x383   : > { %5469 = vmatpush.msra.mxu3 %v9647_v23  ;;  %v10116_v23 = vld [vmem:[%s10422_s12 + $0x260] sm:$0xff] }
 0x384   : > { %9580 = vmatmul.msk.f32.gmra.mxu1 %vm652_vm1, %v10110_v33 }
 0x387   : > { %v12337_v12 = vpop.f32.mrf.mxu0 }
 0x388   : > { %17428 = vst [vmem:[#allocation117_spill] sm:$0xff] %v12337_v12 }
 0x389   : > { %v12339_v37 = vpop.f32.mrf.mxu1 }
 0x38a   : > { %17429 = vst [vmem:[#allocation118_spill] sm:$0xff] %v12339_v37  ;;  %9532 = vmatmul.msk.f32.gmra.mxu0 %vm652_vm1, %v10111_v58  ;;  %v10113_v58 = vld [vmem:[%s10422_s12 + $0xa0] sm:$0xff]  ;;  %v10114_v37 = vld [vmem:[%s10422_s12 + $0x258] sm:$0xff] }
 0x38c   : > { %9581 = vmatmul.msk.f32.gmra.mxu1 %vm652_vm1, %v10112_v31 }
 0x38f   : > { %v12351_v33 = vpop.f32.mrf.mxu0 }
 0x390   : > { %17430 = vst [vmem:[#allocation119_spill] sm:$0xff] %v12351_v33 }
 0x391   : > { %v12353_v12 = vpop.f32.mrf.mxu1 }
 0x392   : > { %17431 = vst [vmem:[#allocation120_spill] sm:$0xff] %v12353_v12  ;;  %9533 = vmatmul.msk.f32.gmra.mxu0 %vm652_vm1, %v10113_v58  ;;  %v10117_v58 = vld [vmem:[%s10422_s12 + $0xb0] sm:$0xff] }
 0x394   : > { %9582 = vmatmul.msk.f32.gmra.mxu1 %vm652_vm1, %v10114_v37 }
 0x397   : > { %v12359_v61 = vpop.f32.mrf.mxu0 }
 0x398   : > { %17432 = vst [vmem:[#allocation121_spill] sm:$0xff] %v12359_v61 }
 0x399   : > { %v12361_v31 = vpop.f32.mrf.mxu1 }
 0x39a   : > { %17433 = vst [vmem:[#allocation122_spill] sm:$0xff] %v12361_v31  ;;  %9534 = vmatmul.msk.f32.gmra.mxu0 %vm652_vm1, %v10115_v29  ;;  %v10119_v31 = vld [vmem:[%s10422_s12 + $0xb8] sm:$0xff]  ;;  %v10120_v29 = vld [vmem:[%s10422_s12 + $0x270] sm:$0xff] }
 0x39c   : > { %9583 = vmatmul.msk.f32.gmra.mxu1 %vm652_vm1, %v10116_v23 }
 0x39f   : > { %v12367_v33 = vpop.f32.mrf.mxu0 }
 0x3a0   : > { %17434 = vst [vmem:[#allocation123_spill] sm:$0xff] %v12367_v33  ;;  %v9630_v33 = vld [vmem:[%s17226_s3 + $0x2d8] sm:$0xff] }
 0x3a1   : > { %v12369_v12 = vpop.f32.mrf.mxu1  ;;  %5414 = vmatpush.msrb.mxu2 %v9630_v33 }
 0x3a2   : > { %17435 = vst [vmem:[#allocation124_spill] sm:$0xff] %v12369_v12  ;;  %9535 = vmatmul.msk.f32.gmra.mxu0 %vm652_vm1, %v10117_v58  ;;  %v10121_v12 = vld [vmem:[%s10422_s12 + $0xc0] sm:$0xff] }
 0x3a4   : > { %9584 = vmatmul.msk.f32.gmra.mxu1 %vm652_vm1, %v10118_v35  ;;  %v9646_v35 = vld [vmem:[%s17226_s3 + $0x358] sm:$0xff] }
 0x3a5   : > { %5470 = vmatpush.msra.mxu3 %v9646_v35  ;;  %v10123_v35 = vld [vmem:[%s10422_s12 + $0xc8] sm:$0xff] }
 0x3a7   : > { %v3559_v37 = vpop.f32.mrf.mxu0 }
 0x3a9   : > { %v12375_v61 = vpop.f32.mrf.mxu1 }
 0x3aa   : > { %17436 = vst [vmem:[#allocation125_spill] sm:$0xff] %v12375_v61  ;;  %9536 = vmatmul.msk.f32.gmra.mxu0 %vm652_vm1, %v10119_v31  ;;  %v3885_v61 = vadd.f32 %v3559_v37, %v11543_v43 }
 0x3ac   : > { %9585 = vmatmul.msk.f32.gmra.mxu1 %vm652_vm1, %v10120_v29 }
 0x3af   : > { %v3562_v23 = vpop.f32.mrf.mxu0 }
 0x3b0   : > { %v3886_v24 = vadd.f32 %v3562_v23, %v11567_v63  ;;  %v10126_v23 = vld [vmem:[%s10422_s12 + $0x288] sm:$0xff] }
 0x3b1   : > { %v3738_v58 = vpop.f32.mrf.mxu1 }
 0x3b2   : > { %v3934_v31 = vadd.f32 %v3738_v58, %v11516_v57  ;;  %9537 = vmatmul.msk.f32.gmra.mxu0 %vm652_vm1, %v10121_v12  ;;  %v10124_v57 = vld [vmem:[%s10422_s12 + $0x280] sm:$0xff] }
 0x3b4   : > { %v3984_v29 = vmax.f32 %v3885_v61, %v3934_v31  ;;  %9586 = vmatmul.msk.f32.gmra.mxu1 %vm652_vm1, %v10122_v8  ;;  %v12402_v8 = vld [vmem:[%s17225_s2] ss:$0 sm:$0xff] }
 0x3b7   : > { %v3565_v45 = vpop.f32.mrf.mxu0 }
 0x3b8   : > { %v3887_v37 = vadd.f32 %v3565_v45, %v11591_v52  ;;  %v9645_v52 = vld [vmem:[%s17226_s3 + $0x350] sm:$0xff] }
 0x3b9   : > { %v3741_v36 = vpop.f32.mrf.mxu1  ;;  %5471 = vmatpush.msra.mxu3 %v9645_v52 }
 0x3ba   : > { %v3935_v33 = vadd.f32 %v3741_v36, %v11538_v3  ;;  %9538 = vmatmul.msk.f32.gmra.mxu0 %vm652_vm1, %v10123_v35  ;;  %v10125_v36 = vld [vmem:[%s10422_s12 + $0xd0] sm:$0xff] }
 0x3bc   : > { %v3985_v43 = vmax.f32 %v3886_v24, %v3935_v33  ;;  %9587 = vmatmul.msk.f32.gmra.mxu1 %vm652_vm1, %v10124_v57  ;;  %v9629_v33 = vld [vmem:[%s17226_s3 + $0x2d0] sm:$0xff] }
 0x3bd   : > { %5415 = vmatpush.msrb.mxu2 %v9629_v33 }
 0x3be   : > { %v4037_v63 = vadd.f32 %v12402_v8, %v3985_v43 }
 0x3bf   : > { %v3568_v12 = vpop.f32.mrf.mxu0 }
 0x3c0   : > { %v4086_v58 = vmax.f32 %v4037_v63, 0.0 }
 0x3c1   : > { %v3744_v61 = vpop.f32.mrf.mxu1 }
 0x3c2   : > { %v3936_v3 = vadd.f32 %v3744_v61, %v11561_v16  ;;  %9539 = vmatmul.msk.f32.gmra.mxu0 %vm652_vm1, %v10125_v36  ;;  %v4036_v16 = vadd.f32 %v12402_v8, %v3984_v29  ;;  %v4137_v57 = vrot.slane %v4086_v58, 6  ;;  %v3888_v61 = vadd.f32 %v3568_v12, %v11615_v18  ;;  %v10128_v29 = vld [vmem:[%s10422_s12 + $0x290] sm:$0xff] }
 0x3c4   : > { %v3986_v24 = vmax.f32 %v3887_v37, %v3936_v3  ;;  %9588 = vmatmul.msk.f32.gmra.mxu1 %vm652_vm1, %v10126_v23  ;;  %v10127_v3 = vld [vmem:[%s10422_s12 + $0xd8] sm:$0xff]  ;;  %v4085_v36 = vmax.f32 %v4036_v16, 0.0  ;;  %v10129_v16 = vld [vmem:[%s10422_s12 + $0xe0] sm:$0xff] }
 0x3c6   : > { %v4038_v31 = vadd.f32 %v12402_v8, %v3986_v24 }
 0x3c7   : > { %v3571_v45 = vpop.f32.mrf.mxu0 }
 0x3c8   : > { %v4087_v35 = vmax.f32 %v4038_v31, 0.0 }
 0x3c9   : > { %v3747_v43 = vpop.f32.mrf.mxu1 }
 0x3ca   : > { %v4138_v37 = vrot.slane %v4087_v35, 6  ;;  %v3937_v63 = vadd.f32 %v3747_v43, %v11585_v27  ;;  %9540 = vmatmul.msk.f32.gmra.mxu0 %vm652_vm1, %v10127_v3  ;;  %v3889_v27 = vadd.f32 %v3571_v45, %v11639_v40 }
 0x3cc   : > { %v4139_v24 = vsel %vm552_vm2, %v4137_v57, %v4138_v37  ;;  %v3987_v23 = vmax.f32 %v3888_v61, %v3937_v63  ;;  %9589 = vmatmul.msk.f32.gmra.mxu1 %vm652_vm1, %v10128_v29  ;;  %v10130_v63 = vld [vmem:[%s10422_s12 + $0x298] sm:$0xff] }
 0x3cd   : > { %v4144_v31 = vmax.f32 %v4085_v36, %v4139_v24 }
 0x3ce   : > { %v4039_v33 = vadd.f32 %v12402_v8, %v3987_v23 }
 0x3cf   : > { %4318 = vst [vmem:[#allocation2 + $0x2b0] sm:$0xff] %v4144_v31  ;;  %v3574_v18 = vpop.f32.mrf.mxu0  ;;  %v4297_v36 = vrot.slane %v4144_v31, 1  ;;  %v4302_v24 = vrot.slane %v4144_v31, 2  ;;  %v4308_v23 = vrot.slane %v4144_v31, 3  ;;  %v4313_v29 = vrot.slane %v4144_v31, 4 }
 0x3d0   : > { %v4088_v12 = vmax.f32 %v4039_v33, 0.0  ;;  %v3890_v31 = vadd.f32 %v3574_v18, %v11663_v55  ;;  %v9644_v55 = vld [vmem:[%s17226_s3 + $0x348] sm:$0xff] }
 0x3d1   : > { %v3750_v52 = vpop.f32.mrf.mxu1  ;;  %5472 = vmatpush.msra.mxu3 %v9644_v55  ;;  %v10136_v55 = vld [vmem:[%s10422_s12 + $0x2b0] sm:$0xff] }
 0x3d2   : > { %v4140_v35 = vrot.slane %v4088_v12, 6  ;;  %v3938_v43 = vadd.f32 %v3750_v52, %v11609_v38  ;;  %9541 = vmatmul.msk.f32.gmra.mxu0 %vm652_vm1, %v10129_v16 }
 0x3d4   : > { %v4141_v57 = vsel %vm552_vm2, %v4138_v37, %v4140_v35  ;;  %v3988_v61 = vmax.f32 %v3889_v27, %v3938_v43  ;;  %9590 = vmatmul.msk.f32.gmra.mxu1 %vm652_vm1, %v10130_v63 }
 0x3d5   : > { %v4145_v3 = vmax.f32 %v4086_v58, %v4141_v57  ;;  %v10131_v57 = vld [vmem:[%s10422_s12 + $0xe8] sm:$0xff] }
 0x3d7   : > { %v4298_v40 = vrot.slane %v4145_v3, 1  ;;  %v4303_v45 = vrot.slane %v4145_v3, 2  ;;  %v4309_v33 = vrot.slane %v4145_v3, 3  ;;  %v4314_v38 = vrot.slane %v4145_v3, 4  ;;  %4323 = vst [vmem:[#allocation2 + $0xf0] sm:$0x3] %v4145_v3  ;;  %v3577_v52 = vpop.f32.mrf.mxu0 }
 0x3d8   : > { %v10132_v3 = vld [vmem:[%s10422_s12 + $0x2a0] sm:$0xff] }
 0x3d9   : > { %v4299_v37 = vsel %vm751_vm0, %v4297_v36, %v4298_v40  ;;  %v4304_v27 = vsel %vm2695_vm4, %v4302_v24, %v4303_v45  ;;  %v4310_v35 = vsel %vm4307_vm5, %v4308_v23, %v4309_v33  ;;  %v4315_v58 = vsel %vm1864_vm3, %v4313_v29, %v4314_v38  ;;  %4324 = vst [vmem:[#allocation2 + $0xf8] sm:$0x3] %v4298_v40  ;;  %v3753_v43 = vpop.f32.mrf.mxu1  ;;  %v9628_v36 = vld [vmem:[%s17226_s3 + $0x2c8] sm:$0xff] }
 0x3da   : > { %4319 = vst [vmem:[#allocation2 + $0xd0] sm:$0xff] %v4299_v37  ;;  %v3939_v16 = vadd.f32 %v3753_v43, %v11633_v49  ;;  %9542 = vmatmul.msk.f32.gmra.mxu0 %vm652_vm1, %v10131_v57  ;;  %5416 = vmatpush.msrb.mxu2 %v9628_v36  ;;  %v3891_v29 = vadd.f32 %v3577_v52, %v11687_v46  ;;  %v10134_v43 = vld [vmem:[%s10422_s12 + $0x2a8] sm:$0xff]  ;;  %v10135_v57 = vld [vmem:[%s10422_s12 + $0xf8] sm:$0xff] }
 0x3db   : > { %4320 = vst [vmem:[#allocation2 + $0x10] sm:$0xff] %v4304_v27  ;;  %v10133_v27 = vld [vmem:[%s10422_s12 + $0xf0] sm:$0xff] }
 0x3dc   : > { %4321 = vst [vmem:[#allocation2 + $0x48] sm:$0xff] %v4310_v35  ;;  %v3989_v63 = vmax.f32 %v3890_v31, %v3939_v16  ;;  %9591 = vmatmul.msk.f32.gmra.mxu1 %vm652_vm1, %v10132_v3 }
 0x3dd   : > { %4322 = vst [vmem:[#allocation2 + $0x30] sm:$0xff] %v4315_v58 }
 0x3de   : > { %4325 = vst [vmem:[#allocation2 + $0x78] sm:$0x3] %v4303_v45  ;;  %v4041_v49 = vadd.f32 %v12402_v8, %v3989_v63  ;;  %v9626_v63 = vld [vmem:[%s17226_s3 + $0x2b8] sm:$0xff] }
 0x3df   : > { %4326 = vst [vmem:[#allocation2 + $0x128] sm:$0x3] %v4309_v33  ;;  %v3580_v18 = vpop.f32.mrf.mxu0  ;;  %v4040_v33 = vadd.f32 %v12402_v8, %v3988_v61 }
 0x3e0   : > { %4327 = vst [vmem:[#allocation2 + $0xe0] sm:$0x3] %v4314_v38  ;;  %v4090_v24 = vmax.f32 %v4041_v49, 0.0  ;;  %v12463_v52 = vadd.f32 %v3580_v18, %v11711_v0  ;;  %v9625_v18 = vld [vmem:[%s17226_s3 + $0x2b0] sm:$0xff] }
 0x3e1   : > { %v3756_v23 = vpop.f32.mrf.mxu1  ;;  %v4089_v61 = vmax.f32 %v4040_v33, 0.0  ;;  %v9624_v33 = vld [vmem:[%s17226_s3 + $0x2a8] sm:$0xff] }
 0x3e2   : > { %v4148_v40 = vrot.slane %v4090_v24, 6  ;;  %v3940_v37 = vadd.f32 %v3756_v23, %v11657_v62  ;;  %9543 = vmatmul.msk.f32.gmra.mxu0 %vm652_vm1, %v10133_v27  ;;  %v9627_v62 = vld [vmem:[%s17226_s3 + $0x2c0] sm:$0xff] }
 0x3e3   : > { %5417 = vmatpush.msrb.mxu2 %v9627_v62 }
 0x3e4   : > { %v4154_v35 = vmax.f32 %v4088_v12, %v4148_v40  ;;  %v3990_v58 = vmax.f32 %v3891_v29, %v3940_v37  ;;  %9592 = vmatmul.msk.f32.gmra.mxu1 %vm652_vm1, %v10134_v43 }
 0x3e5   : > { %5418 = vmatpush.msrb.mxu2 %v9626_v63 }
 0x3e6   : > { %v4042_v45 = vadd.f32 %v12402_v8, %v3990_v58  ;;  %v4333_v23 = vrot.slane %v4154_v35, 2  ;;  %v4337_v29 = vrot.slane %v4154_v35, 3 }
 0x3e7   : > { %v3583_v38 = vpop.f32.mrf.mxu0  ;;  %5419 = vmatpush.msrb.mxu2 %v9625_v18 }
 0x3e8   : > { %v4091_v31 = vmax.f32 %v4042_v45, 0.0 }
 0x3e9   : > { %v3759_v46 = vpop.f32.mrf.mxu1  ;;  %5420 = vmatpush.msrb.mxu2 %v9624_v33  ;;  %v9621_v33 = vld [vmem:[%s17226_s3 + $0x290] sm:$0xff] }
 0x3ea   : > { %v4149_v12 = vrot.slane %v4091_v31, 6  ;;  %v12466_v16 = vadd.f32 %v3759_v46, %v11681_v17  ;;  %9544 = vmatmul.msk.f32.gmra.mxu0 %vm652_vm1, %v10135_v57  ;;  %v4330_v17 = vrot.slane %v4154_v35, 1  ;;  %v3893_v31 = vadd.f32 %v3583_v38, %v11735_v11 }
 0x3ec   : > { %v4150_v3 = vsel %vm552_vm2, %v4148_v40, %v4149_v12  ;;  %v4156_v36 = vmax.f32 %v4090_v24, %v4149_v12  ;;  %v3991_v0 = vmax.f32 %v12463_v52, %v12466_v16  ;;  %9593 = vmatmul.msk.f32.gmra.mxu1 %vm652_vm1, %v10136_v55  ;;  %v9636_v16 = vld [vmem:[%s17226_s3 + $0x308] sm:$0xff] }
 0x3ed   : > { %v4155_v49 = vmax.f32 %v4089_v61, %v4150_v3  ;;  %v9623_v61 = vld [vmem:[%s17226_s3 + $0x2a0] sm:$0xff] }
 0x3ee   : > { %v4340_v37 = vrot.slane %v4156_v36, 3  ;;  %v4343_v27 = vrot.slane %v4156_v36, 4  ;;  %v10137_v36 = vld [vmem:[%s10422_s12 + $0x100] sm:$0xff]  ;;  %5421 = vmatpush.msrb.mxu2 %v9623_v61 }
 0x3ef   : > { %v4331_v40 = vrot.slane %v4155_v49, 1  ;;  %v4334_v24 = vrot.slane %v4155_v49, 2  ;;  %v4338_v58 = vrot.slane %v4155_v49, 3  ;;  %v4342_v43 = vrot.slane %v4155_v49, 4  ;;  %v3586_v45 = vpop.f32.mrf.mxu0  ;;  %v9619_v61 = vld [vmem:[%s17226_s3 + $0x280] sm:$0xff] }
 0x3f1   : > { %v4332_v46 = vsel %vm751_vm0, %v4330_v17, %v4331_v40  ;;  %v4335_v35 = vsel %vm2695_vm4, %v4333_v23, %v4334_v24  ;;  %v4339_v62 = vsel %vm4307_vm5, %v4337_v29, %v4338_v58  ;;  %v4341_v12 = vsel %vm4307_vm5, %v4338_v58, %v4340_v37  ;;  %4372 = vst [vmem:[#allocation2] sm:$0xf] %v4334_v24  ;;  %v3762_v57 = vpop.f32.mrf.mxu1  ;;  %v9622_v23 = vld [vmem:[%s17226_s3 + $0x298] sm:$0xff] }
 0x3f2   : > { %v4344_v63 = vsel %vm1864_vm3, %v4342_v43, %v4343_v27  ;;  %v4345_v3 = vrot.slane %v4332_v46, 2  ;;  %v4346_v11 = vrot.slane %v4331_v40, 2  ;;  %v4348_v38 = vrot.slane %v4335_v35, 2  ;;  %4367 = vst [vmem:[#allocation2 + $0xf0] sm:$0xfc] %v4335_v35  ;;  %9545 = vmatmul.msk.f32.gmra.mxu0 %vm652_vm1, %v10137_v36  ;;  %v10138_v40 = vld [vmem:[%s10422_s12 + $0x2b8] sm:$0xff]  ;;  %5422 = vmatpush.msrb.mxu2 %v9622_v23 }
 0x3f3   : > { %v4349_v55 = vrot.slane %v4334_v24, 2  ;;  %v4351_v17 = vrot.slane %v4339_v62, 2  ;;  %v4352_v49 = vrot.slane %v4341_v12, 2  ;;  %v4354_v18 = vrot.slane %v4342_v43, 2  ;;  %v9643_v24 = vld [vmem:[%s17226_s3 + $0x340] sm:$0xff]  ;;  %v9642_v35 = vld [vmem:[%s17226_s3 + $0x338] sm:$0xff] }
 0x3f4   : > { %v4347_v29 = vsel %vm2695_vm4, %v4345_v3, %v4346_v11  ;;  %v4355_v37 = vrot.slane %v4344_v63, 2  ;;  %4373 = vst [vmem:[#allocation2 + $0x298] sm:$0xf] %v4346_v11  ;;  %v3942_v27 = vadd.f32 %v3762_v57, %v11705_v32  ;;  %9594 = vmatmul.msk.f32.gmra.mxu1 %vm652_vm1, %v10138_v40  ;;  %5473 = vmatpush.msra.mxu3 %v9643_v24  ;;  %v9620_v12 = vld [vmem:[%s17226_s3 + $0x288] sm:$0xff]  ;;  %v9641_v57 = vld [vmem:[%s17226_s3 + $0x330] sm:$0xff] }
 0x3f5   : > { %v4350_v58 = vsel %vm2695_vm4, %v4348_v38, %v4349_v55  ;;  %v4353_v43 = vsel %vm2695_vm4, %v4351_v17, %v4352_v49  ;;  %4368 = vst [vmem:[#allocation2 + $0xf8] sm:$0xfc] %v4347_v29  ;;  %5423 = vmatpush.msrb.mxu2 %v9621_v33  ;;  %v3894_v63 = vadd.f32 %v3586_v45, %v11759_v59  ;;  %v10139_v38 = vld [vmem:[%s10422_s12 + $0x108] sm:$0xff]  ;;  %v10140_v17 = vld [vmem:[%s10422_s12 + $0x2c0] sm:$0xff]  ;;  %v10141_v33 = vld [vmem:[%s10422_s12 + $0x110] sm:$0xff] }
 0x3f6   : > { %v4356_v32 = vsel %vm2695_vm4, %v4354_v18, %v4355_v37  ;;  %4369 = vst [vmem:[#allocation2 + $0x78] sm:$0xfc] %v4350_v58  ;;  %v3992_v46 = vmax.f32 %v3893_v31, %v3942_v27  ;;  %5474 = vmatpush.msra.mxu3 %v9642_v35  ;;  %v9640_v36 = vld [vmem:[%s17226_s3 + $0x328] sm:$0xff]  ;;  %v9639_v59 = vld [vmem:[%s17226_s3 + $0x320] sm:$0xff]  ;;  %v4043_v18 = vadd.f32 %v12402_v8, %v3991_v0  ;;  %v9637_v27 = vld [vmem:[%s17226_s3 + $0x310] sm:$0xff] }
 0x3f7   : > { %4370 = vst [vmem:[#allocation2 + $0x128] sm:$0xfc] %v4353_v43  ;;  %v3589_v62 = vpop.f32.mrf.mxu0  ;;  %5424 = vmatpush.msrb.mxu2 %v9620_v12 }
 0x3f8   : > { %4371 = vst [vmem:[#allocation2 + $0xe0] sm:$0xfc] %v4356_v32  ;;  %5475 = vmatpush.msra.mxu3 %v9641_v57  ;;  %v4044_v3 = vadd.f32 %v12402_v8, %v3992_v46  ;;  %v3895_v24 = vadd.f32 %v3589_v62, %v11783_v25  ;;  %v4092_v52 = vmax.f32 %v4043_v18, 0.0  ;;  %v10142_v46 = vld [vmem:[%s10422_s12 + $0x2c8] sm:$0xff] }
 0x3f9   : > { %4374 = vst [vmem:[#allocation2 + $0x160] sm:$0xf] %v4349_v55  ;;  %v3765_v31 = vpop.f32.mrf.mxu1  ;;  %5425 = vmatpush.msrb.mxu2 %v9619_v61 }
 0x3fa   : > { %4375 = vst [vmem:[#allocation2 + $0x170] sm:$0xf] %v4352_v49  ;;  %v3943_v11 = vadd.f32 %v3765_v31, %v11729_v47  ;;  %9546 = vmatmul.msk.f32.gmra.mxu0 %vm652_vm1, %v10139_v38  ;;  %5476 = vmatpush.msra.mxu3 %v9640_v36  ;;  %v4093_v47 = vmax.f32 %v4044_v3, 0.0  ;;  %v9638_v49 = vld [vmem:[%s17226_s3 + $0x318] sm:$0xff] }
 0x3fb   : > { %4376 = vst [vmem:[#allocation2 + $0x120] sm:$0xf] %v4355_v37 }
 0x3fc   : > { %v3993_v55 = vmax.f32 %v3894_v63, %v3943_v11  ;;  %9595 = vmatmul.msk.f32.gmra.mxu1 %vm652_vm1, %v10140_v17  ;;  %5477 = vmatpush.msra.mxu3 %v9639_v59  ;;  %v4160_v40 = vrot.slane %v4093_v47, 6  ;;  %v10143_v11 = vld [vmem:[%s10422_s12 + $0x118] sm:$0xff] }
 0x3fe   : > { %v4045_v45 = vadd.f32 %v12402_v8, %v3993_v55  ;;  %5478 = vmatpush.msra.mxu3 %v9638_v49  ;;  %v10144_v55 = vld [vmem:[%s10422_s12 + $0x2d0] sm:$0xff] }
 0x3ff   : > { %v3592_v23 = vpop.f32.mrf.mxu0 }
 0x400   : > { %v4094_v29 = vmax.f32 %v4045_v45, 0.0  ;;  %5479 = vmatpush.msra.mxu3 %v9637_v27  ;;  %v12565_v61 = vadd.f32 %v3592_v23, %v11810_v42 }
 0x401   : > { %v3768_v37 = vpop.f32.mrf.mxu1 }
 0x402   : > { %v4161_v58 = vrot.slane %v4094_v29, 6  ;;  %v3944_v43 = vadd.f32 %v3768_v37, %v11753_v4  ;;  %9547 = vmatmul.msk.f32.gmra.mxu0 %vm652_vm1, %v10141_v33  ;;  %5480 = vmatpush.msra.mxu3 %v9636_v16  ;;  %v9635_v4 = vld [vmem:[%s17226_s3 + $0x300] sm:$0xff] }
 0x404   : > { %v4162_v0 = vsel %vm552_vm2, %v4160_v40, %v4161_v58  ;;  %v3994_v32 = vmax.f32 %v3895_v24, %v3944_v43  ;;  %9596 = vmatmul.msk.f32.gmra.mxu1 %vm652_vm1, %v10142_v46  ;;  %5481 = vmatpush.msra.mxu3 %v9635_v4 }
 0x405   : > { %v4167_v25 = vmax.f32 %v4092_v52, %v4162_v0 }
 0x406   : > { %v12561_v35 = vadd.f32 %v12402_v8, %v3994_v32  ;;  %v10145_v32 = vld [vmem:[%s10422_s12 + $0x120] sm:$0xff] }
 0x407   : > { %v4388_v62 = vrot.slane %v4167_v25, 4  ;;  %v3595_v12 = vpop.f32.mrf.mxu0  ;;  %v4379_v42 = vrot.slane %v4167_v25, 1  ;;  %v4382_v59 = vrot.slane %v4167_v25, 2  ;;  %v4385_v45 = vrot.slane %v4167_v25, 3 }
 0x408   : > { %v4095_v57 = vmax.f32 %v12561_v35, 0.0 }
 0x409   : > { %4413 = vst [vmem:[#allocation2] sm:$0xf0] %v4388_v62  ;;  %v3771_v31 = vpop.f32.mrf.mxu1 }
 0x40a   : > { %v4163_v63 = vrot.slane %v4095_v57, 6  ;;  %v12570_v3 = vadd.f32 %v3771_v31, %v11777_v28  ;;  %9548 = vmatmul.msk.f32.gmra.mxu0 %vm652_vm1, %v10143_v11  ;;  %v10146_v11 = vld [vmem:[%s10422_s12 + $0x2d8] sm:$0xff] }
 0x40c   : > { %v4164_v38 = vsel %vm552_vm2, %v4161_v58, %v4163_v63  ;;  %v3995_v36 = vmax.f32 %v12565_v61, %v12570_v3  ;;  %9597 = vmatmul.msk.f32.gmra.mxu1 %vm652_vm1, %v10144_v55  ;;  %v10150_v3 = vld [vmem:[%s10422_s12 + $0x2e8] sm:$0xff] }
 0x40d   : > { %v4168_v17 = vmax.f32 %v4093_v47, %v4164_v38  ;;  %v5059_v47 = vld [vmem:[#allocation2 + $0xf0] sm:$0xfc] }
 0x40e   : > { %v5220_v38 = vrot.slane %v5059_v47, 2 }
 0x40f   : > { %v4380_v49 = vrot.slane %v4168_v17, 1  ;;  %v4383_v18 = vrot.slane %v4168_v17, 2  ;;  %v4386_v28 = vrot.slane %v4168_v17, 3  ;;  %v4389_v23 = vrot.slane %v4168_v17, 4  ;;  %v3598_v29 = vpop.f32.mrf.mxu0 }
 0x410   : > { %v12583_v43 = vld [vmem:[#allocation2] sm:$0xff] }
 0x411   : > { %v4381_v37 = vsel %vm751_vm0, %v4379_v42, %v4380_v49  ;;  %v4384_v27 = vsel %vm2695_vm4, %v4382_v59, %v4383_v18  ;;  %v4387_v40 = vsel %vm4307_vm5, %v4385_v45, %v4386_v28  ;;  %v4390_v24 = vsel %vm1864_vm3, %v4388_v62, %v4389_v23  ;;  %v3774_v58 = vpop.f32.mrf.mxu1 }
 0x412   : > { %v4391_v33 = vrot.slane %v4381_v37, 4  ;;  %v4392_v52 = vrot.slane %v4384_v27, 4  ;;  %v4393_v16 = vrot.slane %v4387_v40, 4  ;;  %v4394_v0 = vrot.slane %v4390_v24, 4  ;;  %4418 = vst [vmem:[#allocation2 + $0x2a8] sm:$0x3f] %v4390_v24  ;;  %9549 = vmatmul.msk.f32.gmra.mxu0 %vm652_vm1, %v10145_v32  ;;  %v12617_v32 = vpop.f32.mrf.mxu3 }
 0x413   : > { %v4395_v46 = vrot.slane %v4380_v49, 4  ;;  %v4397_v25 = vrot.slane %v4383_v18, 4  ;;  %v4399_v4 = vrot.slane %v4386_v28, 4  ;;  %v4401_v31 = vrot.slane %v4389_v23, 4  ;;  %v5060_v23 = vld [vmem:[#allocation2 + $0xf8] sm:$0xfc] }
 0x414   : > { %4414 = vst [vmem:[#allocation2 + $0x298] sm:$0xf0] %v4391_v33  ;;  %v3897_v62 = vadd.f32 %v3595_v12, %v11834_v60  ;;  %v3946_v63 = vadd.f32 %v3774_v58, %v11801_v53  ;;  %9598 = vmatmul.msk.f32.gmra.mxu1 %vm652_vm1, %v10146_v11  ;;  %v5221_v55 = vrot.slane %v12583_v43, 2  ;;  %v12599_v12 = vpop.f32.mrf.mxu2  ;;  %v3898_v37 = vadd.f32 %v3598_v29, %v11858_v56  ;;  %v10147_v24 = vld [vmem:[%s10422_s12 + $0x128] sm:$0xff] }
 0x415   : > { %v4396_v17 = vsel %vm1864_vm3, %v4391_v33, %v4395_v46  ;;  %v4398_v42 = vsel %vm1864_vm3, %v4392_v52, %v4397_v25  ;;  %v4400_v59 = vsel %vm1864_vm3, %v4393_v16, %v4399_v4  ;;  %v4402_v45 = vsel %vm1864_vm3, %v4394_v0, %v4401_v31  ;;  %4415 = vst [vmem:[#allocation2 + $0x160] sm:$0xf0] %v4392_v52  ;;  %v10148_v52 = vld [vmem:[%s10422_s12 + $0x2e0] sm:$0xff] }
 0x416   : > { %4416 = vst [vmem:[#allocation2 + $0x170] sm:$0xf0] %v4393_v16  ;;  %v3996_v60 = vmax.f32 %v3897_v62, %v3946_v63  ;;  %v5222_v53 = vsel %vm2695_vm4, %v5220_v38, %v5221_v55  ;;  %v5223_v16 = vrot.slane %v5060_v23, 2  ;;  %v4047_v25 = vadd.f32 %v12402_v8, %v3995_v36  ;;  %v10149_v63 = vld [vmem:[%s10422_s12 + $0x130] sm:$0xff] }
 0x417   : > { %4417 = vst [vmem:[#allocation2 + $0x120] sm:$0xf0] %v4394_v0  ;;  %5426 = vmatmul.f32.vlgmr.msrb.gmra.mxu2 %v5222_v53  ;;  %v3601_v49 = vpop.f32.mrf.mxu0 }
 0x418   : > { %4419 = vst [vmem:[#allocation2 + $0x240] sm:$0x3f] %v4396_v17  ;;  %v4048_v18 = vadd.f32 %v12402_v8, %v3996_v60  ;;  %v4096_v38 = vmax.f32 %v4047_v25, 0.0 }
 0x419   : > { %4420 = vst [vmem:[#allocation2 + $0x18] sm:$0x3f] %v4398_v42  ;;  %v3777_v28 = vpop.f32.mrf.mxu1 }
 0x41a   : > { %4421 = vst [vmem:[#allocation2 + $0x60] sm:$0x3f] %v4400_v59  ;;  %v4097_v27 = vmax.f32 %v4048_v18, 0.0  ;;  %v3947_v40 = vadd.f32 %v3777_v28, %v11828_v22  ;;  %9550 = vmatmul.msk.f32.gmra.mxu0 %vm652_vm1, %v10147_v24 }
 0x41b   : > { %4422 = vst [vmem:[#allocation2 + $0x220] sm:$0x3f] %v4402_v45  ;;  %v12606_v58 = vld [vmem:[#allocation2 + $0x298] sm:$0xff] }
 0x41c   : > { %v4171_v47 = vrot.slane %v4097_v27, 6  ;;  %v3997_v33 = vmax.f32 %v3898_v37, %v3947_v40  ;;  %9599 = vmatmul.msk.f32.gmra.mxu1 %vm652_vm1, %v10148_v52  ;;  %v5224_v0 = vrot.slane %v12606_v58, 2 }
 0x41e   : > { %v4177_v56 = vmax.f32 %v4095_v57, %v4171_v47  ;;  %v4049_v22 = vadd.f32 %v12402_v8, %v3997_v33  ;;  %v5225_v29 = vsel %vm2695_vm4, %v5223_v16, %v5224_v0  ;;  %v12624_v57 = vadd.f32 %v3601_v49, %v11882_v2 }
 0x41f   : > { %5482 = vmatmul.f32.vlgmr.msra.gmra.mxu3 %v5225_v29  ;;  %v3604_v46 = vpop.f32.mrf.mxu0 }
 0x420   : > { %v4440_v4 = vrot.slane %v4177_v56, 6  ;;  %v4098_v31 = vmax.f32 %v4049_v22, 0.0  ;;  %v4425_v42 = vrot.slane %v4177_v56, 1  ;;  %v4428_v59 = vrot.slane %v4177_v56, 2 }
 0x421   : > { %v3780_v35 = vpop.f32.mrf.mxu1  ;;  %v4432_v45 = vrot.slane %v4177_v56, 3  ;;  %v3900_v40 = vadd.f32 %v3604_v46, %v11906_v15  ;;  %v10151_v56 = vld [vmem:[%s10422_s12 + $0x138] sm:$0xff] }
 0x422   : > { %4465 = vst [vmem:[#allocation2 + $0x2a8] sm:$0xc0] %v4440_v4  ;;  %v12627_v62 = vadd.f32 %v3780_v35, %v11852_v1  ;;  %9551 = vmatmul.msk.f32.gmra.mxu0 %vm652_vm1, %v10149_v63  ;;  %v4172_v11 = vrot.slane %v4098_v31, 6 }
 0x424   : > { %v3998_v61 = vmax.f32 %v12624_v57, %v12627_v62  ;;  %9600 = vmatmul.msk.f32.gmra.mxu1 %vm652_vm1, %v10150_v3  ;;  %v4173_v36 = vsel %vm552_vm2, %v4171_v47, %v4172_v11  ;;  %v4179_v17 = vmax.f32 %v4097_v27, %v4172_v11  ;;  %v10152_v11 = vld [vmem:[%s10422_s12 + $0x2f0] sm:$0xff] }
 0x425   : > { %v4178_v2 = vmax.f32 %v4096_v38, %v4173_v36 }
 0x426   : > { %v4435_v1 = vrot.slane %v4179_v17, 3  ;;  %v4438_v60 = vrot.slane %v4179_v17, 4 }
 0x427   : > { %v3607_v53 = vpop.f32.mrf.mxu0  ;;  %v4426_v49 = vrot.slane %v4178_v2, 1  ;;  %v4429_v18 = vrot.slane %v4178_v2, 2  ;;  %v4433_v28 = vrot.slane %v4178_v2, 3  ;;  %v4437_v23 = vrot.slane %v4178_v2, 4 }
 0x428   : > { %v4445_v37 = vrot.slane %v4178_v2, 6 }
 0x429   : > { %v3783_v24 = vpop.f32.mrf.mxu1  ;;  %v4427_v47 = vsel %vm751_vm0, %v4425_v42, %v4426_v49  ;;  %v4430_v27 = vsel %vm2695_vm4, %v4428_v59, %v4429_v18  ;;  %v4434_v33 = vsel %vm4307_vm5, %v4432_v45, %v4433_v28  ;;  %v4436_v52 = vsel %vm4307_vm5, %v4433_v28, %v4435_v1  ;;  %v4929_v16 = vld [vmem:[#allocation2 + $0x2a8] sm:$0xff]  ;;  %v12650_v42 = vpop.f32.mrf.mxu2 }
 0x42a   : > { %9552 = vmatmul.msk.f32.gmra.mxu0 %vm652_vm1, %v10151_v56  ;;  %v4439_v22 = vsel %vm1864_vm3, %v4437_v23, %v4438_v60  ;;  %v4441_v29 = vrot.slane %v4427_v47, 6  ;;  %v4442_v25 = vrot.slane %v4430_v27, 6  ;;  %v4443_v31 = vrot.slane %v4434_v33, 6  ;;  %v12671_v27 = vpop.f32.mrf.mxu3 }
 0x42b   : > { %v4444_v15 = vrot.slane %v4437_v23, 6  ;;  %v12645_v46 = vsel %vm552_vm2, %v4440_v4, %v4445_v37  ;;  %v4447_v35 = vrot.slane %v4426_v49, 6  ;;  %v4449_v63 = vrot.slane %v4429_v18, 6  ;;  %v10153_v37 = vld [vmem:[%s10422_s12 + $0x140] sm:$0xff] }
 0x42c   : > { %9601 = vmatmul.msk.f32.gmra.mxu1 %vm652_vm1, %v10152_v11  ;;  %v4451_v38 = vrot.slane %v4436_v52, 6  ;;  %v4453_v3 = vrot.slane %v4439_v22, 6  ;;  %4466 = vst [vmem:[#allocation2 + $0x240] sm:$0xc0] %v4441_v29  ;;  %v3949_v36 = vadd.f32 %v3783_v24, %v11876_v41  ;;  %v5235_v17 = vrot.slane %v4929_v16, 2 }
 0x42d   : > { %v12653_v2 = vsel %vm552_vm2, %v4441_v29, %v4447_v35  ;;  %v4450_v59 = vsel %vm552_vm2, %v4442_v25, %v4449_v63  ;;  %4467 = vst [vmem:[#allocation2 + $0x18] sm:$0xc0] %v4442_v25  ;;  %v3901_v18 = vadd.f32 %v3607_v53, %v11930_v9  ;;  %v5245_v43 = vrot.slane %v12645_v46, 2 }
 0x42e   : > { %v4452_v4 = vsel %vm552_vm2, %v4443_v31, %v4451_v38  ;;  %v4454_v45 = vsel %vm552_vm2, %v4444_v15, %v4453_v3  ;;  %4468 = vst [vmem:[#allocation2 + $0x60] sm:$0xc0] %v4443_v31  ;;  %v3999_v1 = vmax.f32 %v3900_v40, %v3949_v36  ;;  %v5236_v41 = vsel %vm2695_vm4, %v5221_v55, %v5235_v17  ;;  %v10154_v40 = vld [vmem:[%s10422_s12 + $0x2f8] sm:$0xff] }
 0x42f   : > { %v3610_v60 = vpop.f32.mrf.mxu0  ;;  %4469 = vst [vmem:[#allocation2 + $0x220] sm:$0xc0] %v4444_v15  ;;  %5429 = vmatmul.f32.gmra.mxu2 %v5236_v41  ;;  %v4050_v53 = vadd.f32 %v12402_v8, %v3998_v61  ;;  %v5246_v33 = vsel %vm2695_vm4, %v5235_v17, %v5245_v43  ;;  %v10155_v61 = vld [vmem:[%s10422_s12 + $0x148] sm:$0xff]  ;;  %v5247_v63 = vrot.slane %v12653_v2, 2  ;;  %v10157_v41 = vld [vmem:[%s10422_s12 + $0x150] sm:$0xff] }
 0x430   : > { %4470 = vst [vmem:[#allocation2 + $0xa0] sm:$0xff] %v12645_v46  ;;  %v4051_v28 = vadd.f32 %v12402_v8, %v3999_v1  ;;  %v3902_v31 = vadd.f32 %v3610_v60, %v11954_v50  ;;  %v10156_v46 = vld [vmem:[%s10422_s12 + $0x300] sm:$0xff] }
 0x431   : > { %v3786_v49 = vpop.f32.mrf.mxu1  ;;  %4471 = vst [vmem:[#allocation2 + $0x28] sm:$0xff] %v12653_v2  ;;  %v12682_v56 = vpop.f32.mrf.mxu2  ;;  %v4099_v58 = vmax.f32 %v4050_v53, 0.0 }
 0x432   : > { %v3950_v23 = vadd.f32 %v3786_v49, %v11900_v34  ;;  %9553 = vmatmul.msk.f32.gmra.mxu0 %vm652_vm1, %v10153_v37  ;;  %4472 = vst [vmem:[#allocation2 + $0x1a8] sm:$0xff] %v4450_v59  ;;  %v4100_v9 = vmax.f32 %v4051_v28, 0.0  ;;  %v12698_v3 = vpop.f32.mrf.mxu3 }
 0x433   : > { %4473 = vst [vmem:[#allocation2 + $0x218] sm:$0xff] %v4452_v4  ;;  %v4930_v24 = vld [vmem:[#allocation2 + $0x240] sm:$0xff] }
 0x434   : > { %v4000_v55 = vmax.f32 %v3901_v18, %v3950_v23  ;;  %9602 = vmatmul.msk.f32.gmra.mxu1 %vm652_vm1, %v10154_v40  ;;  %4474 = vst [vmem:[#allocation2 + $0x250] sm:$0xff] %v4454_v45  ;;  %v5237_v47 = vrot.slane %v4930_v24, 2  ;;  %v4183_v25 = vrot.slane %v4100_v9, 6  ;;  %v10158_v18 = vld [vmem:[%s10422_s12 + $0x308] sm:$0xff] }
 0x436   : > { %v4052_v34 = vadd.f32 %v12402_v8, %v4000_v55  ;;  %v5238_v52 = vsel %vm2695_vm4, %v5224_v0, %v5237_v47 }
 0x437   : > { %v3613_v16 = vpop.f32.mrf.mxu0  ;;  %5432 = vmatmul.f32.gmra.mxu2 %v5246_v33  ;;  %5485 = vmatmul.f32.gmra.mxu3 %v5238_v52  ;;  %v17437_v52 = vld [vmem:[#allocation9_spill] sm:$0xff] }
 0x438   : > { %v4101_v22 = vmax.f32 %v4052_v34, 0.0  ;;  %v3903_v4 = vadd.f32 %v3613_v16, %v11978_v54 }
 0x439   : > { %v3789_v29 = vpop.f32.mrf.mxu1  ;;  %v12703_v2 = vpop.f32.mrf.mxu2 }
 0x43a   : > { %v4184_v57 = vrot.slane %v4101_v22, 6  ;;  %v3951_v62 = vadd.f32 %v3789_v29, %v11924_v21  ;;  %9554 = vmatmul.msk.f32.gmra.mxu0 %vm652_vm1, %v10155_v61  ;;  %v5248_v21 = vsel %vm2695_vm4, %v5237_v47, %v5247_v63  ;;  %v17438_v22 = vld [vmem:[#allocation7_spill] sm:$0xff] }
 0x43c   : > { %v4185_v0 = vsel %vm552_vm2, %v4183_v25, %v4184_v57  ;;  %v4001_v15 = vmax.f32 %v3902_v31, %v3951_v62  ;;  %9603 = vmatmul.msk.f32.gmra.mxu1 %vm652_vm1, %v10156_v46  ;;  %v10159_v25 = vld [vmem:[%s10422_s12 + $0x158] sm:$0xff]  ;;  %v10160_v62 = vld [vmem:[%s10422_s12 + $0x310] sm:$0xff] }
 0x43d   : > { %v4190_v35 = vmax.f32 %v4099_v58, %v4185_v0  ;;  %v12730_v58 = vpop.f32.mrf.mxu3 }
 0x43e   : > { %v12693_v11 = vadd.f32 %v12402_v8, %v4001_v15 }
 0x43f   : > { %v12695_v50 = vrot.slane %v4190_v35, 2  ;;  %4497 = vst [vmem:[#allocation2 + $0x230] sm:$0xff] %v4190_v35  ;;  %v3616_v38 = vpop.f32.mrf.mxu0  ;;  %5488 = vmatmul.f32.gmra.mxu3 %v5248_v21  ;;  %v4477_v23 = vrot.slane %v4190_v35, 1  ;;  %v4487_v37 = vrot.slane %v4190_v35, 3  ;;  %v4492_v24 = vrot.slane %v4190_v35, 4 }
 0x440   : > { %v4102_v36 = vmax.f32 %v12693_v11, 0.0  ;;  %v3904_v16 = vadd.f32 %v3616_v38, %v17437_v52  ;;  %v17439_v11 = vld [vmem:[#allocation11_spill] sm:$0xff] }
 0x441   : > { %v3792_v17 = vpop.f32.mrf.mxu1  ;;  %v5256_v59 = vsel %vm2695_vm4, %v5245_v43, %v12695_v50 }
 0x442   : > { %v4186_v45 = vrot.slane %v4102_v36, 6  ;;  %v3952_v1 = vadd.f32 %v3792_v17, %v11948_v26  ;;  %9555 = vmatmul.msk.f32.gmra.mxu0 %vm652_vm1, %v10157_v41  ;;  %5435 = vmatmul.f32.gmra.mxu2 %v5256_v59  ;;  %v17440_v17 = vld [vmem:[#allocation8_spill] sm:$0xff] }
 0x444   : > { %v4187_v60 = vsel %vm552_vm2, %v4184_v57, %v4186_v45  ;;  %v4002_v49 = vmax.f32 %v3903_v4, %v3952_v1  ;;  %9604 = vmatmul.msk.f32.gmra.mxu1 %vm652_vm1, %v10158_v18  ;;  %v10162_v1 = vld [vmem:[%s10422_s12 + $0x318] sm:$0xff] }
 0x445   : > { %v4191_v28 = vmax.f32 %v4100_v9, %v4187_v60 }
 0x446   : > { %v4054_v60 = vadd.f32 %v12402_v8, %v4002_v49 }
 0x447   : > { %v4478_v43 = vrot.slane %v4191_v28, 1  ;;  %v4483_v55 = vrot.slane %v4191_v28, 2  ;;  %v4488_v54 = vrot.slane %v4191_v28, 3  ;;  %v4493_v40 = vrot.slane %v4191_v28, 4  ;;  %4502 = vst [vmem:[#allocation2 + $0x1a0] sm:$0x3] %v4191_v28  ;;  %v3619_v26 = vpop.f32.mrf.mxu0 }
 0x448   : > { %v3905_v21 = vadd.f32 %v3619_v26, %v17439_v11  ;;  %v4103_v26 = vmax.f32 %v4054_v60, 0.0 }
 0x449   : > { %v12713_v47 = vsel %vm751_vm0, %v4477_v23, %v4478_v43  ;;  %v4484_v34 = vsel %vm2695_vm4, %v12695_v50, %v4483_v55  ;;  %v4489_v53 = vsel %vm4307_vm5, %v4487_v37, %v4488_v54  ;;  %4503 = vst [vmem:[#allocation2 + $0x1b0] sm:$0x3] %v4478_v43  ;;  %v3795_v9 = vpop.f32.mrf.mxu1  ;;  %v4494_v33 = vsel %vm1864_vm3, %v4492_v24, %v4493_v40  ;;  %v17441_v37 = vld [vmem:[#allocation13_spill] sm:$0xff] }
 0x44a   : > { %4498 = vst [vmem:[#allocation2 + $0x40] sm:$0xff] %v12713_v47  ;;  %v3953_v29 = vadd.f32 %v3795_v9, %v17438_v22  ;;  %9556 = vmatmul.msk.f32.gmra.mxu0 %vm652_vm1, %v10159_v25  ;;  %v5257_v31 = vrot.slane %v12713_v47, 2 }
 0x44b   : > { %4499 = vst [vmem:[#allocation2 + $0x150] sm:$0xff] %v4484_v34 }
 0x44c   : > { %4500 = vst [vmem:[#allocation2 + $0x90] sm:$0xff] %v4489_v53  ;;  %v4003_v57 = vmax.f32 %v3904_v16, %v3953_v29  ;;  %9605 = vmatmul.msk.f32.gmra.mxu1 %vm652_vm1, %v10160_v62  ;;  %v5258_v61 = vsel %vm2695_vm4, %v5247_v63, %v5257_v31  ;;  %v10161_v63 = vld [vmem:[%s10422_s12 + $0x160] sm:$0xff] }
 0x44d   : > { %4501 = vst [vmem:[#allocation2 + $0x280] sm:$0xff] %v4494_v33  ;;  %5491 = vmatmul.f32.gmra.mxu3 %v5258_v61  ;;  %v10164_v53 = vld [vmem:[%s10422_s12 + $0x320] sm:$0xff] }
 0x44e   : > { %4504 = vst [vmem:[#allocation2 + $0x38] sm:$0x3] %v4483_v55  ;;  %v4055_v0 = vadd.f32 %v12402_v8, %v4003_v57 }
 0x44f   : > { %4505 = vst [vmem:[#allocation2 + $0x180] sm:$0x3] %v4488_v54  ;;  %v3622_v15 = vpop.f32.mrf.mxu0  ;;  %v17442_v54 = vld [vmem:[#allocation10_spill] sm:$0xff] }
 0x450   : > { %4506 = vst [vmem:[#allocation2 + $0x200] sm:$0x3] %v4493_v40  ;;  %v4104_v46 = vmax.f32 %v4055_v0, 0.0  ;;  %v12742_v43 = vadd.f32 %v3622_v15, %v17441_v37  ;;  %v12754_v15 = vpop.f32.mrf.mxu2 }
 0x451   : > { %v3798_v35 = vpop.f32.mrf.mxu1 }
 0x452   : > { %v4194_v38 = vrot.slane %v4104_v46, 6  ;;  %v3954_v59 = vadd.f32 %v3798_v35, %v17440_v17  ;;  %9557 = vmatmul.msk.f32.gmra.mxu0 %vm652_vm1, %v10161_v63 }
 0x454   : > { %v4200_v4 = vmax.f32 %v4102_v36, %v4194_v38  ;;  %v4004_v45 = vmax.f32 %v3905_v21, %v3954_v59  ;;  %9606 = vmatmul.msk.f32.gmra.mxu1 %vm652_vm1, %v10162_v1  ;;  %v10163_v36 = vld [vmem:[%s10422_s12 + $0x168] sm:$0xff] }
 0x456   : > { %v4056_v41 = vadd.f32 %v12402_v8, %v4004_v45  ;;  %v4509_v9 = vrot.slane %v4200_v4, 1  ;;  %v4512_v52 = vrot.slane %v4200_v4, 2  ;;  %v4516_v16 = vrot.slane %v4200_v4, 3  ;;  %v10165_v45 = vld [vmem:[%s10422_s12 + $0x170] sm:$0xff] }
 0x457   : > { %v3625_v18 = vpop.f32.mrf.mxu0 }
 0x458   : > { %v4105_v28 = vmax.f32 %v4056_v41, 0.0 }
 0x459   : > { %v3801_v23 = vpop.f32.mrf.mxu1 }
 0x45a   : > { %v4195_v55 = vrot.slane %v4105_v28, 6  ;;  %v12745_v40 = vadd.f32 %v3801_v23, %v17442_v54  ;;  %9558 = vmatmul.msk.f32.gmra.mxu0 %vm652_vm1, %v10163_v36  ;;  %v17443_v54 = vld [vmem:[#allocation12_spill] sm:$0xff] }
 0x45c   : > { %v4196_v24 = vsel %vm552_vm2, %v4194_v38, %v4195_v55  ;;  %v4202_v34 = vmax.f32 %v4104_v46, %v4195_v55  ;;  %v4005_v49 = vmax.f32 %v12742_v43, %v12745_v40  ;;  %9607 = vmatmul.msk.f32.gmra.mxu1 %vm652_vm1, %v10164_v53  ;;  %v3907_v55 = vadd.f32 %v3625_v18, %v12072_v30 }
 0x45d   : > { %v4201_v33 = vmax.f32 %v4103_v26, %v4196_v24  ;;  %v10166_v26 = vld [vmem:[%s10422_s12 + $0x328] sm:$0xff] }
 0x45e   : > { %v4519_v22 = vrot.slane %v4202_v34, 3  ;;  %v4522_v29 = vrot.slane %v4202_v34, 4 }
 0x45f   : > { %v4510_v25 = vrot.slane %v4201_v33, 1  ;;  %v4513_v57 = vrot.slane %v4201_v33, 2  ;;  %v4517_v62 = vrot.slane %v4201_v33, 3  ;;  %v4521_v61 = vrot.slane %v4201_v33, 4  ;;  %v3628_v0 = vpop.f32.mrf.mxu0 }
 0x461   : > { %v4511_v46 = vsel %vm751_vm0, %v4509_v9, %v4510_v25  ;;  %v4514_v35 = vsel %vm2695_vm4, %v4512_v52, %v4513_v57  ;;  %v4518_v11 = vsel %vm4307_vm5, %v4516_v16, %v4517_v62  ;;  %v4520_v21 = vsel %vm4307_vm5, %v4517_v62, %v4519_v22  ;;  %4551 = vst [vmem:[#allocation2 + $0x70] sm:$0xf] %v4513_v57  ;;  %v3804_v38 = vpop.f32.mrf.mxu1  ;;  %v12771_v52 = vpop.f32.mrf.mxu3  ;;  %v10167_v62 = vld [vmem:[%s10422_s12 + $0x178] sm:$0xff] }
 0x462   : > { %v4523_v17 = vsel %vm1864_vm3, %v4521_v61, %v4522_v29  ;;  %v4524_v59 = vrot.slane %v4511_v46, 2  ;;  %v4525_v63 = vrot.slane %v4510_v25, 2  ;;  %v4527_v4 = vrot.slane %v4514_v35, 2  ;;  %4546 = vst [vmem:[#allocation2 + $0x1a0] sm:$0xfc] %v4514_v35  ;;  %9559 = vmatmul.msk.f32.gmra.mxu0 %vm652_vm1, %v10165_v45  ;;  %v12775_v16 = vpop.f32.mrf.mxu2  ;;  %v17444_v25 = vld [vmem:[#allocation14_spill] sm:$0xff] }
 0x463   : > { %v4528_v1 = vrot.slane %v4513_v57, 2  ;;  %v4530_v41 = vrot.slane %v4518_v11, 2  ;;  %v4531_v60 = vrot.slane %v4520_v21, 2  ;;  %v4533_v28 = vrot.slane %v4521_v61, 2  ;;  %v10168_v35 = vld [vmem:[%s10422_s12 + $0x330] sm:$0xff] }
 0x464   : > { %v4526_v23 = vsel %vm2695_vm4, %v4524_v59, %v4525_v63  ;;  %v4534_v37 = vrot.slane %v4523_v17, 2  ;;  %4552 = vst [vmem:[#allocation2 + $0x188] sm:$0xf] %v4525_v63  ;;  %v3956_v36 = vadd.f32 %v3804_v38, %v17443_v54  ;;  %9608 = vmatmul.msk.f32.gmra.mxu1 %vm652_vm1, %v10166_v26  ;;  %v3908_v22 = vadd.f32 %v3628_v0, %v12096_v6  ;;  %v12795_v21 = vld [vmem:[%s17225_s2] ss:$0 sm:$0xff]  ;;  %v17446_v45 = vld [vmem:[#allocation41_spill] sm:$0xff] }
 0x465   : > { %v4529_v24 = vsel %vm2695_vm4, %v4527_v4, %v4528_v1  ;;  %v4532_v34 = vsel %vm2695_vm4, %v4530_v41, %v4531_v60  ;;  %4547 = vst [vmem:[#allocation2 + $0x1b0] sm:$0xfc] %v4526_v23  ;;  %v4057_v17 = vadd.f32 %v12795_v21, %v4005_v49  ;;  %v17445_v4 = vld [vmem:[#allocation40_spill] sm:$0xff] }
 0x466   : > { %v4535_v53 = vsel %vm2695_vm4, %v4533_v28, %v4534_v37  ;;  %4548 = vst [vmem:[#allocation2 + $0x38] sm:$0xfc] %v4529_v24  ;;  %v4006_v9 = vmax.f32 %v3907_v55, %v3956_v36  ;;  %v10170_v23 = vld [vmem:[%s10422_s12 + $0x180] sm:$0xff]  ;;  %v10171_v36 = vld [vmem:[%s10422_s12 + $0x338] sm:$0xff] }
 0x467   : > { %4549 = vst [vmem:[#allocation2 + $0x180] sm:$0xfc] %v4532_v34  ;;  %v3631_v33 = vpop.f32.mrf.mxu0  ;;  %v4106_v47 = vmax.f32 %v4057_v17, 0.0  ;;  %v17448_v24 = vld [vmem:[#allocation15_spill] sm:$0xff] }
 0x468   : > { %4550 = vst [vmem:[#allocation2 + $0x200] sm:$0xfc] %v4535_v53  ;;  %v4058_v29 = vadd.f32 %v12402_v8, %v4006_v9  ;;  %v3909_v43 = vadd.f32 %v3631_v33, %v12117_v7  ;;  %v17447_v7 = vld [vmem:[#allocation45_spill] sm:$0xff] }
 0x469   : > { %4553 = vst [vmem:[#allocation2 + $0x210] sm:$0xf] %v4528_v1  ;;  %v3807_v30 = vpop.f32.mrf.mxu1  ;;  %v12773_v18 = vld [vmem:[#allocation2 + $0x1a0] sm:$0xff]  ;;  %v1788_v1 = vadd.f32 %v17446_v45, %v17445_v4  ;;  %v2617_v34 = vadd.f32 %v17448_v24, %v17447_v7  ;;  %v17452_v4 = vld [vmem:[#allocation46_spill] sm:$0xff] }
 0x46a   : > { %4554 = vst [vmem:[#allocation2 + $0x248] sm:$0xf] %v4531_v60  ;;  %v3957_v57 = vadd.f32 %v3807_v30, %v17444_v25  ;;  %9560 = vmatmul.msk.f32.gmra.mxu0 %vm652_vm1, %v10167_v62  ;;  %v5265_v61 = vrot.slane %v12773_v18, 2  ;;  %v4107_v0 = vmax.f32 %v4058_v29, 0.0  ;;  %v12809_v60 = vpop.f32.mrf.mxu3  ;;  %v17449_v29 = vld [vmem:[#allocation43_spill] sm:$0xff]  ;;  %v17450_v25 = vld [vmem:[#allocation44_spill] sm:$0xff] }
 0x46b   : > { %4555 = vst [vmem:[#allocation2 + $0x1c0] sm:$0xf] %v4534_v37  ;;  %v12816_v37 = vpop.f32.mrf.mxu2  ;;  %v3448_v33 = vadd.f32 %v12599_v12, %v2617_v34  ;;  %v17453_v45 = vld [vmem:[#allocation47_spill] sm:$0xff]  ;;  %v5036_v18 = vld [vmem:[%s17226_s3 + $0x1c8] sm:$0xff] }
 0x46c   : > { %v4007_v46 = vmax.f32 %v3908_v22, %v3957_v57  ;;  %9609 = vmatmul.msk.f32.gmra.mxu1 %vm652_vm1, %v10168_v35  ;;  %v5266_v11 = vsel %vm2695_vm4, %v12695_v50, %v5265_v61  ;;  %v12789_v6 = vld [vmem:[#allocation2 + $0x1b0] sm:$0xff]  ;;  %v4206_v28 = vrot.slane %v4107_v0, 6  ;;  %v1791_v57 = vadd.f32 %v17450_v25, %v17449_v29 }
 0x46d   : > { %5438 = vmatmul.f32.gmra.mxu2 %v5266_v11  ;;  %v5267_v8 = vrot.slane %v12789_v6, 2  ;;  %v10172_v11 = vld [vmem:[%s10422_s12 + $0x188] sm:$0xff] }
 0x46e   : > { %v4059_v38 = vadd.f32 %v12795_v21, %v4007_v46 }
 0x46f   : > { %v5268_v50 = vsel %vm2695_vm4, %v5257_v31, %v5267_v8  ;;  %v3634_v59 = vpop.f32.mrf.mxu0  ;;  %v2666_v31 = vadd.f32 %v12107_v10, %v1788_v1  ;;  %v1794_v1 = vadd.f32 %v17453_v45, %v17452_v4 }
 0x470   : > { %v4108_v63 = vmax.f32 %v4059_v38, 0.0  ;;  %5494 = vmatmul.f32.gmra.mxu3 %v5268_v50  ;;  %v12831_v62 = vadd.f32 %v3634_v59, %v3448_v33  ;;  %v5042_v59 = vld [vmem:[%s17226_s3 + $0x1f8] sm:$0xff] }
 0x471   : > { %v3810_v41 = vpop.f32.mrf.mxu1  ;;  %v3497_v10 = vadd.f32 %v12617_v32, %v2666_v31  ;;  %v17451_v32 = vld [vmem:[#allocation18_spill] sm:$0xff]  ;;  %5858 = vmatpush.msrb.mxu0 %v5042_v59 }
 0x472   : > { %v4207_v40 = vrot.slane %v4108_v63, 6  ;;  %v3958_v49 = vadd.f32 %v3810_v41, %v12090_v19  ;;  %9561 = vmatmul.msk.f32.gmra.mxu0 %vm652_vm1, %v10170_v23  ;;  %v2667_v38 = vadd.f32 %v17451_v32, %v1791_v57  ;;  %v12840_v12 = vpop.f32.mrf.mxu3  ;;  %v10173_v63 = vld [vmem:[%s10422_s12 + $0x340] sm:$0xff] }
 0x473   : > { %v12854_v23 = vpop.f32.mrf.mxu2 }
 0x474   : > { %v4208_v55 = vsel %vm552_vm2, %v4206_v28, %v4207_v40  ;;  %v4008_v54 = vmax.f32 %v3909_v43, %v3958_v49  ;;  %9610 = vmatmul.msk.f32.gmra.mxu1 %vm652_vm1, %v10171_v36  ;;  %v17454_v28 = vld [vmem:[#allocation48_spill] sm:$0xff] }
 0x475   : > { %v4213_v26 = vmax.f32 %v4106_v47, %v4208_v55  ;;  %v17455_v43 = vld [vmem:[#allocation16_spill] sm:$0xff]  ;;  %v5041_v55 = vld [vmem:[%s17226_s3 + $0x1f0] sm:$0xff] }
 0x476   : > { %v12824_v19 = vadd.f32 %v12795_v21, %v4008_v54  ;;  %v2618_v49 = vadd.f32 %v17455_v43, %v17454_v28  ;;  %5859 = vmatpush.msrb.mxu0 %v5041_v55  ;;  %v10175_v43 = vld [vmem:[%s10422_s12 + $0x348] sm:$0xff] }
 0x477   : > { %v4567_v53 = vrot.slane %v4213_v26, 4  ;;  %v3637_v9 = vpop.f32.mrf.mxu0  ;;  %v4561_v47 = vrot.slane %v4213_v26, 2  ;;  %v4564_v31 = vrot.slane %v4213_v26, 3 }
 0x478   : > { %v4109_v30 = vmax.f32 %v12824_v19, 0.0  ;;  %v5053_v19 = vld [vmem:[%s17226_s3 + $0x250] sm:$0xff] }
 0x479   : > { %4592 = vst [vmem:[#allocation2 + $0x70] sm:$0xf0] %v4567_v53  ;;  %v3813_v22 = vpop.f32.mrf.mxu1 }
 0x47a   : > { %v4209_v46 = vrot.slane %v4109_v30, 6  ;;  %v12835_v35 = vadd.f32 %v3813_v22, %v3497_v10  ;;  %9562 = vmatmul.msk.f32.gmra.mxu0 %vm652_vm1, %v10172_v11  ;;  %v17456_v10 = vld [vmem:[#allocation20_spill] sm:$0xff]  ;;  %v3449_v22 = vadd.f32 %v12650_v42, %v2618_v49 }
 0x47b   : > { %v2668_v33 = vadd.f32 %v17456_v10, %v1794_v1 }
 0x47c   : > { %v4210_v17 = vsel %vm552_vm2, %v4207_v40, %v4209_v46  ;;  %v4009_v50 = vmax.f32 %v12831_v62, %v12835_v35  ;;  %9611 = vmatmul.msk.f32.gmra.mxu1 %vm652_vm1, %v10173_v63  ;;  %v4558_v40 = vrot.slane %v4213_v26, 1  ;;  %v5040_v26 = vld [vmem:[%s17226_s3 + $0x1e8] sm:$0xff]  ;;  %v10174_v63 = vld [vmem:[%s10422_s12 + $0x190] sm:$0xff]  ;;  %v10178_v35 = vld [vmem:[%s10422_s12 + $0x1a0] sm:$0xff] }
 0x47d   : > { %v4214_v41 = vmax.f32 %v4107_v0, %v4210_v17  ;;  %v3498_v0 = vadd.f32 %v12671_v27, %v2667_v38  ;;  %5860 = vmatpush.msrb.mxu0 %v5040_v26 }
 0x47e   : > { %v4061_v6 = vadd.f32 %v12795_v21, %v4009_v50  ;;  %v5052_v50 = vld [vmem:[%s17226_s3 + $0x248] sm:$0xff] }
 0x47f   : > { %v4559_v54 = vrot.slane %v4214_v41, 1  ;;  %v4562_v36 = vrot.slane %v4214_v41, 2  ;;  %v4565_v7 = vrot.slane %v4214_v41, 3  ;;  %v4568_v24 = vrot.slane %v4214_v41, 4  ;;  %v12859_v34 = vpop.f32.mrf.mxu0 }
 0x480   : > { %v12871_v32 = vld [vmem:[#allocation2 + $0x70] sm:$0xff]  ;;  %v3911_v41 = vadd.f32 %v3637_v9, %v3449_v22  ;;  %v12899_v22 = vpop.f32.mrf.mxu3 }
 0x481   : > { %v4560_v29 = vsel %vm751_vm0, %v4558_v40, %v4559_v54  ;;  %v4563_v25 = vsel %vm2695_vm4, %v4561_v47, %v4562_v36  ;;  %v4566_v57 = vsel %vm4307_vm5, %v4564_v31, %v4565_v7  ;;  %v4569_v46 = vsel %vm1864_vm3, %v4567_v53, %v4568_v24  ;;  %v3816_v11 = vpop.f32.mrf.mxu1  ;;  %v5039_v53 = vld [vmem:[%s17226_s3 + $0x1e0] sm:$0xff]  ;;  %v5038_v40 = vld [vmem:[%s17226_s3 + $0x1d8] sm:$0xff] }
 0x482   : > { %v4570_v27 = vrot.slane %v4560_v29, 4  ;;  %v4571_v38 = vrot.slane %v4563_v25, 4  ;;  %v4572_v42 = vrot.slane %v4566_v57, 4  ;;  %v4573_v17 = vrot.slane %v4569_v46, 4  ;;  %4597 = vst [vmem:[#allocation2 + $0x278] sm:$0x3f] %v4569_v46  ;;  %9563 = vmatmul.msk.f32.gmra.mxu0 %vm652_vm1, %v10174_v63 }
 0x483   : > { %v4574_v59 = vrot.slane %v4559_v54, 4  ;;  %v4576_v4 = vrot.slane %v4562_v36, 4  ;;  %v4578_v45 = vrot.slane %v4565_v7, 4  ;;  %v4580_v1 = vrot.slane %v4568_v24, 4  ;;  %5861 = vmatpush.msrb.mxu0 %v5039_v53  ;;  %v5058_v47 = vld [vmem:[%s17226_s3 + $0x278] sm:$0xff]  ;;  %v5037_v36 = vld [vmem:[%s17226_s3 + $0x1d0] sm:$0xff] }
 0x484   : > { %4593 = vst [vmem:[#allocation2 + $0x188] sm:$0xf0] %v4570_v27  ;;  %v3960_v28 = vadd.f32 %v3816_v11, %v3498_v0  ;;  %9612 = vmatmul.msk.f32.gmra.mxu1 %vm652_vm1, %v10175_v43  ;;  %v5275_v49 = vrot.slane %v12871_v32, 2  ;;  %v5057_v7 = vld [vmem:[%s17226_s3 + $0x270] sm:$0xff]  ;;  %v17457_v24 = vld [vmem:[#allocation51_spill] sm:$0xff]  ;;  %v3499_v57 = vadd.f32 %v12698_v3, %v2668_v33  ;;  %v12908_v11 = vpop.f32.mrf.mxu2 }
 0x485   : > { %v4575_v31 = vsel %vm1864_vm3, %v4570_v27, %v4574_v59  ;;  %v4577_v55 = vsel %vm1864_vm3, %v4571_v38, %v4576_v4  ;;  %v4579_v9 = vsel %vm1864_vm3, %v4572_v42, %v4578_v45  ;;  %v4581_v54 = vsel %vm1864_vm3, %v4573_v17, %v4580_v1  ;;  %4594 = vst [vmem:[#allocation2 + $0x210] sm:$0xf0] %v4571_v38  ;;  %v17458_v0 = vld [vmem:[#allocation17_spill] sm:$0xff]  ;;  %v17460_v33 = vld [vmem:[#allocation50_spill] sm:$0xff]  ;;  %v5035_v4 = vld [vmem:[%s17226_s3 + $0x1c0] sm:$0xff] }
 0x486   : > { %v2619_v10 = vadd.f32 %v17458_v0, %v17457_v24  ;;  %4595 = vst [vmem:[#allocation2 + $0x248] sm:$0xf0] %v4572_v42  ;;  %v4010_v26 = vmax.f32 %v3911_v41, %v3960_v28  ;;  %v5276_v29 = vsel %vm2695_vm4, %v5265_v61, %v5275_v49  ;;  %5862 = vmatpush.msrb.mxu0 %v5038_v40  ;;  %v5056_v61 = vld [vmem:[%s17226_s3 + $0x268] sm:$0xff]  ;;  %v10176_v59 = vld [vmem:[%s10422_s12 + $0x198] sm:$0xff]  ;;  %v5055_v45 = vld [vmem:[%s17226_s3 + $0x260] sm:$0xff] }
 0x487   : > { %5914 = vmatpush.msrb.mxu1 %v5058_v47  ;;  %4596 = vst [vmem:[#allocation2 + $0x1c0] sm:$0xf0] %v4573_v17  ;;  %5441 = vmatmul.f32.gmra.mxu2 %v5276_v29  ;;  %v3643_v25 = vpop.f32.mrf.mxu0  ;;  %v17459_v3 = vld [vmem:[#allocation49_spill] sm:$0xff]  ;;  %v5034_v47 = vld [vmem:[%s17226_s3 + $0x1b8] sm:$0xff] }
 0x488   : > { %v3450_v46 = vadd.f32 %v12682_v56, %v2619_v10  ;;  %4598 = vst [vmem:[#allocation2 + $0x20] sm:$0x3f] %v4575_v31  ;;  %v12911_v27 = vadd.f32 %v12795_v21, %v4010_v26  ;;  %5863 = vmatpush.msrb.mxu0 %v5037_v36  ;;  %v1797_v38 = vadd.f32 %v17460_v33, %v17459_v3  ;;  %v10177_v43 = vld [vmem:[%s10422_s12 + $0x350] sm:$0xff]  ;;  %v5054_v31 = vld [vmem:[%s17226_s3 + $0x258] sm:$0xff]  ;;  %v12963_v29 = vpop.f32.mrf.mxu3 }
 0x489   : > { %5915 = vmatpush.msrb.mxu1 %v5057_v7  ;;  %4599 = vst [vmem:[#allocation2 + $0xb0] sm:$0x3f] %v4577_v55  ;;  %v3819_v56 = vpop.f32.mrf.mxu1  ;;  %v17462_v55 = vld [vmem:[#allocation54_spill] sm:$0xff]  ;;  %v17465_v3 = vld [vmem:[#allocation53_spill] sm:$0xff] }
 0x48a   : > { %4600 = vst [vmem:[#allocation2 + $0xe8] sm:$0x3f] %v4579_v9  ;;  %v3912_v42 = vadd.f32 %v12859_v34, %v3450_v46  ;;  %v4111_v17 = vmax.f32 %v12911_v27, 0.0  ;;  %v3961_v63 = vadd.f32 %v3819_v56, %v3499_v57  ;;  %9564 = vmatmul.msk.f32.gmra.mxu0 %vm652_vm1, %v10176_v59  ;;  %v17461_v34 = vld [vmem:[#allocation22_spill] sm:$0xff]  ;;  %v17463_v9 = vld [vmem:[#allocation19_spill] sm:$0xff]  ;;  %v5032_v57 = vld [vmem:[%s17226_s3 + $0x1a8] sm:$0xff] }
 0x48b   : > { %5916 = vmatpush.msrb.mxu1 %v5056_v61  ;;  %4601 = vst [vmem:[#allocation2 + $0x58] sm:$0x3f] %v4581_v54  ;;  %v12931_v1 = vld [vmem:[#allocation2 + $0x188] sm:$0xff]  ;;  %5864 = vmatpush.msrb.mxu0 %v5036_v18  ;;  %v2669_v53 = vadd.f32 %v17461_v34, %v1797_v38  ;;  %v2620_v54 = vadd.f32 %v17463_v9, %v17462_v55  ;;  %v5033_v0 = vld [vmem:[%s17226_s3 + $0x1b0] sm:$0xff]  ;;  %v5031_v18 = vld [vmem:[%s17226_s3 + $0x1a0] sm:$0xff] }
 0x48c   : > { %v4217_v41 = vrot.slane %v4111_v17, 6  ;;  %v4011_v28 = vmax.f32 %v3912_v42, %v3961_v63  ;;  %9613 = vmatmul.msk.f32.gmra.mxu1 %vm652_vm1, %v10177_v43  ;;  %v5277_v40 = vrot.slane %v12931_v1, 2  ;;  %v17464_v61 = vld [vmem:[#allocation52_spill] sm:$0xff]  ;;  %v17467_v56 = vld [vmem:[#allocation21_spill] sm:$0xff]  ;;  %v4110_v63 = vmax.f32 %v4061_v6, 0.0  ;;  %v5030_v34 = vld [vmem:[%s17226_s3 + $0x198] sm:$0xff] }
 0x48d   : > { %5865 = vmatpush.msrb.mxu0 %v5035_v4  ;;  %5917 = vmatpush.msrb.mxu1 %v5055_v45  ;;  %v3451_v26 = vadd.f32 %v12703_v2, %v2620_v54  ;;  %v1800_v33 = vadd.f32 %v17465_v3, %v17464_v61  ;;  %v10179_v4 = vld [vmem:[%s10422_s12 + $0x358] sm:$0xff]  ;;  %v5051_v45 = vld [vmem:[%s17226_s3 + $0x240] sm:$0xff] }
 0x48e   : > { %v12947_v36 = vmax.f32 %v4109_v30, %v4217_v41  ;;  %v4063_v7 = vadd.f32 %v12795_v21, %v4011_v28  ;;  %v5278_v24 = vsel %vm2695_vm4, %v5267_v8, %v5277_v40  ;;  %v3500_v30 = vadd.f32 %v12730_v58, %v2669_v53  ;;  %v12973_v58 = vpop.f32.mrf.mxu2  ;;  %v17468_v53 = vld [vmem:[#allocation24_spill] sm:$0xff] }
 0x48f   : > { %5497 = vmatmul.f32.gmra.mxu3 %v5278_v24  ;;  %v3646_v10 = vpop.f32.mrf.mxu0  ;;  %5866 = vmatpush.msrb.mxu0 %v5034_v47  ;;  %v12977_v2 = vadd.f32 %v3643_v25, %v3451_v26  ;;  %v17466_v25 = vld [vmem:[#allocation57_spill] sm:$0xff]  ;;  %v2670_v28 = vadd.f32 %v17468_v53, %v1800_v33  ;;  %v17470_v55 = vld [vmem:[#allocation56_spill] sm:$0xff] }
 0x490   : > { %v4619_v8 = vrot.slane %v12947_v36, 6  ;;  %5918 = vmatpush.msrb.mxu1 %v5054_v31  ;;  %v4112_v46 = vmax.f32 %v4063_v7, 0.0  ;;  %v2621_v42 = vadd.f32 %v17467_v56, %v17466_v25  ;;  %v17469_v31 = vld [vmem:[#allocation55_spill] sm:$0xff]  ;;  %v4604_v7 = vrot.slane %v12947_v36, 1  ;;  %v13027_v25 = vpop.f32.mrf.mxu3 }
 0x491   : > { %v3822_v27 = vpop.f32.mrf.mxu1  ;;  %5867 = vmatpush.msrb.mxu0 %v5033_v0  ;;  %v1803_v9 = vadd.f32 %v17470_v55, %v17469_v31  ;;  %v5050_v0 = vld [vmem:[%s17226_s3 + $0x238] sm:$0xff] }
 0x492   : > { %4644 = vst [vmem:[#allocation2 + $0x278] sm:$0xc0] %v4619_v8  ;;  %v12979_v62 = vadd.f32 %v3822_v27, %v3500_v30  ;;  %9565 = vmatmul.msk.f32.gmra.mxu0 %vm652_vm1, %v10178_v35  ;;  %5919 = vmatpush.msrb.mxu1 %v5053_v19  ;;  %v4218_v38 = vrot.slane %v4112_v46, 6  ;;  %v3452_v54 = vadd.f32 %v12754_v15, %v2621_v42  ;;  %v5029_v19 = vld [vmem:[%s17226_s3 + $0x190] sm:$0xff] }
 0x493   : > { %5868 = vmatpush.msrb.mxu0 %v5032_v57  ;;  %v5049_v35 = vld [vmem:[%s17226_s3 + $0x230] sm:$0xff]  ;;  %v2671_v61 = vadd.f32 %v12195_v44, %v1803_v9  ;;  %v5048_v44 = vld [vmem:[%s17226_s3 + $0x228] sm:$0xff] }
 0x494   : > { %v4012_v59 = vmax.f32 %v12977_v2, %v12979_v62  ;;  %9614 = vmatmul.msk.f32.gmra.mxu1 %vm652_vm1, %v10179_v4  ;;  %v4219_v43 = vsel %vm552_vm2, %v4217_v41, %v4218_v38  ;;  %v4225_v47 = vmax.f32 %v4111_v17, %v4218_v38  ;;  %v4607_v17 = vrot.slane %v12947_v36, 2  ;;  %v17476_v2 = vld [vmem:[#allocation61_spill] sm:$0xff]  ;;  %v17477_v62 = vld [vmem:[#allocation62_spill] sm:$0xff] }
 0x495   : > { %5920 = vmatpush.msrb.mxu1 %v5052_v50  ;;  %5869 = vmatpush.msrb.mxu0 %v5031_v18  ;;  %v4224_v24 = vmax.f32 %v4110_v63, %v4219_v43  ;;  %v4611_v41 = vrot.slane %v12947_v36, 3  ;;  %v5028_v50 = vld [vmem:[%s17226_s3 + $0x188] sm:$0xff]  ;;  %v3501_v18 = vadd.f32 %v12771_v52, %v2670_v28  ;;  %v3914_v33 = vadd.f32 %v3646_v10, %v3452_v54  ;;  %v5027_v10 = vld [vmem:[%s17226_s3 + $0x180] sm:$0xff] }
 0x496   : > { %v4614_v30 = vrot.slane %v4225_v47, 3  ;;  %v4617_v26 = vrot.slane %v4225_v47, 4  ;;  %v10180_v52 = vld [vmem:[%s10422_s12 + $0x1a8] sm:$0xff]  ;;  %v13044_v47 = vpop.f32.mrf.mxu2  ;;  %v5047_v36 = vld [vmem:[%s17226_s3 + $0x220] sm:$0xff] }
 0x497   : > { %v13017_v6 = vpop.f32.mrf.mxu0  ;;  %5921 = vmatpush.msrb.mxu1 %v5051_v45  ;;  %5870 = vmatpush.msrb.mxu0 %v5030_v34  ;;  %v4605_v15 = vrot.slane %v4224_v24, 1  ;;  %v4608_v57 = vrot.slane %v4224_v24, 2  ;;  %v4612_v46 = vrot.slane %v4224_v24, 3  ;;  %v4616_v27 = vrot.slane %v4224_v24, 4 }
 0x498   : > { %v4624_v3 = vrot.slane %v4224_v24, 6 }
 0x499   : > { %v3825_v38 = vpop.f32.mrf.mxu1  ;;  %5922 = vmatpush.msrb.mxu1 %v5050_v0  ;;  %5871 = vmatpush.msrb.mxu0 %v5029_v19  ;;  %v4606_v56 = vsel %vm751_vm0, %v4604_v7, %v4605_v15  ;;  %v4609_v42 = vsel %vm2695_vm4, %v4607_v17, %v4608_v57  ;;  %v4613_v63 = vsel %vm4307_vm5, %v4611_v41, %v4612_v46  ;;  %v13033_v45 = vld [vmem:[#allocation2 + $0x278] sm:$0xff]  ;;  %v4623_v31 = vrot.slane %v4616_v27, 6  ;;  %v10181_v7 = vld [vmem:[%s10422_s12 + $0x360] sm:$0xff] }
 0x49a   : > { %v4615_v4 = vsel %vm4307_vm5, %v4612_v46, %v4614_v30  ;;  %9566 = vmatmul.msk.f32.gmra.mxu0 %vm652_vm1, %v10180_v52  ;;  %v4618_v34 = vsel %vm1864_vm3, %v4616_v27, %v4617_v26  ;;  %v4620_v53 = vrot.slane %v4606_v56, 6  ;;  %v4621_v28 = vrot.slane %v4609_v42, 6  ;;  %v17471_v41 = vld [vmem:[#allocation60_spill] sm:$0xff]  ;;  %v17473_v56 = vld [vmem:[#allocation58_spill] sm:$0xff]  ;;  %v17474_v42 = vld [vmem:[#allocation59_spill] sm:$0xff]  ;;  %v13092_v52 = vpop.f32.mrf.mxu3 }
 0x49b   : > { %v4622_v43 = vrot.slane %v4613_v63, 6  ;;  %5923 = vmatpush.msrb.mxu1 %v5049_v35  ;;  %5872 = vmatpush.msrb.mxu0 %v5028_v50  ;;  %v13049_v55 = vsel %vm552_vm2, %v4619_v8, %v4624_v3  ;;  %v4626_v9 = vrot.slane %v4605_v15, 6  ;;  %v4628_v54 = vrot.slane %v4608_v57, 6  ;;  %v17472_v8 = vld [vmem:[#allocation23_spill] sm:$0xff]  ;;  %4648 = vst [vmem:[#allocation2 + $0x58] sm:$0xc0] %v4623_v31 }
 0x49c   : > { %9615 = vmatmul.msk.f32.gmra.mxu1 %vm652_vm1, %v10181_v7  ;;  %v4630_v24 = vrot.slane %v4615_v4, 6  ;;  %v4632_v0 = vrot.slane %v4618_v34, 6  ;;  %4645 = vst [vmem:[#allocation2 + $0x20] sm:$0xc0] %v4620_v53  ;;  %v3963_v19 = vadd.f32 %v3825_v38, %v3501_v18  ;;  %v5285_v17 = vrot.slane %v13033_v45, 2  ;;  %v5046_v18 = vld [vmem:[%s17226_s3 + $0x218] sm:$0xff] }
 0x49d   : > { %5924 = vmatpush.msrb.mxu1 %v5048_v44  ;;  %5873 = vmatpush.msrb.mxu0 %v5027_v10  ;;  %v2622_v30 = vadd.f32 %v17472_v8, %v17471_v41  ;;  %v13060_v26 = vsel %vm552_vm2, %v4620_v53, %v4626_v9  ;;  %v4629_v15 = vsel %vm552_vm2, %v4621_v28, %v4628_v54  ;;  %v5295_v4 = vrot.slane %v13049_v55, 2  ;;  %v10183_v44 = vld [vmem:[%s10422_s12 + $0x368] sm:$0xff]  ;;  %v5043_v9 = vld [vmem:[%s17226_s3 + $0x200] sm:$0xff] }
 0x49e   : > { %4646 = vst [vmem:[#allocation2 + $0xb0] sm:$0xc0] %v4621_v28  ;;  %v13064_v57 = vsel %vm552_vm2, %v4622_v43, %v4630_v24  ;;  %v13067_v46 = vsel %vm552_vm2, %v4623_v31, %v4632_v0  ;;  %v4013_v27 = vmax.f32 %v3914_v33, %v3963_v19  ;;  %v5286_v35 = vsel %vm2695_vm4, %v5275_v49, %v5285_v17  ;;  %v5044_v34 = vld [vmem:[%s17226_s3 + $0x208] sm:$0xff]  ;;  %v17475_v28 = vld [vmem:[#allocation63_spill] sm:$0xff] }
 0x49f   : > { %4647 = vst [vmem:[#allocation2 + $0xe8] sm:$0xc0] %v4622_v43  ;;  %v3652_v50 = vpop.f32.mrf.mxu0  ;;  %v3502_v3 = vadd.f32 %v12809_v60, %v2671_v61  ;;  %v3453_v38 = vadd.f32 %v12775_v16, %v2622_v30  ;;  %5444 = vmatmul.f32.gmra.mxu2 %v5286_v35  ;;  %5925 = vmatpush.msrb.mxu1 %v5047_v36  ;;  %v10182_v61 = vld [vmem:[%s10422_s12 + $0x1b0] sm:$0xff]  ;;  %v13103_v43 = vpop.f32.mrf.mxu2  ;;  %v439_v0 = vld [vmem:[%s10422_s12 + $0x1b8] sm:$0xff] }
 0x4a0   : > { %v1806_v33 = vadd.f32 %v17474_v42, %v17473_v56  ;;  %4649 = vst [vmem:[#allocation2 + $0x208] sm:$0xff] %v13049_v55  ;;  %v13083_v63 = vadd.f32 %v12795_v21, %v4013_v27  ;;  %v5045_v16 = vld [vmem:[%s17226_s3 + $0x210] sm:$0xff]  ;;  %v4064_v54 = vadd.f32 %v12795_v21, %v4012_v59  ;;  %v5296_v7 = vsel %vm2695_vm4, %v5285_v17, %v5295_v4 }
 0x4a1   : > { %v3828_v32 = vpop.f32.mrf.mxu1  ;;  %4650 = vst [vmem:[#allocation2 + $0x1d8] sm:$0xff] %v13060_v26  ;;  %v3915_v49 = vadd.f32 %v13017_v6, %v3453_v38  ;;  %5926 = vmatpush.msrb.mxu1 %v5046_v18  ;;  %v1809_v59 = vadd.f32 %v17477_v62, %v17476_v2  ;;  %v10184_v35 = vld [vmem:[%s10422_s12 + $0x370] sm:$0xff] }
 0x4a2   : > { %v3964_v60 = vadd.f32 %v3828_v32, %v3502_v3  ;;  %9567 = vmatmul.msk.f32.gmra.mxu0 %vm652_vm1, %v10182_v61  ;;  %4651 = vst [vmem:[#allocation2 + $0x2c0] sm:$0xff] %v4629_v15  ;;  %v2672_v45 = vadd.f32 %v12209_v13, %v1806_v33  ;;  %v2623_v13 = vadd.f32 %v12189_v20, %v17475_v28  ;;  %v4114_v31 = vmax.f32 %v13083_v63, 0.0  ;;  %v17478_v38 = vld [vmem:[#allocation66_spill] sm:$0xff]  ;;  %v13131_v56 = vpop.f32.mrf.mxu3 }
 0x4a3   : > { %4652 = vst [vmem:[#allocation2 + $0x1e0] sm:$0xff] %v13064_v57  ;;  %v4955_v10 = vld [vmem:[#allocation2 + $0x20] sm:$0xff]  ;;  %5927 = vmatpush.msrb.mxu1 %v5045_v16  ;;  %v4113_v15 = vmax.f32 %v4064_v54, 0.0  ;;  %v5297_v3 = vrot.slane %v13060_v26, 2  ;;  %v9110_v61 = vld [vmem:[%s10422_s12 + $0x378] sm:$0xff]  ;;  %v4917_v16 = vld [vmem:[#allocation2 + $0x48] sm:$0xff] }
 0x4a4   : > { %v4014_v6 = vmax.f32 %v3915_v49, %v3964_v60  ;;  %9616 = vmatmul.msk.f32.gmra.mxu1 %vm652_vm1, %v10183_v44  ;;  %4653 = vst [vmem:[#allocation2 + $0x238] sm:$0xff] %v13067_v46  ;;  %v5287_v53 = vrot.slane %v4955_v10, 2  ;;  %v3503_v19 = vadd.f32 %v12840_v12, %v2672_v45  ;;  %v3454_v36 = vadd.f32 %v12816_v37, %v2623_v13  ;;  %v17480_v44 = vld [vmem:[#allocation65_spill] sm:$0xff]  ;;  %s378_s12 = scalar_lea.vmem [#allocation3], %s377_s16 }
 0x4a5   : > { %5928 = vmatpush.msrb.mxu1 %v5044_v34  ;;  %v4229_v17 = vrot.slane %v4114_v31, 6  ;;  %v2673_v12 = vadd.f32 %v12221_v14, %v1809_v59  ;;  %v17482_v59 = vld [vmem:[#allocation67_spill] sm:$0xff]  ;;  %s8993_s13 = sshll.u32 %s378_s12, 4  ;;  %s8994_s13 = int_to_ptr.vmem [resolvable:$true] %s8993_s13 }
 0x4a6   : > { %v4066_v55 = vadd.f32 %v12795_v21, %v4014_v6  ;;  %v5288_v20 = vsel %vm2695_vm4, %v5277_v40, %v5287_v53  ;;  %v3916_v1 = vadd.f32 %v3652_v50, %v3454_v36  ;;  %v2624_v50 = vadd.f32 %v12204_v48, %v17478_v38  ;;  %v17479_v6 = vld [vmem:[#allocation64_spill] sm:$0xff] }
 0x4a7   : > { %v3655_v24 = vpop.f32.mrf.mxu0  ;;  %5447 = vmatmul.f32.gmra.mxu2 %v5296_v7  ;;  %5500 = vmatmul.f32.gmra.mxu3 %v5288_v20  ;;  %v5298_v14 = vsel %vm2695_vm4, %v5287_v53, %v5297_v3  ;;  %v3504_v49 = vadd.f32 %v12899_v22, %v2673_v12  ;;  %v13141_v60 = vpop.f32.mrf.mxu2  ;;  %v1812_v10 = vadd.f32 %v17480_v44, %v17479_v6  ;;  %v17487_v6 = vld [vmem:[#allocation71_spill] sm:$0xff] }
 0x4a8   : > { %v4115_v41 = vmax.f32 %v4066_v55, 0.0  ;;  %5929 = vmatpush.msrb.mxu1 %v5043_v9  ;;  %v3455_v63 = vadd.f32 %v12854_v23, %v2624_v50  ;;  %v17481_v55 = vld [vmem:[#allocation69_spill] sm:$0xff]  ;;  %v17484_v50 = vld [vmem:[#allocation72_spill] sm:$0xff] }
 0x4a9   : > { %v3831_v8 = vpop.f32.mrf.mxu1  ;;  %v2674_v53 = vadd.f32 %v12232_v39, %v1812_v10  ;;  %v2625_v9 = vadd.f32 %v12217_v5, %v17481_v55  ;;  %v17488_v55 = vld [vmem:[#allocation28_spill] sm:$0xff] }
 0x4aa   : > { %v4230_v30 = vrot.slane %v4115_v41, 6  ;;  %v3965_v40 = vadd.f32 %v3831_v8, %v3503_v19  ;;  %9568 = vmatmul.msk.f32.gmra.mxu0 %vm652_vm1, %v439_v0  ;;  %v13149_v34 = vadd.f32 %v3655_v24, %v3455_v63  ;;  %v13164_v2 = vpop.f32.mrf.mxu3 }
 0x4ab   : > { %v3505_v39 = vadd.f32 %v12963_v29, %v2674_v53  ;;  %v3456_v41 = vadd.f32 %v12908_v11, %v2625_v9  ;;  %v4922_v29 = vld [vmem:[#allocation2 + $0x128] sm:$0xff] }
 0x4ac   : > { %v4231_v37 = vsel %vm552_vm2, %v4229_v17, %v4230_v30  ;;  %v4015_v27 = vmax.f32 %v3916_v1, %v3965_v40  ;;  %9617 = vmatmul.msk.f32.gmra.mxu1 %vm652_vm1, %v10184_v35 }
 0x4ad   : > { %v4236_v18 = vmax.f32 %v4113_v15, %v4231_v37 }
 0x4ae   : > { %v13134_v42 = vadd.f32 %v12795_v21, %v4015_v27  ;;  %v4918_v27 = vld [vmem:[#allocation2 + $0x30] sm:$0xff] }
 0x4af   : > { %v13136_v33 = vrot.slane %v4236_v18, 2  ;;  %4676 = vst [vmem:[#allocation2 + $0x80] sm:$0xff] %v4236_v18  ;;  %v3658_v32 = vpop.f32.mrf.mxu0  ;;  %5503 = vmatmul.f32.gmra.mxu3 %v5298_v14  ;;  %v4656_v54 = vrot.slane %v4236_v18, 1  ;;  %v4666_v7 = vrot.slane %v4236_v18, 3  ;;  %v4671_v62 = vrot.slane %v4236_v18, 4  ;;  %v13176_v40 = vpop.f32.mrf.mxu2  ;;  %v17485_v14 = vld [vmem:[#allocation25_spill] sm:$0xff] }
 0x4b0   : > { %v4116_v26 = vmax.f32 %v13134_v42, 0.0  ;;  %v3918_v15 = vadd.f32 %v3658_v32, %v3456_v41  ;;  %v2626_v32 = vadd.f32 %v17485_v14, %v17484_v50  ;;  %v17496_v50 = vld [vmem:[#allocation78_spill] sm:$0xff]  ;;  %v17497_v14 = vld [vmem:[#allocation27_spill] sm:$0xff] }
 0x4b1   : > { %v3834_v48 = vpop.f32.mrf.mxu1  ;;  %v5306_v45 = vsel %vm2695_vm4, %v5295_v4, %v13136_v33 }
 0x4b2   : > { %v4232_v22 = vrot.slane %v4116_v26, 6  ;;  %v13153_v23 = vadd.f32 %v3834_v48, %v3504_v49  ;;  %5874 = vmatmul.f32.vlgmr.msrb.gmra.mxu0 %v4917_v16  ;;  %5450 = vmatmul.f32.gmra.mxu2 %v5306_v45  ;;  %v3457_v48 = vadd.f32 %v12973_v58, %v2626_v32  ;;  %v13194_v45 = vld [vmem:[#allocation2 + $0x170] sm:$0xff]  ;;  %v13198_v10 = vpop.f32.mrf.mxu3  ;;  %v2628_v32 = vadd.f32 %v17497_v14, %v17496_v50 }
 0x4b4   : > { %v4233_v28 = vsel %vm552_vm2, %v4230_v30, %v4232_v22  ;;  %v4016_v13 = vmax.f32 %v13149_v34, %v13153_v23  ;;  %9618 = vmatmul.msk.f32.gmra.mxu1 %vm652_vm1, %v9110_v61  ;;  %v4928_v23 = vld [vmem:[#allocation2 + $0x120] sm:$0xff] }
 0x4b5   : > { %v4237_v4 = vmax.f32 %v4114_v31, %v4233_v28  ;;  %v17483_v31 = vld [vmem:[#allocation68_spill] sm:$0xff] }
 0x4b6   : > { %v1815_v8 = vadd.f32 %v17483_v31, %v17482_v59  ;;  %v17491_v59 = vld [vmem:[#allocation73_spill] sm:$0xff]  ;;  %v17492_v31 = vld [vmem:[#allocation74_spill] sm:$0xff] }
 0x4b7   : > { %v4657_v20 = vrot.slane %v4237_v4, 1  ;;  %v4662_v24 = vrot.slane %v4237_v4, 2  ;;  %v4667_v0 = vrot.slane %v4237_v4, 3  ;;  %v4672_v19 = vrot.slane %v4237_v4, 4  ;;  %4681 = vst [vmem:[#allocation2 + $0x1d0] sm:$0x3] %v4237_v4  ;;  %v3661_v36 = vpop.f32.mrf.mxu0  ;;  %v13202_v9 = vpop.f32.mrf.mxu2 }
 0x4b8   : > { %v2675_v35 = vadd.f32 %v12241_v51, %v1815_v8  ;;  %v3919_v22 = vadd.f32 %v3661_v36, %v3457_v48  ;;  %v4923_v4 = vld [vmem:[#allocation2 + $0xe0] sm:$0xff]  ;;  %v1821_v8 = vadd.f32 %v17492_v31, %v17491_v59 }
 0x4b9   : > { %v13169_v5 = vsel %vm751_vm0, %v4656_v54, %v4657_v20  ;;  %v4663_v17 = vsel %vm2695_vm4, %v13136_v33, %v4662_v24  ;;  %v13174_v1 = vsel %vm4307_vm5, %v4666_v7, %v4667_v0  ;;  %4682 = vst [vmem:[#allocation2 + $0x98] sm:$0x3] %v4657_v20  ;;  %v3837_v30 = vpop.f32.mrf.mxu1  ;;  %v13179_v11 = vsel %vm1864_vm3, %v4671_v62, %v4672_v19  ;;  %v17489_v7 = vld [vmem:[#allocation75_spill] sm:$0xff]  ;;  %v17490_v20 = vld [vmem:[#allocation26_spill] sm:$0xff] }
 0x4ba   : > { %4677 = vst [vmem:[#allocation2 + $0x2a0] sm:$0xff] %v13169_v5  ;;  %v3967_v12 = vadd.f32 %v3837_v30, %v3505_v39  ;;  %5877 = vmatmul.f32.gmra.mxu0 %v4922_v29  ;;  %v5307_v37 = vrot.slane %v13169_v5, 2  ;;  %v3506_v51 = vadd.f32 %v13027_v25, %v2675_v35  ;;  %v17494_v35 = vld [vmem:[#allocation76_spill] sm:$0xff] }
 0x4bb   : > { %4678 = vst [vmem:[#allocation2 + $0xd8] sm:$0xff] %v4663_v17 }
 0x4bc   : > { %4679 = vst [vmem:[#allocation2 + $0x158] sm:$0xff] %v13174_v1  ;;  %v4017_v18 = vmax.f32 %v3918_v15, %v3967_v12  ;;  %5930 = vmatmul.f32.vlgmr.msrb.gmra.mxu1 %v4918_v27  ;;  %v5308_v38 = vsel %vm2695_vm4, %v5297_v3, %v5307_v37  ;;  %v17486_v3 = vld [vmem:[#allocation70_spill] sm:$0xff]  ;;  %v13225_v15 = vpop.f32.mrf.mxu3 }
 0x4bd   : > { %4680 = vst [vmem:[#allocation2 + $0x88] sm:$0xff] %v13179_v11  ;;  %5506 = vmatmul.f32.gmra.mxu3 %v5308_v38  ;;  %v1818_v44 = vadd.f32 %v17487_v6, %v17486_v3 }
 0x4be   : > { %4683 = vst [vmem:[#allocation2 + $0x1c8] sm:$0x3] %v4662_v24  ;;  %v4069_v49 = vadd.f32 %v12795_v21, %v4017_v18  ;;  %v2627_v24 = vadd.f32 %v17490_v20, %v17489_v7  ;;  %v17495_v18 = vld [vmem:[#allocation77_spill] sm:$0xff] }
 0x4bf   : > { %4684 = vst [vmem:[#allocation2 + $0x1e8] sm:$0x3] %v4667_v0  ;;  %v3664_v63 = vpop.f32.mrf.mxu0  ;;  %v2676_v25 = vadd.f32 %v17488_v55, %v1818_v44  ;;  %v1824_v38 = vadd.f32 %v17495_v18, %v17494_v35  ;;  %v17498_v55 = vld [vmem:[#allocation32_spill] sm:$0xff] }
 0x4c0   : > { %4685 = vst [vmem:[#allocation2 + $0x270] sm:$0x3] %v4672_v19  ;;  %v4118_v61 = vmax.f32 %v4069_v49, 0.0  ;;  %v4068_v19 = vadd.f32 %v12795_v21, %v4016_v13  ;;  %v3458_v41 = vadd.f32 %v13044_v47, %v2627_v24  ;;  %v17493_v13 = vld [vmem:[#allocation30_spill] sm:$0xff] }
 0x4c1   : > { %v3840_v16 = vpop.f32.mrf.mxu1  ;;  %v3507_v39 = vadd.f32 %v13092_v52, %v2676_v25  ;;  %v2677_v52 = vadd.f32 %v17493_v13, %v1821_v8  ;;  %v2678_v25 = vadd.f32 %v17498_v55, %v1824_v38  ;;  %v4933_v8 = vld [vmem:[#allocation2 + $0x220] sm:$0xff]  ;;  %v9666_v38 = vld [vmem:[%s17226_s3 + $0x3f8] sm:$0xff] }
 0x4c2   : > { %v4240_v53 = vrot.slane %v4118_v61, 6  ;;  %v3968_v28 = vadd.f32 %v3840_v16, %v3506_v51  ;;  %5880 = vmatmul.f32.gmra.mxu0 %v13194_v45  ;;  %v13219_v17 = vadd.f32 %v3664_v63, %v3458_v41  ;;  %v4117_v34 = vmax.f32 %v4068_v19, 0.0  ;;  %v13234_v51 = vpop.f32.mrf.mxu2  ;;  %v13243_v19 = vld [vmem:[#allocation2 + $0x218] sm:$0xff]  ;;  %5522 = vmatpush.msra.mxu2 %v9666_v38  ;;  %v9680_v38 = vld [vmem:[%s17226_s3 + $0x468] sm:$0xff] }
 0x4c4   : > { %v4246_v58 = vmax.f32 %v4116_v26, %v4240_v53  ;;  %v4018_v54 = vmax.f32 %v3919_v22, %v3968_v28  ;;  %5933 = vmatmul.f32.gmra.mxu1 %v4923_v4  ;;  %v13215_v26 = vld [vmem:[#allocation2 + $0x60] sm:$0xff]  ;;  %v3508_v4 = vadd.f32 %v13131_v56, %v2677_v52  ;;  %v17499_v52 = vld [vmem:[#allocation81_spill] sm:$0xff]  ;;  %v13255_v50 = vpop.f32.mrf.mxu3 }
 0x4c6   : > { %v4070_v0 = vadd.f32 %v12795_v21, %v4018_v54  ;;  %v4688_v49 = vrot.slane %v4246_v58, 1  ;;  %v4691_v48 = vrot.slane %v4246_v58, 2  ;;  %v4695_v16 = vrot.slane %v4246_v58, 3 }
 0x4c7   : > { %v3667_v36 = vpop.f32.mrf.mxu0  ;;  %v3459_v54 = vadd.f32 %v13103_v43, %v2628_v32 }
 0x4c8   : > { %v4119_v62 = vmax.f32 %v4070_v0, 0.0 }
 0x4c9   : > { %v3843_v42 = vpop.f32.mrf.mxu1 }
 0x4ca   : > { %v4241_v30 = vrot.slane %v4119_v62, 6  ;;  %v13221_v29 = vadd.f32 %v3843_v42, %v3507_v39  ;;  %5883 = vmatmul.f32.gmra.mxu0 %v13215_v26 }
 0x4cc   : > { %v4242_v47 = vsel %vm552_vm2, %v4240_v53, %v4241_v30  ;;  %v4248_v12 = vmax.f32 %v4118_v61, %v4241_v30  ;;  %v4019_v27 = vmax.f32 %v13219_v17, %v13221_v29  ;;  %5936 = vmatmul.f32.gmra.mxu1 %v4928_v23  ;;  %v3921_v23 = vadd.f32 %v3667_v36, %v3459_v54  ;;  %v9682_v54 = vld [vmem:[%s17226_s3 + $0x478] sm:$0xff] }
 0x4cd   : > { %v4247_v63 = vmax.f32 %v4117_v34, %v4242_v47  ;;  %v17500_v47 = vld [vmem:[#allocation29_spill] sm:$0xff]  ;;  %5578 = vmatpush.msrb.mxu3 %v9682_v54  ;;  %v17506_v17 = vld [vmem:[#allocation82_spill] sm:$0xff]  ;;  %v17507_v29 = vld [vmem:[#allocation83_spill] sm:$0xff] }
 0x4ce   : > { %v4698_v3 = vrot.slane %v4248_v12, 3  ;;  %v4701_v6 = vrot.slane %v4248_v12, 4  ;;  %v2629_v12 = vadd.f32 %v17500_v47, %v17499_v52  ;;  %v13318_v47 = vld [vmem:[#allocation2 + $0x180] sm:$0xff] }
 0x4cf   : > { %v4689_v44 = vrot.slane %v4247_v63, 1  ;;  %v4692_v61 = vrot.slane %v4247_v63, 2  ;;  %v4696_v22 = vrot.slane %v4247_v63, 3  ;;  %v4700_v53 = vrot.slane %v4247_v63, 4  ;;  %v3670_v28 = vpop.f32.mrf.mxu0  ;;  %v9665_v63 = vld [vmem:[%s17226_s3 + $0x3f0] sm:$0xff] }
 0x4d0   : > { %v3460_v32 = vadd.f32 %v13141_v60, %v2629_v12  ;;  %5523 = vmatpush.msra.mxu2 %v9665_v63  ;;  %v17508_v63 = vld [vmem:[#allocation36_spill] sm:$0xff]  ;;  %v13352_v54 = vld [vmem:[%s17225_s2] ss:$0 sm:$0xff] }
 0x4d1   : > { %v4690_v7 = vsel %vm751_vm0, %v4688_v49, %v4689_v44  ;;  %v4693_v20 = vsel %vm2695_vm4, %v4691_v48, %v4692_v61  ;;  %v4697_v24 = vsel %vm4307_vm5, %v4695_v16, %v4696_v22  ;;  %v4699_v58 = vsel %vm4307_vm5, %v4696_v22, %v4698_v3  ;;  %4730 = vst [vmem:[#allocation2 + $0xc0] sm:$0xf] %v4692_v61  ;;  %v3846_v0 = vpop.f32.mrf.mxu1  ;;  %v13263_v16 = vpop.f32.mrf.mxu2  ;;  %v17501_v3 = vld [vmem:[#allocation79_spill] sm:$0xff] }
 0x4d2   : > { %v4702_v39 = vsel %vm1864_vm3, %v4700_v53, %v4701_v6  ;;  %v4703_v41 = vrot.slane %v4690_v7, 2  ;;  %v4704_v56 = vrot.slane %v4689_v44, 2  ;;  %v4706_v62 = vrot.slane %v4693_v20, 2  ;;  %4725 = vst [vmem:[#allocation2 + $0x1d0] sm:$0xfc] %v4693_v20  ;;  %5886 = vmatmul.f32.gmra.mxu0 %v13243_v19  ;;  %v17502_v6 = vld [vmem:[#allocation80_spill] sm:$0xff] }
 0x4d3   : > { %v4707_v43 = vrot.slane %v4692_v61, 2  ;;  %v4709_v42 = vrot.slane %v4697_v24, 2  ;;  %v4710_v59 = vrot.slane %v4699_v58, 2  ;;  %v4712_v31 = vrot.slane %v4700_v53, 2  ;;  %v13267_v53 = vld [vmem:[#allocation2 + $0x90] sm:$0xff]  ;;  %v9663_v7 = vld [vmem:[%s17226_s3 + $0x3e0] sm:$0xff] }
 0x4d4   : > { %v4705_v30 = vsel %vm2695_vm4, %v4703_v41, %v4704_v56  ;;  %v4713_v34 = vrot.slane %v4702_v39, 2  ;;  %4731 = vst [vmem:[#allocation2 + $0x258] sm:$0xf] %v4704_v56  ;;  %v3970_v13 = vadd.f32 %v3846_v0, %v3508_v4  ;;  %5939 = vmatmul.f32.gmra.mxu1 %v4933_v8  ;;  %v3509_v48 = vadd.f32 %v13164_v2, %v2678_v25  ;;  %v9664_v4 = vld [vmem:[%s17226_s3 + $0x3e8] sm:$0xff]  ;;  %v17503_v20 = vld [vmem:[#allocation34_spill] sm:$0xff] }
 0x4d5   : > { %v4708_v35 = vsel %vm2695_vm4, %v4706_v62, %v4707_v43  ;;  %v4711_v18 = vsel %vm2695_vm4, %v4709_v42, %v4710_v59  ;;  %4726 = vst [vmem:[#allocation2 + $0x98] sm:$0xfc] %v4705_v30  ;;  %v1827_v44 = vadd.f32 %v17502_v6, %v17501_v3  ;;  %v3922_v61 = vadd.f32 %v3670_v28, %v3460_v32  ;;  %v4938_v28 = vld [vmem:[#allocation2 + $0x250] sm:$0xff]  ;;  %v9662_v56 = vld [vmem:[%s17226_s3 + $0x3d8] sm:$0xff]  ;;  %v17504_v62 = vld [vmem:[#allocation84_spill] sm:$0xff] }
 0x4d6   : > { %v4714_v14 = vsel %vm2695_vm4, %v4712_v31, %v4713_v34  ;;  %4727 = vst [vmem:[#allocation2 + $0x1c8] sm:$0xfc] %v4708_v35  ;;  %v4020_v36 = vmax.f32 %v3921_v23, %v3970_v13  ;;  %5524 = vmatpush.msra.mxu2 %v9664_v4  ;;  %v13311_v13 = vpop.f32.mrf.mxu3  ;;  %v4943_v32 = vld [vmem:[#allocation2 + $0x280] sm:$0xff] }
 0x4d7   : > { %4728 = vst [vmem:[#allocation2 + $0x1e8] sm:$0xfc] %v4711_v18  ;;  %v3673_v49 = vpop.f32.mrf.mxu0  ;;  %v2679_v24 = vadd.f32 %v17503_v20, %v1827_v44  ;;  %v9659_v6 = vld [vmem:[%s17226_s3 + $0x3c0] sm:$0xff]  ;;  %v9746_v44 = vld [vmem:[%s17226_s3 + $0x678] sm:$0xff] }
 0x4d8   : > { %4729 = vst [vmem:[#allocation2 + $0x270] sm:$0xfc] %v4714_v14  ;;  %v13275_v2 = vadd.f32 %v12795_v21, %v4020_v36  ;;  %5525 = vmatpush.msra.mxu2 %v9663_v7  ;;  %v9660_v14 = vld [vmem:[%s17226_s3 + $0x3c8] sm:$0xff]  ;;  %6483 = vmatpush.msra.mxu0 %v9746_v44  ;;  %v17509_v4 = vld [vmem:[#allocation87_spill] sm:$0xff] }
 0x4d9   : > { %4732 = vst [vmem:[#allocation2 + $0x1f8] sm:$0xf] %v4707_v43  ;;  %v3849_v22 = vpop.f32.mrf.mxu1  ;;  %v13269_v60 = vld [vmem:[#allocation2 + $0x1d0] sm:$0xff]  ;;  %v17505_v43 = vld [vmem:[#allocation31_spill] sm:$0xff] }
 0x4da   : > { %4733 = vst [vmem:[#allocation2 + $0xb8] sm:$0xf] %v4710_v59  ;;  %v3971_v55 = vadd.f32 %v3849_v22, %v3509_v48  ;;  %5889 = vmatmul.f32.gmra.mxu0 %v13267_v53  ;;  %v5315_v25 = vrot.slane %v13269_v60, 2  ;;  %v2630_v42 = vadd.f32 %v17505_v43, %v17504_v62  ;;  %v4121_v59 = vmax.f32 %v13275_v2, 0.0  ;;  %5526 = vmatpush.msra.mxu2 %v9662_v56  ;;  %v9679_v22 = vld [vmem:[%s17226_s3 + $0x460] sm:$0xff]  ;;  %v9658_v20 = vld [vmem:[%s17226_s3 + $0x3b8] sm:$0xff] }
 0x4db   : > { %4734 = vst [vmem:[#allocation2 + $0x118] sm:$0xf] %v4713_v34  ;;  %v3510_v34 = vadd.f32 %v13198_v10, %v2679_v24  ;;  %v9745_v24 = vld [vmem:[%s17226_s3 + $0x670] sm:$0xff]  ;;  %v9678_v56 = vld [vmem:[%s17226_s3 + $0x458] sm:$0xff]  ;;  %v9675_v44 = vld [vmem:[%s17226_s3 + $0x440] sm:$0xff] }
 0x4dc   : > { %v4021_v58 = vmax.f32 %v3922_v61, %v3971_v55  ;;  %5942 = vmatmul.f32.gmra.mxu1 %v4938_v28  ;;  %v5316_v0 = vsel %vm2695_vm4, %v13136_v33, %v5315_v25  ;;  %v13290_v39 = vld [vmem:[#allocation2 + $0x98] sm:$0xff]  ;;  %v4071_v33 = vadd.f32 %v12795_v21, %v4019_v27  ;;  %v3461_v23 = vadd.f32 %v13176_v40, %v2630_v42  ;;  %v13323_v40 = vpop.f32.mrf.mxu2  ;;  %v17510_v55 = vld [vmem:[#allocation33_spill] sm:$0xff]  ;;  %v9671_v60 = vld [vmem:[%s17226_s3 + $0x420] sm:$0xff] }
 0x4dd   : > { %5453 = vmatmul.f32.gmra.mxu2 %v5316_v0  ;;  %v5317_v41 = vrot.slane %v13290_v39, 2  ;;  %v1830_v27 = vadd.f32 %v17507_v29, %v17506_v17  ;;  %v4252_v10 = vrot.slane %v4121_v59, 6  ;;  %v2631_v28 = vadd.f32 %v17510_v55, %v17509_v4  ;;  %6484 = vmatpush.msra.mxu0 %v9745_v24  ;;  %v17517_v4 = vld [vmem:[#allocation35_spill] sm:$0xff] }
 0x4de   : > { %v4073_v31 = vadd.f32 %v12795_v21, %v4021_v58  ;;  %v9661_v21 = vld [vmem:[%s17226_s3 + $0x3d0] sm:$0xff]  ;;  %v3923_v12 = vadd.f32 %v3673_v49, %v3461_v23  ;;  %v4120_v36 = vmax.f32 %v4071_v33, 0.0  ;;  %v9744_v33 = vld [vmem:[%s17226_s3 + $0x668] sm:$0xff]  ;;  %v9654_v2 = vld [vmem:[%s17226_s3 + $0x398] sm:$0xff] }
 0x4df   : > { %v5318_v8 = vsel %vm2695_vm4, %v5307_v37, %v5317_v41  ;;  %v3676_v30 = vpop.f32.mrf.mxu0  ;;  %v9681_v37 = vld [vmem:[%s17226_s3 + $0x470] sm:$0xff]  ;;  %5527 = vmatpush.msra.mxu2 %v9661_v21  ;;  %v2680_v48 = vadd.f32 %v17508_v63, %v1830_v27  ;;  %v3462_v43 = vadd.f32 %v13202_v9, %v2631_v28  ;;  %6485 = vmatpush.msra.mxu0 %v9744_v33  ;;  %v13387_v21 = vpop.f32.mrf.mxu3  ;;  %v9742_v63 = vld [vmem:[%s17226_s3 + $0x658] sm:$0xff] }
 0x4e0   : > { %v4122_v52 = vmax.f32 %v4073_v31, 0.0  ;;  %5509 = vmatmul.f32.gmra.mxu3 %v5318_v8  ;;  %v9657_v31 = vld [vmem:[%s17226_s3 + $0x3b0] sm:$0xff]  ;;  %v9754_v39 = vld [vmem:[%s17226_s3 + $0x6b8] sm:$0xff] }
 0x4e1   : > { %v3852_v5 = vpop.f32.mrf.mxu1  ;;  %5579 = vmatpush.msrb.mxu3 %v9681_v37  ;;  %5528 = vmatpush.msra.mxu2 %v9660_v14  ;;  %v3511_v62 = vadd.f32 %v13225_v15, %v2680_v48  ;;  %v9677_v9 = vld [vmem:[%s17226_s3 + $0x450] sm:$0xff]  ;;  %v13389_v17 = vadd.f32 %v3676_v30, %v3462_v43  ;;  %v9743_v37 = vld [vmem:[%s17226_s3 + $0x660] sm:$0xff]  ;;  %v9676_v30 = vld [vmem:[%s17226_s3 + $0x448] sm:$0xff] }
 0x4e2   : > { %v4253_v35 = vrot.slane %v4122_v52, 6  ;;  %v3972_v18 = vadd.f32 %v3852_v5, %v3510_v34  ;;  %5892 = vmatmul.f32.gmra.mxu0 %v13318_v47  ;;  %v13380_v34 = vld [vmem:[#allocation2 + $0x248] sm:$0xff]  ;;  %v17512_v23 = vld [vmem:[#allocation86_spill] sm:$0xff] }
 0x4e3   : > { %5580 = vmatpush.msrb.mxu3 %v9680_v38  ;;  %5529 = vmatpush.msra.mxu2 %v9659_v6  ;;  %v17511_v15 = vld [vmem:[#allocation85_spill] sm:$0xff]  ;;  %v9762_v48 = vld [vmem:[%s17226_s3 + $0x6f8] sm:$0xff] }
 0x4e4   : > { %v4254_v49 = vsel %vm552_vm2, %v4252_v10, %v4253_v35  ;;  %v4022_v3 = vmax.f32 %v3923_v12, %v3972_v18  ;;  %5945 = vmatmul.f32.gmra.mxu1 %v4943_v32  ;;  %v1833_v52 = vadd.f32 %v17512_v23, %v17511_v15  ;;  %v9656_v5 = vld [vmem:[%s17226_s3 + $0x3a8] sm:$0xff]  ;;  %v4948_v10 = vld [vmem:[#allocation2 + $0x200] sm:$0xff]  ;;  %6486 = vmatpush.msra.mxu0 %v9743_v37  ;;  %v17513_v12 = vld [vmem:[#allocation38_spill] sm:$0xff]  ;;  %v13406_v38 = vpop.f32.mrf.mxu2 }
 0x4e5   : > { %v13342_v61 = vmax.f32 %v4120_v36, %v4254_v49  ;;  %5581 = vmatpush.msrb.mxu3 %v9679_v22  ;;  %5530 = vmatpush.msra.mxu2 %v9658_v20  ;;  %v9655_v32 = vld [vmem:[%s17226_s3 + $0x3a0] sm:$0xff]  ;;  %v17516_v22 = vld [vmem:[#allocation90_spill] sm:$0xff]  ;;  %v9740_v37 = vld [vmem:[%s17226_s3 + $0x648] sm:$0xff] }
 0x4e6   : > { %v13355_v7 = vadd.f32 %v13352_v54, %v4022_v3  ;;  %v2681_v18 = vadd.f32 %v17513_v12, %v1833_v52  ;;  %v17514_v49 = vld [vmem:[#allocation88_spill] sm:$0xff]  ;;  %v17515_v3 = vld [vmem:[#allocation89_spill] sm:$0xff]  ;;  %6487 = vmatpush.msra.mxu0 %v9742_v63  ;;  %v2632_v55 = vadd.f32 %v17517_v4, %v17516_v22  ;;  %6539 = vmatpush.msra.mxu1 %v9762_v48  ;;  %v17518_v23 = vld [vmem:[#allocation42_spill] sm:$0xff] }
 0x4e7   : > { %v4746_v58 = vrot.slane %v13342_v61, 4  ;;  %v13364_v0 = vpop.f32.mrf.mxu0  ;;  %5582 = vmatpush.msrb.mxu3 %v9678_v56  ;;  %5531 = vmatpush.msra.mxu2 %v9657_v31  ;;  %v4737_v28 = vrot.slane %v13342_v61, 1  ;;  %v4740_v20 = vrot.slane %v13342_v61, 2  ;;  %v4743_v24 = vrot.slane %v13342_v61, 3  ;;  %v9761_v56 = vld [vmem:[%s17226_s3 + $0x6f0] sm:$0xff]  ;;  %v4953_v63 = vld [vmem:[#allocation2 + $0x1c0] sm:$0xff] }
 0x4e8   : > { %v4123_v42 = vmax.f32 %v13355_v7, 0.0  ;;  %v3512_v15 = vadd.f32 %v13255_v50, %v2681_v18  ;;  %6540 = vmatpush.msra.mxu1 %v9761_v56  ;;  %v9673_v48 = vld [vmem:[%s17226_s3 + $0x430] sm:$0xff]  ;;  %v9652_v4 = vld [vmem:[%s17226_s3 + $0x388] sm:$0xff] }
 0x4e9   : > { %4771 = vst [vmem:[#allocation2 + $0xc0] sm:$0xf0] %v4746_v58  ;;  %v3855_v8 = vpop.f32.mrf.mxu1  ;;  %5583 = vmatpush.msrb.mxu3 %v9677_v9  ;;  %5532 = vmatpush.msra.mxu2 %v9656_v5  ;;  %v9674_v9 = vld [vmem:[%s17226_s3 + $0x438] sm:$0xff]  ;;  %v9653_v5 = vld [vmem:[%s17226_s3 + $0x390] sm:$0xff] }
 0x4ea   : > { %v4255_v29 = vrot.slane %v4123_v42, 6  ;;  %v13393_v27 = vadd.f32 %v3855_v8, %v3511_v62  ;;  %5895 = vmatmul.f32.gmra.mxu0 %v13380_v34 }
 0x4eb   : > { %5584 = vmatpush.msrb.mxu3 %v9676_v30  ;;  %5533 = vmatpush.msra.mxu2 %v9655_v32  ;;  %v13466_v32 = vld [vmem:[#allocation2 + $0xe8] sm:$0xff] }
 0x4ec   : > { %v4256_v14 = vsel %vm552_vm2, %v4253_v35, %v4255_v29  ;;  %v4023_v36 = vmax.f32 %v13389_v17, %v13393_v27  ;;  %5948 = vmatmul.f32.gmra.mxu1 %v4948_v10  ;;  %v1836_v35 = vadd.f32 %v17515_v3, %v17514_v49  ;;  %v3463_v29 = vadd.f32 %v13234_v51, %v2632_v55  ;;  %v9760_v10 = vld [vmem:[%s17226_s3 + $0x6e8] sm:$0xff]  ;;  %v9739_v55 = vld [vmem:[%s17226_s3 + $0x640] sm:$0xff] }
 0x4ed   : > { %v4260_v6 = vmax.f32 %v4121_v59, %v4256_v14  ;;  %5585 = vmatpush.msrb.mxu3 %v9675_v44  ;;  %v9741_v59 = vld [vmem:[%s17226_s3 + $0x650] sm:$0xff]  ;;  %5534 = vmatpush.msra.mxu2 %v9654_v2 }
 0x4ee   : > { %6488 = vmatpush.msra.mxu0 %v9741_v59  ;;  %v2682_v52 = vadd.f32 %v17518_v23, %v1836_v35  ;;  %6541 = vmatpush.msra.mxu1 %v9760_v10  ;;  %v9759_v59 = vld [vmem:[%s17226_s3 + $0x6e0] sm:$0xff]  ;;  %v9738_v10 = vld [vmem:[%s17226_s3 + $0x638] sm:$0xff] }
 0x4ef   : > { %v4738_v62 = vrot.slane %v4260_v6, 1  ;;  %v4741_v43 = vrot.slane %v4260_v6, 2  ;;  %v4744_v31 = vrot.slane %v4260_v6, 3  ;;  %v4747_v33 = vrot.slane %v4260_v6, 4  ;;  %v13441_v8 = vpop.f32.mrf.mxu0  ;;  %5586 = vmatpush.msrb.mxu3 %v9674_v9  ;;  %5535 = vmatpush.msra.mxu2 %v9653_v5  ;;  %v17519_v9 = vld [vmem:[#allocation93_spill] sm:$0xff] }
 0x4f0   : > { %v13464_v14 = vld [vmem:[#allocation2 + $0xc0] sm:$0xff]  ;;  %6489 = vmatpush.msra.mxu0 %v9740_v37  ;;  %6542 = vmatpush.msra.mxu1 %v9759_v59 }
 0x4f1   : > { %v4739_v50 = vsel %vm751_vm0, %v4737_v28, %v4738_v62  ;;  %v4742_v30 = vsel %vm2695_vm4, %v4740_v20, %v4741_v43  ;;  %v4745_v51 = vsel %vm4307_vm5, %v4743_v24, %v4744_v31  ;;  %v4748_v12 = vsel %vm1864_vm3, %v4746_v58, %v4747_v33  ;;  %v3858_v18 = vpop.f32.mrf.mxu1  ;;  %v13478_v28 = vpop.f32.mrf.mxu3  ;;  %5587 = vmatpush.msrb.mxu3 %v9673_v48  ;;  %v17522_v48 = vld [vmem:[#allocation92_spill] sm:$0xff] }
 0x4f2   : > { %v4749_v49 = vrot.slane %v4739_v50, 4  ;;  %v4750_v3 = vrot.slane %v4742_v30, 4  ;;  %v4751_v35 = vrot.slane %v4745_v51, 4  ;;  %v4752_v6 = vrot.slane %v4748_v12, 4  ;;  %4776 = vst [vmem:[#allocation2 + $0x68] sm:$0x3f] %v4748_v12  ;;  %5898 = vmatmul.f32.gmra.mxu0 %v13466_v32  ;;  %5536 = vmatpush.msra.mxu2 %v9652_v4 }
 0x4f3   : > { %v4753_v61 = vrot.slane %v4738_v62, 4  ;;  %v4755_v58 = vrot.slane %v4741_v43, 4  ;;  %v4757_v44 = vrot.slane %v4744_v31, 4  ;;  %v4759_v22 = vrot.slane %v4747_v33, 4  ;;  %v9672_v33 = vld [vmem:[%s17226_s3 + $0x428] sm:$0xff]  ;;  %6490 = vmatpush.msra.mxu0 %v9739_v55  ;;  %v9758_v50 = vld [vmem:[%s17226_s3 + $0x6d8] sm:$0xff] }
 0x4f4   : > { %4772 = vst [vmem:[#allocation2 + $0x258] sm:$0xf0] %v4749_v49  ;;  %v3925_v20 = vadd.f32 %v13364_v0, %v3463_v29  ;;  %v3974_v24 = vadd.f32 %v3858_v18, %v3512_v15  ;;  %v5325_v2 = vrot.slane %v13464_v14, 2  ;;  %5951 = vmatmul.f32.gmra.mxu1 %v4953_v63  ;;  %v9651_v0 = vld [vmem:[%s17226_s3 + $0x380] sm:$0xff]  ;;  %v17520_v15 = vld [vmem:[#allocation37_spill] sm:$0xff]  ;;  %v13497_v29 = vpop.f32.mrf.mxu2  ;;  %5588 = vmatpush.msrb.mxu3 %v9672_v33 }
 0x4f5   : > { %v4754_v56 = vsel %vm1864_vm3, %v4749_v49, %v4753_v61  ;;  %v4756_v62 = vsel %vm1864_vm3, %v4750_v3, %v4755_v58  ;;  %v4758_v43 = vsel %vm1864_vm3, %v4751_v35, %v4757_v44  ;;  %v4760_v31 = vsel %vm1864_vm3, %v4752_v6, %v4759_v22  ;;  %4773 = vst [vmem:[#allocation2 + $0x1f8] sm:$0xf0] %v4750_v3  ;;  %v9737_v18 = vld [vmem:[%s17226_s3 + $0x630] sm:$0xff]  ;;  %v17521_v63 = vld [vmem:[#allocation91_spill] sm:$0xff]  ;;  %v9736_v58 = vld [vmem:[%s17226_s3 + $0x628] sm:$0xff] }
 0x4f6   : > { %v2633_v23 = vadd.f32 %v17520_v15, %v17519_v9  ;;  %4774 = vst [vmem:[#allocation2 + $0xb8] sm:$0xf0] %v4751_v35  ;;  %v4024_v5 = vmax.f32 %v3925_v20, %v3974_v24  ;;  %v5326_v37 = vsel %vm2695_vm4, %v5315_v25, %v5325_v2  ;;  %v3513_v25 = vadd.f32 %v13311_v13, %v2682_v52  ;;  %v9757_v14 = vld [vmem:[%s17226_s3 + $0x6d0] sm:$0xff]  ;;  %v9670_v52 = vld [vmem:[%s17226_s3 + $0x418] sm:$0xff]  ;;  %v9756_v44 = vld [vmem:[%s17226_s3 + $0x6c8] sm:$0xff] }
 0x4f7   : > { %4775 = vst [vmem:[#allocation2 + $0x118] sm:$0xf0] %v4752_v6  ;;  %5456 = vmatmul.f32.gmra.mxu2 %v5326_v37  ;;  %v13508_v30 = vpop.f32.mrf.mxu0  ;;  %v1839_v49 = vadd.f32 %v17522_v48, %v17521_v63  ;;  %6491 = vmatpush.msra.mxu0 %v9738_v10  ;;  %v17523_v22 = vld [vmem:[#allocation114_spill] sm:$0xff]  ;;  %v17527_v10 = vld [vmem:[#allocation95_spill] sm:$0xff] }
 0x4f8   : > { %v3464_v51 = vadd.f32 %v13263_v16, %v2633_v23  ;;  %4777 = vst [vmem:[#allocation2 + $0x268] sm:$0x3f] %v4754_v56  ;;  %v13516_v12 = vadd.f32 %v13352_v54, %v4024_v5  ;;  %5537 = vmatpush.msra.mxu2 %v9651_v0  ;;  %6543 = vmatpush.msra.mxu1 %v9758_v50  ;;  %v17525_v0 = vld [vmem:[#allocation39_spill] sm:$0xff]  ;;  %v9668_v5 = vld [vmem:[%s17226_s3 + $0x408] sm:$0xff]  ;;  %v17526_v37 = vld [vmem:[#allocation94_spill] sm:$0xff] }
 0x4f9   : > { %4778 = vst [vmem:[#allocation2 + $0x190] sm:$0x3f] %v4756_v62  ;;  %v3861_v13 = vpop.f32.mrf.mxu1  ;;  %v13526_v16 = vld [vmem:[#allocation2 + $0x68] sm:$0x3f]  ;;  %5589 = vmatpush.msrb.mxu3 %v9671_v60  ;;  %v2683_v4 = vadd.f32 %v17523_v22, %v1839_v49  ;;  %6492 = vmatpush.msra.mxu0 %v9737_v18  ;;  %v9735_v62 = vld [vmem:[%s17226_s3 + $0x620] sm:$0xff]  ;;  %v13561_v9 = vpop.f32.mrf.mxu3  ;;  %v1842_v50 = vadd.f32 %v17527_v10, %v17526_v37 }
 0x4fa   : > { %4779 = vst [vmem:[#allocation2 + $0x290] sm:$0x3f] %v4758_v43  ;;  %v3926_v3 = vadd.f32 %v13441_v8, %v3464_v51  ;;  %v4125_v35 = vmax.f32 %v13516_v12, 0.0  ;;  %v3975_v6 = vadd.f32 %v3861_v13, %v3513_v25  ;;  %5901 = vmatmul.f32.gmra.mxu0 %v13064_v57  ;;  %v5335_v61 = vrot.slane %v13526_v16, 2  ;;  %v4958_v8 = vld [vmem:[#allocation2 + $0x58] sm:$0xff]  ;;  %6544 = vmatpush.msra.mxu1 %v9757_v14  ;;  %v9669_v57 = vld [vmem:[%s17226_s3 + $0x410] sm:$0xff] }
 0x4fb   : > { %4780 = vst [vmem:[#allocation2 + $0x108] sm:$0x3f] %v4760_v31  ;;  %v13542_v55 = vld [vmem:[#allocation2 + $0x258] sm:$0xff]  ;;  %5590 = vmatpush.msrb.mxu3 %v9670_v52  ;;  %6493 = vmatpush.msra.mxu0 %v9736_v58  ;;  %v9755_v43 = vld [vmem:[%s17226_s3 + $0x6c0] sm:$0xff]  ;;  %v4075_v51 = vadd.f32 %v13352_v54, %v4023_v36  ;;  %v9733_v13 = vld [vmem:[%s17226_s3 + $0x610] sm:$0xff] }
 0x4fc   : > { %v4263_v20 = vrot.slane %v4125_v35, 6  ;;  %v4025_v24 = vmax.f32 %v3926_v3, %v3975_v6  ;;  %5954 = vmatmul.f32.gmra.mxu1 %v4958_v8  ;;  %v5336_v59 = vsel %vm2695_vm4, %v5325_v2, %v5335_v61  ;;  %v5327_v56 = vrot.slane %v13542_v55, 2  ;;  %v17524_v31 = vld [vmem:[#allocation96_spill] sm:$0xff]  ;;  %v13585_v25 = vpop.f32.mrf.mxu2  ;;  %v9734_v14 = vld [vmem:[%s17226_s3 + $0x618] sm:$0xff]  ;;  %v9753_v52 = vld [vmem:[%s17226_s3 + $0x6b0] sm:$0xff] }
 0x4fd   : > { %6545 = vmatpush.msra.mxu1 %v9756_v44  ;;  %v2634_v33 = vadd.f32 %v17525_v0, %v17524_v31  ;;  %5591 = vmatpush.msrb.mxu3 %v9669_v57  ;;  %v17530_v6 = vld [vmem:[#allocation98_spill] sm:$0xff]  ;;  %v17531_v44 = vld [vmem:[#allocation99_spill] sm:$0xff]  ;;  %v17532_v22 = vld [vmem:[#allocation113_spill] sm:$0xff] }
 0x4fe   : > { %v13565_v2 = vmax.f32 %v4123_v42, %v4263_v20  ;;  %v4077_v15 = vadd.f32 %v13352_v54, %v4025_v24  ;;  %v5328_v23 = vsel %vm2695_vm4, %v5317_v41, %v5327_v56  ;;  %v3514_v41 = vadd.f32 %v13387_v21, %v2683_v4  ;;  %6494 = vmatpush.msra.mxu0 %v9735_v62  ;;  %v9667_v21 = vld [vmem:[%s17226_s3 + $0x400] sm:$0xff]  ;;  %v9752_v62 = vld [vmem:[%s17226_s3 + $0x6a8] sm:$0xff] }
 0x4ff   : > { %5459 = vmatmul.f32.gmra.mxu2 %v5336_v59  ;;  %5512 = vmatmul.f32.gmra.mxu3 %v5328_v23  ;;  %v13576_v60 = vpop.f32.mrf.mxu0  ;;  %v13578_v7 = vld [vmem:[#allocation2 + $0x268] sm:$0x3f]  ;;  %v3465_v42 = vadd.f32 %v13323_v40, %v2634_v33  ;;  %v4124_v4 = vmax.f32 %v4075_v51, 0.0  ;;  %v9751_v16 = vld [vmem:[%s17226_s3 + $0x6a0] sm:$0xff] }
 0x500   : > { %v4798_v18 = vrot.slane %v13565_v2, 6  ;;  %6546 = vmatpush.msra.mxu1 %v9755_v43  ;;  %v17528_v40 = vld [vmem:[#allocation116_spill] sm:$0xff]  ;;  %v4126_v48 = vmax.f32 %v4077_v15, 0.0  ;;  %5592 = vmatpush.msrb.mxu3 %v9668_v5  ;;  %v5337_v36 = vrot.slane %v13578_v7, 2  ;;  %v17533_v43 = vld [vmem:[#allocation118_spill] sm:$0xff]  ;;  %v4786_v0 = vrot.slane %v13565_v2, 2 }
 0x501   : > { %v2684_v63 = vadd.f32 %v17528_v40, %v1842_v50  ;;  %v3864_v49 = vpop.f32.mrf.mxu1  ;;  %v13602_v17 = vadd.f32 %v13508_v30, %v3465_v42  ;;  %6495 = vmatpush.msra.mxu0 %v9734_v14  ;;  %v17529_v30 = vld [vmem:[#allocation97_spill] sm:$0xff]  ;;  %v4790_v33 = vrot.slane %v13565_v2, 3  ;;  %v13646_v37 = vpop.f32.mrf.mxu3 }
 0x502   : > { %4823 = vst [vmem:[#allocation2 + $0x68] sm:$0xc0] %v4798_v18  ;;  %v13604_v27 = vadd.f32 %v3864_v49, %v3514_v41  ;;  %5904 = vmatmul.f32.gmra.mxu0 %v13174_v1  ;;  %6547 = vmatpush.msra.mxu1 %v9754_v39  ;;  %v4264_v3 = vrot.slane %v4126_v48, 6  ;;  %v1845_v58 = vadd.f32 %v17530_v6, %v17529_v30  ;;  %v9732_v59 = vld [vmem:[%s17226_s3 + $0x608] sm:$0xff]  ;;  %v9731_v41 = vld [vmem:[%s17226_s3 + $0x600] sm:$0xff] }
 0x503   : > { %5593 = vmatpush.msrb.mxu3 %v9667_v21  ;;  %v2635_v1 = vadd.f32 %v17532_v22, %v17531_v44  ;;  %v3515_v55 = vadd.f32 %v13478_v28, %v2684_v63  ;;  %6496 = vmatpush.msra.mxu0 %v9733_v13  ;;  %v5338_v12 = vsel %vm2695_vm4, %v5327_v56, %v5337_v36  ;;  %v13655_v14 = vld [vmem:[#allocation2 + $0x1e8] sm:$0xff] }
 0x504   : > { %v4026_v8 = vmax.f32 %v13602_v17, %v13604_v27  ;;  %5957 = vmatmul.f32.gmra.mxu1 %v13067_v46  ;;  %v4265_v57 = vsel %vm552_vm2, %v4263_v20, %v4264_v3  ;;  %v4271_v24 = vmax.f32 %v4125_v35, %v4264_v3  ;;  %v13632_v31 = vadd.f32 %v17533_v43, %v1845_v58  ;;  %v13638_v35 = vld [vmem:[#allocation2 + $0x160] sm:$0xff]  ;;  %v5061_v20 = vld [vmem:[#allocation2 + $0x78] sm:$0xfc]  ;;  %v13658_v63 = vpop.f32.mrf.mxu2  ;;  %v9749_v43 = vld [vmem:[%s17226_s3 + $0x690] sm:$0xff] }
 0x505   : > { %6548 = vmatpush.msra.mxu1 %v9753_v52  ;;  %v4783_v46 = vrot.slane %v13565_v2, 1  ;;  %v4270_v28 = vmax.f32 %v4124_v4, %v4265_v57  ;;  %6497 = vmatpush.msra.mxu0 %v9732_v59  ;;  %v5226_v21 = vrot.slane %v5061_v20, 2  ;;  %v5227_v40 = vrot.slane %v13638_v35, 2  ;;  %v13684_v20 = vld [vmem:[#allocation2 + $0x18] sm:$0xff] }
 0x506   : > { %v4793_v15 = vrot.slane %v4271_v24, 3  ;;  %v4796_v23 = vrot.slane %v4271_v24, 4  ;;  %v5241_v17 = vrot.slane %v13215_v26, 2 }
 0x507   : > { %5462 = vmatmul.f32.gmra.mxu2 %v5335_v61  ;;  %5515 = vmatmul.f32.gmra.mxu3 %v5338_v12  ;;  %v13644_v5 = vpop.f32.mrf.mxu0  ;;  %v4784_v10 = vrot.slane %v4270_v28, 1  ;;  %v4787_v50 = vrot.slane %v4270_v28, 2  ;;  %v4791_v56 = vrot.slane %v4270_v28, 3  ;;  %v4795_v39 = vrot.slane %v4270_v28, 4 }
 0x508   : > { %6549 = vmatpush.msra.mxu1 %v9752_v62  ;;  %v3466_v61 = vadd.f32 %v13406_v38, %v2635_v1  ;;  %v4803_v42 = vrot.slane %v4270_v28, 6  ;;  %v9750_v38 = vld [vmem:[%s17226_s3 + $0x698] sm:$0xff]  ;;  %6498 = vmatpush.msra.mxu0 %v9731_v41 }
 0x509   : > { %v3867_v51 = vpop.f32.mrf.mxu1  ;;  %v4785_v48 = vsel %vm751_vm0, %v4783_v46, %v4784_v10  ;;  %v4788_v49 = vsel %vm2695_vm4, %v4786_v0, %v4787_v50  ;;  %v4792_v13 = vsel %vm4307_vm5, %v4790_v33, %v4791_v56  ;;  %v4794_v52 = vsel %vm4307_vm5, %v4791_v56, %v4793_v15  ;;  %v17534_v46 = vld [vmem:[#allocation102_spill] sm:$0xff]  ;;  %v17535_v28 = vld [vmem:[#allocation115_spill] sm:$0xff]  ;;  %v9748_v15 = vld [vmem:[%s17226_s3 + $0x688] sm:$0xff] }
 0x50a   : > { %5907 = vmatmul.f32.gmra.mxu0 %v13655_v14  ;;  %v4797_v3 = vsel %vm1864_vm3, %v4795_v39, %v4796_v23  ;;  %v4799_v30 = vrot.slane %v4785_v48, 6  ;;  %v4800_v6 = vrot.slane %v4788_v49, 6  ;;  %v4801_v58 = vrot.slane %v4792_v13, 6  ;;  %6550 = vmatpush.msra.mxu1 %v9751_v16  ;;  %v17536_v56 = vld [vmem:[#allocation100_spill] sm:$0xff]  ;;  %v13709_v49 = vld [vmem:[#allocation2 + $0x1f8] sm:$0xff] }
 0x50b   : > { %v4802_v44 = vrot.slane %v4795_v39, 6  ;;  %v4804_v22 = vsel %vm552_vm2, %v4798_v18, %v4803_v42  ;;  %v4805_v1 = vrot.slane %v4784_v10, 6  ;;  %v4807_v4 = vrot.slane %v4787_v50, 6  ;;  %v5062_v50 = vld [vmem:[#allocation2 + $0x128] sm:$0xfc]  ;;  %v13700_v42 = vpop.f32.mrf.mxu3  ;;  %v17538_v13 = vld [vmem:[#allocation120_spill] sm:$0xff] }
 0x50c   : > { %5960 = vmatmul.f32.gmra.mxu1 %v13179_v11  ;;  %v4809_v57 = vrot.slane %v4794_v52, 6  ;;  %v4811_v24 = vrot.slane %v4797_v3, 6  ;;  %4824 = vst [vmem:[#allocation2 + $0x268] sm:$0xc0] %v4799_v30  ;;  %v3928_v59 = vadd.f32 %v13576_v60, %v3466_v61  ;;  %v3977_v62 = vadd.f32 %v3867_v51, %v3515_v55  ;;  %v17537_v39 = vld [vmem:[#allocation101_spill] sm:$0xff]  ;;  %v9747_v51 = vld [vmem:[%s17226_s3 + $0x680] sm:$0xff] }
 0x50d   : > { %6551 = vmatpush.msra.mxu1 %v9750_v38  ;;  %v2636_v2 = vadd.f32 %v17535_v28, %v17534_v46  ;;  %v4806_v18 = vsel %vm552_vm2, %v4799_v30, %v4805_v1  ;;  %v4808_v12 = vsel %vm552_vm2, %v4800_v6, %v4807_v4  ;;  %4825 = vst [vmem:[#allocation2 + $0x190] sm:$0xc0] %v4800_v6  ;;  %v5230_v16 = vrot.slane %v13194_v45, 2  ;;  %v13712_v38 = vpop.f32.mrf.mxu2  ;;  %v5972_v3 = vld [vmem:[#allocation2 + $0x160] sm:$0xf0]  ;;  %v17539_v30 = vld [vmem:[#allocation105_spill] sm:$0xff] }
 0x50e   : > { %v5228_v11 = vsel %vm2695_vm4, %v5226_v21, %v5227_v40  ;;  %v4810_v60 = vsel %vm552_vm2, %v4801_v58, %v4809_v57  ;;  %v4812_v55 = vsel %vm552_vm2, %v4802_v44, %v4811_v24  ;;  %4826 = vst [vmem:[#allocation2 + $0x290] sm:$0xc0] %v4801_v58  ;;  %v4027_v0 = vmax.f32 %v3928_v59, %v3977_v62  ;;  %v4973_v21 = vld [vmem:[#allocation2 + $0x270] sm:$0xff]  ;;  %v13729_v59 = vld [vmem:[#allocation2 + $0x1a8] sm:$0xff] }
 0x50f   : > { %5538 = vmatmul.f32.vlgmr.msra.gmra.mxu2 %v5228_v11  ;;  %5518 = vmatmul.f32.gmra.mxu3 %v5337_v36  ;;  %v3694_v33 = vpop.f32.mrf.mxu0  ;;  %v3516_v23 = vadd.f32 %v13561_v9, %v13632_v31  ;;  %v3467_v10 = vadd.f32 %v13497_v29, %v2636_v2  ;;  %4827 = vst [vmem:[#allocation2 + $0x108] sm:$0xc0] %v4802_v44  ;;  %v4977_v36 = vld [vmem:[#allocation2 + $0xb8] sm:$0xf]  ;;  %v5239_v61 = vrot.slane %v13684_v20, 2  ;;  %v5229_v48 = vrot.slane %v5062_v50, 2 }
 0x510   : > { %6552 = vmatpush.msra.mxu1 %v9749_v43  ;;  %v1848_v41 = vadd.f32 %v17537_v39, %v17536_v56  ;;  %4828 = vst [vmem:[#allocation2 + $0xa8] sm:$0xff] %v4804_v22  ;;  %v13704_v29 = vadd.f32 %v13352_v54, %v4027_v0  ;;  %v17540_v6 = vld [vmem:[#allocation117_spill] sm:$0xff]  ;;  %v6188_v1 = vrot.slane %v13684_v20, 4  ;;  %v17237_v62 = vrot.slane %v13709_v49, 6  ;;  %v17541_v11 = vld [vmem:[#allocation103_spill] sm:$0xff] }
 0x511   : > { %v3870_v7 = vpop.f32.mrf.mxu1  ;;  %4829 = vst [vmem:[#allocation2 + $0x198] sm:$0xff] %v4806_v18  ;;  %v3929_v9 = vadd.f32 %v13644_v5, %v3467_v10  ;;  %v2637_v58 = vadd.f32 %v17540_v6, %v17539_v30  ;;  %v5240_v44 = vsel %vm2695_vm4, %v5227_v40, %v5239_v61  ;;  %v5231_v22 = vsel %vm2695_vm4, %v5229_v48, %v5230_v16  ;;  %v4978_v56 = vld [vmem:[#allocation2 + $0x118] sm:$0xf]  ;;  %v17544_v48 = vld [vmem:[#allocation108_spill] sm:$0xff] }
 0x512   : > { %v3978_v31 = vadd.f32 %v3870_v7, %v3516_v23  ;;  %5910 = vmatmul.f32.gmra.mxu0 %v4977_v36  ;;  %6553 = vmatpush.msra.mxu1 %v9748_v15  ;;  %4830 = vst [vmem:[#allocation2 + $0x2b8] sm:$0xff] %v4808_v12  ;;  %v2686_v52 = vadd.f32 %v17538_v13, %v1848_v41  ;;  %v4128_v57 = vmax.f32 %v13704_v29, 0.0  ;;  %v6187_v46 = vrot.slane %v5972_v3, 4  ;;  %v17543_v41 = vld [vmem:[#allocation122_spill] sm:$0xff]  ;;  %v17545_v13 = vld [vmem:[#allocation119_spill] sm:$0xff] }
 0x513   : > { %4831 = vst [vmem:[#allocation2 + $0x130] sm:$0xff] %v4810_v60  ;;  %v4078_v40 = vadd.f32 %v13352_v54, %v4026_v8  ;;  %v3468_v2 = vadd.f32 %v13585_v25, %v2637_v58  ;;  %v17542_v60 = vld [vmem:[#allocation104_spill] sm:$0xff]  ;;  %v5249_v0 = vrot.slane %v13729_v59, 2  ;;  %v3417_v36 = vpop.f32.mrf.mxu3  ;;  %v5242_v6 = vsel %vm2695_vm4, %v5230_v16, %v5241_v17  ;;  %v5973_v58 = vld [vmem:[#allocation2 + $0x170] sm:$0xf0] }
 0x514   : > { %v4028_v5 = vmax.f32 %v3929_v9, %v3978_v31  ;;  %5963 = vmatmul.f32.gmra.mxu1 %v4973_v21  ;;  %4832 = vst [vmem:[#allocation2 + $0x110] sm:$0xff] %v4812_v55  ;;  %v13725_v4 = vld [vmem:[#allocation2 + $0x190] sm:$0xff]  ;;  %v3517_v28 = vadd.f32 %v13646_v37, %v2686_v52  ;;  %v1851_v55 = vadd.f32 %v17542_v60, %v17541_v11  ;;  %v4275_v37 = vrot.slane %v4128_v57, 6 }
 0x515   : > { %6554 = vmatpush.msra.mxu1 %v9747_v51  ;;  %v6984_v35 = vrot.slane %v13725_v4, 6  ;;  %v6189_v8 = vsel %vm1864_vm3, %v6187_v46, %v6188_v1  ;;  %v3930_v25 = vadd.f32 %v3694_v33, %v3468_v2  ;;  %v4127_v50 = vmax.f32 %v4078_v40, 0.0  ;;  %v17546_v2 = vld [vmem:[#allocation106_spill] sm:$0xff] }
 0x516   : > { %v4080_v24 = vadd.f32 %v13352_v54, %v4028_v5  ;;  %v2687_v7 = vadd.f32 %v17543_v41, %v1851_v55  ;;  %v6200_v33 = vrot.slane %v13729_v59, 4  ;;  %v2638_v52 = vadd.f32 %v17545_v13, %v17544_v48  ;;  %v13766_v5 = vpop.f32.mrf.mxu2  ;;  %v17549_v55 = vld [vmem:[#allocation121_spill] sm:$0xff]  ;;  %v13818_v13 = vld [vmem:[#allocation2 + $0x38] sm:$0xff] }
 0x517   : > { %5541 = vmatmul.f32.gmra.mxu2 %v5240_v44  ;;  %5594 = vmatmul.f32.vlgmr.msrb.gmra.mxu3 %v5231_v22  ;;  %v3697_v43 = vpop.f32.mrf.mxu0  ;;  %v13742_v12 = vsel %vm552_vm2, %v17237_v62, %v6984_v35  ;;  %v5250_v30 = vsel %vm2695_vm4, %v5239_v61, %v5249_v0  ;;  %v13777_v44 = vld [vmem:[#allocation2 + $0x150] sm:$0xff]  ;;  %v5251_v45 = vrot.slane %v13243_v19, 2  ;;  %v6190_v46 = vrot.slane %v5973_v58, 4 }
 0x518   : > { %v4129_v18 = vmax.f32 %v4080_v24, 0.0  ;;  %v6191_v24 = vrot.slane %v13215_v26, 4  ;;  %v3469_v20 = vadd.f32 %v13658_v63, %v2638_v52  ;;  %v6201_v16 = vsel %vm1864_vm3, %v6188_v1, %v6200_v33  ;;  %v17548_v63 = vld [vmem:[#allocation111_spill] sm:$0xff]  ;;  %v17550_v1 = vld [vmem:[#allocation124_spill] sm:$0xff]  ;;  %v17551_v58 = vld [vmem:[#allocation109_spill] sm:$0xff] }
 0x519   : > { %v3873_v27 = vpop.f32.mrf.mxu1  ;;  %v13751_v10 = vld [vmem:[#allocation2 + $0x2b8] sm:$0xff]  ;;  %v5252_v41 = vsel %vm2695_vm4, %v5241_v17, %v5251_v45 }
 0x51a   : > { %v4276_v15 = vrot.slane %v4129_v18, 6  ;;  %v3979_v23 = vadd.f32 %v3873_v27, %v3517_v28  ;;  %6499 = vmatmul.f32.vlgmr.msra.gmra.mxu0 %v6189_v8  ;;  %v17236_v39 = vrot.slane %v13751_v10, 6  ;;  %v5259_v28 = vrot.slane %v13777_v44, 2  ;;  %v17547_v18 = vld [vmem:[#allocation107_spill] sm:$0xff] }
 0x51b   : > { %v1854_v11 = vadd.f32 %v17547_v18, %v17546_v2  ;;  %v13789_v60 = vadd.f32 %v3697_v43, %v3469_v20  ;;  %v2639_v27 = vadd.f32 %v17549_v55, %v17548_v63  ;;  %v6192_v8 = vsel %vm1864_vm3, %v6190_v46, %v6191_v24 }
 0x51c   : > { %v4277_v9 = vsel %vm552_vm2, %v4275_v37, %v4276_v15  ;;  %v4029_v31 = vmax.f32 %v3930_v25, %v3979_v23  ;;  %5966 = vmatmul.f32.gmra.mxu1 %v4978_v56  ;;  %v13762_v21 = vsel %vm552_vm2, %v6984_v35, %v17236_v39  ;;  %v3518_v35 = vadd.f32 %v13700_v42, %v2687_v7 }
 0x51d   : > { %v13756_v51 = vmax.f32 %v4127_v50, %v4277_v9  ;;  %v2688_v37 = vadd.f32 %v17550_v1, %v1854_v11  ;;  %v6210_v43 = vrot.slane %v13777_v44, 4  ;;  %v5260_v56 = vsel %vm2695_vm4, %v5249_v0, %v5259_v28 }
 0x51e   : > { %v13769_v3 = vadd.f32 %v13352_v54, %v4029_v31  ;;  %v6202_v7 = vrot.slane %v13243_v19, 4  ;;  %v13812_v9 = vpop.f32.mrf.mxu2  ;;  %v5261_v63 = vrot.slane %v13267_v53, 2 }
 0x51f   : > { %4855 = vst [vmem:[#allocation2 + $0x1f0] sm:$0xff] %v13756_v51  ;;  %5544 = vmatmul.f32.gmra.mxu2 %v5250_v30  ;;  %5597 = vmatmul.f32.gmra.mxu3 %v5242_v6  ;;  %v3700_v22 = vpop.f32.mrf.mxu0  ;;  %v4835_v31 = vrot.slane %v13756_v51, 1  ;;  %v4840_v48 = vrot.slane %v13756_v51, 2  ;;  %v4845_v29 = vrot.slane %v13756_v51, 3 }
 0x520   : > { %v4130_v61 = vmax.f32 %v13769_v3, 0.0 }
 0x521   : > { %v3876_v40 = vpop.f32.mrf.mxu1 }
 0x522   : > { %v4278_v26 = vrot.slane %v4130_v61, 6  ;;  %v13793_v42 = vadd.f32 %v3876_v40, %v3518_v35  ;;  %6502 = vmatmul.f32.gmra.mxu0 %v6201_v16  ;;  %v17552_v35 = vld [vmem:[#allocation110_spill] sm:$0xff]  ;;  %v3519_v40 = vadd.f32 %v3417_v36, %v2688_v37  ;;  %v3470_v16 = vadd.f32 %v13712_v38, %v2639_v27  ;;  %v17555_v37 = vld [vmem:[#allocation125_spill] sm:$0xff] }
 0x523   : > { %v1857_v20 = vadd.f32 %v17552_v35, %v17551_v58  ;;  %v5269_v38 = vrot.slane %v13818_v13, 2  ;;  %v17553_v27 = vld [vmem:[#allocation6_spill] sm:$0xff]  ;;  %v6212_v58 = vrot.slane %v13267_v53, 4 }
 0x524   : > { %v4279_v25 = vsel %vm552_vm2, %v4276_v15, %v4278_v26  ;;  %v4030_v23 = vmax.f32 %v13789_v60, %v13793_v42  ;;  %6555 = vmatmul.f32.vlgmr.msra.gmra.mxu1 %v6192_v8  ;;  %v3420_v15 = vpop.f32.mrf.mxu3  ;;  %v3932_v36 = vadd.f32 %v3700_v22, %v3470_v16  ;;  %v17554_v8 = vld [vmem:[#allocation112_spill] sm:$0xff]  ;;  %v6220_v22 = vrot.slane %v13818_v13, 4  ;;  %v13854_v35 = vld [vmem:[#allocation2 + $0x210] sm:$0xff]  ;;  %v4994_v53 = vld [vmem:[%s17226_s3 + $0x78] sm:$0xff] }
 0x525   : > { %v4283_v50 = vmax.f32 %v4128_v57, %v4279_v25  ;;  %v4850_v57 = vrot.slane %v13756_v51, 4  ;;  %v6211_v51 = vsel %vm1864_vm3, %v6200_v33, %v6210_v43  ;;  %v6203_v33 = vsel %vm1864_vm3, %v6191_v24, %v6202_v7  ;;  %5690 = vmatpush.msra.mxu3 %v4994_v53  ;;  %v9696_v42 = vld [vmem:[%s17226_s3 + $0x4e8] sm:$0xff] }
 0x526   : > { %v1594_v1 = vadd.f32 %v17554_v8, %v17553_v27  ;;  %v2689_v25 = vadd.f32 %v17555_v37, %v1857_v20  ;;  %v6221_v16 = vsel %vm1864_vm3, %v6210_v43, %v6220_v22  ;;  %v4082_v19 = vadd.f32 %v13352_v54, %v4030_v23  ;;  %v9695_v23 = vld [vmem:[%s17226_s3 + $0x4e0] sm:$0xff] }
 0x527   : > { %v4836_v0 = vrot.slane %v4283_v50, 1  ;;  %v4841_v52 = vrot.slane %v4283_v50, 2  ;;  %v4846_v30 = vrot.slane %v4283_v50, 3  ;;  %v4851_v6 = vrot.slane %v4283_v50, 4  ;;  %4860 = vst [vmem:[#allocation2 + $0x2c8] sm:$0x3] %v4283_v50  ;;  %5547 = vmatmul.f32.gmra.mxu2 %v5260_v56  ;;  %5600 = vmatmul.f32.gmra.mxu3 %v5252_v41  ;;  %v3703_v17 = vpop.f32.mrf.mxu0 }
 0x528   : > { %v17556_v56 = vld [vmem:[#allocation123_spill] sm:$0xff]  ;;  %v3520_v20 = vadd.f32 %v3420_v15, %v2689_v25  ;;  %v6213_v15 = vsel %vm1864_vm3, %v6202_v7, %v6212_v58  ;;  %v9697_v7 = vld [vmem:[%s17226_s3 + $0x4f0] sm:$0xff]  ;;  %v4131_v8 = vmax.f32 %v4082_v19, 0.0 }
 0x529   : > { %v4837_v46 = vsel %vm751_vm0, %v4835_v31, %v4836_v0  ;;  %v4842_v2 = vsel %vm2695_vm4, %v4840_v48, %v4841_v52  ;;  %v4847_v18 = vsel %vm4307_vm5, %v4845_v29, %v4846_v30  ;;  %v4852_v11 = vsel %vm1864_vm3, %v4850_v57, %v4851_v6  ;;  %4861 = vst [vmem:[#allocation2 + $0x228] sm:$0x3] %v4836_v0  ;;  %v3879_v26 = vpop.f32.mrf.mxu1  ;;  %v13842_v48 = vpop.f32.mrf.mxu2 }
 0x52a   : > { %4856 = vst [vmem:[#allocation2 + $0x1b8] sm:$0xff] %v4837_v46  ;;  %v3981_v55 = vadd.f32 %v3879_v26, %v3519_v40  ;;  %6505 = vmatmul.f32.gmra.mxu0 %v6211_v51  ;;  %v2640_v41 = vadd.f32 %v17556_v56, %v1594_v1  ;;  %v5270_v29 = vsel %vm2695_vm4, %v5259_v28, %v5269_v38 }
 0x52b   : > { %4857 = vst [vmem:[#allocation2 + $0xc8] sm:$0xff] %v4842_v2  ;;  %v5262_v57 = vsel %vm2695_vm4, %v5251_v45, %v5261_v63  ;;  %v5271_v45 = vrot.slane %v13318_v47, 2 }
 0x52c   : > { %4858 = vst [vmem:[#allocation2 + $0x50] sm:$0xff] %v4847_v18  ;;  %v4031_v50 = vmax.f32 %v3932_v36, %v3981_v55  ;;  %6558 = vmatmul.f32.gmra.mxu1 %v6203_v33  ;;  %v13840_v31 = vpop.f32.mrf.mxu3  ;;  %v3471_v28 = vadd.f32 %v13766_v5, %v2640_v41  ;;  %v5279_v5 = vrot.slane %v13854_v35, 2  ;;  %v6230_v18 = vrot.slane %v13854_v35, 4  ;;  %v13881_v55 = vld [vmem:[#allocation2 + $0xb0] sm:$0xff] }
 0x52d   : > { %4859 = vst [vmem:[#allocation2 + $0x100] sm:$0xff] %v4852_v11  ;;  %v5272_v36 = vsel %vm2695_vm4, %v5261_v63, %v5271_v45  ;;  %v5281_v33 = vrot.slane %v13380_v34, 2 }
 0x52e   : > { %4862 = vst [vmem:[#allocation2 + $0x168] sm:$0x3] %v4841_v52  ;;  %v4083_v24 = vadd.f32 %v13352_v54, %v4031_v50  ;;  %v9698_v52 = vld [vmem:[%s17226_s3 + $0x4f8] sm:$0xff]  ;;  %v3933_v51 = vadd.f32 %v3703_v17, %v3471_v28  ;;  %v5280_v26 = vsel %vm2695_vm4, %v5269_v38, %v5279_v5  ;;  %v6231_v60 = vsel %vm1864_vm3, %v6220_v22, %v6230_v18 }
 0x52f   : > { %4863 = vst [vmem:[#allocation2 + $0x288] sm:$0x3] %v4846_v30  ;;  %5550 = vmatmul.f32.gmra.mxu2 %v5270_v29  ;;  %5603 = vmatmul.f32.gmra.mxu3 %v5262_v57  ;;  %v13851_v0 = vpop.f32.mrf.mxu0  ;;  %v6240_v50 = vrot.slane %v13881_v55, 4  ;;  %v6232_v22 = vrot.slane %v13380_v34, 4  ;;  %v5282_v29 = vsel %vm2695_vm4, %v5271_v45, %v5281_v33  ;;  %v13918_v57 = vld [vmem:[#allocation2 + $0x2c0] sm:$0xff]  ;;  %v9694_v45 = vld [vmem:[%s17226_s3 + $0x4d8] sm:$0xff] }
 0x530   : > { %4864 = vst [vmem:[#allocation2 + $0x8] sm:$0x3] %v4851_v6  ;;  %v4132_v40 = vmax.f32 %v4083_v24, 0.0  ;;  %5634 = vmatpush.msrb.mxu2 %v9698_v52  ;;  %v9807_v34 = vld [vmem:[%s17226_s3 + $0x860] sm:$0xff] }
 0x531   : > { %v3882_v30 = vpop.f32.mrf.mxu1  ;;  %v13893_v38 = vpop.f32.mrf.mxu2 }
 0x532   : > { %v4286_v46 = vrot.slane %v4132_v40, 6  ;;  %v3982_v2 = vadd.f32 %v3882_v30, %v3520_v20  ;;  %6508 = vmatmul.f32.gmra.mxu0 %v6221_v16  ;;  %5635 = vmatpush.msrb.mxu2 %v9697_v7  ;;  %v9692_v7 = vld [vmem:[%s17226_s3 + $0x4c8] sm:$0xff] }
 0x534   : > { %v13873_v6 = vmax.f32 %v4130_v61, %v4286_v46  ;;  %v4032_v43 = vmax.f32 %v3933_v51, %v3982_v2  ;;  %6561 = vmatmul.f32.gmra.mxu1 %v6213_v15  ;;  %v13876_v11 = vpop.f32.mrf.mxu3  ;;  %v6222_v61 = vrot.slane %v13318_v47, 4  ;;  %v4993_v47 = vld [vmem:[%s17226_s3 + $0x70] sm:$0xff]  ;;  %5636 = vmatpush.msrb.mxu2 %v9696_v42  ;;  %v6241_v15 = vsel %vm1864_vm3, %v6230_v18, %v6240_v50 }
 0x535   : > { %5691 = vmatpush.msra.mxu3 %v4993_v47 }
 0x536   : > { %v4084_v17 = vadd.f32 %v13352_v54, %v4032_v43  ;;  %v5289_v54 = vrot.slane %v13881_v55, 2  ;;  %v6223_v1 = vsel %vm1864_vm3, %v6212_v58, %v6222_v61  ;;  %5637 = vmatpush.msrb.mxu2 %v9695_v23  ;;  %v4867_v56 = vrot.slane %v13873_v6, 1 }
 0x537   : > { %5553 = vmatmul.f32.gmra.mxu2 %v5280_v26  ;;  %5606 = vmatmul.f32.gmra.mxu3 %v5272_v36  ;;  %v13887_v3 = vpop.f32.mrf.mxu0  ;;  %v4870_v58 = vrot.slane %v13873_v6, 2  ;;  %v4874_v52 = vrot.slane %v13873_v6, 3  ;;  %v6233_v6 = vsel %vm1864_vm3, %v6222_v61, %v6232_v22  ;;  %v5299_v43 = vrot.slane %v13918_v57, 2  ;;  %v4992_v26 = vld [vmem:[%s17226_s3 + $0x68] sm:$0xff] }
 0x538   : > { %v4133_v63 = vmax.f32 %v4084_v17, 0.0  ;;  %v5290_v24 = vsel %vm2695_vm4, %v5279_v5, %v5289_v54  ;;  %v5291_v5 = vrot.slane %v13466_v32, 2  ;;  %5638 = vmatpush.msrb.mxu2 %v9694_v45  ;;  %v9693_v17 = vld [vmem:[%s17226_s3 + $0x4d0] sm:$0xff]  ;;  %5692 = vmatpush.msra.mxu3 %v4992_v26  ;;  %v4990_v26 = vld [vmem:[%s17226_s3 + $0x58] sm:$0xff] }
 0x539   : > { %v13931_v2 = vpop.f32.mrf.mxu2 }
 0x53a   : > { %v4287_v27 = vrot.slane %v4133_v63, 6  ;;  %6511 = vmatmul.f32.gmra.mxu0 %v6231_v60  ;;  %5639 = vmatpush.msrb.mxu2 %v9693_v17  ;;  %v9689_v17 = vld [vmem:[%s17226_s3 + $0x4b0] sm:$0xff] }
 0x53c   : > { %v4288_v37 = vsel %vm552_vm2, %v4286_v46, %v4287_v27  ;;  %v4294_v25 = vmax.f32 %v4132_v40, %v4287_v27  ;;  %6564 = vmatmul.f32.gmra.mxu1 %v6223_v1  ;;  %v13929_v46 = vpop.f32.mrf.mxu3  ;;  %5640 = vmatpush.msrb.mxu2 %v9692_v7  ;;  %v4989_v7 = vld [vmem:[%s17226_s3 + $0x50] sm:$0xff] }
 0x53d   : > { %v4293_v41 = vmax.f32 %v4131_v8, %v4288_v37 }
 0x53e   : > { %v4877_v20 = vrot.slane %v4294_v25, 3  ;;  %v4880_v28 = vrot.slane %v4294_v25, 4 }
 0x53f   : > { %v4868_v40 = vrot.slane %v4293_v41, 1  ;;  %v13922_v30 = vrot.slane %v4293_v41, 2  ;;  %v4875_v16 = vrot.slane %v4293_v41, 3  ;;  %v4879_v53 = vrot.slane %v4293_v41, 4  ;;  %5556 = vmatmul.f32.gmra.mxu2 %v5290_v24  ;;  %5609 = vmatmul.f32.gmra.mxu3 %v5282_v29  ;;  %v13924_v51 = vpop.f32.mrf.mxu0  ;;  %v13964_v29 = vpop.f32.mrf.mxu1 }
 0x541   : > { %v4869_v36 = vsel %vm751_vm0, %v4867_v56, %v4868_v40  ;;  %v4872_v18 = vsel %vm2695_vm4, %v4870_v58, %v13922_v30  ;;  %v4876_v19 = vsel %vm4307_vm5, %v4874_v52, %v4875_v16  ;;  %v4878_v61 = vsel %vm4307_vm5, %v4875_v16, %v4877_v20  ;;  %4909 = vst [vmem:[#allocation2 + $0x260] sm:$0xf] %v13922_v30  ;;  %v9691_v56 = vld [vmem:[%s17226_s3 + $0x4c0] sm:$0xff] }
 0x542   : > { %v4881_v63 = vsel %vm1864_vm3, %v4879_v53, %v4880_v28  ;;  %v4882_v60 = vrot.slane %v4869_v36, 2  ;;  %v4883_v42 = vrot.slane %v4868_v40, 2  ;;  %v4885_v47 = vrot.slane %v4872_v18, 2  ;;  %4904 = vst [vmem:[#allocation2 + $0x2c8] sm:$0xfc] %v4872_v18  ;;  %6514 = vmatmul.f32.gmra.mxu0 %v6241_v15  ;;  %v13978_v40 = vld [vmem:[#allocation2 + $0xd8] sm:$0xff]  ;;  %5641 = vmatpush.msrb.mxu2 %v9691_v56  ;;  %v13994_v15 = vpop.f32.mrf.mxu2 }
 0x543   : > { %v4886_v23 = vrot.slane %v13922_v30, 2  ;;  %v4888_v27 = vrot.slane %v4876_v19, 2  ;;  %v4889_v8 = vrot.slane %v4878_v61, 2  ;;  %v4891_v1 = vrot.slane %v4879_v53, 2  ;;  %v9690_v53 = vld [vmem:[%s17226_s3 + $0x4b8] sm:$0xff]  ;;  %v9688_v18 = vld [vmem:[%s17226_s3 + $0x4a8] sm:$0xff] }
 0x544   : > { %v4884_v37 = vsel %vm2695_vm4, %v4882_v60, %v4883_v42  ;;  %v4892_v25 = vrot.slane %v4881_v63, 2  ;;  %4910 = vst [vmem:[#allocation2 + $0x138] sm:$0xf] %v4883_v42  ;;  %6567 = vmatmul.f32.gmra.mxu1 %v6233_v6  ;;  %v6250_v58 = vrot.slane %v13918_v57, 4  ;;  %v5300_v20 = vsel %vm2695_vm4, %v5289_v54, %v5299_v43  ;;  %v9810_v54 = vld [vmem:[%s17226_s3 + $0x878] sm:$0xff]  ;;  %v13992_v45 = vpop.f32.mrf.mxu3  ;;  %5642 = vmatpush.msrb.mxu2 %v9690_v53  ;;  %v9809_v6 = vld [vmem:[%s17226_s3 + $0x870] sm:$0xff] }
 0x545   : > { %v4887_v41 = vsel %vm2695_vm4, %v4885_v47, %v4886_v23  ;;  %v4890_v24 = vsel %vm2695_vm4, %v4888_v27, %v4889_v8  ;;  %4905 = vst [vmem:[#allocation2 + $0x228] sm:$0xfc] %v4884_v37  ;;  %v5292_v28 = vsel %vm2695_vm4, %v5281_v33, %v5291_v5  ;;  %v6242_v16 = vrot.slane %v13466_v32, 4  ;;  %v4991_v33 = vld [vmem:[%s17226_s3 + $0x60] sm:$0xff]  ;;  %7141 = vmatpush.msrb.mxu0 %v9810_v54  ;;  %v9808_v61 = vld [vmem:[%s17226_s3 + $0x868] sm:$0xff]  ;;  %v9685_v53 = vld [vmem:[%s17226_s3 + $0x490] sm:$0xff] }
 0x546   : > { %v4893_v52 = vsel %vm2695_vm4, %v4891_v1, %v4892_v25  ;;  %4906 = vst [vmem:[#allocation2 + $0x168] sm:$0xfc] %v4887_v41  ;;  %v6251_v36 = vsel %vm1864_vm3, %v6240_v50, %v6250_v58  ;;  %5693 = vmatpush.msra.mxu3 %v4991_v33  ;;  %v5309_v19 = vrot.slane %v13978_v40, 2  ;;  %5643 = vmatpush.msrb.mxu2 %v9689_v17  ;;  %v9687_v63 = vld [vmem:[%s17226_s3 + $0x4a0] sm:$0xff]  ;;  %v14048_v56 = vld [vmem:[#allocation2 + $0x1c8] sm:$0xff]  ;;  %v9826_v41 = vld [vmem:[%s17226_s3 + $0x8f8] sm:$0xff] }
 0x547   : > { %4907 = vst [vmem:[#allocation2 + $0x288] sm:$0xfc] %v4890_v24  ;;  %5559 = vmatmul.f32.gmra.mxu2 %v5300_v20  ;;  %5612 = vmatmul.f32.gmra.mxu3 %v5292_v28  ;;  %v13980_v30 = vpop.f32.mrf.mxu0  ;;  %v6243_v50 = vsel %vm1864_vm3, %v6232_v22, %v6242_v16  ;;  %v10186_v60 = vld [vmem:[#allocation2 + $0x1e0] sm:$0xff]  ;;  %v4988_v22 = vld [vmem:[%s17226_s3 + $0x48] sm:$0xff]  ;;  %v14043_v1 = vpop.f32.mrf.mxu1  ;;  %v9825_v28 = vld [vmem:[%s17226_s3 + $0x8f0] sm:$0xff]  ;;  %v5319_v17 = vrot.slane %v14048_v56, 2 }
 0x548   : > { %4908 = vst [vmem:[#allocation2 + $0x8] sm:$0xfc] %v4893_v52  ;;  %7142 = vmatpush.msrb.mxu0 %v9809_v6  ;;  %5694 = vmatpush.msra.mxu3 %v4990_v26  ;;  %v5301_v42 = vrot.slane %v10186_v60, 2  ;;  %v14028_v47 = vld [vmem:[#allocation2 + $0x1e0] sm:$0xff]  ;;  %v5310_v27 = vsel %vm2695_vm4, %v5299_v43, %v5309_v19  ;;  %v9686_v43 = vld [vmem:[%s17226_s3 + $0x498] sm:$0xff]  ;;  %v9805_v26 = vld [vmem:[%s17226_s3 + $0x850] sm:$0xff] }
 0x549   : > { %4911 = vst [vmem:[#allocation2 + $0x140] sm:$0xf] %v4886_v23  ;;  %5644 = vmatpush.msrb.mxu2 %v9688_v18  ;;  %v6260_v23 = vrot.slane %v13978_v40, 4  ;;  %v9806_v52 = vld [vmem:[%s17226_s3 + $0x858] sm:$0xff]  ;;  %v4987_v20 = vld [vmem:[%s17226_s3 + $0x40] sm:$0xff]  ;;  %7197 = vmatpush.msrb.mxu1 %v9826_v41  ;;  %v9824_v18 = vld [vmem:[%s17226_s3 + $0x8e8] sm:$0xff] }
 0x54a   : > { %4912 = vst [vmem:[#allocation2 + $0x148] sm:$0xf] %v4889_v8  ;;  %6517 = vmatmul.f32.gmra.mxu0 %v6251_v36  ;;  %5695 = vmatpush.msra.mxu3 %v4989_v7  ;;  %v5302_v8 = vsel %vm2695_vm4, %v5291_v5, %v5301_v42  ;;  %v14058_v24 = vpop.f32.mrf.mxu2  ;;  %v10187_v33 = vld [vmem:[#allocation2 + $0x158] sm:$0xff]  ;;  %v9804_v32 = vld [vmem:[%s17226_s3 + $0x848] sm:$0xff] }
 0x54b   : > { %4913 = vst [vmem:[#allocation2 + $0x178] sm:$0xf] %v4892_v25  ;;  %7143 = vmatpush.msrb.mxu0 %v9808_v61  ;;  %5645 = vmatpush.msrb.mxu2 %v9687_v63  ;;  %v6252_v25 = vrot.slane %v14028_v47, 4  ;;  %v6261_v54 = vsel %vm1864_vm3, %v6250_v58, %v6260_v23  ;;  %v5311_v6 = vrot.slane %v10187_v33, 2  ;;  %v4986_v58 = vld [vmem:[%s17226_s3 + $0x38] sm:$0xff]  ;;  %v9684_v61 = vld [vmem:[%s17226_s3 + $0x488] sm:$0xff]  ;;  %v5320_v63 = vsel %vm2695_vm4, %v5309_v19, %v5319_v17 }
 0x54c   : > { %6570 = vmatmul.f32.gmra.mxu1 %v6243_v50  ;;  %v14056_v5 = vpop.f32.mrf.mxu3  ;;  %5696 = vmatpush.msra.mxu3 %v4988_v22  ;;  %v14095_v7 = vld [vmem:[#allocation2 + $0x158] sm:$0xff]  ;;  %v6270_v50 = vrot.slane %v14048_v56, 4  ;;  %v9683_v22 = vld [vmem:[%s17226_s3 + $0x480] sm:$0xff]  ;;  %v4984_v19 = vld [vmem:[%s17226_s3 + $0x28] sm:$0xff]  ;;  %v5329_v33 = vrot.slane %v13709_v49, 2 }
 0x54d   : > { %7144 = vmatpush.msrb.mxu0 %v9807_v34  ;;  %5646 = vmatpush.msrb.mxu2 %v9686_v43  ;;  %v6253_v36 = vsel %vm1864_vm3, %v6242_v16, %v6252_v25  ;;  %v4985_v16 = vld [vmem:[%s17226_s3 + $0x30] sm:$0xff]  ;;  %v5312_v60 = vsel %vm2695_vm4, %v5301_v42, %v5311_v6  ;;  %v9823_v34 = vld [vmem:[%s17226_s3 + $0x8e0] sm:$0xff]  ;;  %v9820_v47 = vld [vmem:[%s17226_s3 + $0x8c8] sm:$0xff] }
 0x54e   : > { %5697 = vmatpush.msra.mxu3 %v4987_v20  ;;  %7198 = vmatpush.msrb.mxu1 %v9825_v28  ;;  %v9803_v43 = vld [vmem:[%s17226_s3 + $0x840] sm:$0xff]  ;;  %v6271_v28 = vsel %vm1864_vm3, %v6260_v23, %v6270_v50  ;;  %v9821_v23 = vld [vmem:[%s17226_s3 + $0x8d0] sm:$0xff] }
 0x54f   : > { %5562 = vmatmul.f32.gmra.mxu2 %v5310_v27  ;;  %5615 = vmatmul.f32.gmra.mxu3 %v5302_v8  ;;  %v14045_v37 = vpop.f32.mrf.mxu0  ;;  %v6262_v8 = vrot.slane %v14095_v7, 4  ;;  %v14128_v20 = vpop.f32.mrf.mxu1 }
 0x550   : > { %7145 = vmatpush.msrb.mxu0 %v9806_v52  ;;  %5647 = vmatpush.msrb.mxu2 %v9685_v53  ;;  %v9822_v52 = vld [vmem:[%s17226_s3 + $0x8d8] sm:$0xff]  ;;  %v5321_v53 = vrot.slane %v13655_v14, 2 }
 0x551   : > { %5698 = vmatpush.msra.mxu3 %v4986_v58  ;;  %7199 = vmatpush.msrb.mxu1 %v9824_v18  ;;  %v6263_v58 = vsel %vm1864_vm3, %v6252_v25, %v6262_v8  ;;  %v6280_v18 = vrot.slane %v13709_v49, 4  ;;  %v5330_v25 = vsel %vm2695_vm4, %v5319_v17, %v5329_v33  ;;  %v9819_v17 = vld [vmem:[%s17226_s3 + $0x8c0] sm:$0xff] }
 0x552   : > { %6520 = vmatmul.f32.gmra.mxu0 %v6261_v54  ;;  %5648 = vmatpush.msrb.mxu2 %v9684_v61  ;;  %v14120_v41 = vpop.f32.mrf.mxu2  ;;  %v4983_v54 = vld [vmem:[%s17226_s3 + $0x20] sm:$0xff]  ;;  %v9801_v61 = vld [vmem:[%s17226_s3 + $0x830] sm:$0xff]  ;;  %v5322_v7 = vsel %vm2695_vm4, %v5311_v6, %v5321_v53  ;;  %v9800_v6 = vld [vmem:[%s17226_s3 + $0x828] sm:$0xff] }
 0x553   : > { %7146 = vmatpush.msrb.mxu0 %v9805_v26  ;;  %5699 = vmatpush.msra.mxu3 %v4985_v16  ;;  %v9802_v26 = vld [vmem:[%s17226_s3 + $0x838] sm:$0xff] }
 0x554   : > { %6573 = vmatmul.f32.gmra.mxu1 %v6253_v36  ;;  %v14118_v42 = vpop.f32.mrf.mxu3  ;;  %5649 = vmatpush.msrb.mxu2 %v9683_v22  ;;  %v4982_v36 = vld [vmem:[%s17226_s3 + $0x18] sm:$0xff] }
 0x555   : > { %7147 = vmatpush.msrb.mxu0 %v9804_v32  ;;  %7200 = vmatpush.msrb.mxu1 %v9823_v34  ;;  %v4981_v32 = vld [vmem:[%s17226_s3 + $0x10] sm:$0xff]  ;;  %v14165_v34 = vld [vmem:[#allocation2 + $0xb8] sm:$0xff] }
 0x556   : > { %5700 = vmatpush.msra.mxu3 %v4984_v19  ;;  %v4980_v19 = vld [vmem:[%s17226_s3 + $0x8] sm:$0xff] }
 0x557   : > { %5565 = vmatmul.f32.gmra.mxu2 %v5320_v63  ;;  %5618 = vmatmul.f32.gmra.mxu3 %v5312_v60  ;;  %v14112_v27 = vpop.f32.mrf.mxu0  ;;  %v6272_v63 = vrot.slane %v13655_v14, 4  ;;  %v5071_v60 = vld [vmem:[#allocation2 + $0x190] sm:$0x3f]  ;;  %v6281_v14 = vsel %vm1864_vm3, %v6270_v50, %v6280_v18 }
 0x558   : > { %17557 = vst [vmem:[#allocation9_spill] sm:$0xff] %v14112_v27  ;;  %7148 = vmatpush.msrb.mxu0 %v9803_v43  ;;  %7201 = vmatpush.msrb.mxu1 %v9822_v52  ;;  %v5339_v52 = vrot.slane %v5071_v60, 2  ;;  %v9816_v60 = vld [vmem:[%s17226_s3 + $0x8a8] sm:$0xff]  ;;  %v14301_v27 = vld [vmem:[#allocation2 + $0x20] sm:$0xff] }
 0x559   : > { %5701 = vmatpush.msra.mxu3 %v4983_v54  ;;  %v9799_v54 = vld [vmem:[%s17226_s3 + $0x820] sm:$0xff]  ;;  %v6273_v50 = vsel %vm1864_vm3, %v6262_v8, %v6272_v63 }
 0x55a   : > { %6523 = vmatmul.f32.gmra.mxu0 %v6271_v28  ;;  %7202 = vmatpush.msrb.mxu1 %v9821_v23  ;;  %v14179_v43 = vpop.f32.mrf.mxu2  ;;  %v5331_v28 = vrot.slane %v14165_v34, 2  ;;  %v14188_v23 = vpop.f32.mrf.mxu1  ;;  %v5340_v8 = vsel %vm2695_vm4, %v5329_v33, %v5339_v52 }
 0x55b   : > { %7149 = vmatpush.msrb.mxu0 %v9802_v26  ;;  %5702 = vmatpush.msra.mxu3 %v4982_v36  ;;  %v9818_v26 = vld [vmem:[%s17226_s3 + $0x8b8] sm:$0xff]  ;;  %v6290_v36 = vrot.slane %v13725_v4, 4  ;;  %v6282_v4 = vrot.slane %v14165_v34, 4  ;;  %v9796_v34 = vld [vmem:[%s17226_s3 + $0x808] sm:$0xff] }
 0x55c   : > { %6576 = vmatmul.f32.gmra.mxu1 %v6263_v58  ;;  %v14170_v22 = vpop.f32.mrf.mxu3  ;;  %v4979_v58 = vld [vmem:[%s17226_s3] sm:$0xff] }
 0x55d   : > { %7150 = vmatpush.msrb.mxu0 %v9801_v61  ;;  %7203 = vmatpush.msrb.mxu1 %v9820_v47  ;;  %v9798_v61 = vld [vmem:[%s17226_s3 + $0x818] sm:$0xff]  ;;  %v9817_v47 = vld [vmem:[%s17226_s3 + $0x8b0] sm:$0xff] }
 0x55e   : > { %5703 = vmatpush.msra.mxu3 %v4981_v32  ;;  %v5072_v32 = vld [vmem:[#allocation2 + $0x290] sm:$0x3f] }
 0x55f   : > { %5568 = vmatmul.f32.gmra.mxu2 %v5330_v25  ;;  %5621 = vmatmul.f32.gmra.mxu3 %v5322_v7  ;;  %v14162_v16 = vpop.f32.mrf.mxu0  ;;  %v5332_v25 = vsel %vm2695_vm4, %v5321_v53, %v5331_v28  ;;  %v6291_v53 = vsel %vm1864_vm3, %v6280_v18, %v6290_v36  ;;  %v6028_v18 = vld [vmem:[#allocation2 + $0x290] sm:$0xff] }
 0x560   : > { %17558 = vst [vmem:[#allocation7_spill] sm:$0xff] %v14162_v16  ;;  %7204 = vmatpush.msrb.mxu1 %v9819_v17  ;;  %7151 = vmatpush.msrb.mxu0 %v9800_v6  ;;  %v9797_v17 = vld [vmem:[%s17226_s3 + $0x810] sm:$0xff] }
 0x561   : > { %5704 = vmatpush.msra.mxu3 %v4980_v19  ;;  %v5341_v19 = vrot.slane %v5072_v32, 2 }
 0x562   : > { %6526 = vmatmul.f32.gmra.mxu0 %v6281_v14  ;;  %7205 = vmatpush.msrb.mxu1 %v9818_v26  ;;  %v14215_v6 = vpop.f32.mrf.mxu2  ;;  %v9815_v14 = vld [vmem:[%s17226_s3 + $0x8a0] sm:$0xff]  ;;  %v14224_v26 = vpop.f32.mrf.mxu1 }
 0x563   : > { %7152 = vmatpush.msrb.mxu0 %v9799_v54  ;;  %5705 = vmatpush.msra.mxu3 %v4979_v58  ;;  %v6283_v54 = vsel %vm1864_vm3, %v6272_v63, %v6282_v4  ;;  %v9795_v58 = vld [vmem:[%s17226_s3 + $0x800] sm:$0xff]  ;;  %v6292_v63 = vrot.slane %v6028_v18, 4  ;;  %v6033_v18 = vld [vmem:[#allocation2 + $0x130] sm:$0xff] }
 0x564   : > { %6579 = vmatmul.f32.gmra.mxu1 %v6273_v50  ;;  %v14213_v33 = vpop.f32.mrf.mxu3  ;;  %v6300_v50 = vrot.slane %v13751_v10, 4 }
 0x565   : > { %7153 = vmatpush.msrb.mxu0 %v9798_v61  ;;  %7206 = vmatpush.msrb.mxu1 %v9817_v47  ;;  %v9814_v61 = vld [vmem:[%s17226_s3 + $0x898] sm:$0xff]  ;;  %v5342_v47 = vsel %vm2695_vm4, %v5331_v28, %v5341_v19  ;;  %v6293_v28 = vsel %vm1864_vm3, %v6282_v4, %v6292_v63 }
 0x566   : > { %v6301_v32 = vsel %vm1864_vm3, %v6290_v36, %v6300_v50  ;;  %v9811_v36 = vld [vmem:[%s17226_s3 + $0x880] sm:$0xff] }
 0x567   : > { %5571 = vmatmul.f32.gmra.mxu2 %v5340_v8  ;;  %5624 = vmatmul.f32.gmra.mxu3 %v5332_v25  ;;  %v14203_v7 = vpop.f32.mrf.mxu0  ;;  %v9813_v8 = vld [vmem:[%s17226_s3 + $0x890] sm:$0xff] }
 0x568   : > { %17559 = vst [vmem:[#allocation11_spill] sm:$0xff] %v14203_v7  ;;  %7207 = vmatpush.msrb.mxu1 %v9816_v60  ;;  %7154 = vmatpush.msrb.mxu0 %v9797_v17  ;;  %v5063_v60 = vld [vmem:[#allocation2 + $0xe0] sm:$0xfc] }
 0x569   : > { %v10188_v17 = vld [vmem:[#allocation2 + $0x120] sm:$0xff] }
 0x56a   : > { %6529 = vmatmul.f32.gmra.mxu0 %v6291_v53  ;;  %7208 = vmatpush.msrb.mxu1 %v9815_v14  ;;  %v5233_v53 = vrot.slane %v10188_v17, 2  ;;  %v14242_v14 = vpop.f32.mrf.mxu2 }
 0x56b   : > { %7155 = vmatpush.msrb.mxu0 %v9796_v34 }
 0x56c   : > { %6582 = vmatmul.f32.gmra.mxu1 %v6283_v54  ;;  %v14240_v34 = vpop.f32.mrf.mxu3  ;;  %v5232_v54 = vrot.slane %v5063_v60, 2  ;;  %v6665_v60 = vld [vmem:[#allocation2 + $0x240] sm:$0xc0] }
 0x56d   : > { %7156 = vmatpush.msrb.mxu0 %v9795_v58  ;;  %7209 = vmatpush.msrb.mxu1 %v9814_v61  ;;  %v14252_v61 = vpop.f32.mrf.mxu1 }
 0x56e   : > { %v5234_v58 = vsel %vm2695_vm4, %v5232_v54, %v5233_v53  ;;  %17561 = vst [vmem:[#allocation13_spill] sm:$0xff] %v14252_v61  ;;  %v6888_v54 = vrot.slane %v6665_v60, 6 }
 0x56f   : > { %5574 = vmatmul.f32.gmra.mxu2 %v5339_v52  ;;  %5627 = vmatmul.f32.gmra.mxu3 %v5342_v47  ;;  %v14237_v25 = vpop.f32.mrf.mxu0  ;;  %v9812_v52 = vld [vmem:[%s17226_s3 + $0x888] sm:$0xff]  ;;  %v6302_v47 = vrot.slane %v6033_v18, 4 }
 0x570   : > { %17560 = vst [vmem:[#allocation8_spill] sm:$0xff] %v14237_v25  ;;  %7210 = vmatpush.msrb.mxu1 %v9813_v8  ;;  %v10189_v8 = vld [vmem:[#allocation2 + $0x220] sm:$0xff] }
 0x571   : > { %v6303_v39 = vsel %vm1864_vm3, %v6292_v63, %v6302_v47 }
 0x572   : > { %6532 = vmatmul.f32.gmra.mxu0 %v6301_v32  ;;  %7211 = vmatpush.msrb.mxu1 %v9812_v52  ;;  %v5243_v32 = vrot.slane %v10189_v8, 2  ;;  %v6670_v52 = vld [vmem:[#allocation2 + $0x28] sm:$0xff]  ;;  %v10190_v8 = vld [vmem:[#allocation2 + $0x250] sm:$0xff] }
 0x573   : > { %v6889_v62 = vrot.slane %v6670_v52, 6 }
 0x574   : > { %6585 = vmatmul.f32.gmra.mxu1 %v6293_v28  ;;  %v14254_v17 = vpop.f32.mrf.mxu3 }
 0x575   : > { %7212 = vmatpush.msrb.mxu1 %v9811_v36  ;;  %v14260_v18 = vpop.f32.mrf.mxu1  ;;  %v6890_v36 = vsel %vm552_vm2, %v6888_v54, %v6889_v62 }
 0x576   : > { %17563 = vst [vmem:[#allocation12_spill] sm:$0xff] %v14260_v18 }
 0x577   : > { %5650 = vmatmul.f32.vlgmr.msrb.gmra.mxu2 %v5234_v58  ;;  %5630 = vmatmul.f32.gmra.mxu3 %v5341_v19  ;;  %v14256_v28 = vpop.f32.mrf.mxu0  ;;  %v5244_v58 = vsel %vm2695_vm4, %v5233_v53, %v5243_v32  ;;  %v4914_v19 = vld [vmem:[#allocation2 + $0x2b0] sm:$0xff] }
 0x578   : > { %17562 = vst [vmem:[#allocation10_spill] sm:$0xff] %v14256_v28  ;;  %v14263_v28 = vld [vmem:[#allocation2 + $0x40] sm:$0xff] }
 0x579   : > { %v6902_v53 = vrot.slane %v14263_v28, 6 }
 0x57a   : > { %v5457_v4 = vpop.f32.mrf.mxu2  ;;  %6535 = vmatmul.f32.gmra.mxu0 %v6300_v50  ;;  %v5253_v50 = vrot.slane %v10190_v8, 2  ;;  %v10191_v8 = vld [vmem:[#allocation2 + $0x280] sm:$0xff] }
 0x57b   : > { %v5263_v18 = vrot.slane %v10191_v8, 2  ;;  %v10193_v8 = vld [vmem:[#allocation2 + $0x200] sm:$0xff] }
 0x57c   : > { %6588 = vmatmul.f32.gmra.mxu1 %v6303_v39  ;;  %v6666_v39 = vld [vmem:[#allocation2 + $0x18] sm:$0xc0]  ;;  %v5254_v52 = vsel %vm2695_vm4, %v5243_v32, %v5253_v50 }
 0x57d   : > { %v6891_v54 = vrot.slane %v6666_v39, 6 }
 0x57f   : > { %5653 = vmatmul.f32.gmra.mxu2 %v5244_v58  ;;  %5706 = vmatmul.f32.vlgmr.msra.gmra.mxu3 %v4914_v19  ;;  %v14267_v60 = vpop.f32.mrf.mxu0  ;;  %v4919_v58 = vld [vmem:[#allocation2 + $0xf0] sm:$0xff]  ;;  %v6892_v19 = vrot.slane %v13729_v59, 6  ;;  %v5264_v59 = vsel %vm2695_vm4, %v5253_v50, %v5263_v18 }
 0x580   : > { %17564 = vst [vmem:[#allocation14_spill] sm:$0xff] %v14267_v60  ;;  %v14275_v60 = vpop.f32.mrf.mxu1 }
 0x581   : > { %17565 = vst [vmem:[#allocation40_spill] sm:$0xff] %v14275_v60  ;;  %v6893_v32 = vsel %vm552_vm2, %v6891_v54, %v6892_v19  ;;  %v5273_v60 = vrot.slane %v10193_v8, 2  ;;  %v14286_v54 = vld [vmem:[#allocation2 + $0x188] sm:$0xff] }
 0x582   : > { %v5460_v25 = vpop.f32.mrf.mxu2  ;;  %v5513_v7 = vpop.f32.mrf.mxu3  ;;  %7157 = vmatmul.f32.vlgmr.msrb.gmra.mxu0 %v6890_v36  ;;  %v6903_v36 = vsel %vm552_vm2, %v6889_v62, %v6902_v53  ;;  %v10192_v62 = vld [vmem:[#allocation2] sm:$0xff] }
 0x583   : > { %v14265_v63 = vadd.f32 %v5513_v7, %v5457_v4 }
 0x584   : > { %6591 = vmatmul.f32.gmra.mxu1 %v6302_v47  ;;  %v14273_v47 = vld [vmem:[#allocation2 + $0x1b0] sm:$0xff] }
 0x585   : > { %v6912_v39 = vrot.slane %v14273_v47, 6 }
 0x587   : > { %5656 = vmatmul.f32.gmra.mxu2 %v5254_v52  ;;  %5709 = vmatmul.f32.gmra.mxu3 %v4919_v58  ;;  %v14282_v52 = vpop.f32.mrf.mxu0  ;;  %v6904_v58 = vrot.slane %v13777_v44, 6  ;;  %v5274_v44 = vsel %vm2695_vm4, %v5263_v18, %v5273_v60 }
 0x588   : > { %17566 = vst [vmem:[#allocation41_spill] sm:$0xff] %v14282_v52  ;;  %v14291_v52 = vpop.f32.mrf.mxu1 }
 0x589   : > { %v6905_v50 = vsel %vm552_vm2, %v6892_v19, %v6904_v58  ;;  %17567 = vst [vmem:[#allocation45_spill] sm:$0xff] %v14291_v52 }
 0x58a   : > { %v5463_v7 = vpop.f32.mrf.mxu2  ;;  %v5516_v4 = vpop.f32.mrf.mxu3  ;;  %7160 = vmatmul.f32.gmra.mxu0 %v6903_v36  ;;  %v6913_v36 = vsel %vm552_vm2, %v6902_v53, %v6912_v39  ;;  %v5484_v53 = vadd.f32 %v13840_v31, %v13812_v9  ;;  %v5026_v31 = vld [vmem:[%s17226_s3 + $0x178] sm:$0xff] }
 0x58b   : > { %v14277_v16 = vadd.f32 %v5516_v4, %v5460_v25  ;;  %5802 = vmatpush.msrb.mxu3 %v5026_v31  ;;  %v14320_v31 = vld [vmem:[#allocation2 + $0x1d8] sm:$0xff] }
 0x58c   : > { %7213 = vmatmul.f32.vlgmr.msrb.gmra.mxu1 %v6893_v32 }
 0x58f   : > { %5659 = vmatmul.f32.gmra.mxu2 %v5264_v59  ;;  %5712 = vmatmul.f32.gmra.mxu3 %v10192_v62  ;;  %v6922_v59 = vrot.slane %v14286_v54, 6  ;;  %v10194_v62 = vld [vmem:[#allocation2 + $0x2a8] sm:$0xff] }
 0x591   : > { %v6923_v19 = vsel %vm552_vm2, %v6912_v39, %v6922_v59  ;;  %v6932_v39 = vrot.slane %v14301_v27, 6 }
 0x592   : > { %v5539_v25 = vpop.f32.mrf.mxu2  ;;  %v5519_v4 = vpop.f32.mrf.mxu3  ;;  %7163 = vmatmul.f32.gmra.mxu0 %v6913_v36  ;;  %v6914_v36 = vrot.slane %v13818_v13, 6  ;;  %v5010_v13 = vld [vmem:[%s17226_s3 + $0xf8] sm:$0xff] }
 0x593   : > { %v14288_v32 = vadd.f32 %v5519_v4, %v5463_v7  ;;  %v5540_v8 = vadd.f32 %v5539_v25, %v5484_v53  ;;  %v14298_v7 = vpop.f32.mrf.mxu0  ;;  %v10195_v4 = vld [vmem:[#allocation2 + $0x1c0] sm:$0xff]  ;;  %5746 = vmatpush.msra.mxu2 %v5010_v13  ;;  %v6924_v53 = vrot.slane %v13854_v35, 6  ;;  %v5009_v35 = vld [vmem:[%s17226_s3 + $0xf0] sm:$0xff] }
 0x594   : > { %7216 = vmatmul.f32.gmra.mxu1 %v6905_v50  ;;  %17568 = vst [vmem:[#allocation15_spill] sm:$0xff] %v14298_v7  ;;  %v5283_v50 = vrot.slane %v10195_v4, 2  ;;  %v6915_v9 = vsel %vm552_vm2, %v6904_v58, %v6914_v36  ;;  %v10196_v58 = vld [vmem:[#allocation2 + $0xa0] sm:$0xff]  ;;  %v17572_v7 = vrot.slane %v13918_v57, 6 }
 0x595   : > { %5747 = vmatpush.msra.mxu2 %v5009_v35 }
 0x596   : > { %v5284_v25 = vsel %vm2695_vm4, %v5273_v60, %v5283_v50 }
 0x597   : > { %5662 = vmatmul.f32.gmra.mxu2 %v5274_v44  ;;  %5715 = vmatmul.f32.gmra.mxu3 %v10194_v62  ;;  %v14316_v44 = vpop.f32.mrf.mxu1 }
 0x598   : > { %17569 = vst [vmem:[#allocation43_spill] sm:$0xff] %v14316_v44 }
 0x59a   : > { %v5542_v52 = vpop.f32.mrf.mxu2  ;;  %v5595_v61 = vpop.f32.mrf.mxu3  ;;  %7166 = vmatmul.f32.gmra.mxu0 %v6923_v19  ;;  %v10197_v19 = vld [vmem:[#allocation2 + $0x58] sm:$0xff] }
 0x59b   : > { %v14303_v18 = vadd.f32 %v5595_v61, %v5540_v8  ;;  %v5487_v61 = vadd.f32 %v13876_v11, %v13842_v48  ;;  %v6933_v8 = vsel %vm552_vm2, %v6922_v59, %v6932_v39  ;;  %v5293_v4 = vrot.slane %v10197_v19, 2  ;;  %v14322_v60 = vpop.f32.mrf.mxu0  ;;  %v5025_v59 = vld [vmem:[%s17226_s3 + $0x170] sm:$0xff]  ;;  %v5006_v19 = vld [vmem:[%s17226_s3 + $0xd8] sm:$0xff] }
 0x59c   : > { %7219 = vmatmul.f32.gmra.mxu1 %v6915_v9  ;;  %v6925_v11 = vsel %vm552_vm2, %v6914_v36, %v6924_v53  ;;  %5803 = vmatpush.msrb.mxu3 %v5025_v59  ;;  %v5007_v36 = vld [vmem:[%s17226_s3 + $0xe0] sm:$0xff] }
 0x59d   : > { %v5543_v62 = vadd.f32 %v5542_v52, %v5487_v61  ;;  %v5008_v52 = vld [vmem:[%s17226_s3 + $0xe8] sm:$0xff]  ;;  %v5294_v61 = vsel %vm2695_vm4, %v5283_v50, %v5293_v4  ;;  %v14350_v59 = vld [vmem:[#allocation2 + $0x2a0] sm:$0xff] }
 0x59e   : > { %5748 = vmatpush.msra.mxu2 %v5008_v52 }
 0x59f   : > { %5665 = vmatmul.f32.gmra.mxu2 %v5284_v25  ;;  %5718 = vmatmul.f32.gmra.mxu3 %v10196_v58  ;;  %v6942_v25 = vrot.slane %v14320_v31, 6  ;;  %v5490_v58 = vadd.f32 %v13929_v46, %v13893_v38  ;;  %v5005_v46 = vld [vmem:[%s17226_s3 + $0xd0] sm:$0xff] }
 0x5a0   : > { %5749 = vmatpush.msra.mxu2 %v5007_v36  ;;  %v10199_v36 = vld [vmem:[#allocation2 + $0x238] sm:$0xff] }
 0x5a1   : > { %v6943_v35 = vsel %vm552_vm2, %v6932_v39, %v6942_v25  ;;  %v5004_v39 = vld [vmem:[%s17226_s3 + $0xc8] sm:$0xff] }
 0x5a2   : > { %v5545_v9 = vpop.f32.mrf.mxu2  ;;  %v5598_v13 = vpop.f32.mrf.mxu3  ;;  %7169 = vmatmul.f32.gmra.mxu0 %v6933_v8  ;;  %v6934_v8 = vrot.slane %v13881_v55, 6  ;;  %5750 = vmatpush.msra.mxu2 %v5006_v19 }
 0x5a3   : > { %v14324_v48 = vadd.f32 %v5598_v13, %v5543_v62  ;;  %v10198_v62 = vld [vmem:[#allocation2 + $0x230] sm:$0xff]  ;;  %v14347_v13 = vpop.f32.mrf.mxu1 }
 0x5a4   : > { %7222 = vmatmul.f32.gmra.mxu1 %v6925_v11  ;;  %17570 = vst [vmem:[#allocation44_spill] sm:$0xff] %v14347_v13  ;;  %v5546_v11 = vadd.f32 %v5545_v9, %v5490_v58  ;;  %v6935_v55 = vsel %vm552_vm2, %v6924_v53, %v6934_v8  ;;  %v5024_v9 = vld [vmem:[%s17226_s3 + $0x168] sm:$0xff]  ;;  %5751 = vmatpush.msra.mxu2 %v5005_v46  ;;  %v14364_v58 = vpop.f32.mrf.mxu0  ;;  %v6952_v53 = vrot.slane %v14350_v59, 6  ;;  %v5002_v46 = vld [vmem:[%s17226_s3 + $0xb8] sm:$0xff] }
 0x5a5   : > { %5804 = vmatpush.msrb.mxu3 %v5024_v9 }
 0x5a6   : > { %5752 = vmatpush.msra.mxu2 %v5004_v39  ;;  %v6953_v9 = vsel %vm552_vm2, %v6942_v25, %v6952_v53  ;;  %v14387_v39 = vld [vmem:[#allocation2 + $0x88] sm:$0xff]  ;;  %v5001_v25 = vld [vmem:[%s17226_s3 + $0xb0] sm:$0xff] }
 0x5a7   : > { %5668 = vmatmul.f32.gmra.mxu2 %v5294_v61  ;;  %5721 = vmatmul.f32.gmra.mxu3 %v10198_v62  ;;  %v5303_v61 = vrot.slane %v10199_v36, 2  ;;  %v5003_v62 = vld [vmem:[%s17226_s3 + $0xc0] sm:$0xff]  ;;  %v17238_v36 = vrot.slane %v14387_v39, 2 }
 0x5a8   : > { %5753 = vmatpush.msra.mxu2 %v5003_v62 }
 0x5a9   : > { %v5304_v19 = vsel %vm2695_vm4, %v5293_v4, %v5303_v61  ;;  %v5023_v4 = vld [vmem:[%s17226_s3 + $0x160] sm:$0xff] }
 0x5aa   : > { %v5548_v50 = vpop.f32.mrf.mxu2  ;;  %v5601_v52 = vpop.f32.mrf.mxu3  ;;  %7172 = vmatmul.f32.gmra.mxu0 %v6943_v35  ;;  %v10200_v35 = vld [vmem:[#allocation2 + $0x1a0] sm:$0xff]  ;;  %5805 = vmatpush.msrb.mxu3 %v5023_v4  ;;  %v5000_v4 = vld [vmem:[%s17226_s3 + $0xa8] sm:$0xff] }
 0x5ab   : > { %v14352_v38 = vadd.f32 %v5601_v52, %v5546_v11  ;;  %v5493_v11 = vadd.f32 %v13992_v45, %v13931_v2  ;;  %v9873_v2 = vld [vmem:[%s17226_s3 + $0xa70] sm:$0xff]  ;;  %v14390_v52 = vld [vmem:[#allocation2 + $0x98] sm:$0xff]  ;;  %5754 = vmatpush.msra.mxu2 %v5002_v46  ;;  %v14392_v62 = vpop.f32.mrf.mxu1  ;;  %v9872_v46 = vld [vmem:[%s17226_s3 + $0xa68] sm:$0xff] }
 0x5ac   : > { %7225 = vmatmul.f32.gmra.mxu1 %v6935_v55  ;;  %v9874_v55 = vld [vmem:[%s17226_s3 + $0xa78] sm:$0xff]  ;;  %17571 = vst [vmem:[#allocation18_spill] sm:$0xff] %v14392_v62 }
 0x5ad   : > { %7524 = vmatpush.msra.mxu0 %v9874_v55  ;;  %v5549_v45 = vadd.f32 %v5548_v50, %v5493_v11  ;;  %v6945_v50 = vsel %vm552_vm2, %v6934_v8, %v17572_v7  ;;  %v5022_v11 = vld [vmem:[%s17226_s3 + $0x158] sm:$0xff]  ;;  %5755 = vmatpush.msra.mxu2 %v5001_v25  ;;  %v17239_v7 = vrot.slane %v14390_v52, 6  ;;  %v5021_v8 = vld [vmem:[%s17226_s3 + $0x150] sm:$0xff] }
 0x5ae   : > { %5806 = vmatpush.msrb.mxu3 %v5022_v11  ;;  %v10202_v25 = vld [vmem:[#allocation2 + $0x70] sm:$0xff]  ;;  %v14450_v62 = vld [vmem:[#allocation2 + $0x258] sm:$0xff] }
 0x5af   : > { %5671 = vmatmul.f32.gmra.mxu2 %v5304_v19  ;;  %5724 = vmatmul.f32.gmra.mxu3 %v10200_v35 }
 0x5b0   : > { %7525 = vmatpush.msra.mxu0 %v9873_v2  ;;  %v9871_v2 = vld [vmem:[%s17226_s3 + $0xa60] sm:$0xff]  ;;  %5756 = vmatpush.msra.mxu2 %v5000_v4 }
 0x5b1   : > { %5807 = vmatpush.msrb.mxu3 %v5021_v8  ;;  %v5019_v8 = vld [vmem:[%s17226_s3 + $0x140] sm:$0xff] }
 0x5b2   : > { %v5551_v19 = vpop.f32.mrf.mxu2  ;;  %v5604_v35 = vpop.f32.mrf.mxu3  ;;  %7175 = vmatmul.f32.gmra.mxu0 %v6953_v9  ;;  %v4999_v9 = vld [vmem:[%s17226_s3 + $0xa0] sm:$0xff] }
 0x5b3   : > { %v14394_v55 = vadd.f32 %v5604_v35, %v5549_v45  ;;  %7526 = vmatpush.msra.mxu0 %v9872_v46  ;;  %v5314_v45 = vsel %vm2695_vm4, %v5303_v61, %v17238_v36  ;;  %v5496_v35 = vadd.f32 %v14056_v5, %v13994_v15  ;;  %v5020_v46 = vld [vmem:[%s17226_s3 + $0x148] sm:$0xff]  ;;  %v9890_v61 = vld [vmem:[%s17226_s3 + $0xaf8] sm:$0xff]  ;;  %5757 = vmatpush.msra.mxu2 %v4999_v9 }
 0x5b4   : > { %7228 = vmatmul.f32.gmra.mxu1 %v6945_v50  ;;  %v14426_v50 = vpop.f32.mrf.mxu0  ;;  %v9870_v15 = vld [vmem:[%s17226_s3 + $0xa58] sm:$0xff]  ;;  %5808 = vmatpush.msrb.mxu3 %v5020_v46  ;;  %v4997_v46 = vld [vmem:[%s17226_s3 + $0x90] sm:$0xff] }
 0x5b5   : > { %7527 = vmatpush.msra.mxu0 %v9871_v2  ;;  %v4998_v5 = vld [vmem:[%s17226_s3 + $0x98] sm:$0xff]  ;;  %v5552_v4 = vadd.f32 %v5551_v19, %v5496_v35  ;;  %7580 = vmatpush.msra.mxu1 %v9890_v61  ;;  %v14447_v2 = vld [vmem:[#allocation2 + $0x270] sm:$0xff]  ;;  %v17573_v35 = vrot.slane %v13978_v40, 6  ;;  %v17574_v61 = vrot.slane %v13918_v57, 6  ;;  %v9868_v57 = vld [vmem:[%s17226_s3 + $0xa48] sm:$0xff] }
 0x5b6   : > { %v9889_v19 = vld [vmem:[%s17226_s3 + $0xaf0] sm:$0xff]  ;;  %5758 = vmatpush.msra.mxu2 %v4998_v5  ;;  %5809 = vmatpush.msrb.mxu3 %v5019_v8  ;;  %v17576_v5 = vrot.slane %v14387_v39, 2  ;;  %v4996_v8 = vld [vmem:[%s17226_s3 + $0x88] sm:$0xff]  ;;  %v6964_v39 = vrot.slane %v14048_v56, 6  ;;  %v17577_v56 = vrot.slane %v14390_v52, 6 }
 0x5b7   : > { %5674 = vmatmul.f32.gmra.mxu2 %v5314_v45  ;;  %5727 = vmatmul.f32.gmra.mxu3 %v10202_v25  ;;  %v6963_v45 = vsel %vm552_vm2, %v6952_v53, %v17239_v7  ;;  %v17240_v25 = vrot.slane %v14447_v2, 2  ;;  %v9869_v53 = vld [vmem:[%s17226_s3 + $0xa50] sm:$0xff]  ;;  %v6955_v7 = vsel %vm552_vm2, %v17574_v61, %v17573_v35  ;;  %v10204_v35 = vld [vmem:[#allocation2 + $0x278] sm:$0xff] }
 0x5b8   : > { %7528 = vmatpush.msra.mxu0 %v9870_v15  ;;  %7581 = vmatpush.msra.mxu1 %v9889_v19  ;;  %v9888_v15 = vld [vmem:[%s17226_s3 + $0xae8] sm:$0xff]  ;;  %v5499_v19 = vadd.f32 %v14118_v42, %v14058_v24  ;;  %v14494_v61 = vld [vmem:[#allocation2 + $0x118] sm:$0xff]  ;;  %v4995_v24 = vld [vmem:[%s17226_s3 + $0x80] sm:$0xff] }
 0x5b9   : > { %5759 = vmatpush.msra.mxu2 %v4997_v46  ;;  %v9887_v46 = vld [vmem:[%s17226_s3 + $0xae0] sm:$0xff] }
 0x5ba   : > { %v5554_v36 = vpop.f32.mrf.mxu2  ;;  %v5607_v11 = vpop.f32.mrf.mxu3  ;;  %7178 = vmatmul.f32.gmra.mxu0 %v6963_v45  ;;  %v5018_v45 = vld [vmem:[%s17226_s3 + $0x138] sm:$0xff]  ;;  %7582 = vmatpush.msra.mxu1 %v9888_v15 }
 0x5bb   : > { %v14458_v9 = vadd.f32 %v5607_v11, %v5552_v4  ;;  %v14471_v11 = vpop.f32.mrf.mxu1  ;;  %v6972_v4 = vrot.slane %v14450_v62, 6  ;;  %7529 = vmatpush.msra.mxu0 %v9869_v53  ;;  %5810 = vmatpush.msrb.mxu3 %v5018_v45  ;;  %v5017_v53 = vld [vmem:[%s17226_s3 + $0x130] sm:$0xff]  ;;  %v9867_v45 = vld [vmem:[%s17226_s3 + $0xa40] sm:$0xff] }
 0x5bc   : > { %7231 = vmatmul.f32.gmra.mxu1 %v6955_v7  ;;  %17575 = vst [vmem:[#allocation46_spill] sm:$0xff] %v14471_v11  ;;  %v5324_v7 = vsel %vm2695_vm4, %v17576_v5, %v17240_v25  ;;  %v14505_v42 = vpop.f32.mrf.mxu0  ;;  %v5555_v5 = vadd.f32 %v5554_v36, %v5499_v19  ;;  %5760 = vmatpush.msra.mxu2 %v4996_v8  ;;  %v5333_v25 = vrot.slane %v14494_v61, 2  ;;  %v14516_v11 = vld [vmem:[#allocation2 + $0x268] sm:$0xff]  ;;  %v9866_v36 = vld [vmem:[%s17226_s3 + $0xa38] sm:$0xff]  ;;  %v17578_v19 = vrot.slane %v13978_v40, 6  ;;  %v5015_v61 = vld [vmem:[%s17226_s3 + $0x120] sm:$0xff] }
 0x5bd   : > { %7530 = vmatpush.msra.mxu0 %v9868_v57  ;;  %5811 = vmatpush.msrb.mxu3 %v5017_v53  ;;  %v5016_v57 = vld [vmem:[%s17226_s3 + $0x128] sm:$0xff]  ;;  %v9886_v8 = vld [vmem:[%s17226_s3 + $0xad8] sm:$0xff]  ;;  %v9885_v40 = vld [vmem:[%s17226_s3 + $0xad0] sm:$0xff] }
 0x5be   : > { %7583 = vmatpush.msra.mxu1 %v9887_v46  ;;  %5761 = vmatpush.msra.mxu2 %v4995_v24  ;;  %v6982_v46 = vrot.slane %v14516_v11, 6 }
 0x5bf   : > { %5677 = vmatmul.f32.gmra.mxu2 %v5324_v7  ;;  %5730 = vmatmul.f32.gmra.mxu3 %v10204_v35  ;;  %v6973_v7 = vsel %vm552_vm2, %v17577_v56, %v6972_v4  ;;  %v6965_v56 = vsel %vm552_vm2, %v17578_v19, %v6964_v39  ;;  %v9864_v19 = vld [vmem:[%s17226_s3 + $0xa28] sm:$0xff] }
 0x5c0   : > { %7531 = vmatpush.msra.mxu0 %v9867_v45  ;;  %5812 = vmatpush.msrb.mxu3 %v5016_v57  ;;  %v17579_v45 = vrot.slane %v14447_v2, 2  ;;  %v5502_v57 = vadd.f32 %v14170_v22, %v14120_v41  ;;  %v9884_v2 = vld [vmem:[%s17226_s3 + $0xac8] sm:$0xff]  ;;  %v5013_v41 = vld [vmem:[%s17226_s3 + $0x110] sm:$0xff] }
 0x5c1   : > { %7584 = vmatpush.msra.mxu1 %v9886_v8  ;;  %v5073_v8 = vld [vmem:[#allocation2 + $0x108] sm:$0x3f] }
 0x5c2   : > { %v5557_v15 = vpop.f32.mrf.mxu2  ;;  %v5610_v35 = vpop.f32.mrf.mxu3  ;;  %7181 = vmatmul.f32.gmra.mxu0 %v6973_v7  ;;  %v5334_v24 = vsel %vm2695_vm4, %v17579_v45, %v5333_v25  ;;  %5813 = vmatpush.msrb.mxu3 %v5015_v61  ;;  %v5014_v7 = vld [vmem:[%s17226_s3 + $0x118] sm:$0xff] }
 0x5c3   : > { %v14524_v53 = vadd.f32 %v5610_v35, %v5555_v5  ;;  %7532 = vmatpush.msra.mxu0 %v9866_v36  ;;  %v9865_v5 = vld [vmem:[%s17226_s3 + $0xa30] sm:$0xff]  ;;  %v14547_v35 = vpop.f32.mrf.mxu1  ;;  %v10205_v36 = vld [vmem:[#allocation2 + $0x208] sm:$0xff]  ;;  %7585 = vmatpush.msra.mxu1 %v9885_v40  ;;  %v5558_v22 = vadd.f32 %v5557_v15, %v5502_v57  ;;  %v9863_v40 = vld [vmem:[%s17226_s3 + $0xa20] sm:$0xff] }
 0x5c4   : > { %7234 = vmatmul.f32.gmra.mxu1 %v6965_v56  ;;  %v6983_v56 = vsel %vm552_vm2, %v6972_v4, %v6982_v46  ;;  %5814 = vmatpush.msrb.mxu3 %v5014_v7  ;;  %v9883_v15 = vld [vmem:[%s17226_s3 + $0xac0] sm:$0xff]  ;;  %v14569_v57 = vpop.f32.mrf.mxu0  ;;  %v17580_v4 = vrot.slane %v13709_v49, 6  ;;  %v9882_v49 = vld [vmem:[%s17226_s3 + $0xab8] sm:$0xff] }
 0x5c5   : > { %7533 = vmatpush.msra.mxu0 %v9865_v5  ;;  %v14561_v5 = vld [vmem:[#allocation2 + $0x198] sm:$0xff]  ;;  %7586 = vmatpush.msra.mxu1 %v9884_v2 }
 0x5c6   : > { %v6975_v7 = vsel %vm552_vm2, %v6964_v39, %v17580_v4  ;;  %5815 = vmatpush.msrb.mxu3 %v5013_v41  ;;  %v6992_v2 = vrot.slane %v14561_v5, 6  ;;  %v5505_v41 = vadd.f32 %v14213_v33, %v14179_v43 }
 0x5c7   : > { %5680 = vmatmul.f32.gmra.mxu2 %v5334_v24  ;;  %5733 = vmatmul.f32.gmra.mxu3 %v10205_v36  ;;  %v5343_v24 = vrot.slane %v5073_v8, 2  ;;  %v5012_v8 = vld [vmem:[%s17226_s3 + $0x108] sm:$0xff] }
 0x5c8   : > { %7534 = vmatpush.msra.mxu0 %v9864_v19  ;;  %7587 = vmatpush.msra.mxu1 %v9883_v15  ;;  %v5011_v19 = vld [vmem:[%s17226_s3 + $0x100] sm:$0xff]  ;;  %v6993_v4 = vsel %vm552_vm2, %v6982_v46, %v6992_v2 }
 0x5c9   : > { %v5344_v39 = vsel %vm2695_vm4, %v5333_v25, %v5343_v24  ;;  %5816 = vmatpush.msrb.mxu3 %v5012_v8  ;;  %v9861_v25 = vld [vmem:[%s17226_s3 + $0xa10] sm:$0xff]  ;;  %v9860_v8 = vld [vmem:[%s17226_s3 + $0xa08] sm:$0xff] }
 0x5ca   : > { %v5560_v61 = vpop.f32.mrf.mxu2  ;;  %v5613_v45 = vpop.f32.mrf.mxu3  ;;  %7184 = vmatmul.f32.gmra.mxu0 %v6983_v56  ;;  %v10206_v56 = vld [vmem:[#allocation2 + $0x80] sm:$0xff]  ;;  %7588 = vmatpush.msra.mxu1 %v9882_v49 }
 0x5cb   : > { %v14571_v36 = vadd.f32 %v5613_v45, %v5558_v22  ;;  %7535 = vmatpush.msra.mxu0 %v9863_v40  ;;  %v9862_v22 = vld [vmem:[%s17226_s3 + $0xa18] sm:$0xff]  ;;  %v9881_v45 = vld [vmem:[%s17226_s3 + $0xab0] sm:$0xff]  ;;  %v14598_v40 = vpop.f32.mrf.mxu1  ;;  %v5561_v15 = vadd.f32 %v5560_v61, %v5505_v41  ;;  %5817 = vmatpush.msrb.mxu3 %v5011_v19  ;;  %v9879_v19 = vld [vmem:[%s17226_s3 + $0xaa0] sm:$0xff]  ;;  %v5508_v41 = vadd.f32 %v14240_v34, %v14215_v6 }
 0x5cc   : > { %7237 = vmatmul.f32.gmra.mxu1 %v6975_v7  ;;  %v14601_v7 = vld [vmem:[#allocation2 + $0x1b8] sm:$0xff]  ;;  %v14612_v46 = vpop.f32.mrf.mxu0  ;;  %v9877_v6 = vld [vmem:[%s17226_s3 + $0xa90] sm:$0xff] }
 0x5cd   : > { %7536 = vmatpush.msra.mxu0 %v9862_v22  ;;  %7589 = vmatpush.msra.mxu1 %v9881_v45  ;;  %v9880_v22 = vld [vmem:[%s17226_s3 + $0xaa8] sm:$0xff]  ;;  %v7002_v61 = vrot.slane %v14601_v7, 6 }
 0x5cf   : > { %5683 = vmatmul.f32.gmra.mxu2 %v5344_v39  ;;  %5736 = vmatmul.f32.gmra.mxu3 %v10206_v56  ;;  %v9859_v39 = vld [vmem:[%s17226_s3 + $0xa00] sm:$0xff]  ;;  %v10207_v56 = vld [vmem:[#allocation2 + $0x1d0] sm:$0xff] }
 0x5d0   : > { %7537 = vmatpush.msra.mxu0 %v9861_v25  ;;  %7590 = vmatpush.msra.mxu1 %v9880_v22  ;;  %v7003_v25 = vsel %vm552_vm2, %v6992_v2, %v7002_v61  ;;  %v9876_v2 = vld [vmem:[%s17226_s3 + $0xa88] sm:$0xff] }
 0x5d2   : > { %v5563_v43 = vpop.f32.mrf.mxu2  ;;  %v5616_v33 = vpop.f32.mrf.mxu3  ;;  %7187 = vmatmul.f32.gmra.mxu0 %v6993_v4  ;;  %7591 = vmatpush.msra.mxu1 %v9879_v19  ;;  %v5511_v19 = vadd.f32 %v14254_v17, %v14242_v14  ;;  %v17582_v17 = vrot.slane %v13751_v10, 6 }
 0x5d3   : > { %v14609_v49 = vadd.f32 %v5616_v33, %v5561_v15  ;;  %7538 = vmatpush.msra.mxu0 %v9860_v8  ;;  %v5564_v45 = vadd.f32 %v5563_v43, %v5508_v41  ;;  %v6730_v33 = vld [vmem:[#allocation2 + $0x228] sm:$0x3]  ;;  %v14630_v34 = vpop.f32.mrf.mxu1  ;;  %v4915_v43 = vld [vmem:[#allocation2 + $0xd0] sm:$0xff] }
 0x5d4   : > { %7240 = vmatmul.f32.gmra.mxu1 %v13742_v12  ;;  %v9878_v12 = vld [vmem:[%s17226_s3 + $0xa98] sm:$0xff]  ;;  %v6726_v8 = vld [vmem:[#allocation2 + $0xc8] sm:$0xff]  ;;  %v7012_v22 = vrot.slane %v6730_v33, 6  ;;  %v14640_v41 = vpop.f32.mrf.mxu0 }
 0x5d5   : > { %7539 = vmatpush.msra.mxu0 %v9859_v39  ;;  %7592 = vmatpush.msra.mxu1 %v9878_v12  ;;  %v4974_v39 = vld [vmem:[#allocation2 + $0xc0] sm:$0xf]  ;;  %17581 = vst [vmem:[#allocation47_spill] sm:$0xff] %v14640_v41 }
 0x5d7   : > { %5686 = vmatmul.f32.gmra.mxu2 %v5343_v24  ;;  %5739 = vmatmul.f32.gmra.mxu3 %v10207_v56  ;;  %v7004_v56 = vrot.slane %v6726_v8, 6  ;;  %v6731_v8 = vld [vmem:[#allocation2 + $0x168] sm:$0x3] }
 0x5d8   : > { %7593 = vmatpush.msra.mxu1 %v9877_v6 }
 0x5d9   : > { %v7005_v6 = vsel %vm552_vm2, %v17582_v17, %v7004_v56  ;;  %v14665_v17 = vld [vmem:[#allocation2 + $0x1a0] sm:$0xff] }
 0x5da   : > { %v5566_v15 = vpop.f32.mrf.mxu2  ;;  %v5619_v4 = vpop.f32.mrf.mxu3  ;;  %7190 = vmatmul.f32.gmra.mxu0 %v7003_v25  ;;  %7594 = vmatpush.msra.mxu1 %v9876_v2  ;;  %v4920_v2 = vld [vmem:[#allocation2 + $0xf8] sm:$0xff] }
 0x5db   : > { %v14632_v24 = vadd.f32 %v5619_v4, %v5564_v45  ;;  %v5567_v12 = vadd.f32 %v5566_v15, %v5511_v19  ;;  %v7013_v45 = vsel %vm552_vm2, %v7002_v61, %v7012_v22  ;;  %v4916_v15 = vld [vmem:[#allocation2 + $0x10] sm:$0xff]  ;;  %v7014_v61 = vrot.slane %v6731_v8, 6 }
 0x5dc   : > { %7243 = vmatmul.f32.gmra.mxu1 %v13762_v21  ;;  %v9875_v21 = vld [vmem:[%s17226_s3 + $0xa80] sm:$0xff]  ;;  %v14654_v22 = vpop.f32.mrf.mxu0 }
 0x5dd   : > { %7595 = vmatpush.msra.mxu1 %v9875_v21  ;;  %17583 = vst [vmem:[#allocation48_spill] sm:$0xff] %v14654_v22 }
 0x5df   : > { %5762 = vmatmul.f32.vlgmr.msra.gmra.mxu2 %v4915_v43  ;;  %5742 = vmatmul.f32.gmra.mxu3 %v4974_v39  ;;  %v14652_v43 = vpop.f32.mrf.mxu1  ;;  %v14656_v39 = vld [vmem:[#allocation2 + $0x230] sm:$0xff] }
 0x5e2   : > { %v5569_v25 = vpop.f32.mrf.mxu2  ;;  %v5622_v4 = vpop.f32.mrf.mxu3  ;;  %7193 = vmatmul.f32.gmra.mxu0 %v7013_v45  ;;  %v4921_v45 = vld [vmem:[#allocation2 + $0x78] sm:$0xff] }
 0x5e3   : > { %v5570_v33 = vadd.f32 %v5569_v25, %v14265_v63  ;;  %v14647_v14 = vadd.f32 %v5622_v4, %v5567_v12  ;;  %v7015_v12 = vsel %vm552_vm2, %v7004_v56, %v7014_v61  ;;  %v10208_v4 = vld [vmem:[#allocation2 + $0x298] sm:$0xff]  ;;  %v10209_v56 = vld [vmem:[#allocation2 + $0x240] sm:$0xff] }
 0x5e4   : > { %7246 = vmatmul.f32.gmra.mxu1 %v7005_v6 }
 0x5e7   : > { %5765 = vmatmul.f32.gmra.mxu2 %v4920_v2  ;;  %5818 = vmatmul.f32.vlgmr.msrb.gmra.mxu3 %v4916_v15  ;;  %v14663_v25 = vpop.f32.mrf.mxu1  ;;  %v14668_v2 = vpop.f32.mrf.mxu0  ;;  %v10210_v15 = vld [vmem:[#allocation2 + $0x160] sm:$0xff] }
 0x5e8   : > { %17584 = vst [vmem:[#allocation16_spill] sm:$0xff] %v14668_v2 }
 0x5ea   : > { %v5572_v63 = vpop.f32.mrf.mxu2  ;;  %v5625_v19 = vpop.f32.mrf.mxu3  ;;  %7540 = vmatmul.f32.vlgmr.msra.gmra.mxu0 %v14656_v39 }
 0x5eb   : > { %v5573_v10 = vadd.f32 %v5572_v63, %v14277_v16  ;;  %v14660_v21 = vadd.f32 %v5625_v19, %v5570_v33  ;;  %v14676_v63 = vld [vmem:[#allocation2 + $0x70] sm:$0xff] }
 0x5ec   : > { %7249 = vmatmul.f32.gmra.mxu1 %v7015_v12 }
 0x5ef   : > { %5768 = vmatmul.f32.gmra.mxu2 %v10208_v4  ;;  %5821 = vmatmul.f32.gmra.mxu3 %v4921_v45  ;;  %v14674_v61 = vpop.f32.mrf.mxu1 }
 0x5f0   : > { %17585 = vst [vmem:[#allocation20_spill] sm:$0xff] %v14674_v61 }
 0x5f2   : > { %v5575_v6 = vpop.f32.mrf.mxu2  ;;  %v5628_v8 = vpop.f32.mrf.mxu3  ;;  %7543 = vmatmul.f32.gmra.mxu0 %v14665_v17 }
 0x5f3   : > { %v5576_v16 = vadd.f32 %v5575_v6, %v14288_v32  ;;  %v14671_v33 = vadd.f32 %v5628_v8, %v5573_v10  ;;  %v14683_v32 = vpop.f32.mrf.mxu0  ;;  %v10212_v10 = vld [vmem:[#allocation2 + $0x18] sm:$0xff] }
 0x5f4   : > { %7596 = vmatmul.f32.vlgmr.msra.gmra.mxu1 %v14263_v28  ;;  %17586 = vst [vmem:[#allocation51_spill] sm:$0xff] %v14683_v32  ;;  %v10211_v28 = vld [vmem:[#allocation2 + $0x28] sm:$0xff]  ;;  %v14685_v6 = vld [vmem:[#allocation2 + $0x278] sm:$0xff] }
 0x5f7   : > { %5771 = vmatmul.f32.gmra.mxu2 %v10209_v56  ;;  %5824 = vmatmul.f32.gmra.mxu3 %v10210_v15  ;;  %v14688_v15 = vpop.f32.mrf.mxu1 }
 0x5f8   : > { %17587 = vst [vmem:[#allocation17_spill] sm:$0xff] %v14688_v15 }
 0x5fa   : > { %v5651_v19 = vpop.f32.mrf.mxu2  ;;  %v5631_v12 = vpop.f32.mrf.mxu3  ;;  %7546 = vmatmul.f32.gmra.mxu0 %v14676_v63 }
 0x5fb   : > { %v5652_v45 = vadd.f32 %v5651_v19, %v14303_v18  ;;  %v14680_v4 = vadd.f32 %v5631_v12, %v5576_v16  ;;  %v9730_v19 = vld [vmem:[%s17226_s3 + $0x5f8] sm:$0xff]  ;;  %v14700_v12 = vpop.f32.mrf.mxu0 }
 0x5fc   : > { %7599 = vmatmul.f32.gmra.mxu1 %v14273_v47  ;;  %v9714_v47 = vld [vmem:[%s17226_s3 + $0x578] sm:$0xff]  ;;  %6427 = vmatpush.msra.mxu3 %v9730_v19  ;;  %17588 = vst [vmem:[#allocation49_spill] sm:$0xff] %v14700_v12  ;;  %v9729_v19 = vld [vmem:[%s17226_s3 + $0x5f0] sm:$0xff] }
 0x5fd   : > { %6371 = vmatpush.msrb.mxu2 %v9714_v47  ;;  %v9712_v47 = vld [vmem:[%s17226_s3 + $0x568] sm:$0xff] }
 0x5fe   : > { %6428 = vmatpush.msra.mxu3 %v9729_v19 }
 0x5ff   : > { %5774 = vmatmul.f32.gmra.mxu2 %v10211_v28  ;;  %5827 = vmatmul.f32.gmra.mxu3 %v10212_v10  ;;  %v10213_v28 = vld [vmem:[#allocation2 + $0x40] sm:$0xff]  ;;  %v10214_v10 = vld [vmem:[#allocation2 + $0x1a8] sm:$0xff] }
 0x602   : > { %v5654_v8 = vpop.f32.mrf.mxu2  ;;  %v5707_v56 = vpop.f32.mrf.mxu3  ;;  %7549 = vmatmul.f32.gmra.mxu0 %v14685_v6 }
 0x603   : > { %v5655_v18 = vadd.f32 %v5654_v8, %v14324_v48  ;;  %v14691_v16 = vadd.f32 %v5707_v56, %v5652_v45  ;;  %v14702_v48 = vld [vmem:[#allocation2 + $0x208] sm:$0xff] }
 0x604   : > { %7602 = vmatmul.f32.gmra.mxu1 %v14286_v54  ;;  %v9713_v54 = vld [vmem:[%s17226_s3 + $0x570] sm:$0xff] }
 0x605   : > { %6372 = vmatpush.msrb.mxu2 %v9713_v54 }
 0x607   : > { %5777 = vmatmul.f32.gmra.mxu2 %v10213_v28  ;;  %5830 = vmatmul.f32.gmra.mxu3 %v10214_v10  ;;  %v14718_v28 = vpop.f32.mrf.mxu1  ;;  %v10216_v10 = vld [vmem:[#allocation2 + $0x150] sm:$0xff] }
 0x608   : > { %17589 = vst [vmem:[#allocation50_spill] sm:$0xff] %v14718_v28  ;;  %6373 = vmatpush.msrb.mxu2 %v9712_v47 }
 0x60a   : > { %v5657_v45 = vpop.f32.mrf.mxu2  ;;  %v5710_v8 = vpop.f32.mrf.mxu3  ;;  %7552 = vmatmul.f32.gmra.mxu0 %v14702_v48 }
 0x60b   : > { %v5658_v56 = vadd.f32 %v5657_v45, %v14352_v38  ;;  %v14706_v13 = vadd.f32 %v5710_v8, %v5655_v18  ;;  %v9711_v38 = vld [vmem:[%s17226_s3 + $0x560] sm:$0xff]  ;;  %v10215_v18 = vld [vmem:[#allocation2 + $0x1b0] sm:$0xff]  ;;  %v9710_v45 = vld [vmem:[%s17226_s3 + $0x558] sm:$0xff]  ;;  %v14726_v8 = vpop.f32.mrf.mxu0 }
 0x60c   : > { %7605 = vmatmul.f32.gmra.mxu1 %v14301_v27  ;;  %6374 = vmatpush.msrb.mxu2 %v9711_v38  ;;  %17590 = vst [vmem:[#allocation22_spill] sm:$0xff] %v14726_v8  ;;  %v14728_v27 = vld [vmem:[#allocation2 + $0x80] sm:$0xff]  ;;  %v9728_v38 = vld [vmem:[%s17226_s3 + $0x5e8] sm:$0xff] }
 0x60d   : > { %6429 = vmatpush.msra.mxu3 %v9728_v38  ;;  %v9937_v38 = vld [vmem:[%s17226_s3 + $0xc70] sm:$0xff] }
 0x60e   : > { %6375 = vmatpush.msrb.mxu2 %v9710_v45  ;;  %v10217_v45 = vld [vmem:[#allocation2 + $0x188] sm:$0xff] }
 0x60f   : > { %5780 = vmatmul.f32.gmra.mxu2 %v10215_v18  ;;  %5833 = vmatmul.f32.gmra.mxu3 %v10216_v10  ;;  %v9709_v18 = vld [vmem:[%s17226_s3 + $0x550] sm:$0xff]  ;;  %v9708_v10 = vld [vmem:[%s17226_s3 + $0x548] sm:$0xff] }
 0x610   : > { %6376 = vmatpush.msrb.mxu2 %v9709_v18  ;;  %v9727_v18 = vld [vmem:[%s17226_s3 + $0x5e0] sm:$0xff] }
 0x611   : > { %6430 = vmatpush.msra.mxu3 %v9727_v18  ;;  %v9936_v18 = vld [vmem:[%s17226_s3 + $0xc68] sm:$0xff] }
 0x612   : > { %v5660_v54 = vpop.f32.mrf.mxu2  ;;  %v5713_v19 = vpop.f32.mrf.mxu3  ;;  %7555 = vmatmul.f32.gmra.mxu0 %v14728_v27  ;;  %6377 = vmatpush.msrb.mxu2 %v9708_v10  ;;  %v14761_v10 = vld [vmem:[#allocation2 + $0x1d0] sm:$0xff] }
 0x613   : > { %v5661_v47 = vadd.f32 %v5660_v54, %v14394_v55  ;;  %v14732_v12 = vadd.f32 %v5713_v19, %v5658_v56  ;;  %v9707_v55 = vld [vmem:[%s17226_s3 + $0x540] sm:$0xff]  ;;  %v14747_v56 = vpop.f32.mrf.mxu1  ;;  %v10218_v54 = vld [vmem:[#allocation2 + $0x38] sm:$0xff]  ;;  %v14764_v8 = vpop.f32.mrf.mxu0 }
 0x614   : > { %7608 = vmatmul.f32.gmra.mxu1 %v14320_v31  ;;  %17591 = vst [vmem:[#allocation54_spill] sm:$0xff] %v14747_v56  ;;  %v9938_v19 = vld [vmem:[%s17226_s3 + $0xc78] sm:$0xff]  ;;  %6378 = vmatpush.msrb.mxu2 %v9707_v55  ;;  %v9705_v55 = vld [vmem:[%s17226_s3 + $0x530] sm:$0xff] }
 0x615   : > { %v9706_v31 = vld [vmem:[%s17226_s3 + $0x538] sm:$0xff]  ;;  %7748 = vmatpush.msrb.mxu0 %v9938_v19  ;;  %17592 = vst [vmem:[#allocation19_spill] sm:$0xff] %v14764_v8 }
 0x616   : > { %6379 = vmatpush.msrb.mxu2 %v9706_v31  ;;  %v9726_v19 = vld [vmem:[%s17226_s3 + $0x5d8] sm:$0xff]  ;;  %v9935_v31 = vld [vmem:[%s17226_s3 + $0xc60] sm:$0xff] }
 0x617   : > { %5783 = vmatmul.f32.gmra.mxu2 %v10217_v45  ;;  %5836 = vmatmul.f32.gmra.mxu3 %v10218_v54 }
 0x618   : > { %7749 = vmatpush.msrb.mxu0 %v9937_v38  ;;  %6380 = vmatpush.msrb.mxu2 %v9705_v55  ;;  %v10219_v38 = vld [vmem:[#allocation2 + $0x20] sm:$0xff]  ;;  %v9934_v55 = vld [vmem:[%s17226_s3 + $0xc58] sm:$0xff] }
 0x619   : > { %6431 = vmatpush.msra.mxu3 %v9726_v19  ;;  %v9702_v19 = vld [vmem:[%s17226_s3 + $0x518] sm:$0xff] }
 0x61a   : > { %v5663_v45 = vpop.f32.mrf.mxu2  ;;  %v5716_v54 = vpop.f32.mrf.mxu3  ;;  %7558 = vmatmul.f32.gmra.mxu0 %v14761_v10 }
 0x61b   : > { %v5664_v44 = vadd.f32 %v5663_v45, %v14458_v9  ;;  %v14767_v32 = vadd.f32 %v5716_v54, %v5661_v47  ;;  %v9704_v9 = vld [vmem:[%s17226_s3 + $0x528] sm:$0xff]  ;;  %7750 = vmatpush.msrb.mxu0 %v9936_v18  ;;  %v9725_v47 = vld [vmem:[%s17226_s3 + $0x5d0] sm:$0xff]  ;;  %v14800_v18 = vpop.f32.mrf.mxu1 }
 0x61c   : > { %7611 = vmatmul.f32.gmra.mxu1 %v14350_v59  ;;  %6381 = vmatpush.msrb.mxu2 %v9704_v9  ;;  %v9703_v59 = vld [vmem:[%s17226_s3 + $0x520] sm:$0xff]  ;;  %v10220_v45 = vld [vmem:[#allocation2 + $0x210] sm:$0xff]  ;;  %v9724_v54 = vld [vmem:[%s17226_s3 + $0x5c8] sm:$0xff]  ;;  %17593 = vst [vmem:[#allocation52_spill] sm:$0xff] %v14800_v18 }
 0x61d   : > { %6432 = vmatpush.msra.mxu3 %v9725_v47  ;;  %7751 = vmatpush.msrb.mxu0 %v9935_v31  ;;  %v14802_v9 = vld [vmem:[#allocation2 + $0xc0] sm:$0xff]  ;;  %v9933_v31 = vld [vmem:[%s17226_s3 + $0xc50] sm:$0xff]  ;;  %v9722_v18 = vld [vmem:[%s17226_s3 + $0x5b8] sm:$0xff] }
 0x61e   : > { %6382 = vmatpush.msrb.mxu2 %v9703_v59  ;;  %v9701_v59 = vld [vmem:[%s17226_s3 + $0x510] sm:$0xff] }
 0x61f   : > { %5786 = vmatmul.f32.gmra.mxu2 %v10219_v38  ;;  %5839 = vmatmul.f32.gmra.mxu3 %v10220_v45  ;;  %v9723_v38 = vld [vmem:[%s17226_s3 + $0x5c0] sm:$0xff] }
 0x620   : > { %6433 = vmatpush.msra.mxu3 %v9724_v54  ;;  %7752 = vmatpush.msrb.mxu0 %v9934_v55  ;;  %v14821_v54 = vpop.f32.mrf.mxu0  ;;  %v9721_v55 = vld [vmem:[%s17226_s3 + $0x5b0] sm:$0xff] }
 0x621   : > { %6383 = vmatpush.msrb.mxu2 %v9702_v19  ;;  %17594 = vst [vmem:[#allocation53_spill] sm:$0xff] %v14821_v54  ;;  %v10221_v19 = vld [vmem:[#allocation2 + $0x1d8] sm:$0xff] }
 0x622   : > { %v5666_v45 = vpop.f32.mrf.mxu2  ;;  %v5719_v47 = vpop.f32.mrf.mxu3  ;;  %7561 = vmatmul.f32.gmra.mxu0 %v14802_v9  ;;  %6434 = vmatpush.msra.mxu3 %v9723_v38  ;;  %v9699_v38 = vld [vmem:[%s17226_s3 + $0x500] sm:$0xff] }
 0x623   : > { %v5667_v8 = vadd.f32 %v5666_v45, %v14524_v53  ;;  %v14812_v56 = vadd.f32 %v5719_v47, %v5664_v44  ;;  %7753 = vmatpush.msrb.mxu0 %v9933_v31  ;;  %6384 = vmatpush.msrb.mxu2 %v9701_v59  ;;  %v9932_v44 = vld [vmem:[%s17226_s3 + $0xc48] sm:$0xff]  ;;  %v9931_v45 = vld [vmem:[%s17226_s3 + $0xc40] sm:$0xff] }
 0x624   : > { %7614 = vmatmul.f32.gmra.mxu1 %v14390_v52  ;;  %v9700_v53 = vld [vmem:[%s17226_s3 + $0x508] sm:$0xff]  ;;  %6435 = vmatpush.msra.mxu3 %v9722_v18  ;;  %v10222_v52 = vld [vmem:[#allocation2 + $0xb0] sm:$0xff] }
 0x625   : > { %7754 = vmatpush.msrb.mxu0 %v9932_v44  ;;  %6385 = vmatpush.msrb.mxu2 %v9700_v53  ;;  %v9720_v18 = vld [vmem:[%s17226_s3 + $0x5a8] sm:$0xff]  ;;  %v9930_v44 = vld [vmem:[%s17226_s3 + $0xc38] sm:$0xff]  ;;  %v9719_v53 = vld [vmem:[%s17226_s3 + $0x5a0] sm:$0xff] }
 0x626   : > { %v14841_v47 = vld [vmem:[#allocation2 + $0x68] sm:$0xff]  ;;  %6436 = vmatpush.msra.mxu3 %v9721_v55  ;;  %v9929_v55 = vld [vmem:[%s17226_s3 + $0xc30] sm:$0xff] }
 0x627   : > { %5789 = vmatmul.f32.gmra.mxu2 %v10221_v19  ;;  %5842 = vmatmul.f32.gmra.mxu3 %v10222_v52  ;;  %v14850_v19 = vpop.f32.mrf.mxu1 }
 0x628   : > { %6386 = vmatpush.msrb.mxu2 %v9699_v38  ;;  %17595 = vst [vmem:[#allocation57_spill] sm:$0xff] %v14850_v19  ;;  %7755 = vmatpush.msrb.mxu0 %v9931_v45  ;;  %v9718_v38 = vld [vmem:[%s17226_s3 + $0x598] sm:$0xff]  ;;  %v14862_v2 = vpop.f32.mrf.mxu0  ;;  %v10223_v19 = vld [vmem:[#allocation2 + $0x2a0] sm:$0xff]  ;;  %v14870_v45 = vld [vmem:[#allocation2 + $0xa8] sm:$0xff] }
 0x629   : > { %6437 = vmatpush.msra.mxu3 %v9720_v18  ;;  %17596 = vst [vmem:[#allocation21_spill] sm:$0xff] %v14862_v2  ;;  %v9716_v18 = vld [vmem:[%s17226_s3 + $0x588] sm:$0xff] }
 0x62a   : > { %v5669_v31 = vpop.f32.mrf.mxu2  ;;  %v5722_v59 = vpop.f32.mrf.mxu3  ;;  %7564 = vmatmul.f32.gmra.mxu0 %v14841_v47  ;;  %v7433_v2 = vld [vmem:[#allocation2 + $0x2c8] sm:$0xff] }
 0x62b   : > { %v5670_v52 = vadd.f32 %v5669_v31, %v14571_v36  ;;  %v14853_v54 = vadd.f32 %v5722_v59, %v5667_v8  ;;  %7756 = vmatpush.msrb.mxu0 %v9930_v44  ;;  %6438 = vmatpush.msra.mxu3 %v9719_v53  ;;  %v10224_v36 = vld [vmem:[#allocation2 + $0x2c0] sm:$0xff]  ;;  %v9928_v8 = vld [vmem:[%s17226_s3 + $0xc28] sm:$0xff] }
 0x62c   : > { %7617 = vmatmul.f32.gmra.mxu1 %v14450_v62  ;;  %v9717_v62 = vld [vmem:[%s17226_s3 + $0x590] sm:$0xff]  ;;  %v9927_v44 = vld [vmem:[%s17226_s3 + $0xc20] sm:$0xff] }
 0x62d   : > { %7757 = vmatpush.msrb.mxu0 %v9929_v55  ;;  %6439 = vmatpush.msra.mxu3 %v9718_v38  ;;  %v9715_v55 = vld [vmem:[%s17226_s3 + $0x580] sm:$0xff] }
 0x62f   : > { %5792 = vmatmul.f32.gmra.mxu2 %v10223_v19  ;;  %5845 = vmatmul.f32.gmra.mxu3 %v10224_v36  ;;  %v14886_v38 = vpop.f32.mrf.mxu1  ;;  %v9926_v36 = vld [vmem:[%s17226_s3 + $0xc18] sm:$0xff] }
 0x630   : > { %6440 = vmatpush.msra.mxu3 %v9717_v62  ;;  %7758 = vmatpush.msrb.mxu0 %v9928_v8  ;;  %17597 = vst [vmem:[#allocation24_spill] sm:$0xff] %v14886_v38  ;;  %v10225_v62 = vld [vmem:[#allocation2 + $0x98] sm:$0xff]  ;;  %v14894_v8 = vpop.f32.mrf.mxu0  ;;  %v5976_v38 = vld [vmem:[#allocation2 + $0x240] sm:$0xff] }
 0x631   : > { %17598 = vst [vmem:[#allocation55_spill] sm:$0xff] %v14894_v8  ;;  %v5975_v8 = vld [vmem:[#allocation2 + $0x2a8] sm:$0xff] }
 0x632   : > { %v5672_v31 = vpop.f32.mrf.mxu2  ;;  %v5725_v59 = vpop.f32.mrf.mxu3  ;;  %7567 = vmatmul.f32.gmra.mxu0 %v14870_v45  ;;  %6441 = vmatpush.msra.mxu3 %v9716_v18 }
 0x633   : > { %v5673_v53 = vadd.f32 %v5672_v31, %v14609_v49  ;;  %v14880_v19 = vadd.f32 %v5725_v59, %v5670_v52  ;;  %7759 = vmatpush.msrb.mxu0 %v9927_v44  ;;  %v10226_v49 = vld [vmem:[#allocation2 + $0xd8] sm:$0xff]  ;;  %v9925_v52 = vld [vmem:[%s17226_s3 + $0xc10] sm:$0xff]  ;;  %v9924_v59 = vld [vmem:[%s17226_s3 + $0xc08] sm:$0xff] }
 0x634   : > { %7620 = vmatmul.f32.gmra.mxu1 %v14516_v11  ;;  %6442 = vmatpush.msra.mxu3 %v9715_v55  ;;  %v7428_v11 = vld [vmem:[#allocation2 + $0x1f0] sm:$0xff] }
 0x635   : > { %7760 = vmatpush.msrb.mxu0 %v9926_v36  ;;  %v9923_v36 = vld [vmem:[%s17226_s3 + $0xc00] sm:$0xff] }
 0x637   : > { %5795 = vmatmul.f32.gmra.mxu2 %v10225_v62  ;;  %5848 = vmatmul.f32.gmra.mxu3 %v10226_v49  ;;  %v4975_v62 = vld [vmem:[#allocation2 + $0x258] sm:$0xf]  ;;  %v14906_v49 = vpop.f32.mrf.mxu1 }
 0x638   : > { %7761 = vmatpush.msrb.mxu0 %v9925_v52  ;;  %17599 = vst [vmem:[#allocation56_spill] sm:$0xff] %v14906_v49  ;;  %v6182_v52 = vrot.slane %v5975_v8, 4  ;;  %v5971_v8 = vld [vmem:[#allocation2 + $0x298] sm:$0xf0] }
 0x63a   : > { %v5675_v18 = vpop.f32.mrf.mxu2  ;;  %v5728_v31 = vpop.f32.mrf.mxu3  ;;  %7570 = vmatmul.f32.gmra.mxu0 %v7428_v11  ;;  %v10227_v11 = vld [vmem:[#allocation2 + $0x1c8] sm:$0xff] }
 0x63b   : > { %v5676_v44 = vadd.f32 %v5675_v18, %v14632_v24  ;;  %v14900_v55 = vadd.f32 %v5728_v31, %v5673_v53  ;;  %7762 = vmatpush.msrb.mxu0 %v9924_v59  ;;  %v5970_v24 = vld [vmem:[#allocation2] sm:$0xf0] }
 0x63c   : > { %7623 = vmatmul.f32.gmra.mxu1 %v14561_v5  ;;  %v14908_v5 = vpop.f32.mrf.mxu0  ;;  %v6181_v49 = vrot.slane %v5970_v24, 4 }
 0x63d   : > { %7763 = vmatpush.msrb.mxu0 %v9923_v36  ;;  %17600 = vst [vmem:[#allocation60_spill] sm:$0xff] %v14908_v5  ;;  %v14915_v36 = vld [vmem:[#allocation2 + $0xa0] sm:$0xff] }
 0x63f   : > { %5798 = vmatmul.f32.gmra.mxu2 %v4975_v62  ;;  %5851 = vmatmul.f32.gmra.mxu3 %v10227_v11  ;;  %v6183_v62 = vsel %vm1864_vm3, %v6181_v49, %v6182_v52  ;;  %v4976_v11 = vld [vmem:[#allocation2 + $0x1f8] sm:$0xf]  ;;  %v14917_v28 = vpop.f32.mrf.mxu1  ;;  %v7434_v49 = vld [vmem:[#allocation2 + $0x228] sm:$0xff] }
 0x640   : > { %17601 = vst [vmem:[#allocation23_spill] sm:$0xff] %v14917_v28  ;;  %v5981_v28 = vld [vmem:[#allocation2 + $0x28] sm:$0xff] }
 0x642   : > { %v5678_v53 = vpop.f32.mrf.mxu2  ;;  %v5731_v18 = vpop.f32.mrf.mxu3  ;;  %7573 = vmatmul.f32.gmra.mxu0 %v7433_v2  ;;  %v7438_v2 = vld [vmem:[#allocation2 + $0x260] sm:$0xf] }
 0x643   : > { %v5679_v31 = vadd.f32 %v5678_v53, %v14647_v14  ;;  %v14911_v59 = vadd.f32 %v5731_v18, %v5676_v44  ;;  %v6196_v14 = vrot.slane %v14915_v36, 4  ;;  %v6185_v44 = vrot.slane %v5976_v38, 4 }
 0x644   : > { %7626 = vmatmul.f32.gmra.mxu1 %v14601_v7  ;;  %v6184_v53 = vrot.slane %v5971_v8, 4  ;;  %v14923_v18 = vpop.f32.mrf.mxu0  ;;  %v7439_v8 = vld [vmem:[#allocation2 + $0x138] sm:$0xf] }
 0x645   : > { %17602 = vst [vmem:[#allocation58_spill] sm:$0xff] %v14923_v18  ;;  %v14940_v18 = vld [vmem:[#allocation2 + $0x200] sm:$0xff] }
 0x647   : > { %6387 = vmatmul.f32.vlgmr.msrb.gmra.mxu2 %v6183_v62  ;;  %5854 = vmatmul.f32.gmra.mxu3 %v4976_v11  ;;  %v6197_v62 = vsel %vm1864_vm3, %v6182_v52, %v6196_v14  ;;  %v6186_v11 = vsel %vm1864_vm3, %v6184_v53, %v6185_v44  ;;  %v14934_v52 = vpop.f32.mrf.mxu1 }
 0x648   : > { %17603 = vst [vmem:[#allocation59_spill] sm:$0xff] %v14934_v52 }
 0x64a   : > { %v5681_v5 = vpop.f32.mrf.mxu2  ;;  %v5734_v22 = vpop.f32.mrf.mxu3  ;;  %7576 = vmatmul.f32.gmra.mxu0 %v7438_v2  ;;  %v14927_v2 = vld [vmem:[#allocation2 + $0x280] sm:$0xff] }
 0x64b   : > { %v5682_v7 = vadd.f32 %v5681_v5, %v14660_v21  ;;  %v14921_v24 = vadd.f32 %v5734_v22, %v5679_v31  ;;  %v6206_v22 = vrot.slane %v14656_v39, 4  ;;  %v6198_v21 = vrot.slane %v5981_v28, 4 }
 0x64c   : > { %7629 = vmatmul.f32.gmra.mxu1 %v7434_v49 }
 0x64d   : > { %v6207_v49 = vsel %vm1864_vm3, %v6196_v14, %v6206_v22  ;;  %v6199_v53 = vsel %vm1864_vm3, %v6185_v44, %v6198_v21 }
 0x64f   : > { %6390 = vmatmul.f32.gmra.mxu2 %v6197_v62  ;;  %6443 = vmatmul.f32.vlgmr.msra.gmra.mxu3 %v6186_v11  ;;  %v14938_v62 = vpop.f32.mrf.mxu0  ;;  %v5986_v11 = vld [vmem:[#allocation2 + $0x40] sm:$0xff] }
 0x650   : > { %17604 = vst [vmem:[#allocation63_spill] sm:$0xff] %v14938_v62 }
 0x652   : > { %v5684_v15 = vpop.f32.mrf.mxu2  ;;  %v5737_v38 = vpop.f32.mrf.mxu3  ;;  %7764 = vmatmul.f32.vlgmr.msrb.gmra.mxu0 %v14927_v2 }
 0x653   : > { %v5685_v5 = vadd.f32 %v5684_v15, %v14671_v33  ;;  %v14932_v31 = vadd.f32 %v5737_v38, %v5682_v7  ;;  %v6216_v33 = vrot.slane %v14665_v17, 4  ;;  %v6208_v15 = vrot.slane %v5986_v11, 4 }
 0x654   : > { %7632 = vmatmul.f32.gmra.mxu1 %v7439_v8  ;;  %v5991_v8 = vld [vmem:[#allocation2 + $0x1b0] sm:$0xff]  ;;  %v6226_v17 = vrot.slane %v14676_v63, 4  ;;  %v6236_v63 = vrot.slane %v14685_v6, 4 }
 0x655   : > { %v6217_v14 = vsel %vm1864_vm3, %v6206_v22, %v6216_v33  ;;  %v6209_v44 = vsel %vm1864_vm3, %v6198_v21, %v6208_v15 }
 0x656   : > { %v6227_v22 = vsel %vm1864_vm3, %v6216_v33, %v6226_v17  ;;  %v9794_v33 = vld [vmem:[%s17226_s3 + $0x7f8] sm:$0xff] }
 0x657   : > { %6393 = vmatmul.f32.gmra.mxu2 %v6207_v49  ;;  %6446 = vmatmul.f32.gmra.mxu3 %v6199_v53  ;;  %v14949_v49 = vpop.f32.mrf.mxu0  ;;  %v14951_v53 = vld [vmem:[#allocation2 + $0x1c0] sm:$0xff] }
 0x658   : > { %17605 = vst [vmem:[#allocation61_spill] sm:$0xff] %v14949_v49  ;;  %7085 = vmatpush.msrb.mxu3 %v9794_v33 }
 0x65a   : > { %v5687_v39 = vpop.f32.mrf.mxu2  ;;  %v5740_v28 = vpop.f32.mrf.mxu3  ;;  %7767 = vmatmul.f32.gmra.mxu0 %v14940_v18 }
 0x65b   : > { %v5688_v7 = vadd.f32 %v5687_v39, %v14680_v4  ;;  %v14945_v38 = vadd.f32 %v5740_v28, %v5685_v5  ;;  %v6218_v4 = vrot.slane %v5991_v8, 4  ;;  %v5996_v39 = vld [vmem:[#allocation2 + $0x188] sm:$0xff]  ;;  %v14960_v28 = vld [vmem:[#allocation2 + $0x58] sm:$0xff] }
 0x65c   : > { %v6228_v8 = vrot.slane %v5996_v39, 4 }
 0x65d   : > { %v6219_v21 = vsel %vm1864_vm3, %v6208_v15, %v6218_v4  ;;  %v6237_v15 = vsel %vm1864_vm3, %v6226_v17, %v6236_v63  ;;  %v9777_v17 = vld [vmem:[%s17226_s3 + $0x770] sm:$0xff] }
 0x65e   : > { %v6229_v6 = vsel %vm1864_vm3, %v6218_v4, %v6228_v8 }
 0x65f   : > { %6396 = vmatmul.f32.gmra.mxu2 %v6217_v14  ;;  %6449 = vmatmul.f32.gmra.mxu3 %v6209_v44  ;;  %v14964_v49 = vpop.f32.mrf.mxu0 }
 0x660   : > { %17606 = vst [vmem:[#allocation62_spill] sm:$0xff] %v14964_v49  ;;  %v7432_v49 = vld [vmem:[#allocation2 + $0x100] sm:$0xff] }
 0x662   : > { %v5763_v62 = vpop.f32.mrf.mxu2  ;;  %v5743_v52 = vpop.f32.mrf.mxu3  ;;  %7770 = vmatmul.f32.gmra.mxu0 %v14951_v53 }
 0x663   : > { %v5764_v5 = vadd.f32 %v5763_v62, %v14691_v16  ;;  %v14956_v11 = vadd.f32 %v5743_v52, %v5688_v7  ;;  %v9778_v62 = vld [vmem:[%s17226_s3 + $0x778] sm:$0xff]  ;;  %v6001_v7 = vld [vmem:[#allocation2 + $0x20] sm:$0xff] }
 0x664   : > { %6595 = vmatpush.msra.mxu2 %v9778_v62  ;;  %v6238_v39 = vrot.slane %v6001_v7, 4  ;;  %v9776_v62 = vld [vmem:[%s17226_s3 + $0x768] sm:$0xff] }
 0x665   : > { %v15003_v7 = vld [vmem:[#allocation2 + $0x88] sm:$0xff] }
 0x666   : > { %6596 = vmatpush.msra.mxu2 %v9777_v17  ;;  %v6239_v33 = vsel %vm1864_vm3, %v6228_v8, %v6238_v39 }
 0x667   : > { %6399 = vmatmul.f32.gmra.mxu2 %v6227_v22  ;;  %6452 = vmatmul.f32.gmra.mxu3 %v6219_v21  ;;  %v6246_v21 = vrot.slane %v14702_v48, 4  ;;  %v14987_v4 = vpop.f32.mrf.mxu0  ;;  %v9793_v48 = vld [vmem:[%s17226_s3 + $0x7f0] sm:$0xff] }
 0x668   : > { %17607 = vst [vmem:[#allocation66_spill] sm:$0xff] %v14987_v4  ;;  %6597 = vmatpush.msra.mxu2 %v9776_v62  ;;  %7086 = vmatpush.msrb.mxu3 %v9793_v48  ;;  %v9773_v48 = vld [vmem:[%s17226_s3 + $0x750] sm:$0xff] }
 0x66a   : > { %v5766_v14 = vpop.f32.mrf.mxu2  ;;  %v5819_v44 = vpop.f32.mrf.mxu3  ;;  %7773 = vmatmul.f32.gmra.mxu0 %v14960_v28 }
 0x66b   : > { %v5767_v16 = vadd.f32 %v5766_v14, %v14706_v13  ;;  %v14967_v52 = vadd.f32 %v5819_v44, %v5764_v5  ;;  %v14977_v13 = vld [vmem:[#allocation2 + $0x238] sm:$0xff] }
 0x66f   : > { %6402 = vmatmul.f32.gmra.mxu2 %v6237_v15  ;;  %6455 = vmatmul.f32.gmra.mxu3 %v6229_v6  ;;  %v6006_v15 = vld [vmem:[#allocation2 + $0x1d8] sm:$0xff] }
 0x670   : > { %v9774_v6 = vld [vmem:[%s17226_s3 + $0x758] sm:$0xff]  ;;  %v6248_v17 = vrot.slane %v6006_v15, 4  ;;  %v6011_v15 = vld [vmem:[#allocation2 + $0x2a0] sm:$0xff] }
 0x672   : > { %v5769_v5 = vpop.f32.mrf.mxu2  ;;  %v5822_v22 = vpop.f32.mrf.mxu3  ;;  %7776 = vmatmul.f32.gmra.mxu0 %v14977_v13 }
 0x673   : > { %v5770_v14 = vadd.f32 %v5769_v5, %v14732_v12  ;;  %v14982_v44 = vadd.f32 %v5822_v22, %v5767_v16  ;;  %v9775_v12 = vld [vmem:[%s17226_s3 + $0x760] sm:$0xff]  ;;  %v6247_v16 = vsel %vm1864_vm3, %v6236_v63, %v6246_v21  ;;  %v6256_v63 = vrot.slane %v14728_v27, 4  ;;  %v9772_v27 = vld [vmem:[%s17226_s3 + $0x748] sm:$0xff] }
 0x674   : > { %6598 = vmatpush.msra.mxu2 %v9775_v12  ;;  %v9792_v12 = vld [vmem:[%s17226_s3 + $0x7e8] sm:$0xff] }
 0x675   : > { %7087 = vmatpush.msrb.mxu3 %v9792_v12  ;;  %v6258_v12 = vrot.slane %v6011_v15, 4 }
 0x676   : > { %6599 = vmatpush.msra.mxu2 %v9774_v6  ;;  %v9770_v6 = vld [vmem:[%s17226_s3 + $0x738] sm:$0xff] }
 0x677   : > { %6405 = vmatmul.f32.gmra.mxu2 %v6247_v16  ;;  %6458 = vmatmul.f32.gmra.mxu3 %v6239_v33  ;;  %v6249_v16 = vsel %vm1864_vm3, %v6238_v39, %v6248_v17  ;;  %v15024_v33 = vpop.f32.mrf.mxu0 }
 0x678   : > { %6600 = vmatpush.msra.mxu2 %v9773_v48  ;;  %17608 = vst [vmem:[#allocation64_spill] sm:$0xff] %v15024_v33  ;;  %v6266_v48 = vrot.slane %v14761_v10, 4  ;;  %v9768_v10 = vld [vmem:[%s17226_s3 + $0x728] sm:$0xff]  ;;  %v9781_v33 = vld [vmem:[%s17226_s3 + $0x790] sm:$0xff] }
 0x67a   : > { %v5772_v5 = vpop.f32.mrf.mxu2  ;;  %v5825_v22 = vpop.f32.mrf.mxu3  ;;  %7779 = vmatmul.f32.gmra.mxu0 %v15003_v7  ;;  %6601 = vmatpush.msra.mxu2 %v9772_v27  ;;  %v6267_v15 = vsel %vm1864_vm3, %v6256_v63, %v6266_v48 }
 0x67b   : > { %v5773_v8 = vadd.f32 %v5772_v5, %v14767_v32  ;;  %v15008_v62 = vadd.f32 %v5825_v22, %v5770_v14  ;;  %v9771_v32 = vld [vmem:[%s17226_s3 + $0x740] sm:$0xff]  ;;  %v6257_v14 = vsel %vm1864_vm3, %v6246_v21, %v6256_v63  ;;  %v15032_v22 = vld [vmem:[#allocation2 + $0x270] sm:$0xff] }
 0x67c   : > { %v9791_v5 = vld [vmem:[%s17226_s3 + $0x7e0] sm:$0xff]  ;;  %6602 = vmatpush.msra.mxu2 %v9771_v32  ;;  %v9790_v32 = vld [vmem:[%s17226_s3 + $0x7d8] sm:$0xff] }
 0x67d   : > { %7088 = vmatpush.msrb.mxu3 %v9791_v5  ;;  %v9788_v5 = vld [vmem:[%s17226_s3 + $0x7c8] sm:$0xff]  ;;  %v9787_v63 = vld [vmem:[%s17226_s3 + $0x7c0] sm:$0xff] }
 0x67e   : > { %6603 = vmatpush.msra.mxu2 %v9770_v6  ;;  %v6259_v6 = vsel %vm1864_vm3, %v6248_v17, %v6258_v12 }
 0x67f   : > { %6408 = vmatmul.f32.gmra.mxu2 %v6257_v14  ;;  %6461 = vmatmul.f32.gmra.mxu3 %v6249_v16  ;;  %v9769_v16 = vld [vmem:[%s17226_s3 + $0x730] sm:$0xff]  ;;  %v15065_v17 = vpop.f32.mrf.mxu0 }
 0x680   : > { %6604 = vmatpush.msra.mxu2 %v9769_v16  ;;  %7089 = vmatpush.msrb.mxu3 %v9790_v32  ;;  %17609 = vst [vmem:[#allocation65_spill] sm:$0xff] %v15065_v17  ;;  %v15067_v16 = vld [vmem:[#allocation2 + $0x118] sm:$0xff] }
 0x681   : > { %v9786_v17 = vld [vmem:[%s17226_s3 + $0x7b8] sm:$0xff] }
 0x682   : > { %v5775_v21 = vpop.f32.mrf.mxu2  ;;  %v5828_v39 = vpop.f32.mrf.mxu3  ;;  %7782 = vmatmul.f32.gmra.mxu0 %v15032_v22  ;;  %6605 = vmatpush.msra.mxu2 %v9768_v10 }
 0x683   : > { %v5776_v27 = vadd.f32 %v5775_v21, %v14812_v56  ;;  %v15037_v14 = vadd.f32 %v5828_v39, %v5773_v8  ;;  %v9789_v56 = vld [vmem:[%s17226_s3 + $0x7d0] sm:$0xff]  ;;  %v9767_v8 = vld [vmem:[%s17226_s3 + $0x720] sm:$0xff]  ;;  %v6016_v21 = vld [vmem:[#allocation2 + $0x98] sm:$0xff] }
 0x684   : > { %7090 = vmatpush.msrb.mxu3 %v9789_v56  ;;  %v9766_v39 = vld [vmem:[%s17226_s3 + $0x718] sm:$0xff]  ;;  %6606 = vmatpush.msra.mxu2 %v9767_v8  ;;  %v6276_v56 = vrot.slane %v14802_v9, 4  ;;  %v9764_v9 = vld [vmem:[%s17226_s3 + $0x708] sm:$0xff] }
 0x686   : > { %7091 = vmatpush.msrb.mxu3 %v9788_v5  ;;  %6607 = vmatpush.msra.mxu2 %v9766_v39  ;;  %v9765_v5 = vld [vmem:[%s17226_s3 + $0x710] sm:$0xff] }
 0x687   : > { %6411 = vmatmul.f32.gmra.mxu2 %v6267_v15  ;;  %6464 = vmatmul.f32.gmra.mxu3 %v6259_v6  ;;  %v6268_v15 = vrot.slane %v6016_v21, 4  ;;  %v6277_v21 = vsel %vm1864_vm3, %v6266_v48, %v6276_v56 }
 0x688   : > { %7092 = vmatpush.msrb.mxu3 %v9787_v63  ;;  %6608 = vmatpush.msra.mxu2 %v9765_v5  ;;  %v6021_v63 = vld [vmem:[#allocation2 + $0x258] sm:$0xff] }
 0x689   : > { %v6269_v39 = vsel %vm1864_vm3, %v6258_v12, %v6268_v15  ;;  %v6286_v12 = vrot.slane %v14841_v47, 4 }
 0x68a   : > { %v5778_v32 = vpop.f32.mrf.mxu2  ;;  %v5831_v10 = vpop.f32.mrf.mxu3  ;;  %7785 = vmatmul.f32.gmra.mxu0 %v15067_v16  ;;  %7093 = vmatpush.msrb.mxu3 %v9786_v17  ;;  %v9784_v17 = vld [vmem:[%s17226_s3 + $0x7a8] sm:$0xff] }
 0x68b   : > { %v5779_v6 = vadd.f32 %v5778_v32, %v14853_v54  ;;  %v15072_v8 = vadd.f32 %v5831_v10, %v5776_v27  ;;  %v9785_v54 = vld [vmem:[%s17226_s3 + $0x7b0] sm:$0xff]  ;;  %v9763_v27 = vld [vmem:[%s17226_s3 + $0x700] sm:$0xff]  ;;  %6609 = vmatpush.msra.mxu2 %v9764_v9  ;;  %v15094_v32 = vld [vmem:[#allocation2 + $0x108] sm:$0xff]  ;;  %v6278_v9 = vrot.slane %v6021_v63, 4  ;;  %v6287_v4 = vsel %vm1864_vm3, %v6276_v56, %v6286_v12 }
 0x68c   : > { %7094 = vmatpush.msrb.mxu3 %v9785_v54  ;;  %v9783_v10 = vld [vmem:[%s17226_s3 + $0x7a0] sm:$0xff]  ;;  %v6026_v63 = vld [vmem:[#allocation2 + $0x268] sm:$0xff]  ;;  %v6296_v56 = vrot.slane %v14870_v45, 4 }
 0x68d   : > { %6610 = vmatpush.msra.mxu2 %v9763_v27  ;;  %v9782_v27 = vld [vmem:[%s17226_s3 + $0x798] sm:$0xff]  ;;  %v6279_v47 = vsel %vm1864_vm3, %v6268_v15, %v6278_v9 }
 0x68e   : > { %7095 = vmatpush.msrb.mxu3 %v9784_v17  ;;  %v9779_v17 = vld [vmem:[%s17226_s3 + $0x780] sm:$0xff] }
 0x68f   : > { %6414 = vmatmul.f32.gmra.mxu2 %v6277_v21  ;;  %6467 = vmatmul.f32.gmra.mxu3 %v6269_v39  ;;  %v15101_v21 = vpop.f32.mrf.mxu0 }
 0x690   : > { %17610 = vst [vmem:[#allocation69_spill] sm:$0xff] %v15101_v21  ;;  %7096 = vmatpush.msrb.mxu3 %v9783_v10  ;;  %v6031_v21 = vld [vmem:[#allocation2 + $0x198] sm:$0xff] }
 0x691   : > { %v6298_v45 = vrot.slane %v6031_v21, 4 }
 0x692   : > { %v5781_v5 = vpop.f32.mrf.mxu2  ;;  %v5834_v48 = vpop.f32.mrf.mxu3  ;;  %7788 = vmatmul.f32.gmra.mxu0 %v15094_v32  ;;  %7097 = vmatpush.msrb.mxu3 %v9782_v27  ;;  %v6297_v27 = vsel %vm1864_vm3, %v6286_v12, %v6296_v56  ;;  %v5979_v12 = vld [vmem:[#allocation2 + $0x220] sm:$0xff] }
 0x693   : > { %v5782_v39 = vadd.f32 %v5781_v5, %v14880_v19  ;;  %v15104_v54 = vadd.f32 %v5834_v48, %v5779_v6  ;;  %v9780_v19 = vld [vmem:[%s17226_s3 + $0x788] sm:$0xff]  ;;  %v15117_v6 = vld [vmem:[#allocation2 + $0x110] sm:$0xff] }
 0x694   : > { %7098 = vmatpush.msrb.mxu3 %v9781_v33 }
 0x696   : > { %7099 = vmatpush.msrb.mxu3 %v9780_v19 }
 0x697   : > { %6417 = vmatmul.f32.gmra.mxu2 %v6287_v4  ;;  %6470 = vmatmul.f32.gmra.mxu3 %v6279_v47  ;;  %v6288_v4 = vrot.slane %v6026_v63, 4  ;;  %v15127_v33 = vpop.f32.mrf.mxu0 }
 0x698   : > { %7100 = vmatpush.msrb.mxu3 %v9779_v17  ;;  %17611 = vst [vmem:[#allocation67_spill] sm:$0xff] %v15127_v33  ;;  %v5974_v17 = vld [vmem:[#allocation2 + $0x120] sm:$0xf0] }
 0x699   : > { %v6289_v47 = vsel %vm1864_vm3, %v6278_v9, %v6288_v4  ;;  %v7437_v9 = vld [vmem:[#allocation2 + $0x8] sm:$0xff] }
 0x69a   : > { %v5784_v10 = vpop.f32.mrf.mxu2  ;;  %v5837_v5 = vpop.f32.mrf.mxu3  ;;  %7791 = vmatmul.f32.gmra.mxu0 %v15117_v6 }
 0x69b   : > { %v5785_v15 = vadd.f32 %v5784_v10, %v14900_v55  ;;  %v15125_v48 = vadd.f32 %v5837_v5, %v5782_v39  ;;  %v6299_v39 = vsel %vm1864_vm3, %v6288_v4, %v6298_v45  ;;  %v7442_v4 = vld [vmem:[#allocation2 + $0x178] sm:$0xf] }
 0x69f   : > { %6420 = vmatmul.f32.gmra.mxu2 %v6297_v27  ;;  %6473 = vmatmul.f32.gmra.mxu3 %v6289_v47  ;;  %v15135_v19 = vpop.f32.mrf.mxu0  ;;  %v6194_v27 = vrot.slane %v5979_v12, 4 }
 0x6a0   : > { %17612 = vst [vmem:[#allocation68_spill] sm:$0xff] %v15135_v19 }
 0x6a2   : > { %v5787_v41 = vpop.f32.mrf.mxu2  ;;  %v5840_v61 = vpop.f32.mrf.mxu3  ;;  %7794 = vmatmul.f32.gmra.mxu0 %v7432_v49 }
 0x6a3   : > { %v5788_v63 = vadd.f32 %v5787_v41, %v14911_v59  ;;  %v15132_v55 = vadd.f32 %v5840_v61, %v5785_v15  ;;  %v6193_v41 = vrot.slane %v5974_v17, 4  ;;  %v15141_v59 = vld [vmem:[#allocation2 + $0x250] sm:$0xff]  ;;  %v6664_v15 = vld [vmem:[#allocation2 + $0x2a8] sm:$0xc0] }
 0x6a4   : > { %v6204_v12 = vrot.slane %v15141_v59, 4  ;;  %v6885_v17 = vrot.slane %v6664_v15, 6 }
 0x6a5   : > { %v6195_v61 = vsel %vm1864_vm3, %v6193_v41, %v6194_v27 }
 0x6a7   : > { %6423 = vmatmul.f32.gmra.mxu2 %v6296_v56  ;;  %6476 = vmatmul.f32.gmra.mxu3 %v6299_v39  ;;  %v15143_v56 = vpop.f32.mrf.mxu0 }
 0x6a8   : > { %17613 = vst [vmem:[#allocation72_spill] sm:$0xff] %v15143_v56 }
 0x6aa   : > { %v5790_v10 = vpop.f32.mrf.mxu2  ;;  %v5843_v5 = vpop.f32.mrf.mxu3  ;;  %7797 = vmatmul.f32.gmra.mxu0 %v7437_v9 }
 0x6ab   : > { %v5791_v49 = vadd.f32 %v5790_v10, %v14921_v24  ;;  %v15138_v21 = vadd.f32 %v5843_v5, %v5788_v63  ;;  %v6886_v24 = vrot.slane %v14915_v36, 6  ;;  %v6674_v5 = vld [vmem:[#allocation2 + $0x230] sm:$0xff] }
 0x6ac   : > { %v6900_v56 = vrot.slane %v6674_v5, 6  ;;  %v6234_v5 = vrot.slane %v14951_v53, 4 }
 0x6ad   : > { %v6887_v10 = vsel %vm552_vm2, %v6885_v17, %v6886_v24 }
 0x6af   : > { %6611 = vmatmul.f32.vlgmr.msra.gmra.mxu2 %v6195_v61  ;;  %6479 = vmatmul.f32.gmra.mxu3 %v6298_v45  ;;  %v6205_v45 = vsel %vm1864_vm3, %v6194_v27, %v6204_v12  ;;  %v6679_v27 = vld [vmem:[#allocation2 + $0x1a0] sm:$0xff] }
 0x6b0   : > { %v6910_v17 = vrot.slane %v6679_v27, 6  ;;  %v9842_v27 = vld [vmem:[%s17226_s3 + $0x978] sm:$0xff] }
 0x6b1   : > { %7253 = vmatpush.msrb.mxu2 %v9842_v27  ;;  %v6264_v27 = vrot.slane %v15003_v7, 4  ;;  %v9835_v7 = vld [vmem:[%s17226_s3 + $0x940] sm:$0xff] }
 0x6b2   : > { %v5793_v47 = vpop.f32.mrf.mxu2  ;;  %v5846_v39 = vpop.f32.mrf.mxu3  ;;  %7800 = vmatmul.f32.gmra.mxu0 %v7442_v4  ;;  %v6214_v4 = vrot.slane %v14927_v2, 4 }
 0x6b3   : > { %v5794_v63 = vadd.f32 %v5793_v47, %v14932_v31  ;;  %v15148_v9 = vadd.f32 %v5846_v39, %v5791_v49  ;;  %v6901_v49 = vsel %vm552_vm2, %v6886_v24, %v6900_v56  ;;  %v6224_v39 = vrot.slane %v14940_v18, 4 }
 0x6b4   : > { %v6215_v31 = vsel %vm1864_vm3, %v6204_v12, %v6214_v4  ;;  %v6684_v12 = vld [vmem:[#allocation2 + $0x70] sm:$0xff] }
 0x6b5   : > { %v6235_v18 = vsel %vm1864_vm3, %v6224_v39, %v6234_v5 }
 0x6b7   : > { %6614 = vmatmul.f32.gmra.mxu2 %v6205_v45  ;;  %7101 = vmatmul.f32.vlgmr.msrb.gmra.mxu3 %v6887_v10 }
 0x6ba   : > { %v5796_v41 = vpop.f32.mrf.mxu2  ;;  %v5849_v61 = vpop.f32.mrf.mxu3 }
 0x6bb   : > { %v5797_v19 = vadd.f32 %v5796_v41, %v14945_v38  ;;  %v15154_v36 = vadd.f32 %v5849_v61, %v5794_v63  ;;  %v6225_v38 = vsel %vm1864_vm3, %v6214_v4, %v6224_v39  ;;  %v6911_v63 = vsel %vm552_vm2, %v6900_v56, %v6910_v17 }
 0x6bc   : > { %v6920_v41 = vrot.slane %v6684_v12, 6  ;;  %v6244_v56 = vrot.slane %v14960_v28, 4  ;;  %v6694_v28 = vld [vmem:[#allocation2 + $0x208] sm:$0xff]  ;;  %v9841_v12 = vld [vmem:[%s17226_s3 + $0x970] sm:$0xff] }
 0x6bd   : > { %7254 = vmatpush.msrb.mxu2 %v9841_v12  ;;  %v6704_v12 = vld [vmem:[#allocation2 + $0x1d0] sm:$0xff] }
 0x6bf   : > { %6617 = vmatmul.f32.gmra.mxu2 %v6215_v31  ;;  %7104 = vmatmul.f32.gmra.mxu3 %v6901_v49 }
 0x6c2   : > { %v5799_v15 = vpop.f32.mrf.mxu2  ;;  %v5852_v47 = vpop.f32.mrf.mxu3 }
 0x6c3   : > { %v5800_v45 = vadd.f32 %v5799_v15, %v14956_v11  ;;  %v15160_v2 = vadd.f32 %v5852_v47, %v5797_v19  ;;  %v6921_v11 = vsel %vm552_vm2, %v6910_v17, %v6920_v41  ;;  %v6689_v19 = vld [vmem:[#allocation2 + $0x278] sm:$0xff]  ;;  %v6245_v47 = vsel %vm1864_vm3, %v6234_v5, %v6244_v56  ;;  %v9857_v5 = vld [vmem:[%s17226_s3 + $0x9f0] sm:$0xff] }
 0x6c4   : > { %v6930_v49 = vrot.slane %v6689_v19, 6  ;;  %v9858_v15 = vld [vmem:[%s17226_s3 + $0x9f8] sm:$0xff] }
 0x6c5   : > { %7309 = vmatpush.msra.mxu3 %v9858_v15  ;;  %v9838_v19 = vld [vmem:[%s17226_s3 + $0x958] sm:$0xff] }
 0x6c6   : > { %v6931_v39 = vsel %vm552_vm2, %v6920_v41, %v6930_v49 }
 0x6c7   : > { %6620 = vmatmul.f32.gmra.mxu2 %v6225_v38  ;;  %7107 = vmatmul.f32.gmra.mxu3 %v6911_v63  ;;  %v6254_v38 = vrot.slane %v14977_v13, 4  ;;  %v6940_v63 = vrot.slane %v6694_v28, 6  ;;  %v9839_v13 = vld [vmem:[%s17226_s3 + $0x960] sm:$0xff] }
 0x6c8   : > { %7310 = vmatpush.msra.mxu3 %v9857_v5 }
 0x6c9   : > { %v6255_v41 = vsel %vm1864_vm3, %v6244_v56, %v6254_v38  ;;  %v9837_v56 = vld [vmem:[%s17226_s3 + $0x950] sm:$0xff]  ;;  %v6265_v28 = vsel %vm1864_vm3, %v6254_v38, %v6264_v27  ;;  %v6274_v38 = vrot.slane %v15032_v22, 4 }
 0x6ca   : > { %v6388_v24 = vpop.f32.mrf.mxu2  ;;  %v5855_v10 = vpop.f32.mrf.mxu3  ;;  %v9853_v22 = vld [vmem:[%s17226_s3 + $0x9d0] sm:$0xff] }
 0x6cb   : > { %v15165_v61 = vadd.f32 %v5855_v10, %v5800_v45  ;;  %v9840_v10 = vld [vmem:[%s17226_s3 + $0x968] sm:$0xff] }
 0x6cc   : > { %7255 = vmatpush.msrb.mxu2 %v9840_v10  ;;  %v9855_v10 = vld [vmem:[%s17226_s3 + $0x9e0] sm:$0xff] }
 0x6ce   : > { %7256 = vmatpush.msrb.mxu2 %v9839_v13 }
 0x6cf   : > { %6623 = vmatmul.f32.gmra.mxu2 %v6235_v18  ;;  %7110 = vmatmul.f32.gmra.mxu3 %v6921_v11  ;;  %v6941_v18 = vsel %vm552_vm2, %v6930_v49, %v6940_v63  ;;  %v6699_v11 = vld [vmem:[#allocation2 + $0x80] sm:$0xff]  ;;  %v9856_v49 = vld [vmem:[%s17226_s3 + $0x9e8] sm:$0xff] }
 0x6d0   : > { %v6950_v15 = vrot.slane %v6699_v11, 6  ;;  %7257 = vmatpush.msrb.mxu2 %v9838_v19  ;;  %7311 = vmatpush.msra.mxu3 %v9856_v49  ;;  %v9832_v19 = vld [vmem:[%s17226_s3 + $0x928] sm:$0xff] }
 0x6d2   : > { %v6391_v4 = vpop.f32.mrf.mxu2  ;;  %v6444_v31 = vpop.f32.mrf.mxu3  ;;  %7258 = vmatpush.msrb.mxu2 %v9837_v56  ;;  %7312 = vmatpush.msra.mxu3 %v9855_v10  ;;  %v6275_v56 = vsel %vm1864_vm3, %v6264_v27, %v6274_v38  ;;  %v9850_v10 = vld [vmem:[%s17226_s3 + $0x9b8] sm:$0xff] }
 0x6d3   : > { %v15173_v53 = vadd.f32 %v6444_v31, %v6388_v24 }
 0x6d7   : > { %6626 = vmatmul.f32.gmra.mxu2 %v6245_v47  ;;  %7113 = vmatmul.f32.gmra.mxu3 %v6931_v39  ;;  %v9836_v39 = vld [vmem:[%s17226_s3 + $0x948] sm:$0xff] }
 0x6d8   : > { %7259 = vmatpush.msrb.mxu2 %v9836_v39  ;;  %v6709_v39 = vld [vmem:[#allocation2 + $0xc0] sm:$0xff] }
 0x6da   : > { %v6394_v17 = vpop.f32.mrf.mxu2  ;;  %v6447_v45 = vpop.f32.mrf.mxu3  ;;  %7260 = vmatpush.msrb.mxu2 %v9835_v7  ;;  %v9830_v7 = vld [vmem:[%s17226_s3 + $0x918] sm:$0xff] }
 0x6db   : > { %v15184_v24 = vadd.f32 %v6447_v45, %v6391_v4  ;;  %v6951_v45 = vsel %vm552_vm2, %v6940_v63, %v6950_v15  ;;  %v9833_v63 = vld [vmem:[%s17226_s3 + $0x930] sm:$0xff] }
 0x6df   : > { %6629 = vmatmul.f32.gmra.mxu2 %v6255_v41  ;;  %7116 = vmatmul.f32.gmra.mxu3 %v6941_v18  ;;  %v6960_v41 = vrot.slane %v6704_v12, 6  ;;  %v9854_v18 = vld [vmem:[%s17226_s3 + $0x9d8] sm:$0xff]  ;;  %v6970_v12 = vrot.slane %v6709_v39, 6 }
 0x6e0   : > { %7313 = vmatpush.msra.mxu3 %v9854_v18  ;;  %v9827_v18 = vld [vmem:[%s17226_s3 + $0x900] sm:$0xff]  ;;  %v9846_v39 = vld [vmem:[%s17226_s3 + $0x998] sm:$0xff] }
 0x6e1   : > { %v6961_v49 = vsel %vm552_vm2, %v6950_v15, %v6960_v41 }
 0x6e2   : > { %v6397_v4 = vpop.f32.mrf.mxu2  ;;  %v6450_v31 = vpop.f32.mrf.mxu3  ;;  %7314 = vmatpush.msra.mxu3 %v9853_v22  ;;  %v6971_v22 = vsel %vm552_vm2, %v6960_v41, %v6970_v12 }
 0x6e3   : > { %v15207_v47 = vadd.f32 %v6450_v31, %v6394_v17  ;;  %v9834_v17 = vld [vmem:[%s17226_s3 + $0x938] sm:$0xff]  ;;  %v9831_v31 = vld [vmem:[%s17226_s3 + $0x920] sm:$0xff] }
 0x6e4   : > { %7261 = vmatpush.msrb.mxu2 %v9834_v17  ;;  %v9829_v17 = vld [vmem:[%s17226_s3 + $0x910] sm:$0xff] }
 0x6e6   : > { %7262 = vmatpush.msrb.mxu2 %v9833_v63  ;;  %v9828_v63 = vld [vmem:[%s17226_s3 + $0x908] sm:$0xff] }
 0x6e7   : > { %6632 = vmatmul.f32.gmra.mxu2 %v6265_v28  ;;  %7119 = vmatmul.f32.gmra.mxu3 %v6951_v45  ;;  %v9851_v28 = vld [vmem:[%s17226_s3 + $0x9c0] sm:$0xff]  ;;  %v6284_v45 = vrot.slane %v15067_v16, 4  ;;  %v9849_v16 = vld [vmem:[%s17226_s3 + $0x9b0] sm:$0xff] }
 0x6e8   : > { %7263 = vmatpush.msrb.mxu2 %v9832_v19 }
 0x6e9   : > { %v6285_v19 = vsel %vm1864_vm3, %v6274_v38, %v6284_v45  ;;  %v6294_v38 = vrot.slane %v15094_v32, 4 }
 0x6ea   : > { %v6400_v5 = vpop.f32.mrf.mxu2  ;;  %v6453_v13 = vpop.f32.mrf.mxu3  ;;  %7264 = vmatpush.msrb.mxu2 %v9831_v31  ;;  %v6714_v31 = vld [vmem:[#allocation2 + $0x68] sm:$0xff] }
 0x6eb   : > { %v15230_v11 = vadd.f32 %v6453_v13, %v6397_v4  ;;  %v9852_v4 = vld [vmem:[%s17226_s3 + $0x9c8] sm:$0xff]  ;;  %v6980_v41 = vrot.slane %v6714_v31, 6 }
 0x6ec   : > { %7315 = vmatpush.msra.mxu3 %v9852_v4  ;;  %7265 = vmatpush.msrb.mxu2 %v9830_v7 }
 0x6ed   : > { %v6981_v32 = vsel %vm552_vm2, %v6970_v12, %v6980_v41 }
 0x6ee   : > { %7316 = vmatpush.msra.mxu3 %v9851_v28  ;;  %7266 = vmatpush.msrb.mxu2 %v9829_v17  ;;  %v9845_v28 = vld [vmem:[%s17226_s3 + $0x990] sm:$0xff]  ;;  %v6295_v17 = vsel %vm1864_vm3, %v6284_v45, %v6294_v38 }
 0x6ef   : > { %6635 = vmatmul.f32.gmra.mxu2 %v6275_v56  ;;  %7122 = vmatmul.f32.gmra.mxu3 %v6961_v49  ;;  %v9847_v56 = vld [vmem:[%s17226_s3 + $0x9a0] sm:$0xff] }
 0x6f0   : > { %7317 = vmatpush.msra.mxu3 %v9850_v10  ;;  %7267 = vmatpush.msrb.mxu2 %v9828_v63  ;;  %v6719_v10 = vld [vmem:[#allocation2 + $0xa8] sm:$0xff] }
 0x6f2   : > { %v6403_v27 = vpop.f32.mrf.mxu2  ;;  %v6456_v15 = vpop.f32.mrf.mxu3  ;;  %7318 = vmatpush.msra.mxu3 %v9849_v16  ;;  %7268 = vmatpush.msrb.mxu2 %v9827_v18  ;;  %v6304_v18 = vrot.slane %v15117_v6, 4  ;;  %v6667_v6 = vld [vmem:[#allocation2 + $0x60] sm:$0xc0] }
 0x6f3   : > { %v15259_v13 = vadd.f32 %v6456_v15, %v6400_v5  ;;  %v9848_v5 = vld [vmem:[%s17226_s3 + $0x9a8] sm:$0xff] }
 0x6f4   : > { %7319 = vmatpush.msra.mxu3 %v9848_v5  ;;  %v9844_v15 = vld [vmem:[%s17226_s3 + $0x988] sm:$0xff]  ;;  %v6305_v45 = vsel %vm1864_vm3, %v6294_v38, %v6304_v18  ;;  %v6724_v5 = vld [vmem:[#allocation2 + $0x1f0] sm:$0xff]  ;;  %v6894_v38 = vrot.slane %v6667_v6, 6 }
 0x6f6   : > { %7320 = vmatpush.msra.mxu3 %v9847_v56 }
 0x6f7   : > { %6638 = vmatmul.f32.gmra.mxu2 %v6285_v19  ;;  %7125 = vmatmul.f32.gmra.mxu3 %v6971_v22  ;;  %v6990_v19 = vrot.slane %v6719_v10, 6 }
 0x6f8   : > { %7321 = vmatpush.msra.mxu3 %v9846_v39 }
 0x6f9   : > { %v6991_v12 = vsel %vm552_vm2, %v6980_v41, %v6990_v19 }
 0x6fa   : > { %v6406_v49 = vpop.f32.mrf.mxu2  ;;  %v6459_v4 = vpop.f32.mrf.mxu3  ;;  %7322 = vmatpush.msra.mxu3 %v9845_v28 }
 0x6fb   : > { %v15282_v7 = vadd.f32 %v6459_v4, %v6403_v27  ;;  %v9843_v27 = vld [vmem:[%s17226_s3 + $0x980] sm:$0xff]  ;;  %v7000_v4 = vrot.slane %v6724_v5, 6 }
 0x6fc   : > { %7323 = vmatpush.msra.mxu3 %v9844_v15  ;;  %v6672_v15 = vld [vmem:[#allocation2 + $0x218] sm:$0xff] }
 0x6fd   : > { %v7001_v28 = vsel %vm552_vm2, %v6990_v19, %v7000_v4  ;;  %v6895_v10 = vrot.slane %v6672_v15, 6 }
 0x6fe   : > { %7324 = vmatpush.msra.mxu3 %v9843_v27 }
 0x6ff   : > { %6641 = vmatmul.f32.gmra.mxu2 %v6295_v17  ;;  %7128 = vmatmul.f32.gmra.mxu3 %v6981_v32 }
 0x702   : > { %v6409_v63 = vpop.f32.mrf.mxu2  ;;  %v6462_v16 = vpop.f32.mrf.mxu3 }
 0x703   : > { %v15296_v22 = vadd.f32 %v6462_v16, %v6406_v49  ;;  %v6729_v49 = vld [vmem:[#allocation2 + $0x2c8] sm:$0x3]  ;;  %v6896_v16 = vsel %vm552_vm2, %v6894_v38, %v6895_v10 }
 0x704   : > { %v7010_v41 = vrot.slane %v6729_v49, 6  ;;  %v6678_v49 = vld [vmem:[#allocation2 + $0x280] sm:$0xff] }
 0x707   : > { %6644 = vmatmul.f32.gmra.mxu2 %v6305_v45  ;;  %7131 = vmatmul.f32.gmra.mxu3 %v6991_v12  ;;  %v7011_v45 = vsel %vm552_vm2, %v7000_v4, %v7010_v41  ;;  %v15315_v4 = vld [vmem:[#allocation2 + $0x180] sm:$0xff] }
 0x708   : > { %v6916_v41 = vrot.slane %v15315_v4, 6 }
 0x70a   : > { %v6412_v31 = vpop.f32.mrf.mxu2  ;;  %v6465_v56 = vpop.f32.mrf.mxu3 }
 0x70b   : > { %v15300_v39 = vadd.f32 %v6465_v56, %v6409_v63  ;;  %v15307_v63 = vld [vmem:[#allocation2 + $0x90] sm:$0xff]  ;;  %v6898_v56 = vrot.slane %v15141_v59, 6 }
 0x70c   : > { %v6906_v5 = vrot.slane %v15307_v63, 6 }
 0x70e   : > { %v6917_v59 = vsel %vm552_vm2, %v6906_v5, %v6916_v41 }
 0x70f   : > { %6647 = vmatmul.f32.gmra.mxu2 %v6304_v18  ;;  %7134 = vmatmul.f32.gmra.mxu3 %v7001_v28  ;;  %v6668_v18 = vld [vmem:[#allocation2 + $0x220] sm:$0xc0] }
 0x710   : > { %v6897_v6 = vrot.slane %v6668_v18, 6  ;;  %v6683_v18 = vld [vmem:[#allocation2 + $0x200] sm:$0xff] }
 0x712   : > { %v6415_v17 = vpop.f32.mrf.mxu2  ;;  %v6468_v32 = vpop.f32.mrf.mxu3  ;;  %v6899_v15 = vsel %vm552_vm2, %v6897_v6, %v6898_v56 }
 0x713   : > { %v15303_v27 = vadd.f32 %v6468_v32, %v6412_v31  ;;  %v6907_v31 = vsel %vm552_vm2, %v6895_v10, %v6906_v5  ;;  %v15322_v10 = vld [vmem:[#allocation2 + $0x248] sm:$0xff] }
 0x714   : > { %17614 = vst [vmem:[#allocation25_spill] sm:$0xff] %v15322_v10 }
 0x717   : > { %7269 = vmatmul.f32.vlgmr.msrb.gmra.mxu2 %v6896_v16  ;;  %7137 = vmatmul.f32.gmra.mxu3 %v7011_v45  ;;  %v6908_v16 = vrot.slane %v6678_v49, 6 }
 0x71a   : > { %v6418_v19 = vpop.f32.mrf.mxu2  ;;  %v6471_v12 = vpop.f32.mrf.mxu3 }
 0x71b   : > { %v15311_v28 = vadd.f32 %v6471_v12, %v6415_v17  ;;  %v6909_v17 = vsel %vm552_vm2, %v6898_v56, %v6908_v16  ;;  %v5876_v56 = vadd.f32 %v13851_v0, %v14967_v52  ;;  %v6504_v0 = vadd.f32 %v14364_v58, %v15184_v24 }
 0x71f   : > { %7272 = vmatmul.f32.gmra.mxu2 %v6907_v31  ;;  %7325 = vmatmul.f32.vlgmr.msra.gmra.mxu3 %v6899_v15  ;;  %v6926_v31 = vrot.slane %v15322_v10, 6  ;;  %v6918_v15 = vrot.slane %v6683_v18, 6 }
 0x721   : > { %v6927_v49 = vsel %vm552_vm2, %v6916_v41, %v6926_v31  ;;  %v6919_v5 = vsel %vm552_vm2, %v6908_v16, %v6918_v15 }
 0x722   : > { %v6421_v32 = vpop.f32.mrf.mxu2  ;;  %v6474_v38 = vpop.f32.mrf.mxu3 }
 0x723   : > { %v15318_v45 = vadd.f32 %v6474_v38, %v6418_v19  ;;  %v6501_v19 = vadd.f32 %v14322_v60, %v15173_v53  ;;  %v15333_v38 = vld [vmem:[#allocation2 + $0xe8] sm:$0xff]  ;;  %v5932_v60 = vadd.f32 %v13964_v29, %v5876_v56  ;;  %v6693_v29 = vld [vmem:[#allocation2 + $0x58] sm:$0xff] }
 0x724   : > { %v6938_v24 = vrot.slane %v6693_v29, 6 }
 0x727   : > { %7275 = vmatmul.f32.gmra.mxu2 %v6917_v59  ;;  %7328 = vmatmul.f32.gmra.mxu3 %v6909_v17  ;;  %v6688_v59 = vld [vmem:[#allocation2 + $0x1c0] sm:$0xff]  ;;  %v6557_v17 = vadd.f32 %v14547_v35, %v6501_v19  ;;  %v5879_v35 = vadd.f32 %v13887_v3, %v14982_v44  ;;  %v9906_v44 = vld [vmem:[%s17226_s3 + $0xb78] sm:$0xff] }
 0x728   : > { %v6928_v10 = vrot.slane %v6688_v59, 6  ;;  %v15348_v19 = vld [vmem:[#allocation2 + $0x1e0] sm:$0xff]  ;;  %7636 = vmatpush.msra.mxu2 %v9906_v44 }
 0x729   : > { %v6946_v58 = vrot.slane %v15348_v19, 6 }
 0x72a   : > { %v6424_v12 = vpop.f32.mrf.mxu2  ;;  %v6477_v6 = vpop.f32.mrf.mxu3 }
 0x72b   : > { %v15325_v33 = vadd.f32 %v6477_v6, %v6421_v32  ;;  %v6936_v6 = vrot.slane %v15333_v38, 6 }
 0x72d   : > { %v6937_v16 = vsel %vm552_vm2, %v6926_v31, %v6936_v6  ;;  %v5935_v31 = vadd.f32 %v14043_v1, %v5879_v35  ;;  %v5882_v1 = vadd.f32 %v13924_v51, %v15008_v62  ;;  %v9905_v62 = vld [vmem:[%s17226_s3 + $0xb70] sm:$0xff] }
 0x72e   : > { %v9921_v35 = vld [vmem:[%s17226_s3 + $0xbf0] sm:$0xff]  ;;  %7637 = vmatpush.msra.mxu2 %v9905_v62 }
 0x72f   : > { %7278 = vmatmul.f32.gmra.mxu2 %v6927_v49  ;;  %7331 = vmatmul.f32.gmra.mxu3 %v6919_v5  ;;  %v6929_v49 = vsel %vm552_vm2, %v6918_v15, %v6928_v10  ;;  %v6507_v15 = vadd.f32 %v14426_v50, %v15207_v47  ;;  %v15369_v50 = vld [vmem:[#allocation2 + $0x158] sm:$0xff] }
 0x730   : > { %v6698_v47 = vld [vmem:[#allocation2 + $0x238] sm:$0xff] }
 0x732   : > { %v6612_v18 = vpop.f32.mrf.mxu2  ;;  %v6480_v32 = vpop.f32.mrf.mxu3 }
 0x733   : > { %v6613_v53 = vadd.f32 %v6612_v18, %v6557_v17  ;;  %v15338_v41 = vadd.f32 %v6480_v32, %v6424_v12  ;;  %v6560_v12 = vadd.f32 %v14598_v40, %v6504_v0  ;;  %v9922_v40 = vld [vmem:[%s17226_s3 + $0xbf8] sm:$0xff]  ;;  %v6947_v17 = vsel %vm552_vm2, %v6936_v6, %v6946_v58 }
 0x734   : > { %v6939_v18 = vsel %vm552_vm2, %v6928_v10, %v6938_v24  ;;  %7692 = vmatpush.msrb.mxu3 %v9922_v40  ;;  %v6563_v32 = vadd.f32 %v14630_v34, %v6507_v15  ;;  %v6956_v0 = vrot.slane %v15369_v50, 6  ;;  %v6948_v6 = vrot.slane %v6698_v47, 6  ;;  %v9904_v34 = vld [vmem:[%s17226_s3 + $0xb68] sm:$0xff] }
 0x735   : > { %v15342_v52 = vadd.f32 %v6613_v53, %v5932_v60  ;;  %v5938_v10 = vadd.f32 %v14128_v20, %v5882_v1  ;;  %7638 = vmatpush.msra.mxu2 %v9904_v34  ;;  %v6513_v40 = vadd.f32 %v14569_v57, %v15259_v13  ;;  %v9900_v1 = vld [vmem:[%s17226_s3 + $0xb48] sm:$0xff]  ;;  %v5888_v57 = vadd.f32 %v14045_v37, %v15072_v8  ;;  %v15423_v13 = vld [vmem:[#allocation2 + $0xb8] sm:$0xff] }
 0x736   : > { %v6957_v20 = vsel %vm552_vm2, %v6946_v58, %v6956_v0  ;;  %v6949_v29 = vsel %vm552_vm2, %v6938_v24, %v6948_v6  ;;  %7693 = vmatpush.msrb.mxu3 %v9921_v35  ;;  %v9902_v58 = vld [vmem:[%s17226_s3 + $0xb58] sm:$0xff]  ;;  %v6516_v35 = vadd.f32 %v14612_v46, %v15282_v7  ;;  %v9917_v46 = vld [vmem:[%s17226_s3 + $0xbd0] sm:$0xff] }
 0x737   : > { %7281 = vmatmul.f32.gmra.mxu2 %v6937_v16  ;;  %7334 = vmatmul.f32.gmra.mxu3 %v6929_v49  ;;  %v6510_v49 = vadd.f32 %v14505_v42, %v15230_v11  ;;  %v5885_v42 = vadd.f32 %v13980_v30, %v15037_v14  ;;  %v15393_v11 = vld [vmem:[#allocation2 + $0x1e8] sm:$0xff]  ;;  %v9898_v37 = vld [vmem:[%s17226_s3 + $0xb38] sm:$0xff]  ;;  %v5944_v62 = vadd.f32 %v14224_v26, %v5888_v57 }
 0x738   : > { %v6966_v30 = vrot.slane %v15393_v11, 6  ;;  %v17615_v7 = vld [vmem:[#allocation9_spill] sm:$0xff]  ;;  %v17618_v57 = vld [vmem:[#allocation47_spill] sm:$0xff] }
 0x739   : > { %v5941_v15 = vadd.f32 %v14188_v23, %v5885_v42  ;;  %v9896_v42 = vld [vmem:[%s17226_s3 + $0xb28] sm:$0xff] }
 0x73a   : > { %v6615_v5 = vpop.f32.mrf.mxu2  ;;  %v15351_v56 = vpop.f32.mrf.mxu3  ;;  %v6967_v23 = vsel %vm552_vm2, %v6956_v0, %v6966_v30  ;;  %v9919_v0 = vld [vmem:[%s17226_s3 + $0xbe0] sm:$0xff] }
 0x73b   : > { %v6616_v59 = vadd.f32 %v6615_v5, %v6560_v12  ;;  %v6703_v12 = vld [vmem:[#allocation2 + $0x88] sm:$0xff]  ;;  %v9903_v5 = vld [vmem:[%s17226_s3 + $0xb60] sm:$0xff] }
 0x73c   : > { %v6958_v14 = vrot.slane %v6703_v12, 6  ;;  %7639 = vmatpush.msra.mxu2 %v9903_v5  ;;  %v6713_v5 = vld [vmem:[#allocation2 + $0x118] sm:$0xff] }
 0x73d   : > { %v15357_v3 = vadd.f32 %v6616_v59, %v5935_v31  ;;  %v6566_v31 = vadd.f32 %v14652_v43, %v6510_v49  ;;  %v9901_v43 = vld [vmem:[%s17226_s3 + $0xb50] sm:$0xff] }
 0x73e   : > { %7640 = vmatpush.msra.mxu2 %v9902_v58  ;;  %v6959_v47 = vsel %vm552_vm2, %v6948_v6, %v6958_v14  ;;  %v6569_v6 = vadd.f32 %v14663_v25, %v6513_v40  ;;  %v9897_v25 = vld [vmem:[%s17226_s3 + $0xb30] sm:$0xff] }
 0x73f   : > { %7284 = vmatmul.f32.gmra.mxu2 %v6947_v17  ;;  %7337 = vmatmul.f32.gmra.mxu3 %v6939_v18  ;;  %v9920_v18 = vld [vmem:[%s17226_s3 + $0xbe8] sm:$0xff]  ;;  %v15459_v58 = vld [vmem:[#allocation2 + $0x290] sm:$0xff] }
 0x740   : > { %7641 = vmatpush.msra.mxu2 %v9901_v43  ;;  %7694 = vmatpush.msrb.mxu3 %v9920_v18  ;;  %v6986_v18 = vrot.slane %v15459_v58, 6 }
 0x742   : > { %v6618_v60 = vpop.f32.mrf.mxu2  ;;  %v15372_v53 = vpop.f32.mrf.mxu3  ;;  %7642 = vmatpush.msra.mxu2 %v9900_v1  ;;  %7695 = vmatpush.msrb.mxu3 %v9919_v0  ;;  %v6978_v1 = vrot.slane %v6713_v5, 6 }
 0x743   : > { %v6619_v16 = vadd.f32 %v6618_v60, %v6563_v32  ;;  %v6708_v32 = vld [vmem:[#allocation2 + $0x270] sm:$0xff]  ;;  %v9899_v60 = vld [vmem:[%s17226_s3 + $0xb40] sm:$0xff] }
 0x744   : > { %v6968_v49 = vrot.slane %v6708_v32, 6  ;;  %7643 = vmatpush.msra.mxu2 %v9899_v60  ;;  %v6519_v60 = vadd.f32 %v17618_v57, %v15296_v22  ;;  %v9913_v22 = vld [vmem:[%s17226_s3 + $0xbb0] sm:$0xff]  ;;  %v17623_v57 = vld [vmem:[#allocation11_spill] sm:$0xff] }
 0x745   : > { %v15378_v51 = vadd.f32 %v6619_v16, %v5938_v10  ;;  %v6976_v16 = vrot.slane %v15423_v13, 6 }
 0x746   : > { %7644 = vmatpush.msra.mxu2 %v9898_v37  ;;  %v6969_v12 = vsel %vm552_vm2, %v6958_v14, %v6968_v49  ;;  %v17616_v14 = vld [vmem:[#allocation20_spill] sm:$0xff]  ;;  %v9914_v37 = vld [vmem:[%s17226_s3 + $0xbb8] sm:$0xff] }
 0x747   : > { %7287 = vmatmul.f32.gmra.mxu2 %v6957_v20  ;;  %7340 = vmatmul.f32.gmra.mxu3 %v6949_v29  ;;  %v9918_v29 = vld [vmem:[%s17226_s3 + $0xbd8] sm:$0xff]  ;;  %v6977_v26 = vsel %vm552_vm2, %v6966_v30, %v6976_v16  ;;  %v9916_v30 = vld [vmem:[%s17226_s3 + $0xbc8] sm:$0xff] }
 0x748   : > { %7645 = vmatpush.msra.mxu2 %v9897_v25  ;;  %7696 = vmatpush.msrb.mxu3 %v9918_v29  ;;  %v17619_v25 = vld [vmem:[#allocation7_spill] sm:$0xff] }
 0x749   : > { %v5894_v29 = vadd.f32 %v17619_v25, %v15125_v48  ;;  %v9911_v48 = vld [vmem:[%s17226_s3 + $0xba0] sm:$0xff] }
 0x74a   : > { %v6621_v24 = vpop.f32.mrf.mxu2  ;;  %v15402_v59 = vpop.f32.mrf.mxu3  ;;  %7646 = vmatpush.msra.mxu2 %v9896_v42  ;;  %7697 = vmatpush.msrb.mxu3 %v9917_v46  ;;  %v15498_v42 = vld [vmem:[#allocation2 + $0x130] sm:$0xff] }
 0x74b   : > { %v6622_v44 = vadd.f32 %v6621_v24, %v6566_v31  ;;  %v5891_v31 = vadd.f32 %v17615_v7, %v15104_v54  ;;  %v9895_v24 = vld [vmem:[%s17226_s3 + $0xb20] sm:$0xff]  ;;  %v9894_v54 = vld [vmem:[%s17226_s3 + $0xb18] sm:$0xff]  ;;  %v6996_v7 = vrot.slane %v15498_v42, 6 }
 0x74c   : > { %7647 = vmatpush.msra.mxu2 %v9895_v24  ;;  %7698 = vmatpush.msrb.mxu3 %v9916_v30  ;;  %v17621_v24 = vld [vmem:[#allocation12_spill] sm:$0xff] }
 0x74d   : > { %v15408_v17 = vadd.f32 %v6622_v44, %v5941_v15  ;;  %v6572_v15 = vadd.f32 %v17616_v14, %v6516_v35  ;;  %v9915_v44 = vld [vmem:[%s17226_s3 + $0xbc0] sm:$0xff]  ;;  %v6718_v35 = vld [vmem:[#allocation2 + $0x108] sm:$0xff]  ;;  %v5950_v30 = vadd.f32 %v17621_v24, %v5894_v29 }
 0x74e   : > { %7648 = vmatpush.msra.mxu2 %v9894_v54  ;;  %7699 = vmatpush.msrb.mxu3 %v9915_v44 }
 0x74f   : > { %7290 = vmatmul.f32.gmra.mxu2 %v6967_v23  ;;  %7343 = vmatmul.f32.gmra.mxu3 %v6959_v47  ;;  %v17617_v23 = vld [vmem:[#allocation13_spill] sm:$0xff] }
 0x750   : > { %v5947_v47 = vadd.f32 %v17617_v23, %v5891_v31  ;;  %7700 = vmatpush.msrb.mxu3 %v9914_v37  ;;  %v6988_v31 = vrot.slane %v6718_v35, 6  ;;  %v9909_v23 = vld [vmem:[%s17226_s3 + $0xb90] sm:$0xff]  ;;  %v9908_v37 = vld [vmem:[%s17226_s3 + $0xb88] sm:$0xff] }
 0x752   : > { %v6624_v8 = vpop.f32.mrf.mxu2  ;;  %v15435_v10 = vpop.f32.mrf.mxu3  ;;  %7701 = vmatpush.msrb.mxu3 %v9913_v22  ;;  %v17625_v22 = vld [vmem:[#allocation40_spill] sm:$0xff] }
 0x753   : > { %v6625_v34 = vadd.f32 %v6624_v8, %v6569_v6  ;;  %v9893_v6 = vld [vmem:[%s17226_s3 + $0xb10] sm:$0xff]  ;;  %v9892_v8 = vld [vmem:[%s17226_s3 + $0xb08] sm:$0xff] }
 0x754   : > { %7649 = vmatpush.msra.mxu2 %v9893_v6  ;;  %v6723_v6 = vld [vmem:[#allocation2 + $0x110] sm:$0xff] }
 0x755   : > { %v15441_v20 = vadd.f32 %v6625_v34, %v5944_v62  ;;  %v6987_v62 = vsel %vm552_vm2, %v6976_v16, %v6986_v18  ;;  %v6979_v34 = vsel %vm552_vm2, %v6968_v49, %v6978_v1  ;;  %v9891_v16 = vld [vmem:[%s17226_s3 + $0xb00] sm:$0xff]  ;;  %v9912_v49 = vld [vmem:[%s17226_s3 + $0xba8] sm:$0xff]  ;;  %v6998_v35 = vrot.slane %v6723_v6, 6 }
 0x756   : > { %7650 = vmatpush.msra.mxu2 %v9892_v8  ;;  %7702 = vmatpush.msrb.mxu3 %v9912_v49  ;;  %v17624_v8 = vld [vmem:[#allocation50_spill] sm:$0xff] }
 0x757   : > { %7293 = vmatmul.f32.gmra.mxu2 %v6977_v26  ;;  %7346 = vmatmul.f32.gmra.mxu3 %v6969_v12  ;;  %v17620_v26 = vld [vmem:[#allocation17_spill] sm:$0xff] }
 0x758   : > { %v6575_v12 = vadd.f32 %v17620_v26, %v6519_v60  ;;  %7651 = vmatpush.msra.mxu2 %v9891_v16  ;;  %7703 = vmatpush.msrb.mxu3 %v9911_v48  ;;  %v5897_v60 = vadd.f32 %v17623_v57, %v15132_v55  ;;  %v17626_v16 = vld [vmem:[#allocation16_spill] sm:$0xff]  ;;  %v6999_v48 = vsel %vm552_vm2, %v6988_v31, %v6998_v35 }
 0x759   : > { %v6525_v49 = vadd.f32 %v17626_v16, %v15303_v27 }
 0x75a   : > { %v6627_v40 = vpop.f32.mrf.mxu2  ;;  %v15474_v43 = vpop.f32.mrf.mxu3  ;;  %v5953_v25 = vadd.f32 %v17625_v22, %v5897_v60 }
 0x75b   : > { %v6628_v32 = vadd.f32 %v6627_v40, %v6572_v15  ;;  %v17622_v15 = vld [vmem:[#allocation48_spill] sm:$0xff]  ;;  %v9910_v40 = vld [vmem:[%s17226_s3 + $0xb98] sm:$0xff] }
 0x75c   : > { %v6522_v54 = vadd.f32 %v17622_v15, %v15300_v39  ;;  %7704 = vmatpush.msrb.mxu3 %v9910_v40  ;;  %v15528_v39 = vld [vmem:[#allocation2 + $0x50] sm:$0xff] }
 0x75d   : > { %v15480_v0 = vadd.f32 %v6628_v32, %v5947_v47  ;;  %v6997_v47 = vsel %vm552_vm2, %v6986_v18, %v6996_v7  ;;  %v6989_v32 = vsel %vm552_vm2, %v6978_v1, %v6988_v31  ;;  %v9907_v18 = vld [vmem:[%s17226_s3 + $0xb80] sm:$0xff]  ;;  %v7006_v55 = vrot.slane %v15528_v39, 6  ;;  %v17628_v15 = vld [vmem:[#allocation54_spill] sm:$0xff] }
 0x75e   : > { %7705 = vmatpush.msrb.mxu3 %v9909_v23 }
 0x75f   : > { %7296 = vmatmul.f32.gmra.mxu2 %v6987_v62  ;;  %7349 = vmatmul.f32.gmra.mxu3 %v6979_v34  ;;  %v6578_v62 = vadd.f32 %v17624_v8, %v6522_v54  ;;  %v6581_v54 = vadd.f32 %v17628_v15, %v6525_v49  ;;  %v17631_v8 = vld [vmem:[#allocation10_spill] sm:$0xff]  ;;  %v17633_v49 = vld [vmem:[#allocation43_spill] sm:$0xff]  ;;  %v17636_v15 = vld [vmem:[#allocation57_spill] sm:$0xff] }
 0x760   : > { %7706 = vmatpush.msrb.mxu3 %v9908_v37 }
 0x762   : > { %v6630_v5 = vpop.f32.mrf.mxu2  ;;  %v15510_v46 = vpop.f32.mrf.mxu3  ;;  %7707 = vmatpush.msrb.mxu3 %v9907_v18  ;;  %v6733_v18 = vld [vmem:[#allocation2 + $0x8] sm:$0x3] }
 0x763   : > { %v6631_v14 = vadd.f32 %v6630_v5, %v6575_v12  ;;  %v7007_v12 = vsel %vm552_vm2, %v6996_v7, %v7006_v55  ;;  %v17627_v5 = vld [vmem:[#allocation8_spill] sm:$0xff]  ;;  %v17630_v7 = vld [vmem:[#allocation51_spill] sm:$0xff]  ;;  %v7018_v16 = vrot.slane %v6733_v18, 6 }
 0x764   : > { %v5900_v24 = vadd.f32 %v17627_v5, %v15138_v21  ;;  %v6528_v31 = vadd.f32 %v17630_v7, %v15311_v28  ;;  %v15578_v7 = vpop.f32.mrf.mxu0 }
 0x765   : > { %v15516_v44 = vadd.f32 %v6631_v14, %v5950_v30  ;;  %v6732_v30 = vld [vmem:[#allocation2 + $0x288] sm:$0x3]  ;;  %v6728_v14 = vld [vmem:[#allocation2 + $0x100] sm:$0xff] }
 0x766   : > { %v7008_v27 = vrot.slane %v6728_v14, 6 }
 0x767   : > { %7299 = vmatmul.f32.gmra.mxu2 %v6997_v47  ;;  %7352 = vmatmul.f32.gmra.mxu3 %v6989_v32  ;;  %v7016_v47 = vrot.slane %v6732_v30, 6  ;;  %v17629_v32 = vld [vmem:[#allocation45_spill] sm:$0xff]  ;;  %v17635_v30 = vld [vmem:[#allocation14_spill] sm:$0xff] }
 0x768   : > { %v5956_v57 = vadd.f32 %v17629_v32, %v5900_v24  ;;  %v7009_v37 = vsel %vm552_vm2, %v6998_v35, %v7008_v27  ;;  %v7019_v24 = vsel %vm552_vm2, %v7008_v27, %v7018_v16  ;;  %v5906_v14 = vadd.f32 %v17635_v30, %v15154_v36  ;;  %v17637_v32 = vld [vmem:[#allocation44_spill] sm:$0xff]  ;;  %v7385_v27 = vld [vmem:[#allocation2 + $0x38] sm:$0xff]  ;;  %v17639_v36 = vld [vmem:[#allocation41_spill] sm:$0xff] }
 0x769   : > { %v7017_v21 = vsel %vm552_vm2, %v7006_v55, %v7016_v47  ;;  %v17634_v55 = vld [vmem:[#allocation49_spill] sm:$0xff] }
 0x76a   : > { %v6633_v1 = vpop.f32.mrf.mxu2  ;;  %v15537_v34 = vpop.f32.mrf.mxu3  ;;  %v6531_v35 = vadd.f32 %v17634_v55, %v15318_v45  ;;  %v17638_v45 = vld [vmem:[#allocation22_spill] sm:$0xff] }
 0x76b   : > { %v6634_v29 = vadd.f32 %v6633_v1, %v6578_v62  ;;  %v5903_v62 = vadd.f32 %v17631_v8, %v15148_v9  ;;  %v17632_v1 = vld [vmem:[#allocation52_spill] sm:$0xff]  ;;  %v7380_v9 = vld [vmem:[#allocation2 + $0x150] sm:$0xff]  ;;  %v5909_v8 = vadd.f32 %v17639_v36, %v15160_v2  ;;  %v17643_v2 = vld [vmem:[#allocation15_spill] sm:$0xff] }
 0x76c   : > { %v6584_v22 = vadd.f32 %v17632_v1, %v6528_v31  ;;  %v6534_v31 = vadd.f32 %v17638_v45, %v15325_v33  ;;  %v17642_v33 = vld [vmem:[#allocation19_spill] sm:$0xff]  ;;  %v7390_v55 = vld [vmem:[#allocation2 + $0x210] sm:$0xff] }
 0x76d   : > { %v15543_v26 = vadd.f32 %v6634_v29, %v5953_v25  ;;  %v5959_v28 = vadd.f32 %v17633_v49, %v5903_v62  ;;  %v17640_v62 = vld [vmem:[#allocation24_spill] sm:$0xff]  ;;  %v7395_v45 = vld [vmem:[#allocation2 + $0xb0] sm:$0xff] }
 0x76e   : > { %v6590_v18 = vadd.f32 %v17640_v62, %v6534_v31 }
 0x76f   : > { %7302 = vmatmul.f32.gmra.mxu2 %v7007_v12  ;;  %7355 = vmatmul.f32.gmra.mxu3 %v6999_v48  ;;  %v15565_v48 = vpop.f32.mrf.mxu1 }
 0x772   : > { %v6636_v40 = vpop.f32.mrf.mxu2  ;;  %v15550_v23 = vpop.f32.mrf.mxu3 }
 0x773   : > { %v6637_v60 = vadd.f32 %v6636_v40, %v6581_v54  ;;  %v6587_v54 = vadd.f32 %v17636_v15, %v6531_v35  ;;  %v15597_v35 = vpop.f32.mrf.mxu0 }
 0x775   : > { %v15555_v6 = vadd.f32 %v6637_v60, %v5956_v57  ;;  %v5962_v57 = vadd.f32 %v17637_v32, %v5906_v14  ;;  %v17646_v32 = vld [vmem:[#allocation53_spill] sm:$0xff] }
 0x777   : > { %7305 = vmatmul.f32.gmra.mxu2 %v7017_v21  ;;  %7358 = vmatmul.f32.gmra.mxu3 %v7009_v37  ;;  %v15584_v37 = vpop.f32.mrf.mxu1 }
 0x77a   : > { %v6639_v25 = vpop.f32.mrf.mxu2  ;;  %v15562_v29 = vpop.f32.mrf.mxu3 }
 0x77b   : > { %v6640_v12 = vadd.f32 %v6639_v25, %v6584_v22  ;;  %v17641_v25 = vld [vmem:[#allocation18_spill] sm:$0xff]  ;;  %v15611_v31 = vpop.f32.mrf.mxu0 }
 0x77c   : > { %v5965_v16 = vadd.f32 %v17641_v25, %v5909_v8 }
 0x77d   : > { %v15569_v5 = vadd.f32 %v6640_v12, %v5959_v28  ;;  %v6537_v28 = vadd.f32 %v17642_v33, %v15338_v41 }
 0x77f   : > { %7652 = vmatmul.f32.vlgmr.msra.gmra.mxu2 %v7380_v9  ;;  %7361 = vmatmul.f32.gmra.mxu3 %v7019_v24  ;;  %v5912_v9 = vadd.f32 %v17643_v2, %v15165_v61  ;;  %v17644_v24 = vld [vmem:[#allocation56_spill] sm:$0xff]  ;;  %v17647_v61 = vld [vmem:[#allocation25_spill] sm:$0xff] }
 0x780   : > { %v6593_v30 = vadd.f32 %v17644_v24, %v6537_v28 }
 0x782   : > { %v6642_v40 = vpop.f32.mrf.mxu2  ;;  %v15575_v47 = vpop.f32.mrf.mxu3 }
 0x783   : > { %v6643_v60 = vadd.f32 %v6642_v40, %v6587_v54  ;;  %v17645_v54 = vld [vmem:[#allocation46_spill] sm:$0xff] }
 0x784   : > { %v5968_v40 = vadd.f32 %v17645_v54, %v5912_v9 }
 0x785   : > { %v15582_v21 = vadd.f32 %v6643_v60, %v5962_v57  ;;  %v7159_v57 = vadd.f32 %v17646_v32, %v15351_v56  ;;  %v17650_v56 = vld [vmem:[#allocation59_spill] sm:$0xff] }
 0x787   : > { %7655 = vmatmul.f32.gmra.mxu2 %v7385_v27  ;;  %7708 = vmatmul.f32.vlgmr.msrb.gmra.mxu3 %v15307_v63  ;;  %v7226_v63 = vpop.f32.mrf.mxu1 }
 0x78a   : > { %v6645_v1 = vpop.f32.mrf.mxu2  ;;  %v15590_v22 = vpop.f32.mrf.mxu3 }
 0x78b   : > { %v6646_v49 = vadd.f32 %v6645_v1, %v6590_v18  ;;  %v17649_v1 = vld [vmem:[#allocation21_spill] sm:$0xff] }
 0x78c   : > { %v7162_v25 = vadd.f32 %v17649_v1, %v15372_v53 }
 0x78d   : > { %v15595_v12 = vadd.f32 %v6646_v49, %v5965_v16  ;;  %v7400_v16 = vld [vmem:[#allocation2 + $0x2c0] sm:$0xff] }
 0x78e   : > { %v7218_v49 = vadd.f32 %v17650_v56, %v7162_v25 }
 0x78f   : > { %7658 = vmatmul.f32.gmra.mxu2 %v7390_v55  ;;  %7711 = vmatmul.f32.gmra.mxu3 %v15315_v4  ;;  %v17648_v4 = vld [vmem:[#allocation23_spill] sm:$0xff]  ;;  %v7229_v62 = vpop.f32.mrf.mxu1  ;;  %v15620_v55 = vpop.f32.mrf.mxu0 }
 0x790   : > { %v7215_v27 = vadd.f32 %v17648_v4, %v7159_v57 }
 0x792   : > { %v6648_v14 = vpop.f32.mrf.mxu2  ;;  %v15603_v15 = vpop.f32.mrf.mxu3 }
 0x793   : > { %v6649_v41 = vadd.f32 %v6648_v14, %v6593_v30  ;;  %v7405_v14 = vld [vmem:[#allocation2 + $0xd8] sm:$0xff] }
 0x795   : > { %v15608_v60 = vadd.f32 %v6649_v41, %v5968_v40 }
 0x797   : > { %7661 = vmatmul.f32.gmra.mxu2 %v7395_v45  ;;  %7714 = vmatmul.f32.gmra.mxu3 %v17647_v61  ;;  %v15622_v24 = vpop.f32.mrf.mxu1  ;;  %v15630_v32 = vpop.f32.mrf.mxu0  ;;  %v7410_v45 = vld [vmem:[#allocation2 + $0x1c8] sm:$0xff] }
 0x79a   : > { %v7270_v36 = vpop.f32.mrf.mxu2  ;;  %v15614_v8 = vpop.f32.mrf.mxu3 }
 0x79b   : > { %v7271_v18 = vadd.f32 %v7270_v36, %v7215_v27  ;;  %v17652_v36 = vld [vmem:[#allocation60_spill] sm:$0xff] }
 0x79f   : > { %7664 = vmatmul.f32.gmra.mxu2 %v7400_v16  ;;  %7717 = vmatmul.f32.gmra.mxu3 %v15333_v38  ;;  %v17651_v38 = vld [vmem:[#allocation55_spill] sm:$0xff]  ;;  %v15635_v61 = vpop.f32.mrf.mxu1  ;;  %v15644_v25 = vpop.f32.mrf.mxu0 }
 0x7a0   : > { %v7165_v40 = vadd.f32 %v17651_v38, %v15402_v59  ;;  %v7168_v59 = vadd.f32 %v17652_v36, %v15435_v10  ;;  %v17654_v38 = vld [vmem:[#allocation63_spill] sm:$0xff] }
 0x7a1   : > { %v8051_v36 = vld [vmem:[%s17228_s5 + $0x178] sm:$0xff] }
 0x7a2   : > { %v7273_v33 = vpop.f32.mrf.mxu2  ;;  %v7326_v28 = vpop.f32.mrf.mxu3  ;;  %v7224_v16 = vadd.f32 %v15584_v37, %v7168_v59  ;;  %8445 = vmatpush.msra.mxu3 %v8051_v36 }
 0x7a3   : > { %v7274_v2 = vadd.f32 %v7273_v33, %v7218_v49  ;;  %v7327_v9 = vadd.f32 %v7326_v28, %v7271_v18  ;;  %v17653_v33 = vld [vmem:[#allocation58_spill] sm:$0xff] }
 0x7a4   : > { %v7171_v10 = vadd.f32 %v17653_v33, %v15474_v43  ;;  %v8049_v33 = vld [vmem:[%s17228_s5 + $0x168] sm:$0xff] }
 0x7a5   : > { %v15625_v30 = vadd.f32 %v7327_v9, %v15342_v52  ;;  %v7221_v52 = vadd.f32 %v15565_v48, %v7165_v40  ;;  %v7174_v40 = vadd.f32 %v17654_v38, %v15510_v46  ;;  %v17655_v46 = vld [vmem:[#allocation61_spill] sm:$0xff] }
 0x7a6   : > { %v7227_v9 = vadd.f32 %v7226_v63, %v7171_v10  ;;  %v8015_v10 = vld [vmem:[%s17228_s5 + $0x58] sm:$0xff]  ;;  %v8014_v38 = vld [vmem:[%s17228_s5 + $0x50] sm:$0xff] }
 0x7a7   : > { %7667 = vmatmul.f32.gmra.mxu2 %v7405_v14  ;;  %7720 = vmatmul.f32.gmra.mxu3 %v15348_v19  ;;  %v15648_v48 = vpop.f32.mrf.mxu1  ;;  %v15656_v37 = vpop.f32.mrf.mxu0 }
 0x7aa   : > { %v7276_v53 = vpop.f32.mrf.mxu2  ;;  %v7329_v54 = vpop.f32.mrf.mxu3 }
 0x7ab   : > { %v7330_v41 = vadd.f32 %v7329_v54, %v7274_v2  ;;  %v7277_v19 = vadd.f32 %v7276_v53, %v7221_v52  ;;  %v7420_v2 = vld [vmem:[#allocation2 + $0x190] sm:$0xff] }
 0x7ad   : > { %v15633_v57 = vadd.f32 %v7330_v41, %v15357_v3  ;;  %v7415_v3 = vld [vmem:[#allocation2 + $0x1f8] sm:$0xff] }
 0x7af   : > { %7670 = vmatmul.f32.gmra.mxu2 %v7410_v45  ;;  %7723 = vmatmul.f32.gmra.mxu3 %v15369_v50  ;;  %v15658_v54 = vpop.f32.mrf.mxu1  ;;  %v7230_v45 = vadd.f32 %v7229_v62, %v7174_v40  ;;  %v8018_v62 = vld [vmem:[%s17228_s5 + $0x70] sm:$0xff]  ;;  %v8031_v40 = vld [vmem:[%s17228_s5 + $0xd8] sm:$0xff] }
 0x7b2   : > { %v7279_v4 = vpop.f32.mrf.mxu2  ;;  %v7332_v27 = vpop.f32.mrf.mxu3 }
 0x7b3   : > { %v7333_v18 = vadd.f32 %v7332_v27, %v7277_v19  ;;  %v7280_v50 = vadd.f32 %v7279_v4, %v7224_v16  ;;  %v15669_v4 = vpop.f32.mrf.mxu0  ;;  %v7177_v27 = vadd.f32 %v17655_v46, %v15537_v34  ;;  %v8017_v34 = vld [vmem:[%s17228_s5 + $0x68] sm:$0xff]  ;;  %v8050_v16 = vld [vmem:[%s17228_s5 + $0x170] sm:$0xff] }
 0x7b4   : > { %8446 = vmatpush.msra.mxu3 %v8050_v16 }
 0x7b5   : > { %v15642_v1 = vadd.f32 %v7333_v18, %v15378_v51 }
 0x7b6   : > { %8447 = vmatpush.msra.mxu3 %v8049_v33  ;;  %v17658_v33 = vld [vmem:[#allocation64_spill] sm:$0xff] }
 0x7b7   : > { %7673 = vmatmul.f32.gmra.mxu2 %v7415_v3  ;;  %7726 = vmatmul.f32.gmra.mxu3 %v15393_v11  ;;  %v15682_v59 = vpop.f32.mrf.mxu1  ;;  %v8034_v3 = vld [vmem:[%s17228_s5 + $0xf0] sm:$0xff] }
 0x7ba   : > { %v7282_v56 = vpop.f32.mrf.mxu2  ;;  %v7335_v49 = vpop.f32.mrf.mxu3 }
 0x7bb   : > { %v7336_v28 = vadd.f32 %v7335_v49, %v7280_v50  ;;  %v7283_v11 = vadd.f32 %v7282_v56, %v7227_v9  ;;  %v7430_v50 = vld [vmem:[#allocation2 + $0xc8] sm:$0xff]  ;;  %v7233_v49 = vadd.f32 %v15622_v24, %v7177_v27 }
 0x7bc   : > { %v8033_v56 = vld [vmem:[%s17228_s5 + $0xe8] sm:$0xff] }
 0x7bd   : > { %v15653_v51 = vadd.f32 %v7336_v28, %v15408_v17  ;;  %v7425_v17 = vld [vmem:[#allocation2 + $0x2b8] sm:$0xff]  ;;  %v8032_v28 = vld [vmem:[%s17228_s5 + $0xe0] sm:$0xff]  ;;  %v8029_v27 = vld [vmem:[%s17228_s5 + $0xc8] sm:$0xff] }
 0x7bf   : > { %7676 = vmatmul.f32.gmra.mxu2 %v7420_v2  ;;  %7729 = vmatmul.f32.gmra.mxu3 %v15423_v13  ;;  %v8019_v13 = vld [vmem:[%s17228_s5 + $0x78] sm:$0xff] }
 0x7c0   : > { %8405 = vmatpush.msrb.mxu1 %v8019_v13  ;;  %v8030_v13 = vld [vmem:[%s17228_s5 + $0xd0] sm:$0xff] }
 0x7c2   : > { %v7285_v14 = vpop.f32.mrf.mxu2  ;;  %v7338_v53 = vpop.f32.mrf.mxu3  ;;  %8406 = vmatpush.msrb.mxu1 %v8018_v62  ;;  %v8011_v62 = vld [vmem:[%s17228_s5 + $0x38] sm:$0xff] }
 0x7c3   : > { %v7339_v43 = vadd.f32 %v7338_v53, %v7283_v11  ;;  %v7286_v63 = vadd.f32 %v7285_v14, %v7230_v45  ;;  %v17656_v11 = vld [vmem:[#allocation62_spill] sm:$0xff]  ;;  %v8013_v45 = vld [vmem:[%s17228_s5 + $0x48] sm:$0xff] }
 0x7c4   : > { %8407 = vmatpush.msrb.mxu1 %v8017_v34  ;;  %v7180_v14 = vadd.f32 %v17656_v11, %v15550_v23  ;;  %v8008_v11 = vld [vmem:[%s17228_s5 + $0x20] sm:$0xff] }
 0x7c5   : > { %v15663_v41 = vadd.f32 %v7339_v43, %v15441_v20  ;;  %v8047_v43 = vld [vmem:[%s17228_s5 + $0x158] sm:$0xff] }
 0x7c6   : > { %v7236_v46 = vadd.f32 %v15635_v61, %v7180_v14  ;;  %v8044_v61 = vld [vmem:[%s17228_s5 + $0x140] sm:$0xff]  ;;  %v8025_v14 = vld [vmem:[%s17228_s5 + $0xa8] sm:$0xff] }
 0x7c7   : > { %7679 = vmatmul.f32.gmra.mxu2 %v7425_v17  ;;  %7732 = vmatmul.f32.gmra.mxu3 %v15459_v58  ;;  %v8035_v58 = vld [vmem:[%s17228_s5 + $0xf8] sm:$0xff]  ;;  %v15727_v17 = vpop.f32.mrf.mxu0 }
 0x7c8   : > { %8425 = vmatpush.msrb.mxu2 %v8035_v58 }
 0x7ca   : > { %v7288_v52 = vpop.f32.mrf.mxu2  ;;  %v7341_v19 = vpop.f32.mrf.mxu3  ;;  %8426 = vmatpush.msrb.mxu2 %v8034_v3  ;;  %v17657_v3 = vld [vmem:[#allocation66_spill] sm:$0xff] }
 0x7cb   : > { %v7342_v20 = vadd.f32 %v7341_v19, %v7286_v63  ;;  %v7289_v2 = vadd.f32 %v7288_v52, %v7233_v49  ;;  %v8046_v63 = vld [vmem:[%s17228_s5 + $0x150] sm:$0xff]  ;;  %v7435_v52 = vld [vmem:[#allocation2 + $0x168] sm:$0xff]  ;;  %v15744_v19 = vpop.f32.mrf.mxu1  ;;  %v7183_v16 = vadd.f32 %v17657_v3, %v15562_v29  ;;  %v8043_v49 = vld [vmem:[%s17228_s5 + $0x138] sm:$0xff] }
 0x7cc   : > { %8427 = vmatpush.msrb.mxu2 %v8033_v56  ;;  %v8027_v56 = vld [vmem:[%s17228_s5 + $0xb8] sm:$0xff]  ;;  %v8021_v3 = vld [vmem:[%s17228_s5 + $0x88] sm:$0xff] }
 0x7cd   : > { %v15685_v18 = vadd.f32 %v7342_v20, %v15480_v0  ;;  %v8016_v0 = vld [vmem:[%s17228_s5 + $0x60] sm:$0xff]  ;;  %v8045_v20 = vld [vmem:[%s17228_s5 + $0x148] sm:$0xff] }
 0x7ce   : > { %8408 = vmatpush.msrb.mxu1 %v8016_v0  ;;  %8428 = vmatpush.msrb.mxu2 %v8032_v28  ;;  %v8010_v0 = vld [vmem:[%s17228_s5 + $0x30] sm:$0xff]  ;;  %v8009_v28 = vld [vmem:[%s17228_s5 + $0x28] sm:$0xff] }
 0x7cf   : > { %7682 = vmatmul.f32.gmra.mxu2 %v7430_v50  ;;  %7735 = vmatmul.f32.gmra.mxu3 %v15498_v42  ;;  %v8048_v42 = vld [vmem:[%s17228_s5 + $0x160] sm:$0xff] }
 0x7d0   : > { %8409 = vmatpush.msrb.mxu1 %v8015_v10  ;;  %8448 = vmatpush.msra.mxu3 %v8048_v42  ;;  %v7186_v10 = vadd.f32 %v17658_v33, %v15575_v47  ;;  %v7440_v42 = vld [vmem:[#allocation2 + $0x140] sm:$0xf]  ;;  %v8042_v47 = vld [vmem:[%s17228_s5 + $0x130] sm:$0xff] }
 0x7d1   : > { %8429 = vmatpush.msrb.mxu2 %v8031_v40 }
 0x7d2   : > { %v7291_v24 = vpop.f32.mrf.mxu2  ;;  %v7344_v9 = vpop.f32.mrf.mxu3  ;;  %8410 = vmatpush.msrb.mxu1 %v8014_v38  ;;  %8449 = vmatpush.msra.mxu3 %v8047_v43  ;;  %v8007_v43 = vld [vmem:[%s17228_s5 + $0x18] sm:$0xff] }
 0x7d3   : > { %v7345_v53 = vadd.f32 %v7344_v9, %v7289_v2  ;;  %8430 = vmatpush.msrb.mxu2 %v8030_v13  ;;  %v7292_v58 = vadd.f32 %v7291_v24, %v7236_v46  ;;  %v8026_v2 = vld [vmem:[%s17228_s5 + $0xb0] sm:$0xff]  ;;  %v7436_v24 = vld [vmem:[#allocation2 + $0x288] sm:$0xff]  ;;  %v15788_v9 = vpop.f32.mrf.mxu0  ;;  %v15800_v38 = vpop.f32.mrf.mxu1 }
 0x7d4   : > { %8411 = vmatpush.msrb.mxu1 %v8013_v45  ;;  %8450 = vmatpush.msra.mxu3 %v8046_v63  ;;  %v8024_v45 = vld [vmem:[%s17228_s5 + $0xa0] sm:$0xff] }
 0x7d5   : > { %v15730_v23 = vadd.f32 %v7345_v53, %v15516_v44  ;;  %v8012_v44 = vld [vmem:[%s17228_s5 + $0x40] sm:$0xff]  ;;  %8431 = vmatpush.msrb.mxu2 %v8029_v27  ;;  %v8041_v53 = vld [vmem:[%s17228_s5 + $0x128] sm:$0xff]  ;;  %v8023_v27 = vld [vmem:[%s17228_s5 + $0x98] sm:$0xff] }
 0x7d6   : > { %8412 = vmatpush.msrb.mxu1 %v8012_v44  ;;  %8451 = vmatpush.msra.mxu3 %v8045_v20  ;;  %v17659_v20 = vld [vmem:[#allocation65_spill] sm:$0xff] }
 0x7d7   : > { %7685 = vmatmul.f32.gmra.mxu2 %v7435_v52  ;;  %7738 = vmatmul.f32.gmra.mxu3 %v15528_v39  ;;  %v8028_v39 = vld [vmem:[%s17228_s5 + $0xc0] sm:$0xff] }
 0x7d8   : > { %8413 = vmatpush.msrb.mxu1 %v8011_v62  ;;  %8432 = vmatpush.msrb.mxu2 %v8028_v39  ;;  %v8040_v52 = vld [vmem:[%s17228_s5 + $0x120] sm:$0xff]  ;;  %v7189_v62 = vadd.f32 %v17659_v20, %v15590_v22  ;;  %v8039_v39 = vld [vmem:[%s17228_s5 + $0x118] sm:$0xff] }
 0x7d9   : > { %8452 = vmatpush.msra.mxu3 %v8044_v61  ;;  %v8005_v61 = vld [vmem:[%s17228_s5 + $0x8] sm:$0xff]  ;;  %v8004_v22 = vld [vmem:[%s17228_s5] sm:$0xff] }
 0x7da   : > { %v7294_v36 = vpop.f32.mrf.mxu2  ;;  %v7347_v34 = vpop.f32.mrf.mxu3  ;;  %8414 = vmatpush.msrb.mxu1 %v8010_v0  ;;  %8433 = vmatpush.msrb.mxu2 %v8027_v56  ;;  %v7245_v0 = vadd.f32 %v15682_v59, %v7189_v62  ;;  %v8037_v56 = vld [vmem:[%s17228_s5 + $0x108] sm:$0xff]  ;;  %v8036_v59 = vld [vmem:[%s17228_s5 + $0x100] sm:$0xff]  ;;  %v8063_v62 = vld [vmem:[%s17228_s5 + $0x1d8] sm:$0xff] }
 0x7db   : > { %v7348_v50 = vadd.f32 %v7347_v34, %v7292_v58  ;;  %8453 = vmatpush.msra.mxu3 %v8043_v49  ;;  %v8022_v34 = vld [vmem:[%s17228_s5 + $0x90] sm:$0xff] }
 0x7dc   : > { %8415 = vmatpush.msrb.mxu1 %v8009_v28  ;;  %8434 = vmatpush.msrb.mxu2 %v8026_v2  ;;  %v15853_v28 = vpop.f32.mrf.mxu1 }
 0x7dd   : > { %v15777_v29 = vadd.f32 %v7348_v50, %v15543_v26  ;;  %v7239_v26 = vadd.f32 %v15648_v48, %v7183_v16  ;;  %v7242_v48 = vadd.f32 %v15658_v54, %v7186_v10  ;;  %8454 = vmatpush.msra.mxu3 %v8042_v47  ;;  %v8006_v54 = vld [vmem:[%s17228_s5 + $0x10] sm:$0xff]  ;;  %v8067_v16 = vld [vmem:[%s17228_s5 + $0x1f8] sm:$0xff]  ;;  %v15844_v50 = vpop.f32.mrf.mxu0  ;;  %v8020_v10 = vld [vmem:[%s17228_s5 + $0x80] sm:$0xff] }
 0x7de   : > { %8416 = vmatpush.msrb.mxu1 %v8008_v11  ;;  %8435 = vmatpush.msrb.mxu2 %v8025_v14  ;;  %v8083_v47 = vld [vmem:[%s17228_s5 + $0x278] sm:$0xff]  ;;  %v17660_v11 = vld [vmem:[#allocation69_spill] sm:$0xff] }
 0x7df   : > { %7688 = vmatmul.f32.gmra.mxu2 %v7440_v42  ;;  %7741 = vmatmul.f32.gmra.mxu3 %v7436_v24  ;;  %v7295_v40 = vadd.f32 %v7294_v36, %v7239_v26  ;;  %v7441_v36 = vld [vmem:[#allocation2 + $0x148] sm:$0xf]  ;;  %v8066_v24 = vld [vmem:[%s17228_s5 + $0x1f0] sm:$0xff]  ;;  %v8099_v26 = vld [vmem:[%s17228_s5 + $0x2f8] sm:$0xff]  ;;  %v7192_v14 = vadd.f32 %v17660_v11, %v15603_v15 }
 0x7e0   : > { %8455 = vmatpush.msra.mxu3 %v8041_v53  ;;  %8417 = vmatpush.msrb.mxu1 %v8007_v43  ;;  %v17661_v15 = vld [vmem:[#allocation67_spill] sm:$0xff]  ;;  %v8077_v11 = vld [vmem:[%s17228_s5 + $0x248] sm:$0xff] }
 0x7e1   : > { %8436 = vmatpush.msrb.mxu2 %v8024_v45 }
 0x7e2   : > { %v7297_v13 = vpop.f32.mrf.mxu2  ;;  %v7350_v63 = vpop.f32.mrf.mxu3  ;;  %8456 = vmatpush.msra.mxu3 %v8040_v52  ;;  %8418 = vmatpush.msrb.mxu1 %v8006_v54  ;;  %v8098_v54 = vld [vmem:[%s17228_s5 + $0x2f0] sm:$0xff] }
 0x7e3   : > { %v7298_v44 = vadd.f32 %v7297_v13, %v7242_v48  ;;  %v7351_v46 = vadd.f32 %v7350_v63, %v7295_v40  ;;  %8437 = vmatpush.msrb.mxu2 %v8023_v27  ;;  %v7248_v40 = vadd.f32 %v15744_v19, %v7192_v14  ;;  %v8082_v19 = vld [vmem:[%s17228_s5 + $0x270] sm:$0xff]  ;;  %v8097_v27 = vld [vmem:[%s17228_s5 + $0x2e8] sm:$0xff] }
 0x7e4   : > { %8457 = vmatpush.msra.mxu3 %v8039_v39  ;;  %8419 = vmatpush.msrb.mxu1 %v8005_v61  ;;  %v15875_v52 = vpop.f32.mrf.mxu1  ;;  %v8080_v39 = vld [vmem:[%s17228_s5 + $0x260] sm:$0xff] }
 0x7e5   : > { %v15821_v58 = vadd.f32 %v7351_v46, %v15555_v6  ;;  %v8038_v6 = vld [vmem:[%s17228_s5 + $0x110] sm:$0xff]  ;;  %8438 = vmatpush.msrb.mxu2 %v8022_v34  ;;  %v15873_v45 = vpop.f32.mrf.mxu0  ;;  %v8065_v46 = vld [vmem:[%s17228_s5 + $0x1e8] sm:$0xff]  ;;  %v8096_v34 = vld [vmem:[%s17228_s5 + $0x2e0] sm:$0xff] }
 0x7e6   : > { %8458 = vmatpush.msra.mxu3 %v8038_v6  ;;  %8420 = vmatpush.msrb.mxu1 %v8004_v22 }
 0x7e7   : > { %7744 = vmatmul.f32.gmra.mxu3 %v7441_v36  ;;  %8439 = vmatpush.msrb.mxu2 %v8021_v3  ;;  %v8062_v3 = vld [vmem:[%s17228_s5 + $0x1d0] sm:$0xff] }
 0x7e8   : > { %8465 = vmatpush.msra.mxu1 %v8067_v16  ;;  %8459 = vmatpush.msra.mxu3 %v8037_v56  ;;  %v8079_v16 = vld [vmem:[%s17228_s5 + $0x258] sm:$0xff] }
 0x7e9   : > { %8440 = vmatpush.msrb.mxu2 %v8020_v10  ;;  %v8095_v56 = vld [vmem:[%s17228_s5 + $0x2d8] sm:$0xff] }
 0x7ea   : > { %v7300_v49 = vpop.f32.mrf.mxu2  ;;  %v7353_v33 = vpop.f32.mrf.mxu3  ;;  %8466 = vmatpush.msra.mxu1 %v8066_v24  ;;  %8460 = vmatpush.msra.mxu3 %v8036_v59 }
 0x7eb   : > { %v7301_v2 = vadd.f32 %v7300_v49, %v7245_v0  ;;  %v7354_v42 = vadd.f32 %v7353_v33, %v7298_v44  ;;  %8485 = vmatpush.msra.mxu2 %v8083_v47  ;;  %v7195_v44 = vadd.f32 %v17661_v15, %v15614_v8  ;;  %v8064_v8 = vld [vmem:[%s17228_s5 + $0x1e0] sm:$0xff]  ;;  %v8178_v0 = vld [vmem:[%s17228_s5 + $0x570] sm:$0xff]  ;;  %v8177_v47 = vld [vmem:[%s17228_s5 + $0x568] sm:$0xff] }
 0x7ec   : > { %8505 = vmatpush.msrb.mxu3 %v8099_v26  ;;  %8467 = vmatpush.msra.mxu1 %v8065_v46  ;;  %v15930_v10 = vpop.f32.mrf.mxu1  ;;  %v8060_v26 = vld [vmem:[%s17228_s5 + $0x1c0] sm:$0xff]  ;;  %v8175_v15 = vld [vmem:[%s17228_s5 + $0x558] sm:$0xff]  ;;  %v8058_v46 = vld [vmem:[%s17228_s5 + $0x1b0] sm:$0xff] }
 0x7ed   : > { %v15870_v53 = vadd.f32 %v7354_v42, %v15569_v5  ;;  %8486 = vmatpush.msra.mxu2 %v8082_v19  ;;  %v7251_v20 = vadd.f32 %v15800_v38, %v7195_v44  ;;  %v8179_v38 = vld [vmem:[%s17228_s5 + $0x578] sm:$0xff]  ;;  %v15925_v49 = vpop.f32.mrf.mxu0  ;;  %v8078_v42 = vld [vmem:[%s17228_s5 + $0x250] sm:$0xff] }
 0x7ee   : > { %8506 = vmatpush.msrb.mxu3 %v8098_v54  ;;  %8468 = vmatpush.msra.mxu1 %v8064_v8  ;;  %v8075_v19 = vld [vmem:[%s17228_s5 + $0x238] sm:$0xff]  ;;  %v17662_v8 = vld [vmem:[#allocation68_spill] sm:$0xff] }
 0x7ef   : > { %8605 = vmatpush.msra.mxu0 %v8179_v38  ;;  %v8091_v54 = vld [vmem:[%s17228_s5 + $0x2b8] sm:$0xff]  ;;  %v8173_v38 = vld [vmem:[%s17228_s5 + $0x548] sm:$0xff] }
 0x7f0   : > { %8507 = vmatpush.msrb.mxu3 %v8097_v27  ;;  %8469 = vmatpush.msra.mxu1 %v8063_v62 }
 0x7f1   : > { %8606 = vmatpush.msra.mxu0 %v8178_v0  ;;  %v8172_v0 = vld [vmem:[%s17228_s5 + $0x540] sm:$0xff] }
 0x7f2   : > { %v7303_v48 = vpop.f32.mrf.mxu2  ;;  %v7356_v43 = vpop.f32.mrf.mxu3  ;;  %8508 = vmatpush.msrb.mxu3 %v8096_v34  ;;  %8470 = vmatpush.msra.mxu1 %v8062_v3 }
 0x7f3   : > { %v7304_v13 = vadd.f32 %v7303_v48, %v7248_v40  ;;  %v7357_v63 = vadd.f32 %v7356_v43, %v7301_v2  ;;  %v8061_v2 = vld [vmem:[%s17228_s5 + $0x1c8] sm:$0xff]  ;;  %8607 = vmatpush.msra.mxu0 %v8177_v47  ;;  %v8176_v48 = vld [vmem:[%s17228_s5 + $0x560] sm:$0xff]  ;;  %v8059_v43 = vld [vmem:[%s17228_s5 + $0x1b8] sm:$0xff] }
 0x7f4   : > { %8509 = vmatpush.msrb.mxu3 %v8095_v56  ;;  %8471 = vmatpush.msra.mxu1 %v8061_v2  ;;  %v8093_v40 = vld [vmem:[%s17228_s5 + $0x2c8] sm:$0xff]  ;;  %v8055_v56 = vld [vmem:[%s17228_s5 + $0x198] sm:$0xff]  ;;  %v8072_v2 = vld [vmem:[%s17228_s5 + $0x220] sm:$0xff] }
 0x7f5   : > { %v15880_v5 = vadd.f32 %v7357_v63, %v15582_v21  ;;  %v8081_v21 = vld [vmem:[%s17228_s5 + $0x268] sm:$0xff]  ;;  %v8092_v63 = vld [vmem:[%s17228_s5 + $0x2c0] sm:$0xff]  ;;  %8608 = vmatpush.msra.mxu0 %v8176_v48  ;;  %v15985_v27 = vpop.f32.mrf.mxu0  ;;  %v8071_v47 = vld [vmem:[%s17228_s5 + $0x218] sm:$0xff] }
 0x7f6   : > { %8487 = vmatpush.msra.mxu2 %v8081_v21  ;;  %8472 = vmatpush.msra.mxu1 %v8060_v26  ;;  %v7598_v21 = vadd.f32 %v15853_v28, %v17662_v8  ;;  %v8090_v28 = vld [vmem:[%s17228_s5 + $0x2b0] sm:$0xff]  ;;  %v8087_v26 = vld [vmem:[%s17228_s5 + $0x298] sm:$0xff]  ;;  %v16044_v48 = vld [vmem:[%s17227_s4] ss:$0 sm:$0xff] }
 0x7f7   : > { %8609 = vmatpush.msra.mxu0 %v8175_v15 }
 0x7f8   : > { %8488 = vmatpush.msra.mxu2 %v8080_v39  ;;  %8473 = vmatpush.msra.mxu1 %v8059_v43  ;;  %v8057_v39 = vld [vmem:[%s17228_s5 + $0x1a8] sm:$0xff] }
 0x7fa   : > { %v7306_v61 = vpop.f32.mrf.mxu2  ;;  %v7359_v36 = vpop.f32.mrf.mxu3  ;;  %8489 = vmatpush.msra.mxu2 %v8079_v16  ;;  %8474 = vmatpush.msra.mxu1 %v8058_v46  ;;  %v8089_v16 = vld [vmem:[%s17228_s5 + $0x2a8] sm:$0xff] }
 0x7fb   : > { %v7307_v6 = vadd.f32 %v7306_v61, %v7251_v20  ;;  %v7360_v22 = vadd.f32 %v7359_v36, %v7304_v13  ;;  %v8076_v13 = vld [vmem:[%s17228_s5 + $0x240] sm:$0xff]  ;;  %v15987_v20 = vpop.f32.mrf.mxu1  ;;  %v8074_v61 = vld [vmem:[%s17228_s5 + $0x230] sm:$0xff] }
 0x7fc   : > { %8490 = vmatpush.msra.mxu2 %v8078_v42  ;;  %8475 = vmatpush.msra.mxu1 %v8057_v39  ;;  %v8088_v42 = vld [vmem:[%s17228_s5 + $0x2a0] sm:$0xff] }
 0x7fd   : > { %v15928_v33 = vadd.f32 %v7360_v22, %v15595_v12  ;;  %v8094_v12 = vld [vmem:[%s17228_s5 + $0x2d0] sm:$0xff]  ;;  %v8073_v22 = vld [vmem:[%s17228_s5 + $0x228] sm:$0xff]  ;;  %v16046_v43 = vpop.f32.mrf.mxu0  ;;  %v8168_v39 = vld [vmem:[%s17228_s5 + $0x520] sm:$0xff] }
 0x7fe   : > { %8510 = vmatpush.msrb.mxu3 %v8094_v12  ;;  %8491 = vmatpush.msra.mxu2 %v8077_v11  ;;  %v8171_v12 = vld [vmem:[%s17228_s5 + $0x538] sm:$0xff]  ;;  %v17663_v11 = vld [vmem:[#allocation72_spill] sm:$0xff] }
 0x800   : > { %8511 = vmatpush.msrb.mxu3 %v8093_v40  ;;  %8492 = vmatpush.msra.mxu2 %v8076_v13 }
 0x802   : > { %v7653_v59 = vpop.f32.mrf.mxu2  ;;  %v7362_v24 = vpop.f32.mrf.mxu3  ;;  %8512 = vmatpush.msrb.mxu3 %v8092_v63  ;;  %8493 = vmatpush.msra.mxu2 %v8075_v19  ;;  %v8086_v63 = vld [vmem:[%s17228_s5 + $0x290] sm:$0xff]  ;;  %v8169_v19 = vld [vmem:[%s17228_s5 + $0x528] sm:$0xff] }
 0x803   : > { %v7363_v14 = vadd.f32 %v7362_v24, %v7307_v6  ;;  %v7654_v62 = vadd.f32 %v7653_v59, %v7598_v21  ;;  %v8056_v6 = vld [vmem:[%s17228_s5 + $0x1a0] sm:$0xff]  ;;  %v8054_v24 = vld [vmem:[%s17228_s5 + $0x190] sm:$0xff]  ;;  %v16066_v8 = vpop.f32.mrf.mxu1 }
 0x804   : > { %8513 = vmatpush.msrb.mxu3 %v8091_v54  ;;  %8494 = vmatpush.msra.mxu2 %v8074_v61  ;;  %v8052_v54 = vld [vmem:[%s17228_s5 + $0x180] sm:$0xff] }
 0x805   : > { %v15969_v44 = vadd.f32 %v7363_v14, %v15608_v60  ;;  %v8174_v60 = vld [vmem:[%s17228_s5 + $0x550] sm:$0xff]  ;;  %8476 = vmatpush.msra.mxu1 %v8056_v6  ;;  %v7601_v14 = vadd.f32 %v15875_v52, %v17663_v11  ;;  %v8053_v52 = vld [vmem:[%s17228_s5 + $0x188] sm:$0xff]  ;;  %v8068_v61 = vld [vmem:[%s17228_s5 + $0x200] sm:$0xff]  ;;  %v7604_v6 = vadd.f32 %v15930_v10, %v15578_v7  ;;  %v7607_v11 = vadd.f32 %v15987_v20, %v15597_v35 }
 0x806   : > { %8610 = vmatpush.msra.mxu0 %v8174_v60  ;;  %8514 = vmatpush.msrb.mxu3 %v8090_v28  ;;  %v8069_v60 = vld [vmem:[%s17228_s5 + $0x208] sm:$0xff]  ;;  %v8084_v28 = vld [vmem:[%s17228_s5 + $0x280] sm:$0xff] }
 0x807   : > { %8495 = vmatpush.msra.mxu2 %v8073_v22  ;;  %8477 = vmatpush.msra.mxu1 %v8055_v56  ;;  %v8165_v7 = vld [vmem:[%s17228_s5 + $0x508] sm:$0xff] }
 0x808   : > { %8611 = vmatpush.msra.mxu0 %v8173_v38  ;;  %8515 = vmatpush.msrb.mxu3 %v8089_v16  ;;  %v8167_v38 = vld [vmem:[%s17228_s5 + $0x518] sm:$0xff]  ;;  %v8241_v35 = vld [vmem:[%s17228_s5 + $0x768] sm:$0xff] }
 0x809   : > { %8496 = vmatpush.msra.mxu2 %v8072_v2  ;;  %8478 = vmatpush.msra.mxu1 %v8054_v24 }
 0x80a   : > { %v7656_v36 = vpop.f32.mrf.mxu2  ;;  %v7709_v34 = vpop.f32.mrf.mxu3  ;;  %8612 = vmatpush.msra.mxu0 %v8172_v0  ;;  %8516 = vmatpush.msrb.mxu3 %v8088_v42 }
 0x80b   : > { %v7710_v3 = vadd.f32 %v7709_v34, %v7654_v62  ;;  %8497 = vmatpush.msra.mxu2 %v8071_v47  ;;  %v7657_v13 = vadd.f32 %v7656_v36, %v7601_v14  ;;  %8479 = vmatpush.msra.mxu1 %v8053_v52  ;;  %v8085_v62 = vld [vmem:[%s17228_s5 + $0x288] sm:$0xff]  ;;  %v16092_v42 = vpop.f32.mrf.mxu0 }
 0x80c   : > { %8613 = vmatpush.msra.mxu0 %v8171_v12  ;;  %8517 = vmatpush.msrb.mxu3 %v8087_v26  ;;  %v8164_v26 = vld [vmem:[%s17228_s5 + $0x500] sm:$0xff] }
 0x80d   : > { %v7766_v59 = vadd.f32 %v15873_v45, %v7710_v3  ;;  %v8170_v45 = vld [vmem:[%s17228_s5 + $0x530] sm:$0xff]  ;;  %8480 = vmatpush.msra.mxu1 %v8052_v54  ;;  %v8115_v54 = vld [vmem:[%s17228_s5 + $0x378] sm:$0xff] }
 0x80e   : > { %8614 = vmatpush.msra.mxu0 %v8170_v45  ;;  %8518 = vmatpush.msrb.mxu3 %v8086_v63  ;;  %v8166_v3 = vld [vmem:[%s17228_s5 + $0x510] sm:$0xff]  ;;  %v8243_v45 = vld [vmem:[%s17228_s5 + $0x778] sm:$0xff] }
 0x80f   : > { %v7804_v40 = vadd.f32 %v7766_v59, %v15625_v30  ;;  %v8070_v30 = vld [vmem:[%s17228_s5 + $0x210] sm:$0xff] }
 0x810   : > { %8498 = vmatpush.msra.mxu2 %v8070_v30  ;;  %8615 = vmatpush.msra.mxu0 %v8169_v19 }
 0x811   : > { %v7821_v36 = vadd.f32 %v16044_v48, %v7804_v40  ;;  %8519 = vmatpush.msrb.mxu3 %v8085_v62 }
 0x812   : > { %v7659_v15 = vpop.f32.mrf.mxu2  ;;  %v7712_v46 = vpop.f32.mrf.mxu3  ;;  %8499 = vmatpush.msra.mxu2 %v8069_v60  ;;  %8616 = vmatpush.msra.mxu0 %v8168_v39  ;;  %v8240_v60 = vld [vmem:[%s17228_s5 + $0x760] sm:$0xff] }
 0x813   : > { %v7713_v21 = vadd.f32 %v7712_v46, %v7657_v13  ;;  %8520 = vmatpush.msrb.mxu3 %v8084_v28  ;;  %v7834_v16 = vmax.f32 %v7821_v36, 0.0  ;;  %v8114_v36 = vld [vmem:[%s17228_s5 + $0x370] sm:$0xff] }
 0x814   : > { %8500 = vmatpush.msra.mxu2 %v8068_v61  ;;  %8617 = vmatpush.msra.mxu0 %v8167_v38  ;;  %v8147_v38 = vld [vmem:[%s17228_s5 + $0x478] sm:$0xff] }
 0x815   : > { %v7769_v34 = vadd.f32 %v15925_v49, %v7713_v21  ;;  %v7660_v49 = vadd.f32 %v7659_v15, %v7604_v6  ;;  %v7848_v10 = vrot.slane %v7834_v16, 1  ;;  %v16125_v21 = vpop.f32.mrf.mxu0  ;;  %v7610_v6 = vadd.f32 %v16066_v8, %v15611_v31  ;;  %v8146_v31 = vld [vmem:[%s17228_s5 + $0x470] sm:$0xff] }
 0x816   : > { %8618 = vmatpush.msra.mxu0 %v8166_v3 }
 0x817   : > { %v7805_v22 = vadd.f32 %v7769_v34, %v15633_v57  ;;  %v16097_v57 = vpop.f32.mrf.mxu1  ;;  %v7850_v13 = vmax.f32 %v7834_v16, %v7848_v10  ;;  %v8131_v34 = vld [vmem:[%s17228_s5 + $0x3f8] sm:$0xff] }
 0x818   : > { %8619 = vmatpush.msra.mxu0 %v8165_v7 }
 0x819   : > { %v7822_v0 = vadd.f32 %v16044_v48, %v7805_v22 }
 0x81a   : > { %v7662_v56 = vpop.f32.mrf.mxu2  ;;  %v7715_v2 = vpop.f32.mrf.mxu3  ;;  %8620 = vmatpush.msra.mxu0 %v8164_v26 }
 0x81b   : > { %v7835_v12 = vmax.f32 %v7822_v0, 0.0  ;;  %v7716_v59 = vadd.f32 %v7715_v2, %v7660_v49  ;;  %v7663_v30 = vadd.f32 %v7662_v56, %v7607_v11  ;;  %v8113_v49 = vld [vmem:[%s17228_s5 + $0x368] sm:$0xff]  ;;  %v8130_v0 = vld [vmem:[%s17228_s5 + $0x3f0] sm:$0xff]  ;;  %v8111_v11 = vld [vmem:[%s17228_s5 + $0x358] sm:$0xff] }
 0x81c   : > { %8685 = vmatpush.msrb.mxu0 %v8243_v45 }
 0x81d   : > { %v7852_v24 = vrot.slane %v7835_v12, 1  ;;  %v7772_v47 = vadd.f32 %v15985_v27, %v7716_v59  ;;  %v8242_v27 = vld [vmem:[%s17228_s5 + $0x770] sm:$0xff]  ;;  %v8129_v59 = vld [vmem:[%s17228_s5 + $0x3e8] sm:$0xff] }
 0x81e   : > { %8686 = vmatpush.msrb.mxu0 %v8242_v27 }
 0x81f   : > { %v16108_v14 = vmax.f32 %v7835_v12, %v7852_v24  ;;  %v7806_v40 = vadd.f32 %v7772_v47, %v15642_v1  ;;  %v16142_v22 = vpop.f32.mrf.mxu1  ;;  %v8112_v12 = vld [vmem:[%s17228_s5 + $0x360] sm:$0xff]  ;;  %v8145_v24 = vld [vmem:[%s17228_s5 + $0x468] sm:$0xff] }
 0x820   : > { %8687 = vmatpush.msrb.mxu0 %v8241_v35  ;;  %v8237_v47 = vld [vmem:[%s17228_s5 + $0x748] sm:$0xff] }
 0x821   : > { %v7856_v52 = vrot.slane %v16108_v14, 2  ;;  %v7823_v63 = vadd.f32 %v16044_v48, %v7806_v40  ;;  %v8128_v40 = vld [vmem:[%s17228_s5 + $0x3e0] sm:$0xff] }
 0x822   : > { %v7665_v20 = vpop.f32.mrf.mxu2  ;;  %v7718_v15 = vpop.f32.mrf.mxu3  ;;  %8688 = vmatpush.msrb.mxu0 %v8240_v60  ;;  %v8236_v60 = vld [vmem:[%s17228_s5 + $0x740] sm:$0xff] }
 0x823   : > { %v7836_v1 = vmax.f32 %v7823_v63, 0.0  ;;  %v7719_v46 = vadd.f32 %v7718_v15, %v7663_v30  ;;  %v7858_v19 = vmax.f32 %v7850_v13, %v7856_v52  ;;  %v7666_v56 = vadd.f32 %v7665_v20, %v7610_v6  ;;  %v8144_v52 = vld [vmem:[%s17228_s5 + $0x460] sm:$0xff]  ;;  %v8110_v15 = vld [vmem:[%s17228_s5 + $0x350] sm:$0xff]  ;;  %v8141_v6 = vld [vmem:[%s17228_s5 + $0x448] sm:$0xff] }
 0x825   : > { %v7860_v62 = vrot.slane %v7836_v1, 1  ;;  %v7775_v39 = vadd.f32 %v16046_v43, %v7719_v46  ;;  %8421 = vmatmul.f32.vlgmr.msrb.gmra.mxu1 %v7858_v19  ;;  %v7945_v61 = vrot.slane %v7858_v19, 2  ;;  %v7947_v28 = vrot.slane %v7858_v19, 4  ;;  %v8239_v43 = vld [vmem:[%s17228_s5 + $0x758] sm:$0xff] }
 0x826   : > { %8525 = vmatpush.msrb.mxu1 %v8115_v54  ;;  %8689 = vmatpush.msrb.mxu0 %v8239_v43  ;;  %v8109_v54 = vld [vmem:[%s17228_s5 + $0x348] sm:$0xff] }
 0x827   : > { %v16144_v3 = vmax.f32 %v7836_v1, %v7860_v62  ;;  %v7807_v16 = vadd.f32 %v7775_v39, %v15653_v51  ;;  %8441 = vmatmul.f32.vlgmr.msrb.gmra.mxu2 %v7945_v61  ;;  %8461 = vmatmul.f32.vlgmr.msra.gmra.mxu3 %v7947_v28  ;;  %v8238_v51 = vld [vmem:[%s17228_s5 + $0x750] sm:$0xff]  ;;  %v16195_v1 = vpop.f32.mrf.mxu0  ;;  %v8108_v28 = vld [vmem:[%s17228_s5 + $0x340] sm:$0xff]  ;;  %v8125_v43 = vld [vmem:[%s17228_s5 + $0x3c8] sm:$0xff] }
 0x828   : > { %8526 = vmatpush.msrb.mxu1 %v8114_v36  ;;  %8545 = vmatpush.msrb.mxu2 %v8131_v34  ;;  %v8235_v36 = vld [vmem:[%s17228_s5 + $0x738] sm:$0xff] }
 0x829   : > { %v7864_v8 = vrot.slane %v16144_v3, 2  ;;  %v7824_v2 = vadd.f32 %v16044_v48, %v7807_v16  ;;  %8565 = vmatpush.msra.mxu3 %v8147_v38  ;;  %8690 = vmatpush.msrb.mxu0 %v8238_v51  ;;  %v8234_v51 = vld [vmem:[%s17228_s5 + $0x730] sm:$0xff] }
 0x82a   : > { %v7668_v7 = vpop.f32.mrf.mxu2  ;;  %8527 = vmatpush.msrb.mxu1 %v8113_v49  ;;  %8546 = vmatpush.msrb.mxu2 %v8130_v0  ;;  %v7721_v10 = vpop.f32.mrf.mxu3  ;;  %v8107_v0 = vld [vmem:[%s17228_s5 + $0x338] sm:$0xff] }
 0x82b   : > { %v7837_v26 = vmax.f32 %v7824_v2, 0.0  ;;  %8566 = vmatpush.msra.mxu3 %v8146_v31  ;;  %v7722_v45 = vadd.f32 %v7721_v10, %v7666_v56  ;;  %v7866_v27 = vmax.f32 %v7850_v13, %v7864_v8  ;;  %v7867_v30 = vmax.f32 %v16108_v14, %v7864_v8  ;;  %8691 = vmatpush.msrb.mxu0 %v8237_v47  ;;  %v8127_v13 = vld [vmem:[%s17228_s5 + $0x3d8] sm:$0xff]  ;;  %v8124_v8 = vld [vmem:[%s17228_s5 + $0x3c0] sm:$0xff] }
 0x82c   : > { %8528 = vmatpush.msrb.mxu1 %v8112_v12  ;;  %8547 = vmatpush.msrb.mxu2 %v8129_v59  ;;  %v8143_v14 = vld [vmem:[%s17228_s5 + $0x458] sm:$0xff]  ;;  %v8140_v56 = vld [vmem:[%s17228_s5 + $0x440] sm:$0xff]  ;;  %v8106_v59 = vld [vmem:[%s17228_s5 + $0x330] sm:$0xff] }
 0x82d   : > { %v7869_v63 = vrot.slane %v7837_v26, 1  ;;  %v7778_v35 = vadd.f32 %v16092_v42, %v7722_v45  ;;  %8567 = vmatpush.msra.mxu3 %v8145_v24  ;;  %v7950_v20 = vrot.slane %v7866_v27, 6  ;;  %v7613_v42 = vadd.f32 %v16097_v57, %v15620_v55  ;;  %v8126_v55 = vld [vmem:[%s17228_s5 + $0x3d0] sm:$0xff]  ;;  %v16212_v57 = vpop.f32.mrf.mxu1  ;;  %8692 = vmatpush.msrb.mxu0 %v8236_v60  ;;  %v8123_v10 = vld [vmem:[%s17228_s5 + $0x3b8] sm:$0xff] }
 0x82e   : > { %8529 = vmatpush.msrb.mxu1 %v8111_v11  ;;  %8548 = vmatpush.msrb.mxu2 %v8128_v40  ;;  %v8139_v24 = vld [vmem:[%s17228_s5 + $0x438] sm:$0xff]  ;;  %v7616_v45 = vadd.f32 %v16142_v22, %v15630_v32  ;;  %v8122_v11 = vld [vmem:[%s17228_s5 + $0x3b0] sm:$0xff]  ;;  %v8232_v32 = vld [vmem:[%s17228_s5 + $0x720] sm:$0xff] }
 0x82f   : > { %v16197_v46 = vmax.f32 %v7837_v26, %v7869_v63  ;;  %v7808_v19 = vadd.f32 %v7778_v35, %v15663_v41  ;;  %8568 = vmatpush.msra.mxu3 %v8144_v52  ;;  %8481 = vmatmul.f32.vlgmr.msra.gmra.mxu1 %v7950_v20  ;;  %v8142_v41 = vld [vmem:[%s17228_s5 + $0x450] sm:$0xff]  ;;  %v7669_v39 = vadd.f32 %v7668_v7, %v7613_v42  ;;  %v8105_v26 = vld [vmem:[%s17228_s5 + $0x328] sm:$0xff]  ;;  %v16265_v27 = vpop.f32.mrf.mxu0 }
 0x830   : > { %8501 = vmatmul.f32.vlgmr.msra.gmra.mxu2 %v7867_v30  ;;  %8530 = vmatpush.msrb.mxu1 %v8110_v15  ;;  %v8138_v40 = vld [vmem:[%s17228_s5 + $0x430] sm:$0xff]  ;;  %v8104_v30 = vld [vmem:[%s17228_s5 + $0x320] sm:$0xff]  ;;  %v8121_v15 = vld [vmem:[%s17228_s5 + $0x3a8] sm:$0xff] }
 0x831   : > { %v7873_v62 = vrot.slane %v16197_v46, 2  ;;  %v7825_v61 = vadd.f32 %v16044_v48, %v7808_v19  ;;  %8549 = vmatpush.msrb.mxu2 %v8127_v13  ;;  %8569 = vmatpush.msra.mxu3 %v8143_v14  ;;  %v8137_v13 = vld [vmem:[%s17228_s5 + $0x428] sm:$0xff]  ;;  %v8231_v19 = vld [vmem:[%s17228_s5 + $0x718] sm:$0xff] }
 0x832   : > { %v7671_v34 = vpop.f32.mrf.mxu2  ;;  %8531 = vmatpush.msrb.mxu1 %v8109_v54  ;;  %v7724_v38 = vpop.f32.mrf.mxu3  ;;  %8693 = vmatpush.msrb.mxu0 %v8235_v36  ;;  %v7619_v36 = vadd.f32 %v16212_v57, %v15644_v25  ;;  %v8134_v25 = vld [vmem:[%s17228_s5 + $0x410] sm:$0xff] }
 0x833   : > { %v7838_v16 = vmax.f32 %v7825_v61, 0.0  ;;  %8550 = vmatpush.msrb.mxu2 %v8126_v55  ;;  %8570 = vmatpush.msra.mxu3 %v8142_v41  ;;  %v7725_v49 = vadd.f32 %v7724_v38, %v7669_v39  ;;  %v7875_v31 = vmax.f32 %v16144_v3, %v7873_v62  ;;  %v7672_v22 = vadd.f32 %v7671_v34, %v7616_v45  ;;  %v8102_v55 = vld [vmem:[%s17228_s5 + $0x310] sm:$0xff]  ;;  %v8119_v61 = vld [vmem:[%s17228_s5 + $0x398] sm:$0xff]  ;;  %v8101_v34 = vld [vmem:[%s17228_s5 + $0x308] sm:$0xff] }
 0x834   : > { %8532 = vmatpush.msrb.mxu1 %v8108_v28  ;;  %8694 = vmatpush.msrb.mxu0 %v8234_v51  ;;  %v8230_v41 = vld [vmem:[%s17228_s5 + $0x710] sm:$0xff]  ;;  %v8135_v28 = vld [vmem:[%s17228_s5 + $0x418] sm:$0xff]  ;;  %v8117_v51 = vld [vmem:[%s17228_s5 + $0x388] sm:$0xff] }
 0x835   : > { %v7877_v2 = vrot.slane %v7838_v16, 1  ;;  %8551 = vmatpush.msrb.mxu2 %v8125_v43  ;;  %8571 = vmatpush.msra.mxu3 %v8141_v6  ;;  %v7953_v12 = vrot.slane %v7875_v31, 4  ;;  %v7781_v7 = vadd.f32 %v16125_v21, %v7725_v49  ;;  %v8233_v21 = vld [vmem:[%s17228_s5 + $0x728] sm:$0xff]  ;;  %v7621_v54 = vpop.f32.mrf.mxu1  ;;  %v8118_v43 = vld [vmem:[%s17228_s5 + $0x390] sm:$0xff]  ;;  %v8100_v6 = vld [vmem:[%s17228_s5 + $0x300] sm:$0xff] }
 0x836   : > { %8533 = vmatpush.msrb.mxu1 %v8107_v0  ;;  %8695 = vmatpush.msrb.mxu0 %v8233_v21 }
 0x837   : > { %v7879_v47 = vmax.f32 %v7838_v16, %v7877_v2  ;;  %8552 = vmatpush.msrb.mxu2 %v8124_v8  ;;  %8572 = vmatpush.msra.mxu3 %v8140_v56  ;;  %v7809_v63 = vadd.f32 %v7781_v7, %v15685_v18  ;;  %v8103_v18 = vld [vmem:[%s17228_s5 + $0x318] sm:$0xff]  ;;  %v8133_v8 = vld [vmem:[%s17228_s5 + $0x408] sm:$0xff]  ;;  %v7789_v2 = vpop.f32.mrf.mxu0 }
 0x838   : > { %8521 = vmatmul.f32.vlgmr.msrb.gmra.mxu3 %v7953_v12  ;;  %8534 = vmatpush.msrb.mxu1 %v8106_v59  ;;  %v8163_v7 = vld [vmem:[%s17228_s5 + $0x4f8] sm:$0xff] }
 0x839   : > { %v7881_v52 = vrot.slane %v7879_v47, 2  ;;  %8553 = vmatpush.msrb.mxu2 %v8123_v10  ;;  %8573 = vmatpush.msra.mxu3 %v8139_v24  ;;  %v16303_v62 = vadd.f32 %v16044_v48, %v7809_v63  ;;  %v8116_v10 = vld [vmem:[%s17228_s5 + $0x380] sm:$0xff] }
 0x83a   : > { %v7674_v35 = vpop.f32.mrf.mxu2  ;;  %8535 = vmatpush.msrb.mxu1 %v8105_v26  ;;  %v7727_v20 = vpop.f32.mrf.mxu3  ;;  %8696 = vmatpush.msrb.mxu0 %v8232_v32  ;;  %v8132_v47 = vld [vmem:[%s17228_s5 + $0x400] sm:$0xff]  ;;  %v8211_v32 = vld [vmem:[%s17228_s5 + $0x678] sm:$0xff] }
 0x83b   : > { %v7883_v14 = vmax.f32 %v16144_v3, %v7881_v52  ;;  %v16282_v42 = vmax.f32 %v16197_v46, %v7881_v52  ;;  %8554 = vmatpush.msrb.mxu2 %v8122_v11  ;;  %8574 = vmatpush.msra.mxu3 %v8138_v40  ;;  %v7728_v60 = vadd.f32 %v7727_v20, %v7672_v22  ;;  %v8120_v3 = vld [vmem:[%s17228_s5 + $0x3a0] sm:$0xff]  ;;  %v7839_v16 = vmax.f32 %v16303_v62, 0.0  ;;  %v8162_v11 = vld [vmem:[%s17228_s5 + $0x4f0] sm:$0xff] }
 0x83c   : > { %8536 = vmatpush.msrb.mxu1 %v8104_v30  ;;  %v8136_v46 = vld [vmem:[%s17228_s5 + $0x420] sm:$0xff]  ;;  %8697 = vmatpush.msrb.mxu0 %v8231_v19  ;;  %v7675_v57 = vadd.f32 %v7674_v35, %v7619_v36  ;;  %v7622_v40 = vadd.f32 %v7621_v54, %v15656_v37  ;;  %v8195_v30 = vld [vmem:[%s17228_s5 + $0x5f8] sm:$0xff]  ;;  %v8161_v37 = vld [vmem:[%s17228_s5 + $0x4e8] sm:$0xff] }
 0x83d   : > { %8555 = vmatpush.msrb.mxu2 %v8121_v15  ;;  %8575 = vmatpush.msra.mxu3 %v8137_v13  ;;  %v7784_v39 = vadd.f32 %v16195_v1, %v7728_v60  ;;  %v8229_v1 = vld [vmem:[%s17228_s5 + $0x708] sm:$0xff]  ;;  %v7956_v59 = vrot.slane %v7883_v14, 6  ;;  %v7624_v26 = vpop.f32.mrf.mxu1  ;;  %v7886_v21 = vrot.slane %v7839_v16, 1  ;;  %v8194_v35 = vld [vmem:[%s17228_s5 + $0x5f0] sm:$0xff]  ;;  %v8160_v19 = vld [vmem:[%s17228_s5 + $0x4e0] sm:$0xff] }
 0x83e   : > { %8537 = vmatpush.msrb.mxu1 %v8103_v18  ;;  %8698 = vmatpush.msrb.mxu0 %v8230_v41  ;;  %v8210_v20 = vld [vmem:[%s17228_s5 + $0x670] sm:$0xff] }
 0x83f   : > { %8556 = vmatpush.msrb.mxu2 %v8120_v3  ;;  %8576 = vmatpush.msra.mxu3 %v8136_v46  ;;  %v7810_v38 = vadd.f32 %v7784_v39, %v15730_v23  ;;  %v8228_v23 = vld [vmem:[%s17228_s5 + $0x700] sm:$0xff]  ;;  %v7888_v15 = vmax.f32 %v7839_v16, %v7886_v21  ;;  %v8193_v3 = vld [vmem:[%s17228_s5 + $0x5e8] sm:$0xff]  ;;  %v7792_v36 = vpop.f32.mrf.mxu0  ;;  %v8155_v21 = vld [vmem:[%s17228_s5 + $0x4b8] sm:$0xff] }
 0x840   : > { %8538 = vmatpush.msrb.mxu1 %v8102_v55  ;;  %8699 = vmatpush.msrb.mxu0 %v8229_v1  ;;  %v8209_v46 = vld [vmem:[%s17228_s5 + $0x668] sm:$0xff]  ;;  %v8159_v55 = vld [vmem:[%s17228_s5 + $0x4d8] sm:$0xff]  ;;  %v8158_v1 = vld [vmem:[%s17228_s5 + $0x4d0] sm:$0xff] }
 0x841   : > { %8557 = vmatpush.msrb.mxu2 %v8119_v61  ;;  %8577 = vmatpush.msra.mxu3 %v8135_v28  ;;  %v7827_v49 = vadd.f32 %v16044_v48, %v7810_v38  ;;  %v8192_v61 = vld [vmem:[%s17228_s5 + $0x5e0] sm:$0xff]  ;;  %v7625_v38 = vadd.f32 %v7624_v26, %v15669_v4  ;;  %v8306_v4 = vld [vmem:[%s17228_s5 + $0x970] sm:$0xff] }
 0x842   : > { %v7677_v0 = vpop.f32.mrf.mxu2  ;;  %8539 = vmatpush.msrb.mxu1 %v8101_v34  ;;  %v7730_v31 = vpop.f32.mrf.mxu3  ;;  %8700 = vmatpush.msrb.mxu0 %v8228_v23  ;;  %v8208_v28 = vld [vmem:[%s17228_s5 + $0x660] sm:$0xff]  ;;  %v8307_v34 = vld [vmem:[%s17228_s5 + $0x978] sm:$0xff] }
 0x843   : > { %8558 = vmatpush.msrb.mxu2 %v8118_v43  ;;  %8578 = vmatpush.msra.mxu3 %v8134_v25  ;;  %v7731_v56 = vadd.f32 %v7730_v31, %v7675_v57  ;;  %v7840_v12 = vmax.f32 %v7827_v49, 0.0  ;;  %v8191_v57 = vld [vmem:[%s17228_s5 + $0x5d8] sm:$0xff]  ;;  %v8190_v31 = vld [vmem:[%s17228_s5 + $0x5d0] sm:$0xff]  ;;  %v8304_v26 = vld [vmem:[%s17228_s5 + $0x960] sm:$0xff] }
 0x844   : > { %8540 = vmatpush.msrb.mxu1 %v8100_v6  ;;  %v8207_v6 = vld [vmem:[%s17228_s5 + $0x658] sm:$0xff] }
 0x845   : > { %v7787_v24 = vadd.f32 %v16265_v27, %v7731_v56  ;;  %8559 = vmatpush.msrb.mxu2 %v8117_v51  ;;  %8579 = vmatpush.msra.mxu3 %v8133_v8  ;;  %v7890_v45 = vrot.slane %v7840_v12, 1  ;;  %v7959_v27 = vrot.slane %v16282_v42, 2  ;;  %v7627_v23 = vpop.f32.mrf.mxu1  ;;  %v8206_v51 = vld [vmem:[%s17228_s5 + $0x650] sm:$0xff]  ;;  %v8305_v56 = vld [vmem:[%s17228_s5 + $0x968] sm:$0xff] }
 0x846   : > { %8541 = vmatmul.f32.vlgmr.msrb.gmra.mxu1 %v7956_v59 }
 0x847   : > { %v7811_v52 = vadd.f32 %v7787_v24, %v15777_v29  ;;  %8585 = vmatpush.msra.mxu1 %v8163_v7  ;;  %8560 = vmatpush.msrb.mxu2 %v8116_v10  ;;  %v16363_v22 = vmax.f32 %v7840_v12, %v7890_v45  ;;  %v7678_v29 = vadd.f32 %v7677_v0, %v7622_v40  ;;  %v8156_v12 = vld [vmem:[%s17228_s5 + $0x4c0] sm:$0xff]  ;;  %v8189_v10 = vld [vmem:[%s17228_s5 + $0x5c8] sm:$0xff] }
 0x848   : > { %8580 = vmatpush.msra.mxu3 %v8132_v47  ;;  %8561 = vmatmul.f32.vlgmr.msrb.gmra.mxu2 %v16282_v42  ;;  %v8205_v24 = vld [vmem:[%s17228_s5 + $0x648] sm:$0xff] }
 0x849   : > { %v7828_v63 = vadd.f32 %v16044_v48, %v7811_v52  ;;  %8581 = vmatmul.f32.vlgmr.msra.gmra.mxu3 %v7959_v27  ;;  %8586 = vmatpush.msra.mxu1 %v8162_v11  ;;  %v7894_v13 = vrot.slane %v16363_v22, 2  ;;  %v8188_v52 = vld [vmem:[%s17228_s5 + $0x5c0] sm:$0xff] }
 0x84a   : > { %8625 = vmatpush.msra.mxu2 %v8195_v30  ;;  %8645 = vmatpush.msrb.mxu3 %v8211_v32  ;;  %v7680_v14 = vpop.f32.mrf.mxu2  ;;  %v7733_v18 = vpop.f32.mrf.mxu3  ;;  %v8204_v27 = vld [vmem:[%s17228_s5 + $0x640] sm:$0xff]  ;;  %v8154_v30 = vld [vmem:[%s17228_s5 + $0x4b0] sm:$0xff]  ;;  %v7628_v32 = vadd.f32 %v7627_v23, %v15727_v17  ;;  %v8203_v17 = vld [vmem:[%s17228_s5 + $0x638] sm:$0xff] }
 0x84b   : > { %v7841_v54 = vmax.f32 %v7828_v63, 0.0  ;;  %8587 = vmatpush.msra.mxu1 %v8161_v37  ;;  %v7734_v60 = vadd.f32 %v7733_v18, %v7678_v29  ;;  %v16389_v41 = vmax.f32 %v7888_v15, %v7894_v13  ;;  %v7681_v49 = vadd.f32 %v7680_v14, %v7625_v38  ;;  %v8303_v29 = vld [vmem:[%s17228_s5 + $0x958] sm:$0xff]  ;;  %v8302_v14 = vld [vmem:[%s17228_s5 + $0x950] sm:$0xff] }
 0x84c   : > { %8626 = vmatpush.msra.mxu2 %v8194_v35  ;;  %8646 = vmatpush.msrb.mxu3 %v8210_v20  ;;  %v8187_v63 = vld [vmem:[%s17228_s5 + $0x5b8] sm:$0xff]  ;;  %v7795_v35 = vpop.f32.mrf.mxu0  ;;  %v8186_v18 = vld [vmem:[%s17228_s5 + $0x5b0] sm:$0xff] }
 0x84d   : > { %v7898_v62 = vrot.slane %v7841_v54, 1  ;;  %v7790_v39 = vadd.f32 %v7789_v2, %v7734_v60  ;;  %8588 = vmatpush.msra.mxu1 %v8160_v19  ;;  %8621 = vmatmul.f32.vlgmr.msra.gmra.mxu0 %v16389_v41  ;;  %v7630_v19 = vpop.f32.mrf.mxu1  ;;  %v8150_v23 = vld [vmem:[%s17228_s5 + $0x490] sm:$0xff] }
 0x84e   : > { %8627 = vmatpush.msra.mxu2 %v8193_v3  ;;  %8647 = vmatpush.msrb.mxu3 %v8209_v46  ;;  %v8152_v3 = vld [vmem:[%s17228_s5 + $0x4a0] sm:$0xff] }
 0x84f   : > { %v16404_v43 = vmax.f32 %v7841_v54, %v7898_v62  ;;  %v7812_v25 = vadd.f32 %v7790_v39, %v15821_v58  ;;  %8589 = vmatpush.msra.mxu1 %v8159_v55  ;;  %v8157_v58 = vld [vmem:[%s17228_s5 + $0x4c8] sm:$0xff]  ;;  %8765 = vmatpush.msra.mxu0 %v8307_v34  ;;  %v8202_v54 = vld [vmem:[%s17228_s5 + $0x630] sm:$0xff]  ;;  %v8151_v34 = vld [vmem:[%s17228_s5 + $0x498] sm:$0xff] }
 0x850   : > { %8628 = vmatpush.msra.mxu2 %v8192_v61  ;;  %8648 = vmatpush.msrb.mxu3 %v8208_v28  ;;  %v8301_v55 = vld [vmem:[%s17228_s5 + $0x948] sm:$0xff] }
 0x851   : > { %v7902_v16 = vrot.slane %v16404_v43, 2  ;;  %v7829_v0 = vadd.f32 %v16044_v48, %v7812_v25  ;;  %8590 = vmatpush.msra.mxu1 %v8158_v1  ;;  %8766 = vmatpush.msra.mxu0 %v8306_v4  ;;  %v8185_v39 = vld [vmem:[%s17228_s5 + $0x5a8] sm:$0xff]  ;;  %v8300_v25 = vld [vmem:[%s17228_s5 + $0x940] sm:$0xff] }
 0x852   : > { %8629 = vmatpush.msra.mxu2 %v8191_v57  ;;  %8649 = vmatpush.msrb.mxu3 %v8207_v6  ;;  %v7683_v8 = vpop.f32.mrf.mxu2  ;;  %v7736_v2 = vpop.f32.mrf.mxu3  ;;  %v8184_v57 = vld [vmem:[%s17228_s5 + $0x5a0] sm:$0xff] }
 0x853   : > { %v7842_v59 = vmax.f32 %v7829_v0, 0.0  ;;  %8591 = vmatpush.msra.mxu1 %v8157_v58  ;;  %v7737_v7 = vadd.f32 %v7736_v2, %v7681_v49  ;;  %v7905_v47 = vmax.f32 %v16363_v22, %v7902_v16  ;;  %v16447_v45 = vmax.f32 %v7888_v15, %v7902_v16  ;;  %8767 = vmatpush.msra.mxu0 %v8305_v56  ;;  %v8200_v6 = vld [vmem:[%s17228_s5 + $0x620] sm:$0xff]  ;;  %v8299_v16 = vld [vmem:[%s17228_s5 + $0x938] sm:$0xff] }
 0x854   : > { %8630 = vmatpush.msra.mxu2 %v8190_v31  ;;  %8650 = vmatpush.msrb.mxu3 %v8206_v51  ;;  %v7684_v15 = vadd.f32 %v7683_v8, %v7628_v32  ;;  %v8183_v49 = vld [vmem:[%s17228_s5 + $0x598] sm:$0xff]  ;;  %v7631_v0 = vadd.f32 %v7630_v19, %v15788_v9  ;;  %v8298_v8 = vld [vmem:[%s17228_s5 + $0x930] sm:$0xff]  ;;  %v7798_v56 = vpop.f32.mrf.mxu0 }
 0x855   : > { %v7907_v11 = vrot.slane %v7842_v59, 1  ;;  %v7793_v40 = vadd.f32 %v7792_v36, %v7737_v7  ;;  %8592 = vmatpush.msra.mxu1 %v8156_v12  ;;  %8768 = vmatpush.msra.mxu0 %v8304_v26  ;;  %v8201_v36 = vld [vmem:[%s17228_s5 + $0x628] sm:$0xff]  ;;  %v8199_v31 = vld [vmem:[%s17228_s5 + $0x618] sm:$0xff]  ;;  %v8182_v9 = vld [vmem:[%s17228_s5 + $0x590] sm:$0xff] }
 0x856   : > { %8631 = vmatpush.msra.mxu2 %v8189_v10  ;;  %8651 = vmatpush.msrb.mxu3 %v8205_v24  ;;  %v8198_v12 = vld [vmem:[%s17228_s5 + $0x610] sm:$0xff]  ;;  %v8148_v7 = vld [vmem:[%s17228_s5 + $0x480] sm:$0xff]  ;;  %v8181_v26 = vld [vmem:[%s17228_s5 + $0x588] sm:$0xff] }
 0x857   : > { %v16459_v22 = vmax.f32 %v7842_v59, %v7907_v11  ;;  %v7813_v37 = vadd.f32 %v7793_v40, %v15870_v53  ;;  %8593 = vmatpush.msra.mxu1 %v8155_v21  ;;  %v8153_v53 = vld [vmem:[%s17228_s5 + $0x4a8] sm:$0xff]  ;;  %8701 = vmatmul.f32.vlgmr.msrb.gmra.mxu0 %v7905_v47  ;;  %v7633_v21 = vpop.f32.mrf.mxu1  ;;  %v7961_v40 = vrot.slane %v16282_v42, 4  ;;  %v8196_v42 = vld [vmem:[%s17228_s5 + $0x600] sm:$0xff] }
 0x858   : > { %8632 = vmatpush.msra.mxu2 %v8188_v52  ;;  %8652 = vmatpush.msrb.mxu3 %v8204_v27  ;;  %v8297_v47 = vld [vmem:[%s17228_s5 + $0x928] sm:$0xff]  ;;  %v8227_v52 = vld [vmem:[%s17228_s5 + $0x6f8] sm:$0xff]  ;;  %v8296_v27 = vld [vmem:[%s17228_s5 + $0x920] sm:$0xff] }
 0x859   : > { %v7911_v20 = vrot.slane %v16459_v22, 2  ;;  %v7830_v13 = vadd.f32 %v16044_v48, %v7813_v37  ;;  %8594 = vmatpush.msra.mxu1 %v8154_v30  ;;  %8769 = vmatpush.msra.mxu0 %v8303_v29  ;;  %v8180_v37 = vld [vmem:[%s17228_s5 + $0x580] sm:$0xff]  ;;  %v7634_v29 = vadd.f32 %v7633_v21, %v15844_v50  ;;  %v8275_v50 = vld [vmem:[%s17228_s5 + $0x878] sm:$0xff]  ;;  %v8253_v21 = vld [vmem:[%s17228_s5 + $0x7c8] sm:$0xff] }
 0x85a   : > { %8633 = vmatpush.msra.mxu2 %v8187_v63  ;;  %v7739_v60 = vpop.f32.mrf.mxu3  ;;  %8653 = vmatpush.msrb.mxu3 %v8203_v17  ;;  %v7686_v28 = vpop.f32.mrf.mxu2  ;;  %v7966_v17 = vrot.slane %v16389_v41, 4 }
 0x85b   : > { %v7843_v46 = vmax.f32 %v7830_v13, 0.0  ;;  %8595 = vmatpush.msra.mxu1 %v8153_v53  ;;  %v7740_v62 = vadd.f32 %v7739_v60, %v7684_v15  ;;  %v16495_v61 = vmax.f32 %v16404_v43, %v7911_v20  ;;  %8770 = vmatpush.msra.mxu0 %v8302_v14  ;;  %v7687_v2 = vadd.f32 %v7686_v28, %v7631_v0  ;;  %v8226_v53 = vld [vmem:[%s17228_s5 + $0x6f0] sm:$0xff]  ;;  %v8259_v20 = vld [vmem:[%s17228_s5 + $0x7f8] sm:$0xff]  ;;  %v8225_v14 = vld [vmem:[%s17228_s5 + $0x6e8] sm:$0xff] }
 0x85c   : > { %8634 = vmatpush.msra.mxu2 %v8186_v18  ;;  %8654 = vmatpush.msrb.mxu3 %v8202_v54  ;;  %v8258_v18 = vld [vmem:[%s17228_s5 + $0x7f0] sm:$0xff]  ;;  %v8273_v28 = vld [vmem:[%s17228_s5 + $0x868] sm:$0xff]  ;;  %v8371_v0 = vld [vmem:[%s17228_s5 + $0xb78] sm:$0xff] }
 0x85d   : > { %v7915_v1 = vrot.slane %v7843_v46, 1  ;;  %v7796_v38 = vadd.f32 %v7795_v35, %v7740_v62  ;;  %8596 = vmatpush.msra.mxu1 %v8152_v3  ;;  %8771 = vmatpush.msra.mxu0 %v8301_v55  ;;  %v7964_v35 = vrot.slane %v16389_v41, 2  ;;  %v8274_v54 = vld [vmem:[%s17228_s5 + $0x870] sm:$0xff]  ;;  %v8224_v62 = vld [vmem:[%s17228_s5 + $0x6e0] sm:$0xff] }
 0x85e   : > { %8635 = vmatpush.msra.mxu2 %v8185_v39  ;;  %8655 = vmatpush.msrb.mxu3 %v8201_v36  ;;  %v8294_v60 = vld [vmem:[%s17228_s5 + $0x910] sm:$0xff]  ;;  %v8257_v39 = vld [vmem:[%s17228_s5 + $0x7e8] sm:$0xff] }
 0x85f   : > { %v7917_v4 = vmax.f32 %v7843_v46, %v7915_v1  ;;  %v7814_v58 = vadd.f32 %v7796_v38, %v15880_v5  ;;  %8597 = vmatpush.msra.mxu1 %v8151_v34  ;;  %8772 = vmatpush.msra.mxu0 %v8300_v25  ;;  %v8149_v5 = vld [vmem:[%s17228_s5 + $0x488] sm:$0xff]  ;;  %v7801_v46 = vpop.f32.mrf.mxu0  ;;  %v8223_v25 = vld [vmem:[%s17228_s5 + $0x6d8] sm:$0xff] }
 0x860   : > { %8636 = vmatpush.msra.mxu2 %v8184_v57  ;;  %8656 = vmatpush.msrb.mxu3 %v8200_v6  ;;  %v8293_v36 = vld [vmem:[%s17228_s5 + $0x908] sm:$0xff]  ;;  %v8256_v57 = vld [vmem:[%s17228_s5 + $0x7e0] sm:$0xff] }
 0x861   : > { %v7919_v51 = vrot.slane %v7917_v4, 2  ;;  %8598 = vmatpush.msra.mxu1 %v8150_v23  ;;  %8773 = vmatpush.msra.mxu0 %v8299_v16  ;;  %v16564_v30 = vadd.f32 %v16044_v48, %v7814_v58  ;;  %v8272_v23 = vld [vmem:[%s17228_s5 + $0x860] sm:$0xff]  ;;  %v8222_v16 = vld [vmem:[%s17228_s5 + $0x6d0] sm:$0xff] }
 0x862   : > { %8637 = vmatpush.msra.mxu2 %v8183_v49  ;;  %v7742_v59 = vpop.f32.mrf.mxu3  ;;  %8657 = vmatpush.msrb.mxu3 %v8199_v31  ;;  %v7689_v32 = vpop.f32.mrf.mxu2  ;;  %v8292_v4 = vld [vmem:[%s17228_s5 + $0x900] sm:$0xff]  ;;  %v8255_v31 = vld [vmem:[%s17228_s5 + $0x7d8] sm:$0xff] }
 0x863   : > { %v16542_v10 = vmax.f32 %v16404_v43, %v7919_v51  ;;  %v16545_v24 = vmax.f32 %v16459_v22, %v7919_v51  ;;  %8599 = vmatpush.msra.mxu1 %v8149_v5  ;;  %8774 = vmatpush.msra.mxu0 %v8298_v8  ;;  %v7743_v11 = vadd.f32 %v7742_v59, %v7687_v2  ;;  %v8197_v43 = vld [vmem:[%s17228_s5 + $0x608] sm:$0xff]  ;;  %v7844_v41 = vmax.f32 %v16564_v30, 0.0  ;;  %v8254_v2 = vld [vmem:[%s17228_s5 + $0x7d0] sm:$0xff]  ;;  %v8268_v30 = vld [vmem:[%s17228_s5 + $0x840] sm:$0xff] }
 0x864   : > { %8638 = vmatpush.msra.mxu2 %v8182_v9  ;;  %8658 = vmatpush.msrb.mxu3 %v8198_v12  ;;  %v7690_v15 = vadd.f32 %v7689_v32, %v7634_v29  ;;  %v8221_v8 = vld [vmem:[%s17228_s5 + $0x6c8] sm:$0xff]  ;;  %v8270_v59 = vld [vmem:[%s17228_s5 + $0x850] sm:$0xff]  ;;  %v8267_v29 = vld [vmem:[%s17228_s5 + $0x838] sm:$0xff] }
 0x865   : > { %8600 = vmatpush.msra.mxu1 %v8148_v7  ;;  %8775 = vmatpush.msra.mxu0 %v8297_v47  ;;  %v7799_v22 = vadd.f32 %v7798_v56, %v7743_v11  ;;  %v7924_v1 = vrot.slane %v7844_v41, 1  ;;  %v8370_v56 = vld [vmem:[%s17228_s5 + $0xb70] sm:$0xff]  ;;  %v8220_v7 = vld [vmem:[%s17228_s5 + $0x6c0] sm:$0xff]  ;;  %v8269_v11 = vld [vmem:[%s17228_s5 + $0x848] sm:$0xff] }
 0x866   : > { %8639 = vmatpush.msra.mxu2 %v8181_v26  ;;  %8659 = vmatpush.msrb.mxu3 %v8197_v43  ;;  %v8369_v26 = vld [vmem:[%s17228_s5 + $0xb68] sm:$0xff]  ;;  %v8219_v43 = vld [vmem:[%s17228_s5 + $0x6b8] sm:$0xff]  ;;  %v8218_v32 = vld [vmem:[%s17228_s5 + $0x6b0] sm:$0xff] }
 0x867   : > { %8601 = vmatmul.f32.vlgmr.msra.gmra.mxu1 %v7961_v40  ;;  %v7815_v63 = vadd.f32 %v7799_v22, %v15928_v33  ;;  %8776 = vmatpush.msra.mxu0 %v8296_v27  ;;  %v8295_v33 = vld [vmem:[%s17228_s5 + $0x918] sm:$0xff]  ;;  %v7926_v5 = vmax.f32 %v7844_v41, %v7924_v1  ;;  %v8252_v27 = vld [vmem:[%s17228_s5 + $0x7c0] sm:$0xff]  ;;  %v8249_v41 = vld [vmem:[%s17228_s5 + $0x7a8] sm:$0xff] }
 0x868   : > { %8665 = vmatpush.msrb.mxu1 %v8227_v52  ;;  %8640 = vmatpush.msra.mxu2 %v8180_v37  ;;  %v8368_v52 = vld [vmem:[%s17228_s5 + $0xb60] sm:$0xff]  ;;  %v8367_v37 = vld [vmem:[%s17228_s5 + $0xb58] sm:$0xff]  ;;  %v8361_v1 = vld [vmem:[%s17228_s5 + $0xb28] sm:$0xff] }
 0x869   : > { %8660 = vmatpush.msrb.mxu3 %v8196_v42  ;;  %v7832_v13 = vadd.f32 %v16044_v48, %v7815_v63  ;;  %8641 = vmatmul.f32.vlgmr.msra.gmra.mxu2 %v7964_v35  ;;  %v8251_v42 = vld [vmem:[%s17228_s5 + $0x7b8] sm:$0xff]  ;;  %v8217_v63 = vld [vmem:[%s17228_s5 + $0x6a8] sm:$0xff] }
 0x86a   : > { %8661 = vmatmul.f32.vlgmr.msrb.gmra.mxu3 %v7966_v17  ;;  %v7745_v19 = vpop.f32.mrf.mxu3  ;;  %8666 = vmatpush.msrb.mxu1 %v8226_v53  ;;  %v8366_v53 = vld [vmem:[%s17228_s5 + $0xb50] sm:$0xff] }
 0x86b   : > { %8705 = vmatpush.msrb.mxu2 %v8259_v20  ;;  %v7746_v3 = vadd.f32 %v7745_v19, %v7690_v15  ;;  %v7845_v55 = vmax.f32 %v7832_v13, 0.0  ;;  %8725 = vmatpush.msra.mxu3 %v8275_v50  ;;  %v8250_v20 = vld [vmem:[%s17228_s5 + $0x7b0] sm:$0xff]  ;;  %v8216_v50 = vld [vmem:[%s17228_s5 + $0x6a0] sm:$0xff]  ;;  %v8265_v13 = vld [vmem:[%s17228_s5 + $0x828] sm:$0xff] }
 0x86c   : > { %8777 = vmatpush.msra.mxu0 %v8295_v33  ;;  %8667 = vmatpush.msrb.mxu1 %v8225_v14  ;;  %v8266_v15 = vld [vmem:[%s17228_s5 + $0x830] sm:$0xff]  ;;  %v8365_v33 = vld [vmem:[%s17228_s5 + $0xb48] sm:$0xff]  ;;  %v8215_v14 = vld [vmem:[%s17228_s5 + $0x698] sm:$0xff] }
 0x86d   : > { %8706 = vmatpush.msrb.mxu2 %v8258_v18  ;;  %v7802_v34 = vadd.f32 %v7801_v46, %v7746_v3  ;;  %v7928_v38 = vrot.slane %v7845_v55, 1  ;;  %8726 = vmatpush.msra.mxu3 %v8274_v54  ;;  %v8364_v18 = vld [vmem:[%s17228_s5 + $0xb40] sm:$0xff]  ;;  %v8363_v3 = vld [vmem:[%s17228_s5 + $0xb38] sm:$0xff] }
 0x86e   : > { %8778 = vmatpush.msra.mxu0 %v8294_v60  ;;  %8668 = vmatpush.msrb.mxu1 %v8224_v62  ;;  %v8248_v19 = vld [vmem:[%s17228_s5 + $0x7a0] sm:$0xff]  ;;  %v8214_v60 = vld [vmem:[%s17228_s5 + $0x690] sm:$0xff]  ;;  %v8247_v46 = vld [vmem:[%s17228_s5 + $0x798] sm:$0xff] }
 0x86f   : > { %8707 = vmatpush.msrb.mxu2 %v8257_v39  ;;  %v7816_v6 = vadd.f32 %v7802_v34, %v15969_v44  ;;  %v7930_v58 = vmax.f32 %v7845_v55, %v7928_v38  ;;  %8727 = vmatpush.msra.mxu3 %v8273_v28  ;;  %v9940_v44 = vrot.slane %v16545_v24, 10  ;;  %v8264_v54 = vld [vmem:[%s17228_s5 + $0x820] sm:$0xff]  ;;  %v8263_v55 = vld [vmem:[%s17228_s5 + $0x818] sm:$0xff]  ;;  %v8213_v62 = vld [vmem:[%s17228_s5 + $0x688] sm:$0xff] }
 0x870   : > { %8779 = vmatpush.msra.mxu0 %v8293_v36  ;;  %8669 = vmatpush.msrb.mxu1 %v8223_v25  ;;  %v8362_v39 = vld [vmem:[%s17228_s5 + $0xb30] sm:$0xff]  ;;  %v8212_v34 = vld [vmem:[%s17228_s5 + $0x680] sm:$0xff]  ;;  %v8245_v38 = vld [vmem:[%s17228_s5 + $0x788] sm:$0xff] }
 0x871   : > { %v7833_v49 = vadd.f32 %v16044_v48, %v7816_v6  ;;  %8708 = vmatpush.msrb.mxu2 %v8256_v57  ;;  %v7932_v51 = vrot.slane %v7930_v58, 2  ;;  %8728 = vmatpush.msra.mxu3 %v8272_v23  ;;  %v8271_v48 = vld [vmem:[%s17228_s5 + $0x858] sm:$0xff]  ;;  %v8246_v28 = vld [vmem:[%s17228_s5 + $0x790] sm:$0xff]  ;;  %v8261_v25 = vld [vmem:[%s17228_s5 + $0x808] sm:$0xff]  ;;  %v7969_v57 = vrot.slane %v16447_v45, 6  ;;  %v7972_v45 = vrot.slane %v16495_v61, 4 }
 0x872   : > { %8780 = vmatpush.msra.mxu0 %v8292_v4  ;;  %8670 = vmatpush.msrb.mxu1 %v8222_v16  ;;  %v8262_v36 = vld [vmem:[%s17228_s5 + $0x810] sm:$0xff]  ;;  %v8291_v6 = vld [vmem:[%s17228_s5 + $0x8f8] sm:$0xff]  ;;  %v8360_v23 = vld [vmem:[%s17228_s5 + $0xb20] sm:$0xff]  ;;  %v7986_v16 = vrot.slane %v16542_v10, 6 }
 0x873   : > { %v7846_v9 = vmax.f32 %v7833_v49, 0.0  ;;  %8781 = vmatmul.f32.vlgmr.msra.gmra.mxu0 %v9940_v44  ;;  %v16650_v12 = vmax.f32 %v7926_v5, %v7932_v51  ;;  %8709 = vmatpush.msrb.mxu2 %v8255_v31  ;;  %v8244_v4 = vld [vmem:[%s17228_s5 + $0x780] sm:$0xff]  ;;  %v8290_v49 = vld [vmem:[%s17228_s5 + $0x8f0] sm:$0xff]  ;;  %v8323_v44 = vld [vmem:[%s17228_s5 + $0x9f8] sm:$0xff] }
 0x874   : > { %8845 = vmatpush.msrb.mxu0 %v8371_v0  ;;  %8729 = vmatpush.msra.mxu3 %v8271_v48  ;;  %v8339_v0 = vld [vmem:[%s17228_s5 + $0xa78] sm:$0xff]  ;;  %v8289_v10 = vld [vmem:[%s17228_s5 + $0x8e8] sm:$0xff]  ;;  %v8322_v31 = vld [vmem:[%s17228_s5 + $0x9f0] sm:$0xff] }
 0x875   : > { %v7936_v47 = vrot.slane %v7846_v9, 1  ;;  %8671 = vmatpush.msrb.mxu1 %v8221_v8  ;;  %8710 = vmatpush.msrb.mxu2 %v8254_v2  ;;  %v8359_v61 = vld [vmem:[%s17228_s5 + $0xb18] sm:$0xff]  ;;  %v8358_v51 = vld [vmem:[%s17228_s5 + $0xb10] sm:$0xff]  ;;  %v8288_v48 = vld [vmem:[%s17228_s5 + $0x8e0] sm:$0xff] }
 0x876   : > { %8846 = vmatpush.msrb.mxu0 %v8370_v56  ;;  %8730 = vmatpush.msra.mxu3 %v8270_v59  ;;  %v8321_v8 = vld [vmem:[%s17228_s5 + $0x9e8] sm:$0xff]  ;;  %v8287_v2 = vld [vmem:[%s17228_s5 + $0x8d8] sm:$0xff]  ;;  %v8320_v59 = vld [vmem:[%s17228_s5 + $0x9e0] sm:$0xff] }
 0x877   : > { %v7938_v40 = vmax.f32 %v7846_v9, %v7936_v47  ;;  %8672 = vmatpush.msrb.mxu1 %v8220_v7  ;;  %8711 = vmatpush.msrb.mxu2 %v8253_v21  ;;  %v8337_v9 = vld [vmem:[%s17228_s5 + $0xa68] sm:$0xff]  ;;  %v8336_v7 = vld [vmem:[%s17228_s5 + $0xa60] sm:$0xff]  ;;  %v9944_v21 = vrot.slane %v16650_v12, 12 }
 0x878   : > { %8847 = vmatpush.msrb.mxu0 %v8369_v26  ;;  %8731 = vmatpush.msra.mxu3 %v8269_v11  ;;  %v8357_v56 = vld [vmem:[%s17228_s5 + $0xb08] sm:$0xff]  ;;  %v8356_v47 = vld [vmem:[%s17228_s5 + $0xb00] sm:$0xff]  ;;  %v8286_v26 = vld [vmem:[%s17228_s5 + $0x8d0] sm:$0xff] }
 0x879   : > { %v7940_v22 = vrot.slane %v7938_v40, 2  ;;  %8673 = vmatpush.msrb.mxu1 %v8219_v43  ;;  %8712 = vmatpush.msrb.mxu2 %v8252_v27  ;;  %v8319_v11 = vld [vmem:[%s17228_s5 + $0x9d8] sm:$0xff]  ;;  %v8285_v40 = vld [vmem:[%s17228_s5 + $0x8c8] sm:$0xff]  ;;  %v8334_v27 = vld [vmem:[%s17228_s5 + $0xa50] sm:$0xff] }
 0x87a   : > { %8848 = vmatpush.msrb.mxu0 %v8368_v52  ;;  %8732 = vmatpush.msra.mxu3 %v8268_v30  ;;  %v8335_v43 = vld [vmem:[%s17228_s5 + $0xa58] sm:$0xff]  ;;  %v8318_v52 = vld [vmem:[%s17228_s5 + $0x9d0] sm:$0xff]  ;;  %v8284_v30 = vld [vmem:[%s17228_s5 + $0x8c0] sm:$0xff] }
 0x87b   : > { %v16694_v35 = vmax.f32 %v7926_v5, %v7940_v22  ;;  %v16696_v17 = vmax.f32 %v7930_v58, %v7940_v22  ;;  %8674 = vmatpush.msrb.mxu1 %v8218_v32  ;;  %8713 = vmatpush.msrb.mxu2 %v8251_v42  ;;  %v8260_v58 = vld [vmem:[%s17228_s5 + $0x800] sm:$0xff]  ;;  %v8338_v5 = vld [vmem:[%s17228_s5 + $0xa70] sm:$0xff]  ;;  %v8317_v32 = vld [vmem:[%s17228_s5 + $0x9c8] sm:$0xff] }
 0x87c   : > { %8849 = vmatpush.msrb.mxu0 %v8367_v37  ;;  %8733 = vmatpush.msra.mxu3 %v8267_v29  ;;  %v8333_v22 = vld [vmem:[%s17228_s5 + $0xa48] sm:$0xff]  ;;  %v8283_v37 = vld [vmem:[%s17228_s5 + $0x8b8] sm:$0xff]  ;;  %v8316_v42 = vld [vmem:[%s17228_s5 + $0x9c0] sm:$0xff] }
 0x87d   : > { %8675 = vmatpush.msrb.mxu1 %v8217_v63  ;;  %8714 = vmatpush.msrb.mxu2 %v8250_v20  ;;  %v8332_v29 = vld [vmem:[%s17228_s5 + $0xa40] sm:$0xff]  ;;  %v8282_v63 = vld [vmem:[%s17228_s5 + $0x8b0] sm:$0xff]  ;;  %v8331_v20 = vld [vmem:[%s17228_s5 + $0xa38] sm:$0xff] }
 0x87e   : > { %8850 = vmatpush.msrb.mxu0 %v8366_v53  ;;  %8734 = vmatpush.msra.mxu3 %v8266_v15  ;;  %v8315_v53 = vld [vmem:[%s17228_s5 + $0x9b8] sm:$0xff]  ;;  %v8281_v15 = vld [vmem:[%s17228_s5 + $0x8a8] sm:$0xff] }
 0x87f   : > { %8676 = vmatpush.msrb.mxu1 %v8216_v50  ;;  %8715 = vmatpush.msrb.mxu2 %v8249_v41  ;;  %v8314_v50 = vld [vmem:[%s17228_s5 + $0x9b0] sm:$0xff]  ;;  %v8280_v41 = vld [vmem:[%s17228_s5 + $0x8a0] sm:$0xff] }
 0x880   : > { %8851 = vmatpush.msrb.mxu0 %v8365_v33  ;;  %8735 = vmatpush.msra.mxu3 %v8265_v13  ;;  %v8330_v33 = vld [vmem:[%s17228_s5 + $0xa30] sm:$0xff]  ;;  %v8313_v13 = vld [vmem:[%s17228_s5 + $0x9a8] sm:$0xff] }
 0x881   : > { %8677 = vmatpush.msrb.mxu1 %v8215_v14  ;;  %8716 = vmatpush.msrb.mxu2 %v8248_v19  ;;  %v8329_v14 = vld [vmem:[%s17228_s5 + $0xa28] sm:$0xff]  ;;  %v8312_v19 = vld [vmem:[%s17228_s5 + $0x9a0] sm:$0xff] }
 0x882   : > { %8852 = vmatpush.msrb.mxu0 %v8364_v18  ;;  %8736 = vmatpush.msra.mxu3 %v8264_v54  ;;  %v8279_v18 = vld [vmem:[%s17228_s5 + $0x898] sm:$0xff]  ;;  %v8328_v54 = vld [vmem:[%s17228_s5 + $0xa20] sm:$0xff] }
 0x883   : > { %8678 = vmatpush.msrb.mxu1 %v8214_v60  ;;  %8717 = vmatpush.msrb.mxu2 %v8247_v46  ;;  %v8278_v60 = vld [vmem:[%s17228_s5 + $0x890] sm:$0xff]  ;;  %v8327_v46 = vld [vmem:[%s17228_s5 + $0xa18] sm:$0xff] }
 0x884   : > { %8853 = vmatpush.msrb.mxu0 %v8363_v3  ;;  %8737 = vmatpush.msra.mxu3 %v8263_v55  ;;  %v8311_v3 = vld [vmem:[%s17228_s5 + $0x998] sm:$0xff]  ;;  %v8277_v55 = vld [vmem:[%s17228_s5 + $0x888] sm:$0xff] }
 0x885   : > { %8679 = vmatpush.msrb.mxu1 %v8213_v62  ;;  %8718 = vmatpush.msrb.mxu2 %v8246_v28  ;;  %v8310_v62 = vld [vmem:[%s17228_s5 + $0x990] sm:$0xff]  ;;  %v8276_v28 = vld [vmem:[%s17228_s5 + $0x880] sm:$0xff] }
 0x886   : > { %8854 = vmatpush.msrb.mxu0 %v8362_v39  ;;  %8738 = vmatpush.msra.mxu3 %v8262_v36  ;;  %v8326_v39 = vld [vmem:[%s17228_s5 + $0xa10] sm:$0xff]  ;;  %v8309_v36 = vld [vmem:[%s17228_s5 + $0x988] sm:$0xff] }
 0x887   : > { %8680 = vmatpush.msrb.mxu1 %v8212_v34  ;;  %8719 = vmatpush.msrb.mxu2 %v8245_v38  ;;  %v8325_v34 = vld [vmem:[%s17228_s5 + $0xa08] sm:$0xff]  ;;  %v8308_v38 = vld [vmem:[%s17228_s5 + $0x980] sm:$0xff] }
 0x888   : > { %8855 = vmatpush.msrb.mxu0 %v8361_v1  ;;  %8739 = vmatpush.msra.mxu3 %v8261_v25  ;;  %v8355_v1 = vld [vmem:[%s17228_s5 + $0xaf8] sm:$0xff]  ;;  %v8324_v25 = vld [vmem:[%s17228_s5 + $0xa00] sm:$0xff] }
 0x889   : > { %8681 = vmatmul.f32.vlgmr.msrb.gmra.mxu1 %v7969_v57  ;;  %8720 = vmatpush.msrb.mxu2 %v8244_v4  ;;  %v9941_v57 = vrot.slane %v16545_v24, 12  ;;  %v8403_v4 = vld [vmem:[%s17228_s5 + $0xc78] sm:$0xff] }
 0x88a   : > { %8745 = vmatpush.msra.mxu1 %v8291_v6  ;;  %8856 = vmatpush.msrb.mxu0 %v8360_v23  ;;  %v8354_v6 = vld [vmem:[%s17228_s5 + $0xaf0] sm:$0xff]  ;;  %v8387_v23 = vld [vmem:[%s17228_s5 + $0xbf8] sm:$0xff] }
 0x88b   : > { %8740 = vmatpush.msra.mxu3 %v8260_v58  ;;  %8721 = vmatmul.f32.vlgmr.msrb.gmra.mxu2 %v7972_v45  ;;  %v8386_v58 = vld [vmem:[%s17228_s5 + $0xbf0] sm:$0xff] }
 0x88c   : > { %8741 = vmatmul.f32.vlgmr.msra.gmra.mxu3 %v7986_v16  ;;  %8746 = vmatpush.msra.mxu1 %v8290_v49  ;;  %v8402_v45 = vld [vmem:[%s17228_s5 + $0xc70] sm:$0xff]  ;;  %v8352_v16 = vld [vmem:[%s17228_s5 + $0xae0] sm:$0xff]  ;;  %v8385_v49 = vld [vmem:[%s17228_s5 + $0xbe8] sm:$0xff] }
 0x88d   : > { %8785 = vmatpush.msra.mxu2 %v8323_v44  ;;  %8805 = vmatpush.msrb.mxu3 %v8339_v0  ;;  %v8401_v44 = vld [vmem:[%s17228_s5 + $0xc68] sm:$0xff]  ;;  %v8351_v0 = vld [vmem:[%s17228_s5 + $0xad8] sm:$0xff] }
 0x88e   : > { %8857 = vmatpush.msrb.mxu0 %v8359_v61  ;;  %8747 = vmatpush.msra.mxu1 %v8289_v10  ;;  %v8384_v61 = vld [vmem:[%s17228_s5 + $0xbe0] sm:$0xff] }
 0x88f   : > { %8786 = vmatpush.msra.mxu2 %v8322_v31  ;;  %8806 = vmatpush.msrb.mxu3 %v8338_v5  ;;  %v8400_v10 = vld [vmem:[%s17228_s5 + $0xc60] sm:$0xff]  ;;  %v8350_v31 = vld [vmem:[%s17228_s5 + $0xad0] sm:$0xff]  ;;  %v8383_v5 = vld [vmem:[%s17228_s5 + $0xbd8] sm:$0xff] }
 0x890   : > { %8858 = vmatpush.msrb.mxu0 %v8358_v51  ;;  %8748 = vmatpush.msra.mxu1 %v8288_v48  ;;  %v8399_v51 = vld [vmem:[%s17228_s5 + $0xc58] sm:$0xff]  ;;  %v8349_v48 = vld [vmem:[%s17228_s5 + $0xac8] sm:$0xff] }
 0x891   : > { %8787 = vmatpush.msra.mxu2 %v8321_v8  ;;  %8807 = vmatpush.msrb.mxu3 %v8337_v9  ;;  %v8382_v8 = vld [vmem:[%s17228_s5 + $0xbd0] sm:$0xff] }
 0x892   : > { %8859 = vmatpush.msrb.mxu0 %v8357_v56  ;;  %8749 = vmatpush.msra.mxu1 %v8287_v2  ;;  %v8398_v9 = vld [vmem:[%s17228_s5 + $0xc50] sm:$0xff]  ;;  %v8348_v56 = vld [vmem:[%s17228_s5 + $0xac0] sm:$0xff]  ;;  %v8381_v2 = vld [vmem:[%s17228_s5 + $0xbc8] sm:$0xff] }
 0x893   : > { %8788 = vmatpush.msra.mxu2 %v8320_v59  ;;  %8808 = vmatpush.msrb.mxu3 %v8336_v7  ;;  %v8397_v59 = vld [vmem:[%s17228_s5 + $0xc48] sm:$0xff]  ;;  %v8347_v7 = vld [vmem:[%s17228_s5 + $0xab8] sm:$0xff] }
 0x894   : > { %8860 = vmatpush.msrb.mxu0 %v8356_v47  ;;  %8750 = vmatpush.msra.mxu1 %v8286_v26  ;;  %v8380_v47 = vld [vmem:[%s17228_s5 + $0xbc0] sm:$0xff] }
 0x895   : > { %8861 = vmatmul.f32.vlgmr.msrb.gmra.mxu0 %v9944_v21  ;;  %8789 = vmatpush.msra.mxu2 %v8319_v11  ;;  %v8396_v26 = vld [vmem:[%s17228_s5 + $0xc40] sm:$0xff]  ;;  %v8346_v21 = vld [vmem:[%s17228_s5 + $0xab0] sm:$0xff]  ;;  %v8379_v11 = vld [vmem:[%s17228_s5 + $0xbb8] sm:$0xff] }
 0x896   : > { %8809 = vmatpush.msrb.mxu3 %v8335_v43  ;;  %8751 = vmatpush.msra.mxu1 %v8285_v40  ;;  %v8395_v43 = vld [vmem:[%s17228_s5 + $0xc38] sm:$0xff]  ;;  %v8345_v40 = vld [vmem:[%s17228_s5 + $0xaa8] sm:$0xff] }
 0x897   : > { %8790 = vmatpush.msra.mxu2 %v8318_v52  ;;  %v8378_v52 = vld [vmem:[%s17228_s5 + $0xbb0] sm:$0xff] }
 0x898   : > { %8810 = vmatpush.msrb.mxu3 %v8334_v27  ;;  %8752 = vmatpush.msra.mxu1 %v8284_v30  ;;  %v8394_v27 = vld [vmem:[%s17228_s5 + $0xc30] sm:$0xff]  ;;  %v8344_v30 = vld [vmem:[%s17228_s5 + $0xaa0] sm:$0xff] }
 0x899   : > { %8791 = vmatpush.msra.mxu2 %v8317_v32  ;;  %v8377_v32 = vld [vmem:[%s17228_s5 + $0xba8] sm:$0xff] }
 0x89a   : > { %8811 = vmatpush.msrb.mxu3 %v8333_v22  ;;  %8753 = vmatpush.msra.mxu1 %v8283_v37  ;;  %v8393_v22 = vld [vmem:[%s17228_s5 + $0xc28] sm:$0xff]  ;;  %v8343_v37 = vld [vmem:[%s17228_s5 + $0xa98] sm:$0xff] }
 0x89b   : > { %8792 = vmatpush.msra.mxu2 %v8316_v42  ;;  %v8376_v42 = vld [vmem:[%s17228_s5 + $0xba0] sm:$0xff] }
 0x89c   : > { %8812 = vmatpush.msrb.mxu3 %v8332_v29  ;;  %8754 = vmatpush.msra.mxu1 %v8282_v63  ;;  %v8392_v29 = vld [vmem:[%s17228_s5 + $0xc20] sm:$0xff]  ;;  %v8342_v63 = vld [vmem:[%s17228_s5 + $0xa90] sm:$0xff] }
 0x89d   : > { %8793 = vmatpush.msra.mxu2 %v8315_v53  ;;  %v8375_v53 = vld [vmem:[%s17228_s5 + $0xb98] sm:$0xff] }
 0x89e   : > { %8813 = vmatpush.msrb.mxu3 %v8331_v20  ;;  %8755 = vmatpush.msra.mxu1 %v8281_v15  ;;  %v8391_v20 = vld [vmem:[%s17228_s5 + $0xc18] sm:$0xff]  ;;  %v8341_v15 = vld [vmem:[%s17228_s5 + $0xa88] sm:$0xff] }
 0x89f   : > { %8794 = vmatpush.msra.mxu2 %v8314_v50  ;;  %v8374_v50 = vld [vmem:[%s17228_s5 + $0xb90] sm:$0xff] }
 0x8a0   : > { %8814 = vmatpush.msrb.mxu3 %v8330_v33  ;;  %8756 = vmatpush.msra.mxu1 %v8280_v41  ;;  %v8390_v33 = vld [vmem:[%s17228_s5 + $0xc10] sm:$0xff]  ;;  %v8340_v41 = vld [vmem:[%s17228_s5 + $0xa80] sm:$0xff] }
 0x8a1   : > { %8795 = vmatpush.msra.mxu2 %v8313_v13  ;;  %v8373_v13 = vld [vmem:[%s17228_s5 + $0xb88] sm:$0xff] }
 0x8a2   : > { %8815 = vmatpush.msrb.mxu3 %v8329_v14  ;;  %8757 = vmatpush.msra.mxu1 %v8279_v18  ;;  %v8389_v14 = vld [vmem:[%s17228_s5 + $0xc08] sm:$0xff]  ;;  %v9943_v18 = vrot.slane %v16650_v12, 10 }
 0x8a3   : > { %8796 = vmatpush.msra.mxu2 %v8312_v19  ;;  %v8372_v19 = vld [vmem:[%s17228_s5 + $0xb80] sm:$0xff] }
 0x8a4   : > { %8816 = vmatpush.msrb.mxu3 %v8328_v54  ;;  %8758 = vmatpush.msra.mxu1 %v8278_v60  ;;  %v8388_v54 = vld [vmem:[%s17228_s5 + $0xc00] sm:$0xff]  ;;  %v7993_v60 = vrot.slane %v16694_v35, 6  ;;  %v8920_v35 = vld [vmem:[%s17230_s7 + $0x70] sm:$0xff] }
 0x8a5   : > { %8797 = vmatpush.msra.mxu2 %v8311_v3  ;;  %v8422_v3 = vpop.f32.mrf.mxu1 }
 0x8a6   : > { %8817 = vmatpush.msrb.mxu3 %v8327_v46  ;;  %8759 = vmatpush.msra.mxu1 %v8277_v55 }
 0x8a7   : > { %8798 = vmatpush.msra.mxu2 %v8310_v62 }
 0x8a8   : > { %8818 = vmatpush.msrb.mxu3 %v8326_v39  ;;  %8760 = vmatpush.msra.mxu1 %v8276_v28  ;;  %v8921_v28 = vld [vmem:[%s17230_s7 + $0x78] sm:$0xff] }
 0x8a9   : > { %8799 = vmatpush.msra.mxu2 %v8309_v36  ;;  %8761 = vmatmul.f32.vlgmr.msra.gmra.mxu1 %v16545_v24  ;;  %v8353_v24 = vld [vmem:[%s17228_s5 + $0xae8] sm:$0xff] }
 0x8aa   : > { %8819 = vmatpush.msrb.mxu3 %v8325_v34  ;;  %8825 = vmatpush.msrb.mxu1 %v8355_v1  ;;  %v8442_v46 = vpop.f32.mrf.mxu2  ;;  %v8462_v39 = vpop.f32.mrf.mxu3 }
 0x8ab   : > { %8800 = vmatpush.msra.mxu2 %v8308_v38  ;;  %v8918_v38 = vld [vmem:[%s17230_s7 + $0x60] sm:$0xff] }
 0x8ac   : > { %8820 = vmatpush.msrb.mxu3 %v8324_v25  ;;  %8801 = vmatmul.f32.vlgmr.msra.gmra.mxu2 %v9941_v57  ;;  %v8917_v25 = vld [vmem:[%s17230_s7 + $0x58] sm:$0xff] }
 0x8ad   : > { %8821 = vmatmul.f32.vlgmr.msrb.gmra.mxu3 %v16650_v12  ;;  %8826 = vmatpush.msrb.mxu1 %v8354_v6  ;;  %v8404_v12 = vld [vmem:[%s17229_s6] sm:$0x1]  ;;  %v8482_v36 = vpop.f32.mrf.mxu1 }
 0x8ae   : > { %8865 = vmatpush.msrb.mxu2 %v8387_v23  ;;  %8885 = vmatpush.msra.mxu3 %v8403_v4  ;;  %v8423_v55 = vadd.f32 %v8422_v3, %v8404_v12  ;;  %v8916_v23 = vld [vmem:[%s17230_s7 + $0x50] sm:$0xff]  ;;  %v8951_v3 = vld [vmem:[%s17232_s9 + $0x38] sm:$0xff] }
 0x8af   : > { %8827 = vmatpush.msrb.mxu1 %v8353_v24 }
 0x8b0   : > { %8866 = vmatpush.msrb.mxu2 %v8386_v58  ;;  %8886 = vmatpush.msra.mxu3 %v8402_v45  ;;  %v8443_v62 = vadd.f32 %v8442_v46, %v8423_v55  ;;  %v8915_v58 = vld [vmem:[%s17230_s7 + $0x48] sm:$0xff]  ;;  %v8950_v46 = vld [vmem:[%s17232_s9 + $0x30] sm:$0xff] }
 0x8b1   : > { %8828 = vmatpush.msrb.mxu1 %v8352_v16 }
 0x8b2   : > { %8867 = vmatpush.msrb.mxu2 %v8385_v49  ;;  %8887 = vmatpush.msra.mxu3 %v8401_v44  ;;  %v8463_v34 = vadd.f32 %v8462_v39, %v8443_v62  ;;  %v8914_v49 = vld [vmem:[%s17230_s7 + $0x40] sm:$0xff] }
 0x8b3   : > { %8829 = vmatpush.msrb.mxu1 %v8351_v0  ;;  %v8502_v1 = vpop.f32.mrf.mxu2 }
 0x8b4   : > { %8868 = vmatpush.msrb.mxu2 %v8384_v61  ;;  %8888 = vmatpush.msra.mxu3 %v8400_v10  ;;  %v8483_v57 = vadd.f32 %v8482_v36, %v8463_v34  ;;  %v8948_v36 = vld [vmem:[%s17232_s9 + $0x20] sm:$0xff] }
 0x8b5   : > { %8830 = vmatpush.msrb.mxu1 %v8350_v31 }
 0x8b6   : > { %8869 = vmatpush.msrb.mxu2 %v8383_v5  ;;  %8889 = vmatpush.msra.mxu3 %v8399_v51  ;;  %v8503_v4 = vadd.f32 %v8502_v1, %v8483_v57  ;;  %v8913_v51 = vld [vmem:[%s17230_s7 + $0x38] sm:$0xff] }
 0x8b7   : > { %8831 = vmatpush.msrb.mxu1 %v8349_v48  ;;  %v8912_v48 = vld [vmem:[%s17230_s7 + $0x30] sm:$0xff] }
 0x8b8   : > { %8870 = vmatpush.msrb.mxu2 %v8382_v8  ;;  %8890 = vmatpush.msra.mxu3 %v8398_v9 }
 0x8b9   : > { %8832 = vmatpush.msrb.mxu1 %v8348_v56 }
 0x8ba   : > { %8871 = vmatpush.msrb.mxu2 %v8381_v2  ;;  %8891 = vmatpush.msra.mxu3 %v8397_v59  ;;  %v8911_v2 = vld [vmem:[%s17230_s7 + $0x28] sm:$0xff] }
 0x8bb   : > { %8833 = vmatpush.msrb.mxu1 %v8347_v7  ;;  %v8522_v6 = vpop.f32.mrf.mxu3  ;;  %v8910_v7 = vld [vmem:[%s17230_s7 + $0x20] sm:$0xff] }
 0x8bc   : > { %8872 = vmatpush.msrb.mxu2 %v8380_v47  ;;  %8892 = vmatpush.msra.mxu3 %v8396_v26  ;;  %v8523_v45 = vadd.f32 %v8522_v6, %v8503_v4  ;;  %v8946_v4 = vld [vmem:[%s17232_s9 + $0x10] sm:$0xff] }
 0x8bd   : > { %8834 = vmatpush.msrb.mxu1 %v8346_v21 }
 0x8be   : > { %8873 = vmatpush.msrb.mxu2 %v8379_v11  ;;  %8893 = vmatpush.msra.mxu3 %v8395_v43  ;;  %v8909_v43 = vld [vmem:[%s17230_s7 + $0x18] sm:$0xff] }
 0x8bf   : > { %8835 = vmatpush.msrb.mxu1 %v8345_v40  ;;  %v8908_v40 = vld [vmem:[%s17230_s7 + $0x10] sm:$0xff] }
 0x8c0   : > { %8874 = vmatpush.msrb.mxu2 %v8378_v52  ;;  %8894 = vmatpush.msra.mxu3 %v8394_v27 }
 0x8c1   : > { %8836 = vmatpush.msrb.mxu1 %v8344_v30 }
 0x8c2   : > { %8875 = vmatpush.msrb.mxu2 %v8377_v32  ;;  %8895 = vmatpush.msra.mxu3 %v8393_v22  ;;  %v8907_v32 = vld [vmem:[%s17230_s7 + $0x8] sm:$0xff]  ;;  %v8959_v22 = vld [vmem:[%s17232_s9 + $0x78] sm:$0xff] }
 0x8c3   : > { %8837 = vmatpush.msrb.mxu1 %v8343_v37  ;;  %v8542_v24 = vpop.f32.mrf.mxu1  ;;  %v8958_v37 = vld [vmem:[%s17232_s9 + $0x70] sm:$0xff]  ;;  %8961 = vmatpush.msra.mxu0 %v8959_v22 }
 0x8c4   : > { %8876 = vmatpush.msrb.mxu2 %v8376_v42  ;;  %8896 = vmatpush.msra.mxu3 %v8392_v29  ;;  %v8543_v44 = vadd.f32 %v8542_v24, %v8523_v45  ;;  %v8906_v29 = vld [vmem:[%s17230_s7] sm:$0xff]  ;;  %v8945_v24 = vld [vmem:[%s17232_s9 + $0x8] sm:$0xff] }
 0x8c5   : > { %8838 = vmatpush.msrb.mxu1 %v8342_v63  ;;  %v8957_v63 = vld [vmem:[%s17232_s9 + $0x68] sm:$0xff]  ;;  %8962 = vmatpush.msra.mxu0 %v8958_v37  ;;  %v8922_v45 = vld [vmem:[%s17231_s8] sm:$0x1] }
 0x8c6   : > { %8877 = vmatpush.msrb.mxu2 %v8375_v53  ;;  %8897 = vmatpush.msra.mxu3 %v8391_v20  ;;  %v8956_v53 = vld [vmem:[%s17232_s9 + $0x60] sm:$0xff] }
 0x8c7   : > { %8839 = vmatpush.msrb.mxu1 %v8341_v15  ;;  %8963 = vmatpush.msra.mxu0 %v8957_v63 }
 0x8c8   : > { %8878 = vmatpush.msrb.mxu2 %v8374_v50  ;;  %8898 = vmatpush.msra.mxu3 %v8390_v33  ;;  %v8955_v33 = vld [vmem:[%s17232_s9 + $0x58] sm:$0xff] }
 0x8c9   : > { %8840 = vmatpush.msrb.mxu1 %v8340_v41  ;;  %8964 = vmatpush.msra.mxu0 %v8956_v53 }
 0x8ca   : > { %8879 = vmatpush.msrb.mxu2 %v8373_v13  ;;  %8899 = vmatpush.msra.mxu3 %v8389_v14  ;;  %v8622_v8 = vpop.f32.mrf.mxu0  ;;  %v8954_v13 = vld [vmem:[%s17232_s9 + $0x50] sm:$0xff]  ;;  %v8953_v14 = vld [vmem:[%s17232_s9 + $0x48] sm:$0xff] }
 0x8cb   : > { %8841 = vmatmul.f32.vlgmr.msrb.gmra.mxu1 %v9943_v18  ;;  %v8562_v16 = vpop.f32.mrf.mxu2  ;;  %8965 = vmatpush.msra.mxu0 %v8955_v33 }
 0x8cc   : > { %8880 = vmatpush.msrb.mxu2 %v8372_v19  ;;  %8900 = vmatpush.msra.mxu3 %v8388_v54  ;;  %v8563_v0 = vadd.f32 %v8562_v16, %v8543_v44  ;;  %v8582_v61 = vpop.f32.mrf.mxu3 }
 0x8cd   : > { %8881 = vmatmul.f32.vlgmr.msrb.gmra.mxu2 %v7993_v60  ;;  %8901 = vmatmul.f32.vlgmr.msra.gmra.mxu3 %v16696_v17  ;;  %v8919_v17 = vld [vmem:[%s17230_s7 + $0x68] sm:$0xff]  ;;  %v8952_v60 = vld [vmem:[%s17232_s9 + $0x40] sm:$0xff] }
 0x8ce   : > { %8923 = vmatpush.msra.mxu1 %v8921_v28  ;;  %v8583_v31 = vadd.f32 %v8582_v61, %v8563_v0  ;;  %8966 = vmatpush.msra.mxu0 %v8954_v13  ;;  %v8949_v28 = vld [vmem:[%s17232_s9 + $0x28] sm:$0xff]  ;;  %v8960_v0 = vld [vmem:[%s17233_s10] sm:$0x1] }
 0x8d0   : > { %8924 = vmatpush.msra.mxu1 %v8920_v35  ;;  %8967 = vmatpush.msra.mxu0 %v8953_v14 }
 0x8d2   : > { %8925 = vmatpush.msra.mxu1 %v8919_v17  ;;  %8968 = vmatpush.msra.mxu0 %v8952_v60  ;;  %v8947_v17 = vld [vmem:[%s17232_s9 + $0x18] sm:$0xff] }
 0x8d4   : > { %8926 = vmatpush.msra.mxu1 %v8918_v38  ;;  %v8702_v52 = vpop.f32.mrf.mxu0  ;;  %8969 = vmatpush.msra.mxu0 %v8951_v3 }
 0x8d6   : > { %8927 = vmatpush.msra.mxu1 %v8917_v25  ;;  %8970 = vmatpush.msra.mxu0 %v8950_v46 }
 0x8d8   : > { %8928 = vmatpush.msra.mxu1 %v8916_v23  ;;  %8971 = vmatpush.msra.mxu0 %v8949_v28 }
 0x8da   : > { %8929 = vmatpush.msra.mxu1 %v8915_v58  ;;  %8972 = vmatpush.msra.mxu0 %v8948_v36  ;;  %v8944_v58 = vld [vmem:[%s17232_s9] sm:$0xff] }
 0x8dc   : > { %8930 = vmatpush.msra.mxu1 %v8914_v49  ;;  %8973 = vmatpush.msra.mxu0 %v8947_v17 }
 0x8de   : > { %8931 = vmatpush.msra.mxu1 %v8913_v51  ;;  %8974 = vmatpush.msra.mxu0 %v8946_v4 }
 0x8e0   : > { %8932 = vmatpush.msra.mxu1 %v8912_v48  ;;  %8975 = vmatpush.msra.mxu0 %v8945_v24 }
 0x8e2   : > { %8933 = vmatpush.msra.mxu1 %v8911_v2  ;;  %8976 = vmatpush.msra.mxu0 %v8944_v58 }
 0x8e4   : > { %v8602_v10 = vpop.f32.mrf.mxu1  ;;  %8934 = vmatpush.msra.mxu1 %v8910_v7 }
 0x8e5   : > { %v8603_v5 = vadd.f32 %v8602_v10, %v8583_v31 }
 0x8e6   : > { %8935 = vmatpush.msra.mxu1 %v8909_v43 }
 0x8e7   : > { %v8623_v56 = vadd.f32 %v8622_v8, %v8603_v5 }
 0x8e8   : > { %8936 = vmatpush.msra.mxu1 %v8908_v40 }
 0x8ea   : > { %8937 = vmatpush.msra.mxu1 %v8907_v32 }
 0x8ec   : > { %v8642_v9 = vpop.f32.mrf.mxu2  ;;  %8938 = vmatpush.msra.mxu1 %v8906_v29 }
 0x8ed   : > { %v8643_v59 = vadd.f32 %v8642_v9, %v8623_v56  ;;  %v8662_v47 = vpop.f32.mrf.mxu3 }
 0x8ef   : > { %v8663_v21 = vadd.f32 %v8662_v47, %v8643_v59 }
 0x8f0   : > { %v8782_v18 = vpop.f32.mrf.mxu0 }
 0x906   : > { %v8682_v26 = vpop.f32.mrf.mxu1 }
 0x907   : > { %v8683_v11 = vadd.f32 %v8682_v26, %v8663_v21 }
 0x909   : > { %v8703_v30 = vadd.f32 %v8702_v52, %v8683_v11 }
 0x90e   : > { %v8722_v27 = vpop.f32.mrf.mxu2 }
 0x90f   : > { %v8723_v42 = vadd.f32 %v8722_v27, %v8703_v30  ;;  %v8742_v20 = vpop.f32.mrf.mxu3 }
 0x911   : > { %v8743_v50 = vadd.f32 %v8742_v20, %v8723_v42 }
 0x912   : > { %v8862_v34 = vpop.f32.mrf.mxu0 }
 0x926   : > { %v8762_v15 = vpop.f32.mrf.mxu1 }
 0x927   : > { %v8763_v41 = vadd.f32 %v8762_v15, %v8743_v50 }
 0x929   : > { %v8783_v54 = vadd.f32 %v8782_v18, %v8763_v41 }
 0x92f   : > { %v8802_v19 = vpop.f32.mrf.mxu2 }
 0x930   : > { %v8803_v12 = vadd.f32 %v8802_v19, %v8783_v54  ;;  %v8822_v55 = vpop.f32.mrf.mxu3 }
 0x932   : > { %v8823_v39 = vadd.f32 %v8822_v55, %v8803_v12 }
 0x948   : > { %v8842_v62 = vpop.f32.mrf.mxu1 }
 0x949   : > { %v8843_v35 = vadd.f32 %v8842_v62, %v8823_v39 }
 0x94b   : > { %v8863_v1 = vadd.f32 %v8862_v34, %v8843_v35 }
 0x950   : > { %v8882_v38 = vpop.f32.mrf.mxu2  ;;  %v8902_v57 = vpop.f32.mrf.mxu3 }
 0x951   : > { %v8883_v25 = vadd.f32 %v8882_v38, %v8863_v1 }
 0x953   : > { %v8903_v6 = vadd.f32 %v8902_v57, %v8883_v25 }
 0x955   : > { %v8905_v23 = vmax.f32 %v8903_v6, 0.0 }
 0x957   : > { %8939 = vmatmul.f32.vlgmr.msra.gmra.mxu1 %v8905_v23 }
 0x9d4   : > { %v8940_v16 = vpop.f32.mrf.mxu1 }
 0x9d5   : > { %v8941_v49 = vadd.f32 %v8940_v16, %v8922_v45 }
 0x9d7   : > { %v8943_v44 = vmax.f32 %v8941_v49, 0.0 }
 0x9d9   : > { %8977 = vmatmul.f32.vlgmr.msra.gmra.mxu0 %v8943_v44 }
 0xa56   : > { %v8978_v61 = vpop.f32.mrf.mxu0 }
 0xa57   : > { %v8979_v10 = vadd.f32 %v8978_v61, %v8960_v0 }
 0xa59   : > { %8981 = vst [vmem:[%s378_s12] sm:$0x1] %v8979_v10 }
 0xa5a   : > { %10255 = shalt.err (!%p10252_p3)
}
 0xa5b   : > { %9951 = dma.vmem_to_hbm [thread:$0]  (%p10390_p5), %s8994_s13, 16, %s8996_s0, %s8983_s14  }
 0xa5c PF: > { %p9957_p4 = scmp.ge.s32.totalorder %s10290_s20, 2  ;;  %s9007_s16 = sand.u32 1, %s10278_s17  }
 0xa5d   : > { %s9008_s25 = scalar_lea.sflag [#allocation4], %s9007_s16 }
 0xa5e   : > { %p9954_p7 = pnand %p9957_p4, %p10394_p6 }
 0xa60   : > { %p9955_p8 = pneg %p9954_p7 }
 0xa62   : > { %10273 = dma.done.wait (%p9955_p8), %s9008_s25, 16  }
 0xa63   : > { %10275 = vsyncadd (%p9955_p8), %s9008_s25, 4294967280  ;;  %p21_p9 = scmp.ge.s32.totalorder %s10377_s23, 4   ;;  %s17664_s17 = smov %s10282_s18 }
 0xa64   : > { %s17665_s18 = smov %s10286_s19  ;;  %s17666_s19 = smov %s10388_s26 }
 0xa65   : > { %s17667_s20 = smov %s10377_s23  ;;  %23 = sbr.rel (!%p21_p9) target bundleno = 6 (0x6), region = 108 }
 0xa6a   :  { %9013 = vsyncpa [#allocation4], 1 }
 0xa6b   :  { %9015 = vsyncpa [#allocation4 + $0x1], 1 }

</bundles_post_ra>
